<compile_context>
chip_gen: v7x
topology: tpu7x:2x2x1
jax: 0.10.0
libtpu: 0.0.40
codegen_flags: <defaults>
</compile_context>

<pallas_src>
import math
import functools

import jax
import jax.numpy as jnp
from jax.experimental import pallas as pl
from jax.experimental.pallas import tpu as pltpu


# ----------------------------------------------------------------------------
# helpers shared by the kernel and the pure-JAX reference
# ----------------------------------------------------------------------------
def _layer_norm(x, g, b, eps=1e-5):
    mu = jnp.mean(x, axis=-1, keepdims=True)
    xc = x - mu
    var = jnp.mean(xc * xc, axis=-1, keepdims=True)
    return xc * jax.lax.rsqrt(var + eps) * g + b


def sinusoidal_pos_emb(seq_len, dim):
    # fairseq-style SinusoidalPositionalEmbedding; positions start at 1
    # (padding_idx=0; synthetic float inputs contain no exact-zero "pad" tokens).
    half = dim // 2
    freqs = jnp.exp(jnp.arange(half, dtype=jnp.float32)
                    * -(math.log(10000.0) / (half - 1)))
    pos = jnp.arange(1, seq_len + 1, dtype=jnp.float32)[:, None]
    ang = pos * freqs[None, :]
    emb = jnp.concatenate([jnp.sin(ang), jnp.cos(ang)], axis=1)
    if dim % 2 == 1:
        emb = jnp.concatenate([emb, jnp.zeros((seq_len, 1), jnp.float32)], axis=1)
    return emb  # (seq_len, dim)


# ----------------------------------------------------------------------------
# Fused Pallas kernel: one grid step = one full modality stream
#   (2 cross-modal encoders -> concat -> 1 self-attention "mem" encoder)
# ----------------------------------------------------------------------------
def mult_fused_kernel(kv1_sm, kv2_sm,            # scalar-prefetch refs (used in index_maps)
                      xq_ref, xk1_ref, xk2_ref, pos_d_ref, pos_2d_ref, mask_ref,
                      cQO_ref, cKV_ref, cF1_ref, cF2_ref, cSM_ref, cB1_ref, cLNf_ref,
                      mQKV_ref, mWO_ref, mF1_ref, mF2_ref, mSM_ref, mB1_ref, mLNf_ref,
                      out_ref, *, S, B, D, H, L):
    del kv1_sm, kv2_sm
    N = S * B
    D2 = 2 * D
    NH = N * H

    # (NH, NH) additive mask (same batch AND same head), precomputed on the host,
    # DMA'd once (grid-invariant index_map) and reused by every attention below.
    mask_bias = mask_ref[...]

    def bf16_dot(x, w):
        # cast activations to bf16 only at the MXU boundary; weights are already bf16.
        return jnp.dot(x.astype(jnp.bfloat16), w, preferred_element_type=jnp.float32)

    def attend(q, k, v, E):
        # q/k/v: (N, E) f32.  Fold heads onto the sublane axis (head-major rows) via
        # sublane concatenation, so one masked score matmul + one softmax covers all
        # (batch, head) pairs; then put heads back onto lanes.
        hd = E // H

        def fold(x):
            return jnp.concatenate([x[:, h * hd:(h + 1) * hd] for h in range(H)],
                                   axis=0)                                 # (H*N, hd)

        qf, kf, vf = fold(q), fold(k), fold(v)
        s = jax.lax.dot_general(qf, kf, (((1,), (1,)), ((), ())),
                                preferred_element_type=jnp.float32)        # (NH, NH)
        s = s + mask_bias
        s = s - jnp.max(s, axis=-1, keepdims=True)
        p = jnp.exp(s)
        p = p * (1.0 / jnp.sum(p, axis=-1, keepdims=True))                 # exact denom
        ctx = jnp.dot(p, vf, preferred_element_type=jnp.float32)           # (NH, hd)
        return jnp.concatenate([ctx[h * N:(h + 1) * N, :] for h in range(H)],
                               axis=1)                                     # (N, E)

    def ffn(x, w1, b1, w2, sm):
        y = _layer_norm(x, sm[6:7], sm[7:8])
        y = jnp.maximum(bf16_dot(y, w1) + b1, 0.0)
        return bf16_dot(y, w2) + sm[8:9]

    # sm rows: 0 ln0_g, 1 ln0_b, 2 bq, 3 bk, 4 bv, 5 bo, 6 ln1_g, 7 ln1_b, 8 b2
    def cross_layer(x, x_kv, wq, wo, wkv, w1, b1, w2, sm):
        q_in = _layer_norm(x, sm[0:1], sm[1:2])
        kv_in = _layer_norm(x_kv, sm[0:1], sm[1:2])
        q = (bf16_dot(q_in, wq) + sm[2:3]) * (1.0 / math.sqrt(D // H))
        kv = bf16_dot(kv_in, wkv)                       # one fused K|V matmul: (N, 2D)
        k = kv[:, :D] + sm[3:4]
        v = kv[:, D:] + sm[4:5]
        ctx = attend(q, k, v, D)
        x = x + bf16_dot(ctx, wo) + sm[5:6]
        return x + ffn(x, w1, b1, w2, sm)

    def self_layer(x, wqkv, wo, w1, b1, w2, sm):
        x_in = _layer_norm(x, sm[0:1], sm[1:2])
        qkv = bf16_dot(x_in, wqkv)                      # one fused Q|K|V matmul: (N, 3*D2)
        q = (qkv[:, :D2] + sm[2:3]) * (1.0 / math.sqrt(D2 // H))
        k = qkv[:, D2:2 * D2] + sm[3:4]
        v = qkv[:, 2 * D2:] + sm[4:5]
        ctx = attend(q, k, v, D2)
        x = x + bf16_dot(ctx, wo) + sm[5:6]
        return x + ffn(x, w1, b1, w2, sm)

    def cross_encoder(e, x_q, x_kv):
        x = x_q
        for l in range(L):                              # static unroll over layers
            il = e * L + l
            x = cross_layer(x, x_kv,
                            cQO_ref[0, 2 * il], cQO_ref[0, 2 * il + 1],
                            cKV_ref[0, il], cF1_ref[0, il], cB1_ref[0, il],
                            cF2_ref[0, il], cSM_ref[0, il])
        lnf = cLNf_ref[0, e]
        return _layer_norm(x, lnf[0:1], lnf[1:2])

    def mem_encoder(x):
        for l in range(L):
            x = self_layer(x, mQKV_ref[0, l], mWO_ref[0, l],
                           mF1_ref[0, l], mB1_ref[0, l], mF2_ref[0, l],
                           mSM_ref[0, l])
        lnf = mLNf_ref[0]
        return _layer_norm(x, lnf[0:1], lnf[1:2])

    # embed-scale + positional embedding fused in-kernel (embed_dropout = identity)
    pos_d = pos_d_ref[...]
    xq = math.sqrt(D) * xq_ref[0] + pos_d
    xk1 = math.sqrt(D) * xk1_ref[0] + pos_d
    xk2 = math.sqrt(D) * xk2_ref[0] + pos_d

    h0 = cross_encoder(0, xq, xk1)                      # e.g. trans_m_with_a for step 0
    h1 = cross_encoder(1, xq, xk2)                      # e.g. trans_m_with_s for step 0
    h = jnp.concatenate([h0, h1], axis=-1)              # (N, 2D) feature concat

    h = math.sqrt(D2) * h + pos_2d_ref[...]
    out = mem_encoder(h)                                # (N, D2) f32

    # lane-dense store: pack groups of token rows onto lanes so the final vector stores
    # are unmasked full-128-lane vst (g row-groups of D2 lanes each -> o_cols lanes).
    o_rows, o_cols = out_ref.shape[1], out_ref.shape[2]
    if o_cols == D2:
        out_ref[0] = out
    else:
        g = o_cols // D2
        out_ref[0] = jnp.concatenate(
            [out[j * o_rows:(j + 1) * o_rows, :] for j in range(g)], axis=1)


# ----------------------------------------------------------------------------
# wrapper: pallas_call setup
# ----------------------------------------------------------------------------
def build_forward(cross_packed, mem_packed, *, S, B, D, H, L):
    assert D % H == 0 and (2 * D) % H == 0
    N = S * B
    D2, F, F2 = 2 * D, 4 * D, 8 * D
    NH = N * H
    (cQO, cKV, cF1, cF2, cSM, cB1, cLNf) = cross_packed
    (mQKV, mWO, mF1, mF2, mSM, mB1, mLNf) = mem_packed

    pos_d = jnp.repeat(sinusoidal_pos_emb(S, D), B, axis=0)      # (N, D),  rows s-major
    pos_2d = jnp.repeat(sinusoidal_pos_emb(S, D2), B, axis=0)    # (N, 2D)

    # additive attention mask for the head-major folded layout, hoisted out of kernel:
    # row r -> head = r // N, token n = r % N (s-major), batch = n % B;
    # (query, key) is valid iff same head AND same batch element.
    r = jnp.arange(NH, dtype=jnp.int32)
    head = r // N
    batch = (r % N) % B
    valid = (head[:, None] == head[None, :]) & (batch[:, None] == batch[None, :])
    mask_bias = jnp.where(valid, 0.0, -1e30).astype(jnp.float32)  # (NH, NH)

    # kv-stream index per modality step: [motion, audio, state] = [0, 1, 2]
    kv1_idx = jnp.array([1, 0, 1], jnp.int32)    # ma, am, sa
    kv2_idx = jnp.array([2, 2, 0], jnp.int32)    # ms, as, sm

    # lane-dense output layout (fallback to (N, D2) if it does not pack evenly)
    if D2 % 128 == 0:
        out_cols = D2
    elif 128 % D2 == 0 and N % (128 // D2) == 0:
        out_cols = 128
    else:
        out_cols = D2
    out_rows = (N * D2) // out_cols

    kernel = functools.partial(mult_fused_kernel, S=S, B=B, D=D, H=H, L=L)

    grid_spec = pltpu.PrefetchScalarGridSpec(
        num_scalar_prefetch=2,
        grid=(3,),
        in_specs=[
            # activations: same stacked array passed 3x with different index_maps
            pl.BlockSpec((1, N, D), lambda i, kv1, kv2: (i, 0, 0)),
            pl.BlockSpec((1, N, D), lambda i, kv1, kv2: (kv1[i], 0, 0)),
            pl.BlockSpec((1, N, D), lambda i, kv1, kv2: (kv2[i], 0, 0)),
            # grid-invariant tables: positional embeddings + attention mask (DMA'd once)
            pl.BlockSpec((N, D), lambda i, kv1, kv2: (0, 0)),
            pl.BlockSpec((N, D2), lambda i, kv1, kv2: (0, 0)),
            pl.BlockSpec((NH, NH), lambda i, kv1, kv2: (0, 0)),
            # cross-encoder slabs (per modality: 2 encoders x L layers), weights bf16
            pl.BlockSpec((1, 4 * L, D, D), lambda i, kv1, kv2: (i, 0, 0, 0)),     # wq/wo
            pl.BlockSpec((1, 2 * L, D, D2), lambda i, kv1, kv2: (i, 0, 0, 0)),    # wk|wv
            pl.BlockSpec((1, 2 * L, D, F), lambda i, kv1, kv2: (i, 0, 0, 0)),     # w1
            pl.BlockSpec((1, 2 * L, F, D), lambda i, kv1, kv2: (i, 0, 0, 0)),     # w2
            pl.BlockSpec((1, 2 * L, 9, D), lambda i, kv1, kv2: (i, 0, 0, 0)),     # small
            pl.BlockSpec((1, 2 * L, 1, F), lambda i, kv1, kv2: (i, 0, 0, 0)),     # b1
            pl.BlockSpec((1, 2, 2, D), lambda i, kv1, kv2: (i, 0, 0, 0)),         # final LN
            # mem-encoder slabs (per modality: 1 encoder x L layers, dim 2D), weights bf16
            pl.BlockSpec((1, L, D2, 3 * D2), lambda i, kv1, kv2: (i, 0, 0, 0)),   # wq|wk|wv
            pl.BlockSpec((1, L, D2, D2), lambda i, kv1, kv2: (i, 0, 0, 0)),       # wo
            pl.BlockSpec((1, L, D2, F2), lambda i, kv1, kv2: (i, 0, 0, 0)),       # w1
            pl.BlockSpec((1, L, F2, D2), lambda i, kv1, kv2: (i, 0, 0, 0)),       # w2
            pl.BlockSpec((1, L, 9, D2), lambda i, kv1, kv2: (i, 0, 0, 0)),        # small
            pl.BlockSpec((1, L, 1, F2), lambda i, kv1, kv2: (i, 0, 0, 0)),        # b1
            pl.BlockSpec((1, 2, D2), lambda i, kv1, kv2: (i, 0, 0)),              # final LN
        ],
        out_specs=pl.BlockSpec((1, out_rows, out_cols),
                               lambda i, kv1, kv2: (i, 0, 0)),
    )

    call = pl.pallas_call(
        kernel,
        grid_spec=grid_spec,
        out_shape=jax.ShapeDtypeStruct((3, out_rows, out_cols), jnp.float32),
        compiler_params=pltpu.CompilerParams(
            dimension_semantics=("parallel",)),   # 3 independent streams -> 2 TCs on v7x
    )

    @jax.jit
    def forward(x_motion, x_audio, x_state):
        # inputs: [seq_len, batch, d_model] (PyTorch MulT layout); (S,B)->N is a free
        # row-major reshape, so no transposes are needed anywhere.
        x_all = jnp.stack([x_motion.reshape(N, D),
                           x_audio.reshape(N, D),
                           x_state.reshape(N, D)], axis=0)       # (3, N, D)
        out = call(kv1_idx, kv2_idx, x_all, x_all, x_all,
                   pos_d, pos_2d, mask_bias,
                   cQO, cKV, cF1, cF2, cSM, cB1, cLNf,
                   mQKV, mWO, mF1, mF2, mSM, mB1, mLNf)          # (3, out_rows, out_cols)
        if out_cols != D2:
            g = out_cols // D2
            out = jnp.concatenate([out[:, :, j * D2:(j + 1) * D2] for j in range(g)],
                                  axis=1)                        # undo lane packing
        out = out.reshape(3, S, B, D2)
        return out[0], out[1], out[2]

    return forward


# ----------------------------------------------------------------------------
# parameter init (deterministic, synthetic) + packing into stacked slabs
# ----------------------------------------------------------------------------
def _init_layer_params(key, E):
    F = 4 * E
    ks = jax.random.split(key, 12)
    w = lambda k, shape: jax.random.normal(k, shape, jnp.float32) * 0.05
    return dict(
        ln0_g=jnp.ones((E,), jnp.float32), ln0_b=jnp.zeros((E,), jnp.float32),
        wq=w(ks[0], (E, E)), bq=w(ks[1], (E,)),
        wk=w(ks[2], (E, E)), bk=w(ks[3], (E,)),
        wv=w(ks[4], (E, E)), bv=w(ks[5], (E,)),
        wo=w(ks[6], (E, E)), bo=w(ks[7], (E,)),
        ln1_g=jnp.ones((E,), jnp.float32), ln1_b=jnp.zeros((E,), jnp.float32),
        w1=w(ks[8], (E, F)), b1=w(ks[9], (F,)),
        w2=w(ks[10], (F, E)), b2=w(ks[11], (E,)),
    )


def _init_encoder_params(key, E, L):
    keys = jax.random.split(key, L)
    return dict(
        layers=[_init_layer_params(keys[i], E) for i in range(L)],
        ln_g=jnp.ones((E,), jnp.float32),
        ln_b=jnp.zeros((E,), jnp.float32),
    )


def init_mult_params(key, d_model, num_layers):
    names = ['ma', 'ms', 'am', 'as', 'sa', 'sm', 'm_mem', 'a_mem', 's_mem']
    keys = jax.random.split(key, len(names))
    params = {}
    for i, n in enumerate(names):
        E = 2 * d_model if n.endswith('_mem') else d_model
        params[n] = _init_encoder_params(keys[i], E, num_layers)
    # TODO(synk): proj1/proj2 from MULTModel.__init__ are unused in forward -> omitted.
    return params


_SM_ROWS = ('ln0_g', 'ln0_b', 'bq', 'bk', 'bv', 'bo', 'ln1_g', 'ln1_b', 'b2')


def _small_slab(lp):
    return jnp.stack([lp[k] for k in _SM_ROWS], axis=0)          # (9, E) f32


def _pack_cross_group(encs):
    """Pack the two cross encoders of one modality (same embed dim D)."""
    QO, KV, W1, W2, SM, B1, LNF = [], [], [], [], [], [], []
    for enc in encs:
        for lp in enc['layers']:
            QO += [lp['wq'], lp['wo']]
            KV.append(jnp.concatenate([lp['wk'], lp['wv']], axis=1))     # fused K|V
            W1.append(lp['w1'])
            W2.append(lp['w2'])
            SM.append(_small_slab(lp))
            B1.append(lp['b1'][None, :])
        LNF.append(jnp.stack([enc['ln_g'], enc['ln_b']], axis=0))
    return (jnp.stack(QO), jnp.stack(KV), jnp.stack(W1), jnp.stack(W2),
            jnp.stack(SM), jnp.stack(B1), jnp.stack(LNF))


def _pack_mem_enc(enc):
    """Pack one self-attention mem encoder (embed dim 2D), with fused Q|K|V."""
    QKV, WO, W1, W2, SM, B1 = [], [], [], [], [], []
    for lp in enc['layers']:
        QKV.append(jnp.concatenate([lp['wq'], lp['wk'], lp['wv']], axis=1))
        WO.append(lp['wo'])
        W1.append(lp['w1'])
        W2.append(lp['w2'])
        SM.append(_small_slab(lp))
        B1.append(lp['b1'][None, :])
    LNF = jnp.stack([enc['ln_g'], enc['ln_b']], axis=0)
    return (jnp.stack(QKV), jnp.stack(WO), jnp.stack(W1), jnp.stack(W2),
            jnp.stack(SM), jnp.stack(B1), LNF)


def pack_mult_params(params):
    cross_groups = [[params['ma'], params['ms']],
                    [params['am'], params['as']],
                    [params['sa'], params['sm']]]
    cpacks = [_pack_cross_group(g) for g in cross_groups]
    mpacks = [_pack_mem_enc(params[n]) for n in ('m_mem', 'a_mem', 's_mem')]
    cross = [jnp.stack([p[j] for p in cpacks], axis=0) for j in range(7)]
    mem = [jnp.stack([p[j] for p in mpacks], axis=0) for j in range(7)]
    # bf16 for the large matmul weight slabs (halves the dominant weight-DMA traffic);
    # LayerNorm / bias vectors stay f32 (v5e has no bf16 VPU/EUP).
    for j in range(4):
        cross[j] = cross[j].astype(jnp.bfloat16)
        mem[j] = mem[j].astype(jnp.bfloat16)
    return tuple(cross), tuple(mem)


# ----------------------------------------------------------------------------
# pure-JAX reference (same math as the PyTorch module, eval mode)
# ----------------------------------------------------------------------------
def _ref_encoder(enc, x_q, x_kv, H):
    S, B, E = x_q.shape
    hd = E // H
    scale = math.sqrt(E)
    pos = sinusoidal_pos_emb(S, E)[:, None, :]
    x = scale * x_q + pos
    xkv = scale * x_kv + pos if x_kv is not None else None
    for lp in enc['layers']:
        q_in = _layer_norm(x, lp['ln0_g'], lp['ln0_b'])
        kv_in = _layer_norm(xkv, lp['ln0_g'], lp['ln0_b']) if xkv is not None else q_in
        q = (q_in @ lp['wq'] + lp['bq']) * (1.0 / math.sqrt(hd))
        k = kv_in @ lp['wk'] + lp['bk']
        v = kv_in @ lp['wv'] + lp['bv']
        qh = q.reshape(S, B, H, hd)
        kh = k.reshape(S, B, H, hd)
        vh = v.reshape(S, B, H, hd)
        sc = jnp.einsum('qbhd,kbhd->bhqk', qh, kh)
        p = jax.nn.softmax(sc, axis=-1)
        ctx = jnp.einsum('bhqk,kbhd->qbhd', p, vh).reshape(S, B, E)
        x = x + (ctx @ lp['wo'] + lp['bo'])
        y = _layer_norm(x, lp['ln1_g'], lp['ln1_b'])
        y = jnp.maximum(y @ lp['w1'] + lp['b1'], 0.0) @ lp['w2'] + lp['b2']
        x = x + y
    return _layer_norm(x, enc['ln_g'], enc['ln_b'])


def ref_mult_forward(params, x_m, x_a, x_s, H):
    h_ms = jnp.concatenate([_ref_encoder(params['ma'], x_m, x_a, H),
                            _ref_encoder(params['ms'], x_m, x_s, H)], axis=-1)
    h_ms = _ref_encoder(params['m_mem'], h_ms, None, H)
    h_as = jnp.concatenate([_ref_encoder(params['am'], x_a, x_m, H),
                            _ref_encoder(params['as'], x_a, x_s, H)], axis=-1)
    h_as = _ref_encoder(params['a_mem'], h_as, None, H)
    h_ss = jnp.concatenate([_ref_encoder(params['sa'], x_s, x_a, H),
                            _ref_encoder(params['sm'], x_s, x_m, H)], axis=-1)
    h_ss = _ref_encoder(params['s_mem'], h_ss, None, H)
    return h_ms, h_as, h_ss


# ----------------------------------------------------------------------------
if __name__ == "__main__":
    SEQ, BATCH, D_MODEL = 8, 2, 32
    NUM_HEADS, NUM_LAYERS = 4, 2

    root = jax.random.PRNGKey(0)
    k_params, k_m, k_a, k_s = jax.random.split(root, 4)

    params = init_mult_params(k_params, D_MODEL, NUM_LAYERS)
    cross_packed, mem_packed = pack_mult_params(params)

    # inputs: [seq_len, batch, n_features] as in the PyTorch module docstring
    x_motion = jax.random.normal(k_m, (SEQ, BATCH, D_MODEL), jnp.float32)
    x_audio = jax.random.normal(k_a, (SEQ, BATCH, D_MODEL), jnp.float32)
    x_state = jax.random.normal(k_s, (SEQ, BATCH, D_MODEL), jnp.float32)

    forward = build_forward(cross_packed, mem_packed, S=SEQ, B=BATCH, D=D_MODEL,
                            H=NUM_HEADS, L=NUM_LAYERS)
    h_ms, h_as, h_ss = forward(x_motion, x_audio, x_state)
    jax.block_until_ready((h_ms, h_as, h_ss))

    assert h_ms.shape == (SEQ, BATCH, 2 * D_MODEL)
    assert h_as.shape == (SEQ, BATCH, 2 * D_MODEL)
    assert h_ss.shape == (SEQ, BATCH, 2 * D_MODEL)
    assert all(bool(jnp.all(jnp.isfinite(h))) for h in (h_ms, h_as, h_ss))

    # cross-check the fused kernel against the plain-JAX (f32-weight) reference;
    # tolerance accounts for the bf16 weight slabs used by the kernel.
    r_ms, r_as, r_ss = ref_mult_forward(params, x_motion, x_audio, x_state, NUM_HEADS)
    for got, want in ((h_ms, r_ms), (h_as, r_as), (h_ss, r_ss)):
        err = float(jnp.max(jnp.abs(got - want)))
        assert err < 5e-2, f"kernel/reference mismatch: max abs err {err}"

    print("KERNEL_OK")
</pallas_src>

<mosaic_0001>
module attributes {stable_mosaic.version = 11 : i64} {
  func.func @mult_fused_kernel(%arg0: i32, %arg1: memref<3xi32, #tpu.memory_space<smem>>, %arg2: memref<3xi32, #tpu.memory_space<smem>>, %arg3: memref<1x16x32xf32, #tpu.memory_space<vmem>>, %arg4: memref<1x16x32xf32, #tpu.memory_space<vmem>>, %arg5: memref<1x16x32xf32, #tpu.memory_space<vmem>>, %arg6: memref<16x32xf32, #tpu.memory_space<vmem>>, %arg7: memref<16x64xf32, #tpu.memory_space<vmem>>, %arg8: memref<64x64xf32, #tpu.memory_space<vmem>>, %arg9: memref<1x8x32x32xbf16, #tpu.memory_space<vmem>>, %arg10: memref<1x4x32x64xbf16, #tpu.memory_space<vmem>>, %arg11: memref<1x4x32x128xbf16, #tpu.memory_space<vmem>>, %arg12: memref<1x4x128x32xbf16, #tpu.memory_space<vmem>>, %arg13: memref<1x4x9x32xf32, #tpu.memory_space<vmem>>, %arg14: memref<1x4x1x128xf32, #tpu.memory_space<vmem>>, %arg15: memref<1x2x2x32xf32, #tpu.memory_space<vmem>>, %arg16: memref<1x2x64x192xbf16, #tpu.memory_space<vmem>>, %arg17: memref<1x2x64x64xbf16, #tpu.memory_space<vmem>>, %arg18: memref<1x2x64x256xbf16, #tpu.memory_space<vmem>>, %arg19: memref<1x2x256x64xbf16, #tpu.memory_space<vmem>>, %arg20: memref<1x2x9x64xf32, #tpu.memory_space<vmem>>, %arg21: memref<1x2x1x256xf32, #tpu.memory_space<vmem>>, %arg22: memref<1x2x64xf32, #tpu.memory_space<vmem>>, %arg23: memref<1x8x128xf32, #tpu.memory_space<vmem>>) attributes {dimension_semantics = [#tpu.dimension_semantics<parallel>], iteration_bounds = array<i64: 3>, scalar_prefetch = 2 : i64, scratch_operands = 0 : i64, tpu.core_type = #tpu.core_type<tc>, window_params = [{transform_indices = @transform_0, window_bounds = array<i64: 1, 16, 32>}, {transform_indices = @transform_1, window_bounds = array<i64: 1, 16, 32>}, {transform_indices = @transform_2, window_bounds = array<i64: 1, 16, 32>}, {pipeline_mode = #tpu.pipeline_mode<synchronous>, transform_indices = @transform_3, window_bounds = array<i64: 16, 32>}, {pipeline_mode = #tpu.pipeline_mode<synchronous>, transform_indices = @transform_4, window_bounds = array<i64: 16, 64>}, {pipeline_mode = #tpu.pipeline_mode<synchronous>, transform_indices = @transform_5, window_bounds = array<i64: 64, 64>}, {transform_indices = @transform_6, window_bounds = array<i64: 1, 8, 32, 32>}, {transform_indices = @transform_7, window_bounds = array<i64: 1, 4, 32, 64>}, {transform_indices = @transform_8, window_bounds = array<i64: 1, 4, 32, 128>}, {transform_indices = @transform_9, window_bounds = array<i64: 1, 4, 128, 32>}, {transform_indices = @transform_10, window_bounds = array<i64: 1, 4, 9, 32>}, {transform_indices = @transform_11, window_bounds = array<i64: 1, 4, 1, 128>}, {transform_indices = @transform_12, window_bounds = array<i64: 1, 2, 2, 32>}, {transform_indices = @transform_13, window_bounds = array<i64: 1, 2, 64, 192>}, {transform_indices = @transform_14, window_bounds = array<i64: 1, 2, 64, 64>}, {transform_indices = @transform_15, window_bounds = array<i64: 1, 2, 64, 256>}, {transform_indices = @transform_16, window_bounds = array<i64: 1, 2, 256, 64>}, {transform_indices = @transform_17, window_bounds = array<i64: 1, 2, 9, 64>}, {transform_indices = @transform_18, window_bounds = array<i64: 1, 2, 1, 256>}, {transform_indices = @transform_19, window_bounds = array<i64: 1, 2, 64>}, {transform_indices = @transform_20, window_bounds = array<i64: 1, 8, 128>}]} {
    %c0 = arith.constant 0 : index
    %c0_0 = arith.constant 0 : index
    %0 = vector.load %arg8[%c0, %c0_0] : memref<64x64xf32, #tpu.memory_space<vmem>>, vector<64x64xf32>
    %c0_1 = arith.constant 0 : index
    %c0_2 = arith.constant 0 : index
    %1 = vector.load %arg6[%c0_1, %c0_2] : memref<16x32xf32, #tpu.memory_space<vmem>>, vector<16x32xf32>
    %c0_3 = arith.constant 0 : index
    %c0_4 = arith.constant 0 : index
    %c0_5 = arith.constant 0 : index
    %2 = vector.load %arg3[%c0_3, %c0_4, %c0_5] : memref<1x16x32xf32, #tpu.memory_space<vmem>>, vector<1x16x32xf32>
    %3 = vector.shape_cast %2 : vector<1x16x32xf32> to vector<16x32xf32>
    %cst = arith.constant 5.65685415 : f32
    %4 = vector.broadcast %cst : f32 to vector<16x32xf32>
    %5 = arith.mulf %4, %3 : vector<16x32xf32>
    %6 = arith.addf %5, %1 : vector<16x32xf32>
    %c0_6 = arith.constant 0 : index
    %c0_7 = arith.constant 0 : index
    %c0_8 = arith.constant 0 : index
    %7 = vector.load %arg4[%c0_6, %c0_7, %c0_8] : memref<1x16x32xf32, #tpu.memory_space<vmem>>, vector<1x16x32xf32>
    %8 = vector.shape_cast %7 : vector<1x16x32xf32> to vector<16x32xf32>
    %cst_9 = arith.constant 5.65685415 : f32
    %9 = vector.broadcast %cst_9 : f32 to vector<16x32xf32>
    %10 = arith.mulf %9, %8 : vector<16x32xf32>
    %11 = arith.addf %10, %1 : vector<16x32xf32>
    %c0_10 = arith.constant 0 : index
    %c0_11 = arith.constant 0 : index
    %c0_12 = arith.constant 0 : index
    %12 = vector.load %arg5[%c0_10, %c0_11, %c0_12] : memref<1x16x32xf32, #tpu.memory_space<vmem>>, vector<1x16x32xf32>
    %13 = vector.shape_cast %12 : vector<1x16x32xf32> to vector<16x32xf32>
    %cst_13 = arith.constant 5.65685415 : f32
    %14 = vector.broadcast %cst_13 : f32 to vector<16x32xf32>
    %15 = arith.mulf %14, %13 : vector<16x32xf32>
    %16 = arith.addf %15, %1 : vector<16x32xf32>
    %c0_14 = arith.constant 0 : index
    %c0_15 = arith.constant 0 : index
    %c0_16 = arith.constant 0 : index
    %c0_17 = arith.constant 0 : index
    %17 = vector.load %arg9[%c0_14, %c0_15, %c0_16, %c0_17] : memref<1x8x32x32xbf16, #tpu.memory_space<vmem>>, vector<1x1x32x32xbf16>
    %18 = vector.shape_cast %17 : vector<1x1x32x32xbf16> to vector<32x32xbf16>
    %c0_18 = arith.constant 0 : index
    %c1 = arith.constant 1 : index
    %c0_19 = arith.constant 0 : index
    %c0_20 = arith.constant 0 : index
    %19 = vector.load %arg9[%c0_18, %c1, %c0_19, %c0_20] : memref<1x8x32x32xbf16, #tpu.memory_space<vmem>>, vector<1x1x32x32xbf16>
    %20 = vector.shape_cast %19 : vector<1x1x32x32xbf16> to vector<32x32xbf16>
    %c0_21 = arith.constant 0 : index
    %c0_22 = arith.constant 0 : index
    %c0_23 = arith.constant 0 : index
    %c0_24 = arith.constant 0 : index
    %21 = vector.load %arg10[%c0_21, %c0_22, %c0_23, %c0_24] : memref<1x4x32x64xbf16, #tpu.memory_space<vmem>>, vector<1x1x32x64xbf16>
    %22 = vector.shape_cast %21 : vector<1x1x32x64xbf16> to vector<32x64xbf16>
    %c0_25 = arith.constant 0 : index
    %c0_26 = arith.constant 0 : index
    %c0_27 = arith.constant 0 : index
    %c0_28 = arith.constant 0 : index
    %23 = vector.load %arg11[%c0_25, %c0_26, %c0_27, %c0_28] : memref<1x4x32x128xbf16, #tpu.memory_space<vmem>>, vector<1x1x32x128xbf16>
    %24 = vector.shape_cast %23 : vector<1x1x32x128xbf16> to vector<32x128xbf16>
    %c0_29 = arith.constant 0 : index
    %c0_30 = arith.constant 0 : index
    %c0_31 = arith.constant 0 : index
    %c0_32 = arith.constant 0 : index
    %25 = vector.load %arg14[%c0_29, %c0_30, %c0_31, %c0_32] : memref<1x4x1x128xf32, #tpu.memory_space<vmem>>, vector<1x1x1x128xf32>
    %26 = vector.shape_cast %25 : vector<1x1x1x128xf32> to vector<1x128xf32>
    %c0_33 = arith.constant 0 : index
    %c0_34 = arith.constant 0 : index
    %c0_35 = arith.constant 0 : index
    %c0_36 = arith.constant 0 : index
    %27 = vector.load %arg12[%c0_33, %c0_34, %c0_35, %c0_36] : memref<1x4x128x32xbf16, #tpu.memory_space<vmem>>, vector<1x1x128x32xbf16>
    %28 = vector.shape_cast %27 : vector<1x1x128x32xbf16> to vector<128x32xbf16>
    %c0_37 = arith.constant 0 : index
    %c0_38 = arith.constant 0 : index
    %c0_39 = arith.constant 0 : index
    %c0_40 = arith.constant 0 : index
    %29 = vector.load %arg13[%c0_37, %c0_38, %c0_39, %c0_40] : memref<1x4x9x32xf32, #tpu.memory_space<vmem>>, vector<1x1x9x32xf32>
    %30 = vector.shape_cast %29 : vector<1x1x9x32xf32> to vector<9x32xf32>
    %31 = vector.extract_strided_slice %30 {offsets = [0, 0], sizes = [1, 32], strides = [1, 1]} : vector<9x32xf32> to vector<1x32xf32>
    %32 = vector.extract_strided_slice %30 {offsets = [1, 0], sizes = [1, 32], strides = [1, 1]} : vector<9x32xf32> to vector<1x32xf32>
    %cst_41 = arith.constant dense<0.000000e+00> : vector<16xf32>
    %33 = vector.multi_reduction <add>, %6, %cst_41 [1] : vector<16x32xf32> to vector<16xf32>
    %34 = vector.shape_cast %33 : vector<16xf32> to vector<16x1xf32>
    %cst_42 = arith.constant 3.200000e+01 : f32
    %35 = vector.broadcast %cst_42 : f32 to vector<16x1xf32>
    %36 = arith.divf %34, %35 : vector<16x1xf32>
    %37 = vector.broadcast %36 : vector<16x1xf32> to vector<16x32xf32>
    %38 = arith.subf %6, %37 : vector<16x32xf32>
    %39 = arith.mulf %38, %38 : vector<16x32xf32>
    %cst_43 = arith.constant dense<0.000000e+00> : vector<16xf32>
    %40 = vector.multi_reduction <add>, %39, %cst_43 [1] : vector<16x32xf32> to vector<16xf32>
    %41 = vector.shape_cast %40 : vector<16xf32> to vector<16x1xf32>
    %cst_44 = arith.constant 3.200000e+01 : f32
    %42 = vector.broadcast %cst_44 : f32 to vector<16x1xf32>
    %43 = arith.divf %41, %42 : vector<16x1xf32>
    %cst_45 = arith.constant 9.99999974E-6 : f32
    %44 = vector.broadcast %cst_45 : f32 to vector<16x1xf32>
    %45 = arith.addf %43, %44 : vector<16x1xf32>
    %46 = math.rsqrt %45 : vector<16x1xf32>
    %47 = vector.broadcast %46 : vector<16x1xf32> to vector<16x32xf32>
    %48 = arith.mulf %38, %47 : vector<16x32xf32>
    %49 = vector.broadcast %31 : vector<1x32xf32> to vector<16x32xf32>
    %50 = arith.mulf %48, %49 : vector<16x32xf32>
    %51 = vector.broadcast %32 : vector<1x32xf32> to vector<16x32xf32>
    %52 = arith.addf %50, %51 : vector<16x32xf32>
    %53 = vector.extract_strided_slice %30 {offsets = [0, 0], sizes = [1, 32], strides = [1, 1]} : vector<9x32xf32> to vector<1x32xf32>
    %54 = vector.extract_strided_slice %30 {offsets = [1, 0], sizes = [1, 32], strides = [1, 1]} : vector<9x32xf32> to vector<1x32xf32>
    %cst_46 = arith.constant dense<0.000000e+00> : vector<16xf32>
    %55 = vector.multi_reduction <add>, %11, %cst_46 [1] : vector<16x32xf32> to vector<16xf32>
    %56 = vector.shape_cast %55 : vector<16xf32> to vector<16x1xf32>
    %cst_47 = arith.constant 3.200000e+01 : f32
    %57 = vector.broadcast %cst_47 : f32 to vector<16x1xf32>
    %58 = arith.divf %56, %57 : vector<16x1xf32>
    %59 = vector.broadcast %58 : vector<16x1xf32> to vector<16x32xf32>
    %60 = arith.subf %11, %59 : vector<16x32xf32>
    %61 = arith.mulf %60, %60 : vector<16x32xf32>
    %cst_48 = arith.constant dense<0.000000e+00> : vector<16xf32>
    %62 = vector.multi_reduction <add>, %61, %cst_48 [1] : vector<16x32xf32> to vector<16xf32>
    %63 = vector.shape_cast %62 : vector<16xf32> to vector<16x1xf32>
    %cst_49 = arith.constant 3.200000e+01 : f32
    %64 = vector.broadcast %cst_49 : f32 to vector<16x1xf32>
    %65 = arith.divf %63, %64 : vector<16x1xf32>
    %cst_50 = arith.constant 9.99999974E-6 : f32
    %66 = vector.broadcast %cst_50 : f32 to vector<16x1xf32>
    %67 = arith.addf %65, %66 : vector<16x1xf32>
    %68 = math.rsqrt %67 : vector<16x1xf32>
    %69 = vector.broadcast %68 : vector<16x1xf32> to vector<16x32xf32>
    %70 = arith.mulf %60, %69 : vector<16x32xf32>
    %71 = vector.broadcast %53 : vector<1x32xf32> to vector<16x32xf32>
    %72 = arith.mulf %70, %71 : vector<16x32xf32>
    %73 = vector.broadcast %54 : vector<1x32xf32> to vector<16x32xf32>
    %74 = arith.addf %72, %73 : vector<16x32xf32>
    %75 = arith.truncf %52 : vector<16x32xf32> to vector<16x32xbf16>
    %cst_51 = arith.constant dense<0.000000e+00> : vector<16x32xf32>
    %76 = tpu.matmul %75, %18, %cst_51 {dimension_numbers = #tpu.dot_dimension_numbers<[1], [0], [0], [1], [0, 0, 1, 1], [], []>} : vector<16x32xbf16>, vector<32x32xbf16>, vector<16x32xf32> -> vector<16x32xf32>
    %77 = vector.extract_strided_slice %30 {offsets = [2, 0], sizes = [1, 32], strides = [1, 1]} : vector<9x32xf32> to vector<1x32xf32>
    %78 = vector.broadcast %77 : vector<1x32xf32> to vector<16x32xf32>
    %79 = arith.addf %76, %78 : vector<16x32xf32>
    %cst_52 = arith.constant 0.353553385 : f32
    %80 = vector.broadcast %cst_52 : f32 to vector<16x32xf32>
    %81 = arith.mulf %79, %80 : vector<16x32xf32>
    %82 = arith.truncf %74 : vector<16x32xf32> to vector<16x32xbf16>
    %cst_53 = arith.constant dense<0.000000e+00> : vector<16x64xf32>
    %83 = tpu.matmul %82, %22, %cst_53 {dimension_numbers = #tpu.dot_dimension_numbers<[1], [0], [0], [1], [0, 0, 1, 1], [], []>} : vector<16x32xbf16>, vector<32x64xbf16>, vector<16x64xf32> -> vector<16x64xf32>
    %84 = vector.extract_strided_slice %83 {offsets = [0, 0], sizes = [16, 32], strides = [1, 1]} : vector<16x64xf32> to vector<16x32xf32>
    %85 = vector.extract_strided_slice %30 {offsets = [3, 0], sizes = [1, 32], strides = [1, 1]} : vector<9x32xf32> to vector<1x32xf32>
    %86 = vector.broadcast %85 : vector<1x32xf32> to vector<16x32xf32>
    %87 = arith.addf %84, %86 : vector<16x32xf32>
    %88 = vector.extract_strided_slice %83 {offsets = [0, 32], sizes = [16, 32], strides = [1, 1]} : vector<16x64xf32> to vector<16x32xf32>
    %89 = vector.extract_strided_slice %30 {offsets = [4, 0], sizes = [1, 32], strides = [1, 1]} : vector<9x32xf32> to vector<1x32xf32>
    %90 = vector.broadcast %89 : vector<1x32xf32> to vector<16x32xf32>
    %91 = arith.addf %88, %90 : vector<16x32xf32>
    %92 = vector.extract_strided_slice %81 {offsets = [0, 0], sizes = [16, 8], strides = [1, 1]} : vector<16x32xf32> to vector<16x8xf32>
    %93 = vector.extract_strided_slice %81 {offsets = [0, 8], sizes = [16, 8], strides = [1, 1]} : vector<16x32xf32> to vector<16x8xf32>
    %94 = vector.extract_strided_slice %81 {offsets = [0, 16], sizes = [16, 8], strides = [1, 1]} : vector<16x32xf32> to vector<16x8xf32>
    %95 = vector.extract_strided_slice %81 {offsets = [0, 24], sizes = [16, 8], strides = [1, 1]} : vector<16x32xf32> to vector<16x8xf32>
    %96 = tpu.concatenate %92, %93, %94, %95 in 0 : vector<16x8xf32>, vector<16x8xf32>, vector<16x8xf32>, vector<16x8xf32> -> vector<64x8xf32>
    %97 = vector.extract_strided_slice %87 {offsets = [0, 0], sizes = [16, 8], strides = [1, 1]} : vector<16x32xf32> to vector<16x8xf32>
    %98 = vector.extract_strided_slice %87 {offsets = [0, 8], sizes = [16, 8], strides = [1, 1]} : vector<16x32xf32> to vector<16x8xf32>
    %99 = vector.extract_strided_slice %87 {offsets = [0, 16], sizes = [16, 8], strides = [1, 1]} : vector<16x32xf32> to vector<16x8xf32>
    %100 = vector.extract_strided_slice %87 {offsets = [0, 24], sizes = [16, 8], strides = [1, 1]} : vector<16x32xf32> to vector<16x8xf32>
    %101 = tpu.concatenate %97, %98, %99, %100 in 0 : vector<16x8xf32>, vector<16x8xf32>, vector<16x8xf32>, vector<16x8xf32> -> vector<64x8xf32>
    %102 = vector.extract_strided_slice %91 {offsets = [0, 0], sizes = [16, 8], strides = [1, 1]} : vector<16x32xf32> to vector<16x8xf32>
    %103 = vector.extract_strided_slice %91 {offsets = [0, 8], sizes = [16, 8], strides = [1, 1]} : vector<16x32xf32> to vector<16x8xf32>
    %104 = vector.extract_strided_slice %91 {offsets = [0, 16], sizes = [16, 8], strides = [1, 1]} : vector<16x32xf32> to vector<16x8xf32>
    %105 = vector.extract_strided_slice %91 {offsets = [0, 24], sizes = [16, 8], strides = [1, 1]} : vector<16x32xf32> to vector<16x8xf32>
    %106 = tpu.concatenate %102, %103, %104, %105 in 0 : vector<16x8xf32>, vector<16x8xf32>, vector<16x8xf32>, vector<16x8xf32> -> vector<64x8xf32>
    %cst_54 = arith.constant dense<0.000000e+00> : vector<64x64xf32>
    %107 = tpu.matmul %96, %101, %cst_54 {dimension_numbers = #tpu.dot_dimension_numbers<[1], [1], [0], [0], [0, 0, 1, 0], [], []>} : vector<64x8xf32>, vector<64x8xf32>, vector<64x64xf32> -> vector<64x64xf32>
    %108 = arith.addf %107, %0 : vector<64x64xf32>
    %cst_55 = arith.constant dense<0xFF800000> : vector<64xf32>
    %109 = vector.multi_reduction <maximumf>, %108, %cst_55 [1] : vector<64x64xf32> to vector<64xf32>
    %110 = vector.shape_cast %109 : vector<64xf32> to vector<64x1xf32>
    %111 = vector.broadcast %110 : vector<64x1xf32> to vector<64x64xf32>
    %112 = arith.subf %108, %111 : vector<64x64xf32>
    %113 = math.exp %112 : vector<64x64xf32>
    %cst_56 = arith.constant dense<0.000000e+00> : vector<64xf32>
    %114 = vector.multi_reduction <add>, %113, %cst_56 [1] : vector<64x64xf32> to vector<64xf32>
    %115 = vector.shape_cast %114 : vector<64xf32> to vector<64x1xf32>
    %cst_57 = arith.constant 1.000000e+00 : f32
    %116 = vector.broadcast %cst_57 : f32 to vector<64x1xf32>
    %117 = arith.divf %116, %115 : vector<64x1xf32>
    %118 = vector.broadcast %117 : vector<64x1xf32> to vector<64x64xf32>
    %119 = arith.mulf %113, %118 : vector<64x64xf32>
    %cst_58 = arith.constant dense<0.000000e+00> : vector<64x8xf32>
    %120 = tpu.matmul %119, %106, %cst_58 {dimension_numbers = #tpu.dot_dimension_numbers<[1], [0], [0], [1], [0, 0, 1, 1], [], []>} : vector<64x64xf32>, vector<64x8xf32>, vector<64x8xf32> -> vector<64x8xf32>
    %121 = vector.extract_strided_slice %120 {offsets = [0, 0], sizes = [16, 8], strides = [1, 1]} : vector<64x8xf32> to vector<16x8xf32>
    %122 = vector.extract_strided_slice %120 {offsets = [16, 0], sizes = [16, 8], strides = [1, 1]} : vector<64x8xf32> to vector<16x8xf32>
    %123 = vector.extract_strided_slice %120 {offsets = [32, 0], sizes = [16, 8], strides = [1, 1]} : vector<64x8xf32> to vector<16x8xf32>
    %124 = vector.extract_strided_slice %120 {offsets = [48, 0], sizes = [16, 8], strides = [1, 1]} : vector<64x8xf32> to vector<16x8xf32>
    %125 = tpu.concatenate %121, %122, %123, %124 in 1 : vector<16x8xf32>, vector<16x8xf32>, vector<16x8xf32>, vector<16x8xf32> -> vector<16x32xf32>
    %126 = arith.truncf %125 : vector<16x32xf32> to vector<16x32xbf16>
    %cst_59 = arith.constant dense<0.000000e+00> : vector<16x32xf32>
    %127 = tpu.matmul %126, %20, %cst_59 {dimension_numbers = #tpu.dot_dimension_numbers<[1], [0], [0], [1], [0, 0, 1, 1], [], []>} : vector<16x32xbf16>, vector<32x32xbf16>, vector<16x32xf32> -> vector<16x32xf32>
    %128 = arith.addf %6, %127 : vector<16x32xf32>
    %129 = vector.extract_strided_slice %30 {offsets = [5, 0], sizes = [1, 32], strides = [1, 1]} : vector<9x32xf32> to vector<1x32xf32>
    %130 = vector.broadcast %129 : vector<1x32xf32> to vector<16x32xf32>
    %131 = arith.addf %128, %130 : vector<16x32xf32>
    %132 = vector.extract_strided_slice %30 {offsets = [6, 0], sizes = [1, 32], strides = [1, 1]} : vector<9x32xf32> to vector<1x32xf32>
    %133 = vector.extract_strided_slice %30 {offsets = [7, 0], sizes = [1, 32], strides = [1, 1]} : vector<9x32xf32> to vector<1x32xf32>
    %cst_60 = arith.constant dense<0.000000e+00> : vector<16xf32>
    %134 = vector.multi_reduction <add>, %131, %cst_60 [1] : vector<16x32xf32> to vector<16xf32>
    %135 = vector.shape_cast %134 : vector<16xf32> to vector<16x1xf32>
    %cst_61 = arith.constant 3.200000e+01 : f32
    %136 = vector.broadcast %cst_61 : f32 to vector<16x1xf32>
    %137 = arith.divf %135, %136 : vector<16x1xf32>
    %138 = vector.broadcast %137 : vector<16x1xf32> to vector<16x32xf32>
    %139 = arith.subf %131, %138 : vector<16x32xf32>
    %140 = arith.mulf %139, %139 : vector<16x32xf32>
    %cst_62 = arith.constant dense<0.000000e+00> : vector<16xf32>
    %141 = vector.multi_reduction <add>, %140, %cst_62 [1] : vector<16x32xf32> to vector<16xf32>
    %142 = vector.shape_cast %141 : vector<16xf32> to vector<16x1xf32>
    %cst_63 = arith.constant 3.200000e+01 : f32
    %143 = vector.broadcast %cst_63 : f32 to vector<16x1xf32>
    %144 = arith.divf %142, %143 : vector<16x1xf32>
    %cst_64 = arith.constant 9.99999974E-6 : f32
    %145 = vector.broadcast %cst_64 : f32 to vector<16x1xf32>
    %146 = arith.addf %144, %145 : vector<16x1xf32>
    %147 = math.rsqrt %146 : vector<16x1xf32>
    %148 = vector.broadcast %147 : vector<16x1xf32> to vector<16x32xf32>
    %149 = arith.mulf %139, %148 : vector<16x32xf32>
    %150 = vector.broadcast %132 : vector<1x32xf32> to vector<16x32xf32>
    %151 = arith.mulf %149, %150 : vector<16x32xf32>
    %152 = vector.broadcast %133 : vector<1x32xf32> to vector<16x32xf32>
    %153 = arith.addf %151, %152 : vector<16x32xf32>
    %154 = arith.truncf %153 : vector<16x32xf32> to vector<16x32xbf16>
    %cst_65 = arith.constant dense<0.000000e+00> : vector<16x128xf32>
    %155 = tpu.matmul %154, %24, %cst_65 {dimension_numbers = #tpu.dot_dimension_numbers<[1], [0], [0], [1], [0, 0, 1, 1], [], []>} : vector<16x32xbf16>, vector<32x128xbf16>, vector<16x128xf32> -> vector<16x128xf32>
    %156 = vector.broadcast %26 : vector<1x128xf32> to vector<16x128xf32>
    %157 = arith.addf %155, %156 : vector<16x128xf32>
    %cst_66 = arith.constant 0.000000e+00 : f32
    %158 = vector.broadcast %cst_66 : f32 to vector<16x128xf32>
    %159 = arith.maximumf %157, %158 : vector<16x128xf32>
    %160 = arith.truncf %159 : vector<16x128xf32> to vector<16x128xbf16>
    %cst_67 = arith.constant dense<0.000000e+00> : vector<16x32xf32>
    %161 = tpu.matmul %160, %28, %cst_67 {dimension_numbers = #tpu.dot_dimension_numbers<[1], [0], [0], [1], [0, 0, 1, 1], [], []>} : vector<16x128xbf16>, vector<128x32xbf16>, vector<16x32xf32> -> vector<16x32xf32>
    %162 = vector.extract_strided_slice %30 {offsets = [8, 0], sizes = [1, 32], strides = [1, 1]} : vector<9x32xf32> to vector<1x32xf32>
    %163 = vector.broadcast %162 : vector<1x32xf32> to vector<16x32xf32>
    %164 = arith.addf %161, %163 : vector<16x32xf32>
    %165 = arith.addf %131, %164 : vector<16x32xf32>
    %c0_68 = arith.constant 0 : index
    %c2 = arith.constant 2 : index
    %c0_69 = arith.constant 0 : index
    %c0_70 = arith.constant 0 : index
    %166 = vector.load %arg9[%c0_68, %c2, %c0_69, %c0_70] : memref<1x8x32x32xbf16, #tpu.memory_space<vmem>>, vector<1x1x32x32xbf16>
    %167 = vector.shape_cast %166 : vector<1x1x32x32xbf16> to vector<32x32xbf16>
    %c0_71 = arith.constant 0 : index
    %c3 = arith.constant 3 : index
    %c0_72 = arith.constant 0 : index
    %c0_73 = arith.constant 0 : index
    %168 = vector.load %arg9[%c0_71, %c3, %c0_72, %c0_73] : memref<1x8x32x32xbf16, #tpu.memory_space<vmem>>, vector<1x1x32x32xbf16>
    %169 = vector.shape_cast %168 : vector<1x1x32x32xbf16> to vector<32x32xbf16>
    %c0_74 = arith.constant 0 : index
    %c1_75 = arith.constant 1 : index
    %c0_76 = arith.constant 0 : index
    %c0_77 = arith.constant 0 : index
    %170 = vector.load %arg10[%c0_74, %c1_75, %c0_76, %c0_77] : memref<1x4x32x64xbf16, #tpu.memory_space<vmem>>, vector<1x1x32x64xbf16>
    %171 = vector.shape_cast %170 : vector<1x1x32x64xbf16> to vector<32x64xbf16>
    %c0_78 = arith.constant 0 : index
    %c1_79 = arith.constant 1 : index
    %c0_80 = arith.constant 0 : index
    %c0_81 = arith.constant 0 : index
    %172 = vector.load %arg11[%c0_78, %c1_79, %c0_80, %c0_81] : memref<1x4x32x128xbf16, #tpu.memory_space<vmem>>, vector<1x1x32x128xbf16>
    %173 = vector.shape_cast %172 : vector<1x1x32x128xbf16> to vector<32x128xbf16>
    %c0_82 = arith.constant 0 : index
    %c1_83 = arith.constant 1 : index
    %c0_84 = arith.constant 0 : index
    %c0_85 = arith.constant 0 : index
    %174 = vector.load %arg14[%c0_82, %c1_83, %c0_84, %c0_85] : memref<1x4x1x128xf32, #tpu.memory_space<vmem>>, vector<1x1x1x128xf32>
    %175 = vector.shape_cast %174 : vector<1x1x1x128xf32> to vector<1x128xf32>
    %c0_86 = arith.constant 0 : index
    %c1_87 = arith.constant 1 : index
    %c0_88 = arith.constant 0 : index
    %c0_89 = arith.constant 0 : index
    %176 = vector.load %arg12[%c0_86, %c1_87, %c0_88, %c0_89] : memref<1x4x128x32xbf16, #tpu.memory_space<vmem>>, vector<1x1x128x32xbf16>
    %177 = vector.shape_cast %176 : vector<1x1x128x32xbf16> to vector<128x32xbf16>
    %c0_90 = arith.constant 0 : index
    %c1_91 = arith.constant 1 : index
    %c0_92 = arith.constant 0 : index
    %c0_93 = arith.constant 0 : index
    %178 = vector.load %arg13[%c0_90, %c1_91, %c0_92, %c0_93] : memref<1x4x9x32xf32, #tpu.memory_space<vmem>>, vector<1x1x9x32xf32>
    %179 = vector.shape_cast %178 : vector<1x1x9x32xf32> to vector<9x32xf32>
    %180 = vector.extract_strided_slice %179 {offsets = [0, 0], sizes = [1, 32], strides = [1, 1]} : vector<9x32xf32> to vector<1x32xf32>
    %181 = vector.extract_strided_slice %179 {offsets = [1, 0], sizes = [1, 32], strides = [1, 1]} : vector<9x32xf32> to vector<1x32xf32>
    %cst_94 = arith.constant dense<0.000000e+00> : vector<16xf32>
    %182 = vector.multi_reduction <add>, %165, %cst_94 [1] : vector<16x32xf32> to vector<16xf32>
    %183 = vector.shape_cast %182 : vector<16xf32> to vector<16x1xf32>
    %cst_95 = arith.constant 3.200000e+01 : f32
    %184 = vector.broadcast %cst_95 : f32 to vector<16x1xf32>
    %185 = arith.divf %183, %184 : vector<16x1xf32>
    %186 = vector.broadcast %185 : vector<16x1xf32> to vector<16x32xf32>
    %187 = arith.subf %165, %186 : vector<16x32xf32>
    %188 = arith.mulf %187, %187 : vector<16x32xf32>
    %cst_96 = arith.constant dense<0.000000e+00> : vector<16xf32>
    %189 = vector.multi_reduction <add>, %188, %cst_96 [1] : vector<16x32xf32> to vector<16xf32>
    %190 = vector.shape_cast %189 : vector<16xf32> to vector<16x1xf32>
    %cst_97 = arith.constant 3.200000e+01 : f32
    %191 = vector.broadcast %cst_97 : f32 to vector<16x1xf32>
    %192 = arith.divf %190, %191 : vector<16x1xf32>
    %cst_98 = arith.constant 9.99999974E-6 : f32
    %193 = vector.broadcast %cst_98 : f32 to vector<16x1xf32>
    %194 = arith.addf %192, %193 : vector<16x1xf32>
    %195 = math.rsqrt %194 : vector<16x1xf32>
    %196 = vector.broadcast %195 : vector<16x1xf32> to vector<16x32xf32>
    %197 = arith.mulf %187, %196 : vector<16x32xf32>
    %198 = vector.broadcast %180 : vector<1x32xf32> to vector<16x32xf32>
    %199 = arith.mulf %197, %198 : vector<16x32xf32>
    %200 = vector.broadcast %181 : vector<1x32xf32> to vector<16x32xf32>
    %201 = arith.addf %199, %200 : vector<16x32xf32>
    %202 = vector.extract_strided_slice %179 {offsets = [0, 0], sizes = [1, 32], strides = [1, 1]} : vector<9x32xf32> to vector<1x32xf32>
    %203 = vector.extract_strided_slice %179 {offsets = [1, 0], sizes = [1, 32], strides = [1, 1]} : vector<9x32xf32> to vector<1x32xf32>
    %cst_99 = arith.constant dense<0.000000e+00> : vector<16xf32>
    %204 = vector.multi_reduction <add>, %11, %cst_99 [1] : vector<16x32xf32> to vector<16xf32>
    %205 = vector.shape_cast %204 : vector<16xf32> to vector<16x1xf32>
    %cst_100 = arith.constant 3.200000e+01 : f32
    %206 = vector.broadcast %cst_100 : f32 to vector<16x1xf32>
    %207 = arith.divf %205, %206 : vector<16x1xf32>
    %208 = vector.broadcast %207 : vector<16x1xf32> to vector<16x32xf32>
    %209 = arith.subf %11, %208 : vector<16x32xf32>
    %210 = arith.mulf %209, %209 : vector<16x32xf32>
    %cst_101 = arith.constant dense<0.000000e+00> : vector<16xf32>
    %211 = vector.multi_reduction <add>, %210, %cst_101 [1] : vector<16x32xf32> to vector<16xf32>
    %212 = vector.shape_cast %211 : vector<16xf32> to vector<16x1xf32>
    %cst_102 = arith.constant 3.200000e+01 : f32
    %213 = vector.broadcast %cst_102 : f32 to vector<16x1xf32>
    %214 = arith.divf %212, %213 : vector<16x1xf32>
    %cst_103 = arith.constant 9.99999974E-6 : f32
    %215 = vector.broadcast %cst_103 : f32 to vector<16x1xf32>
    %216 = arith.addf %214, %215 : vector<16x1xf32>
    %217 = math.rsqrt %216 : vector<16x1xf32>
    %218 = vector.broadcast %217 : vector<16x1xf32> to vector<16x32xf32>
    %219 = arith.mulf %209, %218 : vector<16x32xf32>
    %220 = vector.broadcast %202 : vector<1x32xf32> to vector<16x32xf32>
    %221 = arith.mulf %219, %220 : vector<16x32xf32>
    %222 = vector.broadcast %203 : vector<1x32xf32> to vector<16x32xf32>
    %223 = arith.addf %221, %222 : vector<16x32xf32>
    %224 = arith.truncf %201 : vector<16x32xf32> to vector<16x32xbf16>
    %cst_104 = arith.constant dense<0.000000e+00> : vector<16x32xf32>
    %225 = tpu.matmul %224, %167, %cst_104 {dimension_numbers = #tpu.dot_dimension_numbers<[1], [0], [0], [1], [0, 0, 1, 1], [], []>} : vector<16x32xbf16>, vector<32x32xbf16>, vector<16x32xf32> -> vector<16x32xf32>
    %226 = vector.extract_strided_slice %179 {offsets = [2, 0], sizes = [1, 32], strides = [1, 1]} : vector<9x32xf32> to vector<1x32xf32>
    %227 = vector.broadcast %226 : vector<1x32xf32> to vector<16x32xf32>
    %228 = arith.addf %225, %227 : vector<16x32xf32>
    %cst_105 = arith.constant 0.353553385 : f32
    %229 = vector.broadcast %cst_105 : f32 to vector<16x32xf32>
    %230 = arith.mulf %228, %229 : vector<16x32xf32>
    %231 = arith.truncf %223 : vector<16x32xf32> to vector<16x32xbf16>
    %cst_106 = arith.constant dense<0.000000e+00> : vector<16x64xf32>
    %232 = tpu.matmul %231, %171, %cst_106 {dimension_numbers = #tpu.dot_dimension_numbers<[1], [0], [0], [1], [0, 0, 1, 1], [], []>} : vector<16x32xbf16>, vector<32x64xbf16>, vector<16x64xf32> -> vector<16x64xf32>
    %233 = vector.extract_strided_slice %232 {offsets = [0, 0], sizes = [16, 32], strides = [1, 1]} : vector<16x64xf32> to vector<16x32xf32>
    %234 = vector.extract_strided_slice %179 {offsets = [3, 0], sizes = [1, 32], strides = [1, 1]} : vector<9x32xf32> to vector<1x32xf32>
    %235 = vector.broadcast %234 : vector<1x32xf32> to vector<16x32xf32>
    %236 = arith.addf %233, %235 : vector<16x32xf32>
    %237 = vector.extract_strided_slice %232 {offsets = [0, 32], sizes = [16, 32], strides = [1, 1]} : vector<16x64xf32> to vector<16x32xf32>
    %238 = vector.extract_strided_slice %179 {offsets = [4, 0], sizes = [1, 32], strides = [1, 1]} : vector<9x32xf32> to vector<1x32xf32>
    %239 = vector.broadcast %238 : vector<1x32xf32> to vector<16x32xf32>
    %240 = arith.addf %237, %239 : vector<16x32xf32>
    %241 = vector.extract_strided_slice %230 {offsets = [0, 0], sizes = [16, 8], strides = [1, 1]} : vector<16x32xf32> to vector<16x8xf32>
    %242 = vector.extract_strided_slice %230 {offsets = [0, 8], sizes = [16, 8], strides = [1, 1]} : vector<16x32xf32> to vector<16x8xf32>
    %243 = vector.extract_strided_slice %230 {offsets = [0, 16], sizes = [16, 8], strides = [1, 1]} : vector<16x32xf32> to vector<16x8xf32>
    %244 = vector.extract_strided_slice %230 {offsets = [0, 24], sizes = [16, 8], strides = [1, 1]} : vector<16x32xf32> to vector<16x8xf32>
    %245 = tpu.concatenate %241, %242, %243, %244 in 0 : vector<16x8xf32>, vector<16x8xf32>, vector<16x8xf32>, vector<16x8xf32> -> vector<64x8xf32>
    %246 = vector.extract_strided_slice %236 {offsets = [0, 0], sizes = [16, 8], strides = [1, 1]} : vector<16x32xf32> to vector<16x8xf32>
    %247 = vector.extract_strided_slice %236 {offsets = [0, 8], sizes = [16, 8], strides = [1, 1]} : vector<16x32xf32> to vector<16x8xf32>
    %248 = vector.extract_strided_slice %236 {offsets = [0, 16], sizes = [16, 8], strides = [1, 1]} : vector<16x32xf32> to vector<16x8xf32>
    %249 = vector.extract_strided_slice %236 {offsets = [0, 24], sizes = [16, 8], strides = [1, 1]} : vector<16x32xf32> to vector<16x8xf32>
    %250 = tpu.concatenate %246, %247, %248, %249 in 0 : vector<16x8xf32>, vector<16x8xf32>, vector<16x8xf32>, vector<16x8xf32> -> vector<64x8xf32>
    %251 = vector.extract_strided_slice %240 {offsets = [0, 0], sizes = [16, 8], strides = [1, 1]} : vector<16x32xf32> to vector<16x8xf32>
    %252 = vector.extract_strided_slice %240 {offsets = [0, 8], sizes = [16, 8], strides = [1, 1]} : vector<16x32xf32> to vector<16x8xf32>
    %253 = vector.extract_strided_slice %240 {offsets = [0, 16], sizes = [16, 8], strides = [1, 1]} : vector<16x32xf32> to vector<16x8xf32>
    %254 = vector.extract_strided_slice %240 {offsets = [0, 24], sizes = [16, 8], strides = [1, 1]} : vector<16x32xf32> to vector<16x8xf32>
    %255 = tpu.concatenate %251, %252, %253, %254 in 0 : vector<16x8xf32>, vector<16x8xf32>, vector<16x8xf32>, vector<16x8xf32> -> vector<64x8xf32>
    %cst_107 = arith.constant dense<0.000000e+00> : vector<64x64xf32>
    %256 = tpu.matmul %245, %250, %cst_107 {dimension_numbers = #tpu.dot_dimension_numbers<[1], [1], [0], [0], [0, 0, 1, 0], [], []>} : vector<64x8xf32>, vector<64x8xf32>, vector<64x64xf32> -> vector<64x64xf32>
    %257 = arith.addf %256, %0 : vector<64x64xf32>
    %cst_108 = arith.constant dense<0xFF800000> : vector<64xf32>
    %258 = vector.multi_reduction <maximumf>, %257, %cst_108 [1] : vector<64x64xf32> to vector<64xf32>
    %259 = vector.shape_cast %258 : vector<64xf32> to vector<64x1xf32>
    %260 = vector.broadcast %259 : vector<64x1xf32> to vector<64x64xf32>
    %261 = arith.subf %257, %260 : vector<64x64xf32>
    %262 = math.exp %261 : vector<64x64xf32>
    %cst_109 = arith.constant dense<0.000000e+00> : vector<64xf32>
    %263 = vector.multi_reduction <add>, %262, %cst_109 [1] : vector<64x64xf32> to vector<64xf32>
    %264 = vector.shape_cast %263 : vector<64xf32> to vector<64x1xf32>
    %cst_110 = arith.constant 1.000000e+00 : f32
    %265 = vector.broadcast %cst_110 : f32 to vector<64x1xf32>
    %266 = arith.divf %265, %264 : vector<64x1xf32>
    %267 = vector.broadcast %266 : vector<64x1xf32> to vector<64x64xf32>
    %268 = arith.mulf %262, %267 : vector<64x64xf32>
    %cst_111 = arith.constant dense<0.000000e+00> : vector<64x8xf32>
    %269 = tpu.matmul %268, %255, %cst_111 {dimension_numbers = #tpu.dot_dimension_numbers<[1], [0], [0], [1], [0, 0, 1, 1], [], []>} : vector<64x64xf32>, vector<64x8xf32>, vector<64x8xf32> -> vector<64x8xf32>
    %270 = vector.extract_strided_slice %269 {offsets = [0, 0], sizes = [16, 8], strides = [1, 1]} : vector<64x8xf32> to vector<16x8xf32>
    %271 = vector.extract_strided_slice %269 {offsets = [16, 0], sizes = [16, 8], strides = [1, 1]} : vector<64x8xf32> to vector<16x8xf32>
    %272 = vector.extract_strided_slice %269 {offsets = [32, 0], sizes = [16, 8], strides = [1, 1]} : vector<64x8xf32> to vector<16x8xf32>
    %273 = vector.extract_strided_slice %269 {offsets = [48, 0], sizes = [16, 8], strides = [1, 1]} : vector<64x8xf32> to vector<16x8xf32>
    %274 = tpu.concatenate %270, %271, %272, %273 in 1 : vector<16x8xf32>, vector<16x8xf32>, vector<16x8xf32>, vector<16x8xf32> -> vector<16x32xf32>
    %275 = arith.truncf %274 : vector<16x32xf32> to vector<16x32xbf16>
    %cst_112 = arith.constant dense<0.000000e+00> : vector<16x32xf32>
    %276 = tpu.matmul %275, %169, %cst_112 {dimension_numbers = #tpu.dot_dimension_numbers<[1], [0], [0], [1], [0, 0, 1, 1], [], []>} : vector<16x32xbf16>, vector<32x32xbf16>, vector<16x32xf32> -> vector<16x32xf32>
    %277 = arith.addf %165, %276 : vector<16x32xf32>
    %278 = vector.extract_strided_slice %179 {offsets = [5, 0], sizes = [1, 32], strides = [1, 1]} : vector<9x32xf32> to vector<1x32xf32>
    %279 = vector.broadcast %278 : vector<1x32xf32> to vector<16x32xf32>
    %280 = arith.addf %277, %279 : vector<16x32xf32>
    %281 = vector.extract_strided_slice %179 {offsets = [6, 0], sizes = [1, 32], strides = [1, 1]} : vector<9x32xf32> to vector<1x32xf32>
    %282 = vector.extract_strided_slice %179 {offsets = [7, 0], sizes = [1, 32], strides = [1, 1]} : vector<9x32xf32> to vector<1x32xf32>
    %cst_113 = arith.constant dense<0.000000e+00> : vector<16xf32>
    %283 = vector.multi_reduction <add>, %280, %cst_113 [1] : vector<16x32xf32> to vector<16xf32>
    %284 = vector.shape_cast %283 : vector<16xf32> to vector<16x1xf32>
    %cst_114 = arith.constant 3.200000e+01 : f32
    %285 = vector.broadcast %cst_114 : f32 to vector<16x1xf32>
    %286 = arith.divf %284, %285 : vector<16x1xf32>
    %287 = vector.broadcast %286 : vector<16x1xf32> to vector<16x32xf32>
    %288 = arith.subf %280, %287 : vector<16x32xf32>
    %289 = arith.mulf %288, %288 : vector<16x32xf32>
    %cst_115 = arith.constant dense<0.000000e+00> : vector<16xf32>
    %290 = vector.multi_reduction <add>, %289, %cst_115 [1] : vector<16x32xf32> to vector<16xf32>
    %291 = vector.shape_cast %290 : vector<16xf32> to vector<16x1xf32>
    %cst_116 = arith.constant 3.200000e+01 : f32
    %292 = vector.broadcast %cst_116 : f32 to vector<16x1xf32>
    %293 = arith.divf %291, %292 : vector<16x1xf32>
    %cst_117 = arith.constant 9.99999974E-6 : f32
    %294 = vector.broadcast %cst_117 : f32 to vector<16x1xf32>
    %295 = arith.addf %293, %294 : vector<16x1xf32>
    %296 = math.rsqrt %295 : vector<16x1xf32>
    %297 = vector.broadcast %296 : vector<16x1xf32> to vector<16x32xf32>
    %298 = arith.mulf %288, %297 : vector<16x32xf32>
    %299 = vector.broadcast %281 : vector<1x32xf32> to vector<16x32xf32>
    %300 = arith.mulf %298, %299 : vector<16x32xf32>
    %301 = vector.broadcast %282 : vector<1x32xf32> to vector<16x32xf32>
    %302 = arith.addf %300, %301 : vector<16x32xf32>
    %303 = arith.truncf %302 : vector<16x32xf32> to vector<16x32xbf16>
    %cst_118 = arith.constant dense<0.000000e+00> : vector<16x128xf32>
    %304 = tpu.matmul %303, %173, %cst_118 {dimension_numbers = #tpu.dot_dimension_numbers<[1], [0], [0], [1], [0, 0, 1, 1], [], []>} : vector<16x32xbf16>, vector<32x128xbf16>, vector<16x128xf32> -> vector<16x128xf32>
    %305 = vector.broadcast %175 : vector<1x128xf32> to vector<16x128xf32>
    %306 = arith.addf %304, %305 : vector<16x128xf32>
    %cst_119 = arith.constant 0.000000e+00 : f32
    %307 = vector.broadcast %cst_119 : f32 to vector<16x128xf32>
    %308 = arith.maximumf %306, %307 : vector<16x128xf32>
    %309 = arith.truncf %308 : vector<16x128xf32> to vector<16x128xbf16>
    %cst_120 = arith.constant dense<0.000000e+00> : vector<16x32xf32>
    %310 = tpu.matmul %309, %177, %cst_120 {dimension_numbers = #tpu.dot_dimension_numbers<[1], [0], [0], [1], [0, 0, 1, 1], [], []>} : vector<16x128xbf16>, vector<128x32xbf16>, vector<16x32xf32> -> vector<16x32xf32>
    %311 = vector.extract_strided_slice %179 {offsets = [8, 0], sizes = [1, 32], strides = [1, 1]} : vector<9x32xf32> to vector<1x32xf32>
    %312 = vector.broadcast %311 : vector<1x32xf32> to vector<16x32xf32>
    %313 = arith.addf %310, %312 : vector<16x32xf32>
    %314 = arith.addf %280, %313 : vector<16x32xf32>
    %c0_121 = arith.constant 0 : index
    %c0_122 = arith.constant 0 : index
    %c0_123 = arith.constant 0 : index
    %c0_124 = arith.constant 0 : index
    %315 = vector.load %arg15[%c0_121, %c0_122, %c0_123, %c0_124] : memref<1x2x2x32xf32, #tpu.memory_space<vmem>>, vector<1x1x2x32xf32>
    %316 = vector.shape_cast %315 : vector<1x1x2x32xf32> to vector<2x32xf32>
    %317 = vector.extract_strided_slice %316 {offsets = [0, 0], sizes = [1, 32], strides = [1, 1]} : vector<2x32xf32> to vector<1x32xf32>
    %318 = vector.extract_strided_slice %316 {offsets = [1, 0], sizes = [1, 32], strides = [1, 1]} : vector<2x32xf32> to vector<1x32xf32>
    %cst_125 = arith.constant dense<0.000000e+00> : vector<16xf32>
    %319 = vector.multi_reduction <add>, %314, %cst_125 [1] : vector<16x32xf32> to vector<16xf32>
    %320 = vector.shape_cast %319 : vector<16xf32> to vector<16x1xf32>
    %cst_126 = arith.constant 3.200000e+01 : f32
    %321 = vector.broadcast %cst_126 : f32 to vector<16x1xf32>
    %322 = arith.divf %320, %321 : vector<16x1xf32>
    %323 = vector.broadcast %322 : vector<16x1xf32> to vector<16x32xf32>
    %324 = arith.subf %314, %323 : vector<16x32xf32>
    %325 = arith.mulf %324, %324 : vector<16x32xf32>
    %cst_127 = arith.constant dense<0.000000e+00> : vector<16xf32>
    %326 = vector.multi_reduction <add>, %325, %cst_127 [1] : vector<16x32xf32> to vector<16xf32>
    %327 = vector.shape_cast %326 : vector<16xf32> to vector<16x1xf32>
    %cst_128 = arith.constant 3.200000e+01 : f32
    %328 = vector.broadcast %cst_128 : f32 to vector<16x1xf32>
    %329 = arith.divf %327, %328 : vector<16x1xf32>
    %cst_129 = arith.constant 9.99999974E-6 : f32
    %330 = vector.broadcast %cst_129 : f32 to vector<16x1xf32>
    %331 = arith.addf %329, %330 : vector<16x1xf32>
    %332 = math.rsqrt %331 : vector<16x1xf32>
    %333 = vector.broadcast %332 : vector<16x1xf32> to vector<16x32xf32>
    %334 = arith.mulf %324, %333 : vector<16x32xf32>
    %335 = vector.broadcast %317 : vector<1x32xf32> to vector<16x32xf32>
    %336 = arith.mulf %334, %335 : vector<16x32xf32>
    %337 = vector.broadcast %318 : vector<1x32xf32> to vector<16x32xf32>
    %338 = arith.addf %336, %337 : vector<16x32xf32>
    %c0_130 = arith.constant 0 : index
    %c4 = arith.constant 4 : index
    %c0_131 = arith.constant 0 : index
    %c0_132 = arith.constant 0 : index
    %339 = vector.load %arg9[%c0_130, %c4, %c0_131, %c0_132] : memref<1x8x32x32xbf16, #tpu.memory_space<vmem>>, vector<1x1x32x32xbf16>
    %340 = vector.shape_cast %339 : vector<1x1x32x32xbf16> to vector<32x32xbf16>
    %c0_133 = arith.constant 0 : index
    %c5 = arith.constant 5 : index
    %c0_134 = arith.constant 0 : index
    %c0_135 = arith.constant 0 : index
    %341 = vector.load %arg9[%c0_133, %c5, %c0_134, %c0_135] : memref<1x8x32x32xbf16, #tpu.memory_space<vmem>>, vector<1x1x32x32xbf16>
    %342 = vector.shape_cast %341 : vector<1x1x32x32xbf16> to vector<32x32xbf16>
    %c0_136 = arith.constant 0 : index
    %c2_137 = arith.constant 2 : index
    %c0_138 = arith.constant 0 : index
    %c0_139 = arith.constant 0 : index
    %343 = vector.load %arg10[%c0_136, %c2_137, %c0_138, %c0_139] : memref<1x4x32x64xbf16, #tpu.memory_space<vmem>>, vector<1x1x32x64xbf16>
    %344 = vector.shape_cast %343 : vector<1x1x32x64xbf16> to vector<32x64xbf16>
    %c0_140 = arith.constant 0 : index
    %c2_141 = arith.constant 2 : index
    %c0_142 = arith.constant 0 : index
    %c0_143 = arith.constant 0 : index
    %345 = vector.load %arg11[%c0_140, %c2_141, %c0_142, %c0_143] : memref<1x4x32x128xbf16, #tpu.memory_space<vmem>>, vector<1x1x32x128xbf16>
    %346 = vector.shape_cast %345 : vector<1x1x32x128xbf16> to vector<32x128xbf16>
    %c0_144 = arith.constant 0 : index
    %c2_145 = arith.constant 2 : index
    %c0_146 = arith.constant 0 : index
    %c0_147 = arith.constant 0 : index
    %347 = vector.load %arg14[%c0_144, %c2_145, %c0_146, %c0_147] : memref<1x4x1x128xf32, #tpu.memory_space<vmem>>, vector<1x1x1x128xf32>
    %348 = vector.shape_cast %347 : vector<1x1x1x128xf32> to vector<1x128xf32>
    %c0_148 = arith.constant 0 : index
    %c2_149 = arith.constant 2 : index
    %c0_150 = arith.constant 0 : index
    %c0_151 = arith.constant 0 : index
    %349 = vector.load %arg12[%c0_148, %c2_149, %c0_150, %c0_151] : memref<1x4x128x32xbf16, #tpu.memory_space<vmem>>, vector<1x1x128x32xbf16>
    %350 = vector.shape_cast %349 : vector<1x1x128x32xbf16> to vector<128x32xbf16>
    %c0_152 = arith.constant 0 : index
    %c2_153 = arith.constant 2 : index
    %c0_154 = arith.constant 0 : index
    %c0_155 = arith.constant 0 : index
    %351 = vector.load %arg13[%c0_152, %c2_153, %c0_154, %c0_155] : memref<1x4x9x32xf32, #tpu.memory_space<vmem>>, vector<1x1x9x32xf32>
    %352 = vector.shape_cast %351 : vector<1x1x9x32xf32> to vector<9x32xf32>
    %353 = vector.extract_strided_slice %352 {offsets = [0, 0], sizes = [1, 32], strides = [1, 1]} : vector<9x32xf32> to vector<1x32xf32>
    %354 = vector.extract_strided_slice %352 {offsets = [1, 0], sizes = [1, 32], strides = [1, 1]} : vector<9x32xf32> to vector<1x32xf32>
    %cst_156 = arith.constant dense<0.000000e+00> : vector<16xf32>
    %355 = vector.multi_reduction <add>, %6, %cst_156 [1] : vector<16x32xf32> to vector<16xf32>
    %356 = vector.shape_cast %355 : vector<16xf32> to vector<16x1xf32>
    %cst_157 = arith.constant 3.200000e+01 : f32
    %357 = vector.broadcast %cst_157 : f32 to vector<16x1xf32>
    %358 = arith.divf %356, %357 : vector<16x1xf32>
    %359 = vector.broadcast %358 : vector<16x1xf32> to vector<16x32xf32>
    %360 = arith.subf %6, %359 : vector<16x32xf32>
    %361 = arith.mulf %360, %360 : vector<16x32xf32>
    %cst_158 = arith.constant dense<0.000000e+00> : vector<16xf32>
    %362 = vector.multi_reduction <add>, %361, %cst_158 [1] : vector<16x32xf32> to vector<16xf32>
    %363 = vector.shape_cast %362 : vector<16xf32> to vector<16x1xf32>
    %cst_159 = arith.constant 3.200000e+01 : f32
    %364 = vector.broadcast %cst_159 : f32 to vector<16x1xf32>
    %365 = arith.divf %363, %364 : vector<16x1xf32>
    %cst_160 = arith.constant 9.99999974E-6 : f32
    %366 = vector.broadcast %cst_160 : f32 to vector<16x1xf32>
    %367 = arith.addf %365, %366 : vector<16x1xf32>
    %368 = math.rsqrt %367 : vector<16x1xf32>
    %369 = vector.broadcast %368 : vector<16x1xf32> to vector<16x32xf32>
    %370 = arith.mulf %360, %369 : vector<16x32xf32>
    %371 = vector.broadcast %353 : vector<1x32xf32> to vector<16x32xf32>
    %372 = arith.mulf %370, %371 : vector<16x32xf32>
    %373 = vector.broadcast %354 : vector<1x32xf32> to vector<16x32xf32>
    %374 = arith.addf %372, %373 : vector<16x32xf32>
    %375 = vector.extract_strided_slice %352 {offsets = [0, 0], sizes = [1, 32], strides = [1, 1]} : vector<9x32xf32> to vector<1x32xf32>
    %376 = vector.extract_strided_slice %352 {offsets = [1, 0], sizes = [1, 32], strides = [1, 1]} : vector<9x32xf32> to vector<1x32xf32>
    %cst_161 = arith.constant dense<0.000000e+00> : vector<16xf32>
    %377 = vector.multi_reduction <add>, %16, %cst_161 [1] : vector<16x32xf32> to vector<16xf32>
    %378 = vector.shape_cast %377 : vector<16xf32> to vector<16x1xf32>
    %cst_162 = arith.constant 3.200000e+01 : f32
    %379 = vector.broadcast %cst_162 : f32 to vector<16x1xf32>
    %380 = arith.divf %378, %379 : vector<16x1xf32>
    %381 = vector.broadcast %380 : vector<16x1xf32> to vector<16x32xf32>
    %382 = arith.subf %16, %381 : vector<16x32xf32>
    %383 = arith.mulf %382, %382 : vector<16x32xf32>
    %cst_163 = arith.constant dense<0.000000e+00> : vector<16xf32>
    %384 = vector.multi_reduction <add>, %383, %cst_163 [1] : vector<16x32xf32> to vector<16xf32>
    %385 = vector.shape_cast %384 : vector<16xf32> to vector<16x1xf32>
    %cst_164 = arith.constant 3.200000e+01 : f32
    %386 = vector.broadcast %cst_164 : f32 to vector<16x1xf32>
    %387 = arith.divf %385, %386 : vector<16x1xf32>
    %cst_165 = arith.constant 9.99999974E-6 : f32
    %388 = vector.broadcast %cst_165 : f32 to vector<16x1xf32>
    %389 = arith.addf %387, %388 : vector<16x1xf32>
    %390 = math.rsqrt %389 : vector<16x1xf32>
    %391 = vector.broadcast %390 : vector<16x1xf32> to vector<16x32xf32>
    %392 = arith.mulf %382, %391 : vector<16x32xf32>
    %393 = vector.broadcast %375 : vector<1x32xf32> to vector<16x32xf32>
    %394 = arith.mulf %392, %393 : vector<16x32xf32>
    %395 = vector.broadcast %376 : vector<1x32xf32> to vector<16x32xf32>
    %396 = arith.addf %394, %395 : vector<16x32xf32>
    %397 = arith.truncf %374 : vector<16x32xf32> to vector<16x32xbf16>
    %cst_166 = arith.constant dense<0.000000e+00> : vector<16x32xf32>
    %398 = tpu.matmul %397, %340, %cst_166 {dimension_numbers = #tpu.dot_dimension_numbers<[1], [0], [0], [1], [0, 0, 1, 1], [], []>} : vector<16x32xbf16>, vector<32x32xbf16>, vector<16x32xf32> -> vector<16x32xf32>
    %399 = vector.extract_strided_slice %352 {offsets = [2, 0], sizes = [1, 32], strides = [1, 1]} : vector<9x32xf32> to vector<1x32xf32>
    %400 = vector.broadcast %399 : vector<1x32xf32> to vector<16x32xf32>
    %401 = arith.addf %398, %400 : vector<16x32xf32>
    %cst_167 = arith.constant 0.353553385 : f32
    %402 = vector.broadcast %cst_167 : f32 to vector<16x32xf32>
    %403 = arith.mulf %401, %402 : vector<16x32xf32>
    %404 = arith.truncf %396 : vector<16x32xf32> to vector<16x32xbf16>
    %cst_168 = arith.constant dense<0.000000e+00> : vector<16x64xf32>
    %405 = tpu.matmul %404, %344, %cst_168 {dimension_numbers = #tpu.dot_dimension_numbers<[1], [0], [0], [1], [0, 0, 1, 1], [], []>} : vector<16x32xbf16>, vector<32x64xbf16>, vector<16x64xf32> -> vector<16x64xf32>
    %406 = vector.extract_strided_slice %405 {offsets = [0, 0], sizes = [16, 32], strides = [1, 1]} : vector<16x64xf32> to vector<16x32xf32>
    %407 = vector.extract_strided_slice %352 {offsets = [3, 0], sizes = [1, 32], strides = [1, 1]} : vector<9x32xf32> to vector<1x32xf32>
    %408 = vector.broadcast %407 : vector<1x32xf32> to vector<16x32xf32>
    %409 = arith.addf %406, %408 : vector<16x32xf32>
    %410 = vector.extract_strided_slice %405 {offsets = [0, 32], sizes = [16, 32], strides = [1, 1]} : vector<16x64xf32> to vector<16x32xf32>
    %411 = vector.extract_strided_slice %352 {offsets = [4, 0], sizes = [1, 32], strides = [1, 1]} : vector<9x32xf32> to vector<1x32xf32>
    %412 = vector.broadcast %411 : vector<1x32xf32> to vector<16x32xf32>
    %413 = arith.addf %410, %412 : vector<16x32xf32>
    %414 = vector.extract_strided_slice %403 {offsets = [0, 0], sizes = [16, 8], strides = [1, 1]} : vector<16x32xf32> to vector<16x8xf32>
    %415 = vector.extract_strided_slice %403 {offsets = [0, 8], sizes = [16, 8], strides = [1, 1]} : vector<16x32xf32> to vector<16x8xf32>
    %416 = vector.extract_strided_slice %403 {offsets = [0, 16], sizes = [16, 8], strides = [1, 1]} : vector<16x32xf32> to vector<16x8xf32>
    %417 = vector.extract_strided_slice %403 {offsets = [0, 24], sizes = [16, 8], strides = [1, 1]} : vector<16x32xf32> to vector<16x8xf32>
    %418 = tpu.concatenate %414, %415, %416, %417 in 0 : vector<16x8xf32>, vector<16x8xf32>, vector<16x8xf32>, vector<16x8xf32> -> vector<64x8xf32>
    %419 = vector.extract_strided_slice %409 {offsets = [0, 0], sizes = [16, 8], strides = [1, 1]} : vector<16x32xf32> to vector<16x8xf32>
    %420 = vector.extract_strided_slice %409 {offsets = [0, 8], sizes = [16, 8], strides = [1, 1]} : vector<16x32xf32> to vector<16x8xf32>
    %421 = vector.extract_strided_slice %409 {offsets = [0, 16], sizes = [16, 8], strides = [1, 1]} : vector<16x32xf32> to vector<16x8xf32>
    %422 = vector.extract_strided_slice %409 {offsets = [0, 24], sizes = [16, 8], strides = [1, 1]} : vector<16x32xf32> to vector<16x8xf32>
    %423 = tpu.concatenate %419, %420, %421, %422 in 0 : vector<16x8xf32>, vector<16x8xf32>, vector<16x8xf32>, vector<16x8xf32> -> vector<64x8xf32>
    %424 = vector.extract_strided_slice %413 {offsets = [0, 0], sizes = [16, 8], strides = [1, 1]} : vector<16x32xf32> to vector<16x8xf32>
    %425 = vector.extract_strided_slice %413 {offsets = [0, 8], sizes = [16, 8], strides = [1, 1]} : vector<16x32xf32> to vector<16x8xf32>
    %426 = vector.extract_strided_slice %413 {offsets = [0, 16], sizes = [16, 8], strides = [1, 1]} : vector<16x32xf32> to vector<16x8xf32>
    %427 = vector.extract_strided_slice %413 {offsets = [0, 24], sizes = [16, 8], strides = [1, 1]} : vector<16x32xf32> to vector<16x8xf32>
    %428 = tpu.concatenate %424, %425, %426, %427 in 0 : vector<16x8xf32>, vector<16x8xf32>, vector<16x8xf32>, vector<16x8xf32> -> vector<64x8xf32>
    %cst_169 = arith.constant dense<0.000000e+00> : vector<64x64xf32>
    %429 = tpu.matmul %418, %423, %cst_169 {dimension_numbers = #tpu.dot_dimension_numbers<[1], [1], [0], [0], [0, 0, 1, 0], [], []>} : vector<64x8xf32>, vector<64x8xf32>, vector<64x64xf32> -> vector<64x64xf32>
    %430 = arith.addf %429, %0 : vector<64x64xf32>
    %cst_170 = arith.constant dense<0xFF800000> : vector<64xf32>
    %431 = vector.multi_reduction <maximumf>, %430, %cst_170 [1] : vector<64x64xf32> to vector<64xf32>
    %432 = vector.shape_cast %431 : vector<64xf32> to vector<64x1xf32>
    %433 = vector.broadcast %432 : vector<64x1xf32> to vector<64x64xf32>
    %434 = arith.subf %430, %433 : vector<64x64xf32>
    %435 = math.exp %434 : vector<64x64xf32>
    %cst_171 = arith.constant dense<0.000000e+00> : vector<64xf32>
    %436 = vector.multi_reduction <add>, %435, %cst_171 [1] : vector<64x64xf32> to vector<64xf32>
    %437 = vector.shape_cast %436 : vector<64xf32> to vector<64x1xf32>
    %cst_172 = arith.constant 1.000000e+00 : f32
    %438 = vector.broadcast %cst_172 : f32 to vector<64x1xf32>
    %439 = arith.divf %438, %437 : vector<64x1xf32>
    %440 = vector.broadcast %439 : vector<64x1xf32> to vector<64x64xf32>
    %441 = arith.mulf %435, %440 : vector<64x64xf32>
    %cst_173 = arith.constant dense<0.000000e+00> : vector<64x8xf32>
    %442 = tpu.matmul %441, %428, %cst_173 {dimension_numbers = #tpu.dot_dimension_numbers<[1], [0], [0], [1], [0, 0, 1, 1], [], []>} : vector<64x64xf32>, vector<64x8xf32>, vector<64x8xf32> -> vector<64x8xf32>
    %443 = vector.extract_strided_slice %442 {offsets = [0, 0], sizes = [16, 8], strides = [1, 1]} : vector<64x8xf32> to vector<16x8xf32>
    %444 = vector.extract_strided_slice %442 {offsets = [16, 0], sizes = [16, 8], strides = [1, 1]} : vector<64x8xf32> to vector<16x8xf32>
    %445 = vector.extract_strided_slice %442 {offsets = [32, 0], sizes = [16, 8], strides = [1, 1]} : vector<64x8xf32> to vector<16x8xf32>
    %446 = vector.extract_strided_slice %442 {offsets = [48, 0], sizes = [16, 8], strides = [1, 1]} : vector<64x8xf32> to vector<16x8xf32>
    %447 = tpu.concatenate %443, %444, %445, %446 in 1 : vector<16x8xf32>, vector<16x8xf32>, vector<16x8xf32>, vector<16x8xf32> -> vector<16x32xf32>
    %448 = arith.truncf %447 : vector<16x32xf32> to vector<16x32xbf16>
    %cst_174 = arith.constant dense<0.000000e+00> : vector<16x32xf32>
    %449 = tpu.matmul %448, %342, %cst_174 {dimension_numbers = #tpu.dot_dimension_numbers<[1], [0], [0], [1], [0, 0, 1, 1], [], []>} : vector<16x32xbf16>, vector<32x32xbf16>, vector<16x32xf32> -> vector<16x32xf32>
    %450 = arith.addf %6, %449 : vector<16x32xf32>
    %451 = vector.extract_strided_slice %352 {offsets = [5, 0], sizes = [1, 32], strides = [1, 1]} : vector<9x32xf32> to vector<1x32xf32>
    %452 = vector.broadcast %451 : vector<1x32xf32> to vector<16x32xf32>
    %453 = arith.addf %450, %452 : vector<16x32xf32>
    %454 = vector.extract_strided_slice %352 {offsets = [6, 0], sizes = [1, 32], strides = [1, 1]} : vector<9x32xf32> to vector<1x32xf32>
    %455 = vector.extract_strided_slice %352 {offsets = [7, 0], sizes = [1, 32], strides = [1, 1]} : vector<9x32xf32> to vector<1x32xf32>
    %cst_175 = arith.constant dense<0.000000e+00> : vector<16xf32>
    %456 = vector.multi_reduction <add>, %453, %cst_175 [1] : vector<16x32xf32> to vector<16xf32>
    %457 = vector.shape_cast %456 : vector<16xf32> to vector<16x1xf32>
    %cst_176 = arith.constant 3.200000e+01 : f32
    %458 = vector.broadcast %cst_176 : f32 to vector<16x1xf32>
    %459 = arith.divf %457, %458 : vector<16x1xf32>
    %460 = vector.broadcast %459 : vector<16x1xf32> to vector<16x32xf32>
    %461 = arith.subf %453, %460 : vector<16x32xf32>
    %462 = arith.mulf %461, %461 : vector<16x32xf32>
    %cst_177 = arith.constant dense<0.000000e+00> : vector<16xf32>
    %463 = vector.multi_reduction <add>, %462, %cst_177 [1] : vector<16x32xf32> to vector<16xf32>
    %464 = vector.shape_cast %463 : vector<16xf32> to vector<16x1xf32>
    %cst_178 = arith.constant 3.200000e+01 : f32
    %465 = vector.broadcast %cst_178 : f32 to vector<16x1xf32>
    %466 = arith.divf %464, %465 : vector<16x1xf32>
    %cst_179 = arith.constant 9.99999974E-6 : f32
    %467 = vector.broadcast %cst_179 : f32 to vector<16x1xf32>
    %468 = arith.addf %466, %467 : vector<16x1xf32>
    %469 = math.rsqrt %468 : vector<16x1xf32>
    %470 = vector.broadcast %469 : vector<16x1xf32> to vector<16x32xf32>
    %471 = arith.mulf %461, %470 : vector<16x32xf32>
    %472 = vector.broadcast %454 : vector<1x32xf32> to vector<16x32xf32>
    %473 = arith.mulf %471, %472 : vector<16x32xf32>
    %474 = vector.broadcast %455 : vector<1x32xf32> to vector<16x32xf32>
    %475 = arith.addf %473, %474 : vector<16x32xf32>
    %476 = arith.truncf %475 : vector<16x32xf32> to vector<16x32xbf16>
    %cst_180 = arith.constant dense<0.000000e+00> : vector<16x128xf32>
    %477 = tpu.matmul %476, %346, %cst_180 {dimension_numbers = #tpu.dot_dimension_numbers<[1], [0], [0], [1], [0, 0, 1, 1], [], []>} : vector<16x32xbf16>, vector<32x128xbf16>, vector<16x128xf32> -> vector<16x128xf32>
    %478 = vector.broadcast %348 : vector<1x128xf32> to vector<16x128xf32>
    %479 = arith.addf %477, %478 : vector<16x128xf32>
    %cst_181 = arith.constant 0.000000e+00 : f32
    %480 = vector.broadcast %cst_181 : f32 to vector<16x128xf32>
    %481 = arith.maximumf %479, %480 : vector<16x128xf32>
    %482 = arith.truncf %481 : vector<16x128xf32> to vector<16x128xbf16>
    %cst_182 = arith.constant dense<0.000000e+00> : vector<16x32xf32>
    %483 = tpu.matmul %482, %350, %cst_182 {dimension_numbers = #tpu.dot_dimension_numbers<[1], [0], [0], [1], [0, 0, 1, 1], [], []>} : vector<16x128xbf16>, vector<128x32xbf16>, vector<16x32xf32> -> vector<16x32xf32>
    %484 = vector.extract_strided_slice %352 {offsets = [8, 0], sizes = [1, 32], strides = [1, 1]} : vector<9x32xf32> to vector<1x32xf32>
    %485 = vector.broadcast %484 : vector<1x32xf32> to vector<16x32xf32>
    %486 = arith.addf %483, %485 : vector<16x32xf32>
    %487 = arith.addf %453, %486 : vector<16x32xf32>
    %c0_183 = arith.constant 0 : index
    %c6 = arith.constant 6 : index
    %c0_184 = arith.constant 0 : index
    %c0_185 = arith.constant 0 : index
    %488 = vector.load %arg9[%c0_183, %c6, %c0_184, %c0_185] : memref<1x8x32x32xbf16, #tpu.memory_space<vmem>>, vector<1x1x32x32xbf16>
    %489 = vector.shape_cast %488 : vector<1x1x32x32xbf16> to vector<32x32xbf16>
    %c0_186 = arith.constant 0 : index
    %c7 = arith.constant 7 : index
    %c0_187 = arith.constant 0 : index
    %c0_188 = arith.constant 0 : index
    %490 = vector.load %arg9[%c0_186, %c7, %c0_187, %c0_188] : memref<1x8x32x32xbf16, #tpu.memory_space<vmem>>, vector<1x1x32x32xbf16>
    %491 = vector.shape_cast %490 : vector<1x1x32x32xbf16> to vector<32x32xbf16>
    %c0_189 = arith.constant 0 : index
    %c3_190 = arith.constant 3 : index
    %c0_191 = arith.constant 0 : index
    %c0_192 = arith.constant 0 : index
    %492 = vector.load %arg10[%c0_189, %c3_190, %c0_191, %c0_192] : memref<1x4x32x64xbf16, #tpu.memory_space<vmem>>, vector<1x1x32x64xbf16>
    %493 = vector.shape_cast %492 : vector<1x1x32x64xbf16> to vector<32x64xbf16>
    %c0_193 = arith.constant 0 : index
    %c3_194 = arith.constant 3 : index
    %c0_195 = arith.constant 0 : index
    %c0_196 = arith.constant 0 : index
    %494 = vector.load %arg11[%c0_193, %c3_194, %c0_195, %c0_196] : memref<1x4x32x128xbf16, #tpu.memory_space<vmem>>, vector<1x1x32x128xbf16>
    %495 = vector.shape_cast %494 : vector<1x1x32x128xbf16> to vector<32x128xbf16>
    %c0_197 = arith.constant 0 : index
    %c3_198 = arith.constant 3 : index
    %c0_199 = arith.constant 0 : index
    %c0_200 = arith.constant 0 : index
    %496 = vector.load %arg14[%c0_197, %c3_198, %c0_199, %c0_200] : memref<1x4x1x128xf32, #tpu.memory_space<vmem>>, vector<1x1x1x128xf32>
    %497 = vector.shape_cast %496 : vector<1x1x1x128xf32> to vector<1x128xf32>
    %c0_201 = arith.constant 0 : index
    %c3_202 = arith.constant 3 : index
    %c0_203 = arith.constant 0 : index
    %c0_204 = arith.constant 0 : index
    %498 = vector.load %arg12[%c0_201, %c3_202, %c0_203, %c0_204] : memref<1x4x128x32xbf16, #tpu.memory_space<vmem>>, vector<1x1x128x32xbf16>
    %499 = vector.shape_cast %498 : vector<1x1x128x32xbf16> to vector<128x32xbf16>
    %c0_205 = arith.constant 0 : index
    %c3_206 = arith.constant 3 : index
    %c0_207 = arith.constant 0 : index
    %c0_208 = arith.constant 0 : index
    %500 = vector.load %arg13[%c0_205, %c3_206, %c0_207, %c0_208] : memref<1x4x9x32xf32, #tpu.memory_space<vmem>>, vector<1x1x9x32xf32>
    %501 = vector.shape_cast %500 : vector<1x1x9x32xf32> to vector<9x32xf32>
    %502 = vector.extract_strided_slice %501 {offsets = [0, 0], sizes = [1, 32], strides = [1, 1]} : vector<9x32xf32> to vector<1x32xf32>
    %503 = vector.extract_strided_slice %501 {offsets = [1, 0], sizes = [1, 32], strides = [1, 1]} : vector<9x32xf32> to vector<1x32xf32>
    %cst_209 = arith.constant dense<0.000000e+00> : vector<16xf32>
    %504 = vector.multi_reduction <add>, %487, %cst_209 [1] : vector<16x32xf32> to vector<16xf32>
    %505 = vector.shape_cast %504 : vector<16xf32> to vector<16x1xf32>
    %cst_210 = arith.constant 3.200000e+01 : f32
    %506 = vector.broadcast %cst_210 : f32 to vector<16x1xf32>
    %507 = arith.divf %505, %506 : vector<16x1xf32>
    %508 = vector.broadcast %507 : vector<16x1xf32> to vector<16x32xf32>
    %509 = arith.subf %487, %508 : vector<16x32xf32>
    %510 = arith.mulf %509, %509 : vector<16x32xf32>
    %cst_211 = arith.constant dense<0.000000e+00> : vector<16xf32>
    %511 = vector.multi_reduction <add>, %510, %cst_211 [1] : vector<16x32xf32> to vector<16xf32>
    %512 = vector.shape_cast %511 : vector<16xf32> to vector<16x1xf32>
    %cst_212 = arith.constant 3.200000e+01 : f32
    %513 = vector.broadcast %cst_212 : f32 to vector<16x1xf32>
    %514 = arith.divf %512, %513 : vector<16x1xf32>
    %cst_213 = arith.constant 9.99999974E-6 : f32
    %515 = vector.broadcast %cst_213 : f32 to vector<16x1xf32>
    %516 = arith.addf %514, %515 : vector<16x1xf32>
    %517 = math.rsqrt %516 : vector<16x1xf32>
    %518 = vector.broadcast %517 : vector<16x1xf32> to vector<16x32xf32>
    %519 = arith.mulf %509, %518 : vector<16x32xf32>
    %520 = vector.broadcast %502 : vector<1x32xf32> to vector<16x32xf32>
    %521 = arith.mulf %519, %520 : vector<16x32xf32>
    %522 = vector.broadcast %503 : vector<1x32xf32> to vector<16x32xf32>
    %523 = arith.addf %521, %522 : vector<16x32xf32>
    %524 = vector.extract_strided_slice %501 {offsets = [0, 0], sizes = [1, 32], strides = [1, 1]} : vector<9x32xf32> to vector<1x32xf32>
    %525 = vector.extract_strided_slice %501 {offsets = [1, 0], sizes = [1, 32], strides = [1, 1]} : vector<9x32xf32> to vector<1x32xf32>
    %cst_214 = arith.constant dense<0.000000e+00> : vector<16xf32>
    %526 = vector.multi_reduction <add>, %16, %cst_214 [1] : vector<16x32xf32> to vector<16xf32>
    %527 = vector.shape_cast %526 : vector<16xf32> to vector<16x1xf32>
    %cst_215 = arith.constant 3.200000e+01 : f32
    %528 = vector.broadcast %cst_215 : f32 to vector<16x1xf32>
    %529 = arith.divf %527, %528 : vector<16x1xf32>
    %530 = vector.broadcast %529 : vector<16x1xf32> to vector<16x32xf32>
    %531 = arith.subf %16, %530 : vector<16x32xf32>
    %532 = arith.mulf %531, %531 : vector<16x32xf32>
    %cst_216 = arith.constant dense<0.000000e+00> : vector<16xf32>
    %533 = vector.multi_reduction <add>, %532, %cst_216 [1] : vector<16x32xf32> to vector<16xf32>
    %534 = vector.shape_cast %533 : vector<16xf32> to vector<16x1xf32>
    %cst_217 = arith.constant 3.200000e+01 : f32
    %535 = vector.broadcast %cst_217 : f32 to vector<16x1xf32>
    %536 = arith.divf %534, %535 : vector<16x1xf32>
    %cst_218 = arith.constant 9.99999974E-6 : f32
    %537 = vector.broadcast %cst_218 : f32 to vector<16x1xf32>
    %538 = arith.addf %536, %537 : vector<16x1xf32>
    %539 = math.rsqrt %538 : vector<16x1xf32>
    %540 = vector.broadcast %539 : vector<16x1xf32> to vector<16x32xf32>
    %541 = arith.mulf %531, %540 : vector<16x32xf32>
    %542 = vector.broadcast %524 : vector<1x32xf32> to vector<16x32xf32>
    %543 = arith.mulf %541, %542 : vector<16x32xf32>
    %544 = vector.broadcast %525 : vector<1x32xf32> to vector<16x32xf32>
    %545 = arith.addf %543, %544 : vector<16x32xf32>
    %546 = arith.truncf %523 : vector<16x32xf32> to vector<16x32xbf16>
    %cst_219 = arith.constant dense<0.000000e+00> : vector<16x32xf32>
    %547 = tpu.matmul %546, %489, %cst_219 {dimension_numbers = #tpu.dot_dimension_numbers<[1], [0], [0], [1], [0, 0, 1, 1], [], []>} : vector<16x32xbf16>, vector<32x32xbf16>, vector<16x32xf32> -> vector<16x32xf32>
    %548 = vector.extract_strided_slice %501 {offsets = [2, 0], sizes = [1, 32], strides = [1, 1]} : vector<9x32xf32> to vector<1x32xf32>
    %549 = vector.broadcast %548 : vector<1x32xf32> to vector<16x32xf32>
    %550 = arith.addf %547, %549 : vector<16x32xf32>
    %cst_220 = arith.constant 0.353553385 : f32
    %551 = vector.broadcast %cst_220 : f32 to vector<16x32xf32>
    %552 = arith.mulf %550, %551 : vector<16x32xf32>
    %553 = arith.truncf %545 : vector<16x32xf32> to vector<16x32xbf16>
    %cst_221 = arith.constant dense<0.000000e+00> : vector<16x64xf32>
    %554 = tpu.matmul %553, %493, %cst_221 {dimension_numbers = #tpu.dot_dimension_numbers<[1], [0], [0], [1], [0, 0, 1, 1], [], []>} : vector<16x32xbf16>, vector<32x64xbf16>, vector<16x64xf32> -> vector<16x64xf32>
    %555 = vector.extract_strided_slice %554 {offsets = [0, 0], sizes = [16, 32], strides = [1, 1]} : vector<16x64xf32> to vector<16x32xf32>
    %556 = vector.extract_strided_slice %501 {offsets = [3, 0], sizes = [1, 32], strides = [1, 1]} : vector<9x32xf32> to vector<1x32xf32>
    %557 = vector.broadcast %556 : vector<1x32xf32> to vector<16x32xf32>
    %558 = arith.addf %555, %557 : vector<16x32xf32>
    %559 = vector.extract_strided_slice %554 {offsets = [0, 32], sizes = [16, 32], strides = [1, 1]} : vector<16x64xf32> to vector<16x32xf32>
    %560 = vector.extract_strided_slice %501 {offsets = [4, 0], sizes = [1, 32], strides = [1, 1]} : vector<9x32xf32> to vector<1x32xf32>
    %561 = vector.broadcast %560 : vector<1x32xf32> to vector<16x32xf32>
    %562 = arith.addf %559, %561 : vector<16x32xf32>
    %563 = vector.extract_strided_slice %552 {offsets = [0, 0], sizes = [16, 8], strides = [1, 1]} : vector<16x32xf32> to vector<16x8xf32>
    %564 = vector.extract_strided_slice %552 {offsets = [0, 8], sizes = [16, 8], strides = [1, 1]} : vector<16x32xf32> to vector<16x8xf32>
    %565 = vector.extract_strided_slice %552 {offsets = [0, 16], sizes = [16, 8], strides = [1, 1]} : vector<16x32xf32> to vector<16x8xf32>
    %566 = vector.extract_strided_slice %552 {offsets = [0, 24], sizes = [16, 8], strides = [1, 1]} : vector<16x32xf32> to vector<16x8xf32>
    %567 = tpu.concatenate %563, %564, %565, %566 in 0 : vector<16x8xf32>, vector<16x8xf32>, vector<16x8xf32>, vector<16x8xf32> -> vector<64x8xf32>
    %568 = vector.extract_strided_slice %558 {offsets = [0, 0], sizes = [16, 8], strides = [1, 1]} : vector<16x32xf32> to vector<16x8xf32>
    %569 = vector.extract_strided_slice %558 {offsets = [0, 8], sizes = [16, 8], strides = [1, 1]} : vector<16x32xf32> to vector<16x8xf32>
    %570 = vector.extract_strided_slice %558 {offsets = [0, 16], sizes = [16, 8], strides = [1, 1]} : vector<16x32xf32> to vector<16x8xf32>
    %571 = vector.extract_strided_slice %558 {offsets = [0, 24], sizes = [16, 8], strides = [1, 1]} : vector<16x32xf32> to vector<16x8xf32>
    %572 = tpu.concatenate %568, %569, %570, %571 in 0 : vector<16x8xf32>, vector<16x8xf32>, vector<16x8xf32>, vector<16x8xf32> -> vector<64x8xf32>
    %573 = vector.extract_strided_slice %562 {offsets = [0, 0], sizes = [16, 8], strides = [1, 1]} : vector<16x32xf32> to vector<16x8xf32>
    %574 = vector.extract_strided_slice %562 {offsets = [0, 8], sizes = [16, 8], strides = [1, 1]} : vector<16x32xf32> to vector<16x8xf32>
    %575 = vector.extract_strided_slice %562 {offsets = [0, 16], sizes = [16, 8], strides = [1, 1]} : vector<16x32xf32> to vector<16x8xf32>
    %576 = vector.extract_strided_slice %562 {offsets = [0, 24], sizes = [16, 8], strides = [1, 1]} : vector<16x32xf32> to vector<16x8xf32>
    %577 = tpu.concatenate %573, %574, %575, %576 in 0 : vector<16x8xf32>, vector<16x8xf32>, vector<16x8xf32>, vector<16x8xf32> -> vector<64x8xf32>
    %cst_222 = arith.constant dense<0.000000e+00> : vector<64x64xf32>
    %578 = tpu.matmul %567, %572, %cst_222 {dimension_numbers = #tpu.dot_dimension_numbers<[1], [1], [0], [0], [0, 0, 1, 0], [], []>} : vector<64x8xf32>, vector<64x8xf32>, vector<64x64xf32> -> vector<64x64xf32>
    %579 = arith.addf %578, %0 : vector<64x64xf32>
    %cst_223 = arith.constant dense<0xFF800000> : vector<64xf32>
    %580 = vector.multi_reduction <maximumf>, %579, %cst_223 [1] : vector<64x64xf32> to vector<64xf32>
    %581 = vector.shape_cast %580 : vector<64xf32> to vector<64x1xf32>
    %582 = vector.broadcast %581 : vector<64x1xf32> to vector<64x64xf32>
    %583 = arith.subf %579, %582 : vector<64x64xf32>
    %584 = math.exp %583 : vector<64x64xf32>
    %cst_224 = arith.constant dense<0.000000e+00> : vector<64xf32>
    %585 = vector.multi_reduction <add>, %584, %cst_224 [1] : vector<64x64xf32> to vector<64xf32>
    %586 = vector.shape_cast %585 : vector<64xf32> to vector<64x1xf32>
    %cst_225 = arith.constant 1.000000e+00 : f32
    %587 = vector.broadcast %cst_225 : f32 to vector<64x1xf32>
    %588 = arith.divf %587, %586 : vector<64x1xf32>
    %589 = vector.broadcast %588 : vector<64x1xf32> to vector<64x64xf32>
    %590 = arith.mulf %584, %589 : vector<64x64xf32>
    %cst_226 = arith.constant dense<0.000000e+00> : vector<64x8xf32>
    %591 = tpu.matmul %590, %577, %cst_226 {dimension_numbers = #tpu.dot_dimension_numbers<[1], [0], [0], [1], [0, 0, 1, 1], [], []>} : vector<64x64xf32>, vector<64x8xf32>, vector<64x8xf32> -> vector<64x8xf32>
    %592 = vector.extract_strided_slice %591 {offsets = [0, 0], sizes = [16, 8], strides = [1, 1]} : vector<64x8xf32> to vector<16x8xf32>
    %593 = vector.extract_strided_slice %591 {offsets = [16, 0], sizes = [16, 8], strides = [1, 1]} : vector<64x8xf32> to vector<16x8xf32>
    %594 = vector.extract_strided_slice %591 {offsets = [32, 0], sizes = [16, 8], strides = [1, 1]} : vector<64x8xf32> to vector<16x8xf32>
    %595 = vector.extract_strided_slice %591 {offsets = [48, 0], sizes = [16, 8], strides = [1, 1]} : vector<64x8xf32> to vector<16x8xf32>
    %596 = tpu.concatenate %592, %593, %594, %595 in 1 : vector<16x8xf32>, vector<16x8xf32>, vector<16x8xf32>, vector<16x8xf32> -> vector<16x32xf32>
    %597 = arith.truncf %596 : vector<16x32xf32> to vector<16x32xbf16>
    %cst_227 = arith.constant dense<0.000000e+00> : vector<16x32xf32>
    %598 = tpu.matmul %597, %491, %cst_227 {dimension_numbers = #tpu.dot_dimension_numbers<[1], [0], [0], [1], [0, 0, 1, 1], [], []>} : vector<16x32xbf16>, vector<32x32xbf16>, vector<16x32xf32> -> vector<16x32xf32>
    %599 = arith.addf %487, %598 : vector<16x32xf32>
    %600 = vector.extract_strided_slice %501 {offsets = [5, 0], sizes = [1, 32], strides = [1, 1]} : vector<9x32xf32> to vector<1x32xf32>
    %601 = vector.broadcast %600 : vector<1x32xf32> to vector<16x32xf32>
    %602 = arith.addf %599, %601 : vector<16x32xf32>
    %603 = vector.extract_strided_slice %501 {offsets = [6, 0], sizes = [1, 32], strides = [1, 1]} : vector<9x32xf32> to vector<1x32xf32>
    %604 = vector.extract_strided_slice %501 {offsets = [7, 0], sizes = [1, 32], strides = [1, 1]} : vector<9x32xf32> to vector<1x32xf32>
    %cst_228 = arith.constant dense<0.000000e+00> : vector<16xf32>
    %605 = vector.multi_reduction <add>, %602, %cst_228 [1] : vector<16x32xf32> to vector<16xf32>
    %606 = vector.shape_cast %605 : vector<16xf32> to vector<16x1xf32>
    %cst_229 = arith.constant 3.200000e+01 : f32
    %607 = vector.broadcast %cst_229 : f32 to vector<16x1xf32>
    %608 = arith.divf %606, %607 : vector<16x1xf32>
    %609 = vector.broadcast %608 : vector<16x1xf32> to vector<16x32xf32>
    %610 = arith.subf %602, %609 : vector<16x32xf32>
    %611 = arith.mulf %610, %610 : vector<16x32xf32>
    %cst_230 = arith.constant dense<0.000000e+00> : vector<16xf32>
    %612 = vector.multi_reduction <add>, %611, %cst_230 [1] : vector<16x32xf32> to vector<16xf32>
    %613 = vector.shape_cast %612 : vector<16xf32> to vector<16x1xf32>
    %cst_231 = arith.constant 3.200000e+01 : f32
    %614 = vector.broadcast %cst_231 : f32 to vector<16x1xf32>
    %615 = arith.divf %613, %614 : vector<16x1xf32>
    %cst_232 = arith.constant 9.99999974E-6 : f32
    %616 = vector.broadcast %cst_232 : f32 to vector<16x1xf32>
    %617 = arith.addf %615, %616 : vector<16x1xf32>
    %618 = math.rsqrt %617 : vector<16x1xf32>
    %619 = vector.broadcast %618 : vector<16x1xf32> to vector<16x32xf32>
    %620 = arith.mulf %610, %619 : vector<16x32xf32>
    %621 = vector.broadcast %603 : vector<1x32xf32> to vector<16x32xf32>
    %622 = arith.mulf %620, %621 : vector<16x32xf32>
    %623 = vector.broadcast %604 : vector<1x32xf32> to vector<16x32xf32>
    %624 = arith.addf %622, %623 : vector<16x32xf32>
    %625 = arith.truncf %624 : vector<16x32xf32> to vector<16x32xbf16>
    %cst_233 = arith.constant dense<0.000000e+00> : vector<16x128xf32>
    %626 = tpu.matmul %625, %495, %cst_233 {dimension_numbers = #tpu.dot_dimension_numbers<[1], [0], [0], [1], [0, 0, 1, 1], [], []>} : vector<16x32xbf16>, vector<32x128xbf16>, vector<16x128xf32> -> vector<16x128xf32>
    %627 = vector.broadcast %497 : vector<1x128xf32> to vector<16x128xf32>
    %628 = arith.addf %626, %627 : vector<16x128xf32>
    %cst_234 = arith.constant 0.000000e+00 : f32
    %629 = vector.broadcast %cst_234 : f32 to vector<16x128xf32>
    %630 = arith.maximumf %628, %629 : vector<16x128xf32>
    %631 = arith.truncf %630 : vector<16x128xf32> to vector<16x128xbf16>
    %cst_235 = arith.constant dense<0.000000e+00> : vector<16x32xf32>
    %632 = tpu.matmul %631, %499, %cst_235 {dimension_numbers = #tpu.dot_dimension_numbers<[1], [0], [0], [1], [0, 0, 1, 1], [], []>} : vector<16x128xbf16>, vector<128x32xbf16>, vector<16x32xf32> -> vector<16x32xf32>
    %633 = vector.extract_strided_slice %501 {offsets = [8, 0], sizes = [1, 32], strides = [1, 1]} : vector<9x32xf32> to vector<1x32xf32>
    %634 = vector.broadcast %633 : vector<1x32xf32> to vector<16x32xf32>
    %635 = arith.addf %632, %634 : vector<16x32xf32>
    %636 = arith.addf %602, %635 : vector<16x32xf32>
    %c0_236 = arith.constant 0 : index
    %c1_237 = arith.constant 1 : index
    %c0_238 = arith.constant 0 : index
    %c0_239 = arith.constant 0 : index
    %637 = vector.load %arg15[%c0_236, %c1_237, %c0_238, %c0_239] : memref<1x2x2x32xf32, #tpu.memory_space<vmem>>, vector<1x1x2x32xf32>
    %638 = vector.shape_cast %637 : vector<1x1x2x32xf32> to vector<2x32xf32>
    %639 = vector.extract_strided_slice %638 {offsets = [0, 0], sizes = [1, 32], strides = [1, 1]} : vector<2x32xf32> to vector<1x32xf32>
    %640 = vector.extract_strided_slice %638 {offsets = [1, 0], sizes = [1, 32], strides = [1, 1]} : vector<2x32xf32> to vector<1x32xf32>
    %cst_240 = arith.constant dense<0.000000e+00> : vector<16xf32>
    %641 = vector.multi_reduction <add>, %636, %cst_240 [1] : vector<16x32xf32> to vector<16xf32>
    %642 = vector.shape_cast %641 : vector<16xf32> to vector<16x1xf32>
    %cst_241 = arith.constant 3.200000e+01 : f32
    %643 = vector.broadcast %cst_241 : f32 to vector<16x1xf32>
    %644 = arith.divf %642, %643 : vector<16x1xf32>
    %645 = vector.broadcast %644 : vector<16x1xf32> to vector<16x32xf32>
    %646 = arith.subf %636, %645 : vector<16x32xf32>
    %647 = arith.mulf %646, %646 : vector<16x32xf32>
    %cst_242 = arith.constant dense<0.000000e+00> : vector<16xf32>
    %648 = vector.multi_reduction <add>, %647, %cst_242 [1] : vector<16x32xf32> to vector<16xf32>
    %649 = vector.shape_cast %648 : vector<16xf32> to vector<16x1xf32>
    %cst_243 = arith.constant 3.200000e+01 : f32
    %650 = vector.broadcast %cst_243 : f32 to vector<16x1xf32>
    %651 = arith.divf %649, %650 : vector<16x1xf32>
    %cst_244 = arith.constant 9.99999974E-6 : f32
    %652 = vector.broadcast %cst_244 : f32 to vector<16x1xf32>
    %653 = arith.addf %651, %652 : vector<16x1xf32>
    %654 = math.rsqrt %653 : vector<16x1xf32>
    %655 = vector.broadcast %654 : vector<16x1xf32> to vector<16x32xf32>
    %656 = arith.mulf %646, %655 : vector<16x32xf32>
    %657 = vector.broadcast %639 : vector<1x32xf32> to vector<16x32xf32>
    %658 = arith.mulf %656, %657 : vector<16x32xf32>
    %659 = vector.broadcast %640 : vector<1x32xf32> to vector<16x32xf32>
    %660 = arith.addf %658, %659 : vector<16x32xf32>
    %661 = tpu.concatenate %338, %660 in 1 : vector<16x32xf32>, vector<16x32xf32> -> vector<16x64xf32>
    %cst_245 = arith.constant 8.000000e+00 : f32
    %662 = vector.broadcast %cst_245 : f32 to vector<16x64xf32>
    %663 = arith.mulf %662, %661 : vector<16x64xf32>
    %c0_246 = arith.constant 0 : index
    %c0_247 = arith.constant 0 : index
    %664 = vector.load %arg7[%c0_246, %c0_247] : memref<16x64xf32, #tpu.memory_space<vmem>>, vector<16x64xf32>
    %665 = arith.addf %663, %664 : vector<16x64xf32>
    %c0_248 = arith.constant 0 : index
    %c0_249 = arith.constant 0 : index
    %c0_250 = arith.constant 0 : index
    %c0_251 = arith.constant 0 : index
    %666 = vector.load %arg16[%c0_248, %c0_249, %c0_250, %c0_251] : memref<1x2x64x192xbf16, #tpu.memory_space<vmem>>, vector<1x1x64x192xbf16>
    %667 = vector.shape_cast %666 : vector<1x1x64x192xbf16> to vector<64x192xbf16>
    %c0_252 = arith.constant 0 : index
    %c0_253 = arith.constant 0 : index
    %c0_254 = arith.constant 0 : index
    %c0_255 = arith.constant 0 : index
    %668 = vector.load %arg17[%c0_252, %c0_253, %c0_254, %c0_255] : memref<1x2x64x64xbf16, #tpu.memory_space<vmem>>, vector<1x1x64x64xbf16>
    %669 = vector.shape_cast %668 : vector<1x1x64x64xbf16> to vector<64x64xbf16>
    %c0_256 = arith.constant 0 : index
    %c0_257 = arith.constant 0 : index
    %c0_258 = arith.constant 0 : index
    %c0_259 = arith.constant 0 : index
    %670 = vector.load %arg18[%c0_256, %c0_257, %c0_258, %c0_259] : memref<1x2x64x256xbf16, #tpu.memory_space<vmem>>, vector<1x1x64x256xbf16>
    %671 = vector.shape_cast %670 : vector<1x1x64x256xbf16> to vector<64x256xbf16>
    %c0_260 = arith.constant 0 : index
    %c0_261 = arith.constant 0 : index
    %c0_262 = arith.constant 0 : index
    %c0_263 = arith.constant 0 : index
    %672 = vector.load %arg21[%c0_260, %c0_261, %c0_262, %c0_263] : memref<1x2x1x256xf32, #tpu.memory_space<vmem>>, vector<1x1x1x256xf32>
    %673 = vector.shape_cast %672 : vector<1x1x1x256xf32> to vector<1x256xf32>
    %c0_264 = arith.constant 0 : index
    %c0_265 = arith.constant 0 : index
    %c0_266 = arith.constant 0 : index
    %c0_267 = arith.constant 0 : index
    %674 = vector.load %arg19[%c0_264, %c0_265, %c0_266, %c0_267] : memref<1x2x256x64xbf16, #tpu.memory_space<vmem>>, vector<1x1x256x64xbf16>
    %675 = vector.shape_cast %674 : vector<1x1x256x64xbf16> to vector<256x64xbf16>
    %c0_268 = arith.constant 0 : index
    %c0_269 = arith.constant 0 : index
    %c0_270 = arith.constant 0 : index
    %c0_271 = arith.constant 0 : index
    %676 = vector.load %arg20[%c0_268, %c0_269, %c0_270, %c0_271] : memref<1x2x9x64xf32, #tpu.memory_space<vmem>>, vector<1x1x9x64xf32>
    %677 = vector.shape_cast %676 : vector<1x1x9x64xf32> to vector<9x64xf32>
    %678 = vector.extract_strided_slice %677 {offsets = [0, 0], sizes = [1, 64], strides = [1, 1]} : vector<9x64xf32> to vector<1x64xf32>
    %679 = vector.extract_strided_slice %677 {offsets = [1, 0], sizes = [1, 64], strides = [1, 1]} : vector<9x64xf32> to vector<1x64xf32>
    %cst_272 = arith.constant dense<0.000000e+00> : vector<16xf32>
    %680 = vector.multi_reduction <add>, %665, %cst_272 [1] : vector<16x64xf32> to vector<16xf32>
    %681 = vector.shape_cast %680 : vector<16xf32> to vector<16x1xf32>
    %cst_273 = arith.constant 6.400000e+01 : f32
    %682 = vector.broadcast %cst_273 : f32 to vector<16x1xf32>
    %683 = arith.divf %681, %682 : vector<16x1xf32>
    %684 = vector.broadcast %683 : vector<16x1xf32> to vector<16x64xf32>
    %685 = arith.subf %665, %684 : vector<16x64xf32>
    %686 = arith.mulf %685, %685 : vector<16x64xf32>
    %cst_274 = arith.constant dense<0.000000e+00> : vector<16xf32>
    %687 = vector.multi_reduction <add>, %686, %cst_274 [1] : vector<16x64xf32> to vector<16xf32>
    %688 = vector.shape_cast %687 : vector<16xf32> to vector<16x1xf32>
    %cst_275 = arith.constant 6.400000e+01 : f32
    %689 = vector.broadcast %cst_275 : f32 to vector<16x1xf32>
    %690 = arith.divf %688, %689 : vector<16x1xf32>
    %cst_276 = arith.constant 9.99999974E-6 : f32
    %691 = vector.broadcast %cst_276 : f32 to vector<16x1xf32>
    %692 = arith.addf %690, %691 : vector<16x1xf32>
    %693 = math.rsqrt %692 : vector<16x1xf32>
    %694 = vector.broadcast %693 : vector<16x1xf32> to vector<16x64xf32>
    %695 = arith.mulf %685, %694 : vector<16x64xf32>
    %696 = vector.broadcast %678 : vector<1x64xf32> to vector<16x64xf32>
    %697 = arith.mulf %695, %696 : vector<16x64xf32>
    %698 = vector.broadcast %679 : vector<1x64xf32> to vector<16x64xf32>
    %699 = arith.addf %697, %698 : vector<16x64xf32>
    %700 = arith.truncf %699 : vector<16x64xf32> to vector<16x64xbf16>
    %cst_277 = arith.constant dense<0.000000e+00> : vector<16x192xf32>
    %701 = tpu.matmul %700, %667, %cst_277 {dimension_numbers = #tpu.dot_dimension_numbers<[1], [0], [0], [1], [0, 0, 1, 1], [], []>} : vector<16x64xbf16>, vector<64x192xbf16>, vector<16x192xf32> -> vector<16x192xf32>
    %702 = vector.extract_strided_slice %701 {offsets = [0, 0], sizes = [16, 64], strides = [1, 1]} : vector<16x192xf32> to vector<16x64xf32>
    %703 = vector.extract_strided_slice %677 {offsets = [2, 0], sizes = [1, 64], strides = [1, 1]} : vector<9x64xf32> to vector<1x64xf32>
    %704 = vector.broadcast %703 : vector<1x64xf32> to vector<16x64xf32>
    %705 = arith.addf %702, %704 : vector<16x64xf32>
    %cst_278 = arith.constant 2.500000e-01 : f32
    %706 = vector.broadcast %cst_278 : f32 to vector<16x64xf32>
    %707 = arith.mulf %705, %706 : vector<16x64xf32>
    %708 = vector.extract_strided_slice %701 {offsets = [0, 64], sizes = [16, 64], strides = [1, 1]} : vector<16x192xf32> to vector<16x64xf32>
    %709 = vector.extract_strided_slice %677 {offsets = [3, 0], sizes = [1, 64], strides = [1, 1]} : vector<9x64xf32> to vector<1x64xf32>
    %710 = vector.broadcast %709 : vector<1x64xf32> to vector<16x64xf32>
    %711 = arith.addf %708, %710 : vector<16x64xf32>
    %712 = vector.extract_strided_slice %701 {offsets = [0, 128], sizes = [16, 64], strides = [1, 1]} : vector<16x192xf32> to vector<16x64xf32>
    %713 = vector.extract_strided_slice %677 {offsets = [4, 0], sizes = [1, 64], strides = [1, 1]} : vector<9x64xf32> to vector<1x64xf32>
    %714 = vector.broadcast %713 : vector<1x64xf32> to vector<16x64xf32>
    %715 = arith.addf %712, %714 : vector<16x64xf32>
    %716 = vector.extract_strided_slice %707 {offsets = [0, 0], sizes = [16, 16], strides = [1, 1]} : vector<16x64xf32> to vector<16x16xf32>
    %717 = vector.extract_strided_slice %707 {offsets = [0, 16], sizes = [16, 16], strides = [1, 1]} : vector<16x64xf32> to vector<16x16xf32>
    %718 = vector.extract_strided_slice %707 {offsets = [0, 32], sizes = [16, 16], strides = [1, 1]} : vector<16x64xf32> to vector<16x16xf32>
    %719 = vector.extract_strided_slice %707 {offsets = [0, 48], sizes = [16, 16], strides = [1, 1]} : vector<16x64xf32> to vector<16x16xf32>
    %720 = tpu.concatenate %716, %717, %718, %719 in 0 : vector<16x16xf32>, vector<16x16xf32>, vector<16x16xf32>, vector<16x16xf32> -> vector<64x16xf32>
    %721 = vector.extract_strided_slice %711 {offsets = [0, 0], sizes = [16, 16], strides = [1, 1]} : vector<16x64xf32> to vector<16x16xf32>
    %722 = vector.extract_strided_slice %711 {offsets = [0, 16], sizes = [16, 16], strides = [1, 1]} : vector<16x64xf32> to vector<16x16xf32>
    %723 = vector.extract_strided_slice %711 {offsets = [0, 32], sizes = [16, 16], strides = [1, 1]} : vector<16x64xf32> to vector<16x16xf32>
    %724 = vector.extract_strided_slice %711 {offsets = [0, 48], sizes = [16, 16], strides = [1, 1]} : vector<16x64xf32> to vector<16x16xf32>
    %725 = tpu.concatenate %721, %722, %723, %724 in 0 : vector<16x16xf32>, vector<16x16xf32>, vector<16x16xf32>, vector<16x16xf32> -> vector<64x16xf32>
    %726 = vector.extract_strided_slice %715 {offsets = [0, 0], sizes = [16, 16], strides = [1, 1]} : vector<16x64xf32> to vector<16x16xf32>
    %727 = vector.extract_strided_slice %715 {offsets = [0, 16], sizes = [16, 16], strides = [1, 1]} : vector<16x64xf32> to vector<16x16xf32>
    %728 = vector.extract_strided_slice %715 {offsets = [0, 32], sizes = [16, 16], strides = [1, 1]} : vector<16x64xf32> to vector<16x16xf32>
    %729 = vector.extract_strided_slice %715 {offsets = [0, 48], sizes = [16, 16], strides = [1, 1]} : vector<16x64xf32> to vector<16x16xf32>
    %730 = tpu.concatenate %726, %727, %728, %729 in 0 : vector<16x16xf32>, vector<16x16xf32>, vector<16x16xf32>, vector<16x16xf32> -> vector<64x16xf32>
    %cst_279 = arith.constant dense<0.000000e+00> : vector<64x64xf32>
    %731 = tpu.matmul %720, %725, %cst_279 {dimension_numbers = #tpu.dot_dimension_numbers<[1], [1], [0], [0], [0, 0, 1, 0], [], []>} : vector<64x16xf32>, vector<64x16xf32>, vector<64x64xf32> -> vector<64x64xf32>
    %732 = arith.addf %731, %0 : vector<64x64xf32>
    %cst_280 = arith.constant dense<0xFF800000> : vector<64xf32>
    %733 = vector.multi_reduction <maximumf>, %732, %cst_280 [1] : vector<64x64xf32> to vector<64xf32>
    %734 = vector.shape_cast %733 : vector<64xf32> to vector<64x1xf32>
    %735 = vector.broadcast %734 : vector<64x1xf32> to vector<64x64xf32>
    %736 = arith.subf %732, %735 : vector<64x64xf32>
    %737 = math.exp %736 : vector<64x64xf32>
    %cst_281 = arith.constant dense<0.000000e+00> : vector<64xf32>
    %738 = vector.multi_reduction <add>, %737, %cst_281 [1] : vector<64x64xf32> to vector<64xf32>
    %739 = vector.shape_cast %738 : vector<64xf32> to vector<64x1xf32>
    %cst_282 = arith.constant 1.000000e+00 : f32
    %740 = vector.broadcast %cst_282 : f32 to vector<64x1xf32>
    %741 = arith.divf %740, %739 : vector<64x1xf32>
    %742 = vector.broadcast %741 : vector<64x1xf32> to vector<64x64xf32>
    %743 = arith.mulf %737, %742 : vector<64x64xf32>
    %cst_283 = arith.constant dense<0.000000e+00> : vector<64x16xf32>
    %744 = tpu.matmul %743, %730, %cst_283 {dimension_numbers = #tpu.dot_dimension_numbers<[1], [0], [0], [1], [0, 0, 1, 1], [], []>} : vector<64x64xf32>, vector<64x16xf32>, vector<64x16xf32> -> vector<64x16xf32>
    %745 = vector.extract_strided_slice %744 {offsets = [0, 0], sizes = [16, 16], strides = [1, 1]} : vector<64x16xf32> to vector<16x16xf32>
    %746 = vector.extract_strided_slice %744 {offsets = [16, 0], sizes = [16, 16], strides = [1, 1]} : vector<64x16xf32> to vector<16x16xf32>
    %747 = vector.extract_strided_slice %744 {offsets = [32, 0], sizes = [16, 16], strides = [1, 1]} : vector<64x16xf32> to vector<16x16xf32>
    %748 = vector.extract_strided_slice %744 {offsets = [48, 0], sizes = [16, 16], strides = [1, 1]} : vector<64x16xf32> to vector<16x16xf32>
    %749 = tpu.concatenate %745, %746, %747, %748 in 1 : vector<16x16xf32>, vector<16x16xf32>, vector<16x16xf32>, vector<16x16xf32> -> vector<16x64xf32>
    %750 = arith.truncf %749 : vector<16x64xf32> to vector<16x64xbf16>
    %cst_284 = arith.constant dense<0.000000e+00> : vector<16x64xf32>
    %751 = tpu.matmul %750, %669, %cst_284 {dimension_numbers = #tpu.dot_dimension_numbers<[1], [0], [0], [1], [0, 0, 1, 1], [], []>} : vector<16x64xbf16>, vector<64x64xbf16>, vector<16x64xf32> -> vector<16x64xf32>
    %752 = arith.addf %665, %751 : vector<16x64xf32>
    %753 = vector.extract_strided_slice %677 {offsets = [5, 0], sizes = [1, 64], strides = [1, 1]} : vector<9x64xf32> to vector<1x64xf32>
    %754 = vector.broadcast %753 : vector<1x64xf32> to vector<16x64xf32>
    %755 = arith.addf %752, %754 : vector<16x64xf32>
    %756 = vector.extract_strided_slice %677 {offsets = [6, 0], sizes = [1, 64], strides = [1, 1]} : vector<9x64xf32> to vector<1x64xf32>
    %757 = vector.extract_strided_slice %677 {offsets = [7, 0], sizes = [1, 64], strides = [1, 1]} : vector<9x64xf32> to vector<1x64xf32>
    %cst_285 = arith.constant dense<0.000000e+00> : vector<16xf32>
    %758 = vector.multi_reduction <add>, %755, %cst_285 [1] : vector<16x64xf32> to vector<16xf32>
    %759 = vector.shape_cast %758 : vector<16xf32> to vector<16x1xf32>
    %cst_286 = arith.constant 6.400000e+01 : f32
    %760 = vector.broadcast %cst_286 : f32 to vector<16x1xf32>
    %761 = arith.divf %759, %760 : vector<16x1xf32>
    %762 = vector.broadcast %761 : vector<16x1xf32> to vector<16x64xf32>
    %763 = arith.subf %755, %762 : vector<16x64xf32>
    %764 = arith.mulf %763, %763 : vector<16x64xf32>
    %cst_287 = arith.constant dense<0.000000e+00> : vector<16xf32>
    %765 = vector.multi_reduction <add>, %764, %cst_287 [1] : vector<16x64xf32> to vector<16xf32>
    %766 = vector.shape_cast %765 : vector<16xf32> to vector<16x1xf32>
    %cst_288 = arith.constant 6.400000e+01 : f32
    %767 = vector.broadcast %cst_288 : f32 to vector<16x1xf32>
    %768 = arith.divf %766, %767 : vector<16x1xf32>
    %cst_289 = arith.constant 9.99999974E-6 : f32
    %769 = vector.broadcast %cst_289 : f32 to vector<16x1xf32>
    %770 = arith.addf %768, %769 : vector<16x1xf32>
    %771 = math.rsqrt %770 : vector<16x1xf32>
    %772 = vector.broadcast %771 : vector<16x1xf32> to vector<16x64xf32>
    %773 = arith.mulf %763, %772 : vector<16x64xf32>
    %774 = vector.broadcast %756 : vector<1x64xf32> to vector<16x64xf32>
    %775 = arith.mulf %773, %774 : vector<16x64xf32>
    %776 = vector.broadcast %757 : vector<1x64xf32> to vector<16x64xf32>
    %777 = arith.addf %775, %776 : vector<16x64xf32>
    %778 = arith.truncf %777 : vector<16x64xf32> to vector<16x64xbf16>
    %cst_290 = arith.constant dense<0.000000e+00> : vector<16x256xf32>
    %779 = tpu.matmul %778, %671, %cst_290 {dimension_numbers = #tpu.dot_dimension_numbers<[1], [0], [0], [1], [0, 0, 1, 1], [], []>} : vector<16x64xbf16>, vector<64x256xbf16>, vector<16x256xf32> -> vector<16x256xf32>
    %780 = vector.broadcast %673 : vector<1x256xf32> to vector<16x256xf32>
    %781 = arith.addf %779, %780 : vector<16x256xf32>
    %cst_291 = arith.constant 0.000000e+00 : f32
    %782 = vector.broadcast %cst_291 : f32 to vector<16x256xf32>
    %783 = arith.maximumf %781, %782 : vector<16x256xf32>
    %784 = arith.truncf %783 : vector<16x256xf32> to vector<16x256xbf16>
    %cst_292 = arith.constant dense<0.000000e+00> : vector<16x64xf32>
    %785 = tpu.matmul %784, %675, %cst_292 {dimension_numbers = #tpu.dot_dimension_numbers<[1], [0], [0], [1], [0, 0, 1, 1], [], []>} : vector<16x256xbf16>, vector<256x64xbf16>, vector<16x64xf32> -> vector<16x64xf32>
    %786 = vector.extract_strided_slice %677 {offsets = [8, 0], sizes = [1, 64], strides = [1, 1]} : vector<9x64xf32> to vector<1x64xf32>
    %787 = vector.broadcast %786 : vector<1x64xf32> to vector<16x64xf32>
    %788 = arith.addf %785, %787 : vector<16x64xf32>
    %789 = arith.addf %755, %788 : vector<16x64xf32>
    %c0_293 = arith.constant 0 : index
    %c1_294 = arith.constant 1 : index
    %c0_295 = arith.constant 0 : index
    %c0_296 = arith.constant 0 : index
    %790 = vector.load %arg16[%c0_293, %c1_294, %c0_295, %c0_296] : memref<1x2x64x192xbf16, #tpu.memory_space<vmem>>, vector<1x1x64x192xbf16>
    %791 = vector.shape_cast %790 : vector<1x1x64x192xbf16> to vector<64x192xbf16>
    %c0_297 = arith.constant 0 : index
    %c1_298 = arith.constant 1 : index
    %c0_299 = arith.constant 0 : index
    %c0_300 = arith.constant 0 : index
    %792 = vector.load %arg17[%c0_297, %c1_298, %c0_299, %c0_300] : memref<1x2x64x64xbf16, #tpu.memory_space<vmem>>, vector<1x1x64x64xbf16>
    %793 = vector.shape_cast %792 : vector<1x1x64x64xbf16> to vector<64x64xbf16>
    %c0_301 = arith.constant 0 : index
    %c1_302 = arith.constant 1 : index
    %c0_303 = arith.constant 0 : index
    %c0_304 = arith.constant 0 : index
    %794 = vector.load %arg18[%c0_301, %c1_302, %c0_303, %c0_304] : memref<1x2x64x256xbf16, #tpu.memory_space<vmem>>, vector<1x1x64x256xbf16>
    %795 = vector.shape_cast %794 : vector<1x1x64x256xbf16> to vector<64x256xbf16>
    %c0_305 = arith.constant 0 : index
    %c1_306 = arith.constant 1 : index
    %c0_307 = arith.constant 0 : index
    %c0_308 = arith.constant 0 : index
    %796 = vector.load %arg21[%c0_305, %c1_306, %c0_307, %c0_308] : memref<1x2x1x256xf32, #tpu.memory_space<vmem>>, vector<1x1x1x256xf32>
    %797 = vector.shape_cast %796 : vector<1x1x1x256xf32> to vector<1x256xf32>
    %c0_309 = arith.constant 0 : index
    %c1_310 = arith.constant 1 : index
    %c0_311 = arith.constant 0 : index
    %c0_312 = arith.constant 0 : index
    %798 = vector.load %arg19[%c0_309, %c1_310, %c0_311, %c0_312] : memref<1x2x256x64xbf16, #tpu.memory_space<vmem>>, vector<1x1x256x64xbf16>
    %799 = vector.shape_cast %798 : vector<1x1x256x64xbf16> to vector<256x64xbf16>
    %c0_313 = arith.constant 0 : index
    %c1_314 = arith.constant 1 : index
    %c0_315 = arith.constant 0 : index
    %c0_316 = arith.constant 0 : index
    %800 = vector.load %arg20[%c0_313, %c1_314, %c0_315, %c0_316] : memref<1x2x9x64xf32, #tpu.memory_space<vmem>>, vector<1x1x9x64xf32>
    %801 = vector.shape_cast %800 : vector<1x1x9x64xf32> to vector<9x64xf32>
    %802 = vector.extract_strided_slice %801 {offsets = [0, 0], sizes = [1, 64], strides = [1, 1]} : vector<9x64xf32> to vector<1x64xf32>
    %803 = vector.extract_strided_slice %801 {offsets = [1, 0], sizes = [1, 64], strides = [1, 1]} : vector<9x64xf32> to vector<1x64xf32>
    %cst_317 = arith.constant dense<0.000000e+00> : vector<16xf32>
    %804 = vector.multi_reduction <add>, %789, %cst_317 [1] : vector<16x64xf32> to vector<16xf32>
    %805 = vector.shape_cast %804 : vector<16xf32> to vector<16x1xf32>
    %cst_318 = arith.constant 6.400000e+01 : f32
    %806 = vector.broadcast %cst_318 : f32 to vector<16x1xf32>
    %807 = arith.divf %805, %806 : vector<16x1xf32>
    %808 = vector.broadcast %807 : vector<16x1xf32> to vector<16x64xf32>
    %809 = arith.subf %789, %808 : vector<16x64xf32>
    %810 = arith.mulf %809, %809 : vector<16x64xf32>
    %cst_319 = arith.constant dense<0.000000e+00> : vector<16xf32>
    %811 = vector.multi_reduction <add>, %810, %cst_319 [1] : vector<16x64xf32> to vector<16xf32>
    %812 = vector.shape_cast %811 : vector<16xf32> to vector<16x1xf32>
    %cst_320 = arith.constant 6.400000e+01 : f32
    %813 = vector.broadcast %cst_320 : f32 to vector<16x1xf32>
    %814 = arith.divf %812, %813 : vector<16x1xf32>
    %cst_321 = arith.constant 9.99999974E-6 : f32
    %815 = vector.broadcast %cst_321 : f32 to vector<16x1xf32>
    %816 = arith.addf %814, %815 : vector<16x1xf32>
    %817 = math.rsqrt %816 : vector<16x1xf32>
    %818 = vector.broadcast %817 : vector<16x1xf32> to vector<16x64xf32>
    %819 = arith.mulf %809, %818 : vector<16x64xf32>
    %820 = vector.broadcast %802 : vector<1x64xf32> to vector<16x64xf32>
    %821 = arith.mulf %819, %820 : vector<16x64xf32>
    %822 = vector.broadcast %803 : vector<1x64xf32> to vector<16x64xf32>
    %823 = arith.addf %821, %822 : vector<16x64xf32>
    %824 = arith.truncf %823 : vector<16x64xf32> to vector<16x64xbf16>
    %cst_322 = arith.constant dense<0.000000e+00> : vector<16x192xf32>
    %825 = tpu.matmul %824, %791, %cst_322 {dimension_numbers = #tpu.dot_dimension_numbers<[1], [0], [0], [1], [0, 0, 1, 1], [], []>} : vector<16x64xbf16>, vector<64x192xbf16>, vector<16x192xf32> -> vector<16x192xf32>
    %826 = vector.extract_strided_slice %825 {offsets = [0, 0], sizes = [16, 64], strides = [1, 1]} : vector<16x192xf32> to vector<16x64xf32>
    %827 = vector.extract_strided_slice %801 {offsets = [2, 0], sizes = [1, 64], strides = [1, 1]} : vector<9x64xf32> to vector<1x64xf32>
    %828 = vector.broadcast %827 : vector<1x64xf32> to vector<16x64xf32>
    %829 = arith.addf %826, %828 : vector<16x64xf32>
    %cst_323 = arith.constant 2.500000e-01 : f32
    %830 = vector.broadcast %cst_323 : f32 to vector<16x64xf32>
    %831 = arith.mulf %829, %830 : vector<16x64xf32>
    %832 = vector.extract_strided_slice %825 {offsets = [0, 64], sizes = [16, 64], strides = [1, 1]} : vector<16x192xf32> to vector<16x64xf32>
    %833 = vector.extract_strided_slice %801 {offsets = [3, 0], sizes = [1, 64], strides = [1, 1]} : vector<9x64xf32> to vector<1x64xf32>
    %834 = vector.broadcast %833 : vector<1x64xf32> to vector<16x64xf32>
    %835 = arith.addf %832, %834 : vector<16x64xf32>
    %836 = vector.extract_strided_slice %825 {offsets = [0, 128], sizes = [16, 64], strides = [1, 1]} : vector<16x192xf32> to vector<16x64xf32>
    %837 = vector.extract_strided_slice %801 {offsets = [4, 0], sizes = [1, 64], strides = [1, 1]} : vector<9x64xf32> to vector<1x64xf32>
    %838 = vector.broadcast %837 : vector<1x64xf32> to vector<16x64xf32>
    %839 = arith.addf %836, %838 : vector<16x64xf32>
    %840 = vector.extract_strided_slice %831 {offsets = [0, 0], sizes = [16, 16], strides = [1, 1]} : vector<16x64xf32> to vector<16x16xf32>
    %841 = vector.extract_strided_slice %831 {offsets = [0, 16], sizes = [16, 16], strides = [1, 1]} : vector<16x64xf32> to vector<16x16xf32>
    %842 = vector.extract_strided_slice %831 {offsets = [0, 32], sizes = [16, 16], strides = [1, 1]} : vector<16x64xf32> to vector<16x16xf32>
    %843 = vector.extract_strided_slice %831 {offsets = [0, 48], sizes = [16, 16], strides = [1, 1]} : vector<16x64xf32> to vector<16x16xf32>
    %844 = tpu.concatenate %840, %841, %842, %843 in 0 : vector<16x16xf32>, vector<16x16xf32>, vector<16x16xf32>, vector<16x16xf32> -> vector<64x16xf32>
    %845 = vector.extract_strided_slice %835 {offsets = [0, 0], sizes = [16, 16], strides = [1, 1]} : vector<16x64xf32> to vector<16x16xf32>
    %846 = vector.extract_strided_slice %835 {offsets = [0, 16], sizes = [16, 16], strides = [1, 1]} : vector<16x64xf32> to vector<16x16xf32>
    %847 = vector.extract_strided_slice %835 {offsets = [0, 32], sizes = [16, 16], strides = [1, 1]} : vector<16x64xf32> to vector<16x16xf32>
    %848 = vector.extract_strided_slice %835 {offsets = [0, 48], sizes = [16, 16], strides = [1, 1]} : vector<16x64xf32> to vector<16x16xf32>
    %849 = tpu.concatenate %845, %846, %847, %848 in 0 : vector<16x16xf32>, vector<16x16xf32>, vector<16x16xf32>, vector<16x16xf32> -> vector<64x16xf32>
    %850 = vector.extract_strided_slice %839 {offsets = [0, 0], sizes = [16, 16], strides = [1, 1]} : vector<16x64xf32> to vector<16x16xf32>
    %851 = vector.extract_strided_slice %839 {offsets = [0, 16], sizes = [16, 16], strides = [1, 1]} : vector<16x64xf32> to vector<16x16xf32>
    %852 = vector.extract_strided_slice %839 {offsets = [0, 32], sizes = [16, 16], strides = [1, 1]} : vector<16x64xf32> to vector<16x16xf32>
    %853 = vector.extract_strided_slice %839 {offsets = [0, 48], sizes = [16, 16], strides = [1, 1]} : vector<16x64xf32> to vector<16x16xf32>
    %854 = tpu.concatenate %850, %851, %852, %853 in 0 : vector<16x16xf32>, vector<16x16xf32>, vector<16x16xf32>, vector<16x16xf32> -> vector<64x16xf32>
    %cst_324 = arith.constant dense<0.000000e+00> : vector<64x64xf32>
    %855 = tpu.matmul %844, %849, %cst_324 {dimension_numbers = #tpu.dot_dimension_numbers<[1], [1], [0], [0], [0, 0, 1, 0], [], []>} : vector<64x16xf32>, vector<64x16xf32>, vector<64x64xf32> -> vector<64x64xf32>
    %856 = arith.addf %855, %0 : vector<64x64xf32>
    %cst_325 = arith.constant dense<0xFF800000> : vector<64xf32>
    %857 = vector.multi_reduction <maximumf>, %856, %cst_325 [1] : vector<64x64xf32> to vector<64xf32>
    %858 = vector.shape_cast %857 : vector<64xf32> to vector<64x1xf32>
    %859 = vector.broadcast %858 : vector<64x1xf32> to vector<64x64xf32>
    %860 = arith.subf %856, %859 : vector<64x64xf32>
    %861 = math.exp %860 : vector<64x64xf32>
    %cst_326 = arith.constant dense<0.000000e+00> : vector<64xf32>
    %862 = vector.multi_reduction <add>, %861, %cst_326 [1] : vector<64x64xf32> to vector<64xf32>
    %863 = vector.shape_cast %862 : vector<64xf32> to vector<64x1xf32>
    %cst_327 = arith.constant 1.000000e+00 : f32
    %864 = vector.broadcast %cst_327 : f32 to vector<64x1xf32>
    %865 = arith.divf %864, %863 : vector<64x1xf32>
    %866 = vector.broadcast %865 : vector<64x1xf32> to vector<64x64xf32>
    %867 = arith.mulf %861, %866 : vector<64x64xf32>
    %cst_328 = arith.constant dense<0.000000e+00> : vector<64x16xf32>
    %868 = tpu.matmul %867, %854, %cst_328 {dimension_numbers = #tpu.dot_dimension_numbers<[1], [0], [0], [1], [0, 0, 1, 1], [], []>} : vector<64x64xf32>, vector<64x16xf32>, vector<64x16xf32> -> vector<64x16xf32>
    %869 = vector.extract_strided_slice %868 {offsets = [0, 0], sizes = [16, 16], strides = [1, 1]} : vector<64x16xf32> to vector<16x16xf32>
    %870 = vector.extract_strided_slice %868 {offsets = [16, 0], sizes = [16, 16], strides = [1, 1]} : vector<64x16xf32> to vector<16x16xf32>
    %871 = vector.extract_strided_slice %868 {offsets = [32, 0], sizes = [16, 16], strides = [1, 1]} : vector<64x16xf32> to vector<16x16xf32>
    %872 = vector.extract_strided_slice %868 {offsets = [48, 0], sizes = [16, 16], strides = [1, 1]} : vector<64x16xf32> to vector<16x16xf32>
    %873 = tpu.concatenate %869, %870, %871, %872 in 1 : vector<16x16xf32>, vector<16x16xf32>, vector<16x16xf32>, vector<16x16xf32> -> vector<16x64xf32>
    %874 = arith.truncf %873 : vector<16x64xf32> to vector<16x64xbf16>
    %cst_329 = arith.constant dense<0.000000e+00> : vector<16x64xf32>
    %875 = tpu.matmul %874, %793, %cst_329 {dimension_numbers = #tpu.dot_dimension_numbers<[1], [0], [0], [1], [0, 0, 1, 1], [], []>} : vector<16x64xbf16>, vector<64x64xbf16>, vector<16x64xf32> -> vector<16x64xf32>
    %876 = arith.addf %789, %875 : vector<16x64xf32>
    %877 = vector.extract_strided_slice %801 {offsets = [5, 0], sizes = [1, 64], strides = [1, 1]} : vector<9x64xf32> to vector<1x64xf32>
    %878 = vector.broadcast %877 : vector<1x64xf32> to vector<16x64xf32>
    %879 = arith.addf %876, %878 : vector<16x64xf32>
    %880 = vector.extract_strided_slice %801 {offsets = [6, 0], sizes = [1, 64], strides = [1, 1]} : vector<9x64xf32> to vector<1x64xf32>
    %881 = vector.extract_strided_slice %801 {offsets = [7, 0], sizes = [1, 64], strides = [1, 1]} : vector<9x64xf32> to vector<1x64xf32>
    %cst_330 = arith.constant dense<0.000000e+00> : vector<16xf32>
    %882 = vector.multi_reduction <add>, %879, %cst_330 [1] : vector<16x64xf32> to vector<16xf32>
    %883 = vector.shape_cast %882 : vector<16xf32> to vector<16x1xf32>
    %cst_331 = arith.constant 6.400000e+01 : f32
    %884 = vector.broadcast %cst_331 : f32 to vector<16x1xf32>
    %885 = arith.divf %883, %884 : vector<16x1xf32>
    %886 = vector.broadcast %885 : vector<16x1xf32> to vector<16x64xf32>
    %887 = arith.subf %879, %886 : vector<16x64xf32>
    %888 = arith.mulf %887, %887 : vector<16x64xf32>
    %cst_332 = arith.constant dense<0.000000e+00> : vector<16xf32>
    %889 = vector.multi_reduction <add>, %888, %cst_332 [1] : vector<16x64xf32> to vector<16xf32>
    %890 = vector.shape_cast %889 : vector<16xf32> to vector<16x1xf32>
    %cst_333 = arith.constant 6.400000e+01 : f32
    %891 = vector.broadcast %cst_333 : f32 to vector<16x1xf32>
    %892 = arith.divf %890, %891 : vector<16x1xf32>
    %cst_334 = arith.constant 9.99999974E-6 : f32
    %893 = vector.broadcast %cst_334 : f32 to vector<16x1xf32>
    %894 = arith.addf %892, %893 : vector<16x1xf32>
    %895 = math.rsqrt %894 : vector<16x1xf32>
    %896 = vector.broadcast %895 : vector<16x1xf32> to vector<16x64xf32>
    %897 = arith.mulf %887, %896 : vector<16x64xf32>
    %898 = vector.broadcast %880 : vector<1x64xf32> to vector<16x64xf32>
    %899 = arith.mulf %897, %898 : vector<16x64xf32>
    %900 = vector.broadcast %881 : vector<1x64xf32> to vector<16x64xf32>
    %901 = arith.addf %899, %900 : vector<16x64xf32>
    %902 = arith.truncf %901 : vector<16x64xf32> to vector<16x64xbf16>
    %cst_335 = arith.constant dense<0.000000e+00> : vector<16x256xf32>
    %903 = tpu.matmul %902, %795, %cst_335 {dimension_numbers = #tpu.dot_dimension_numbers<[1], [0], [0], [1], [0, 0, 1, 1], [], []>} : vector<16x64xbf16>, vector<64x256xbf16>, vector<16x256xf32> -> vector<16x256xf32>
    %904 = vector.broadcast %797 : vector<1x256xf32> to vector<16x256xf32>
    %905 = arith.addf %903, %904 : vector<16x256xf32>
    %cst_336 = arith.constant 0.000000e+00 : f32
    %906 = vector.broadcast %cst_336 : f32 to vector<16x256xf32>
    %907 = arith.maximumf %905, %906 : vector<16x256xf32>
    %908 = arith.truncf %907 : vector<16x256xf32> to vector<16x256xbf16>
    %cst_337 = arith.constant dense<0.000000e+00> : vector<16x64xf32>
    %909 = tpu.matmul %908, %799, %cst_337 {dimension_numbers = #tpu.dot_dimension_numbers<[1], [0], [0], [1], [0, 0, 1, 1], [], []>} : vector<16x256xbf16>, vector<256x64xbf16>, vector<16x64xf32> -> vector<16x64xf32>
    %910 = vector.extract_strided_slice %801 {offsets = [8, 0], sizes = [1, 64], strides = [1, 1]} : vector<9x64xf32> to vector<1x64xf32>
    %911 = vector.broadcast %910 : vector<1x64xf32> to vector<16x64xf32>
    %912 = arith.addf %909, %911 : vector<16x64xf32>
    %913 = arith.addf %879, %912 : vector<16x64xf32>
    %c0_338 = arith.constant 0 : index
    %c0_339 = arith.constant 0 : index
    %c0_340 = arith.constant 0 : index
    %914 = vector.load %arg22[%c0_338, %c0_339, %c0_340] : memref<1x2x64xf32, #tpu.memory_space<vmem>>, vector<1x2x64xf32>
    %915 = vector.shape_cast %914 : vector<1x2x64xf32> to vector<2x64xf32>
    %916 = vector.extract_strided_slice %915 {offsets = [0, 0], sizes = [1, 64], strides = [1, 1]} : vector<2x64xf32> to vector<1x64xf32>
    %917 = vector.extract_strided_slice %915 {offsets = [1, 0], sizes = [1, 64], strides = [1, 1]} : vector<2x64xf32> to vector<1x64xf32>
    %cst_341 = arith.constant dense<0.000000e+00> : vector<16xf32>
    %918 = vector.multi_reduction <add>, %913, %cst_341 [1] : vector<16x64xf32> to vector<16xf32>
    %919 = vector.shape_cast %918 : vector<16xf32> to vector<16x1xf32>
    %cst_342 = arith.constant 6.400000e+01 : f32
    %920 = vector.broadcast %cst_342 : f32 to vector<16x1xf32>
    %921 = arith.divf %919, %920 : vector<16x1xf32>
    %922 = vector.broadcast %921 : vector<16x1xf32> to vector<16x64xf32>
    %923 = arith.subf %913, %922 : vector<16x64xf32>
    %924 = arith.mulf %923, %923 : vector<16x64xf32>
    %cst_343 = arith.constant dense<0.000000e+00> : vector<16xf32>
    %925 = vector.multi_reduction <add>, %924, %cst_343 [1] : vector<16x64xf32> to vector<16xf32>
    %926 = vector.shape_cast %925 : vector<16xf32> to vector<16x1xf32>
    %cst_344 = arith.constant 6.400000e+01 : f32
    %927 = vector.broadcast %cst_344 : f32 to vector<16x1xf32>
    %928 = arith.divf %926, %927 : vector<16x1xf32>
    %cst_345 = arith.constant 9.99999974E-6 : f32
    %929 = vector.broadcast %cst_345 : f32 to vector<16x1xf32>
    %930 = arith.addf %928, %929 : vector<16x1xf32>
    %931 = math.rsqrt %930 : vector<16x1xf32>
    %932 = vector.broadcast %931 : vector<16x1xf32> to vector<16x64xf32>
    %933 = arith.mulf %923, %932 : vector<16x64xf32>
    %934 = vector.broadcast %916 : vector<1x64xf32> to vector<16x64xf32>
    %935 = arith.mulf %933, %934 : vector<16x64xf32>
    %936 = vector.broadcast %917 : vector<1x64xf32> to vector<16x64xf32>
    %937 = arith.addf %935, %936 : vector<16x64xf32>
    %938 = vector.extract_strided_slice %937 {offsets = [0, 0], sizes = [8, 64], strides = [1, 1]} : vector<16x64xf32> to vector<8x64xf32>
    %939 = vector.extract_strided_slice %937 {offsets = [8, 0], sizes = [8, 64], strides = [1, 1]} : vector<16x64xf32> to vector<8x64xf32>
    %940 = tpu.concatenate %938, %939 in 1 : vector<8x64xf32>, vector<8x64xf32> -> vector<8x128xf32>
    %c0_346 = arith.constant 0 : index
    %c0_347 = arith.constant 0 : index
    %c0_348 = arith.constant 0 : index
    %941 = vector.load %arg23[%c0_346, %c0_347, %c0_348] : memref<1x8x128xf32, #tpu.memory_space<vmem>>, vector<1x8x128xf32>
    %942 = vector.shape_cast %941 : vector<1x8x128xf32> to vector<8x128xf32>
    %943 = vector.shape_cast %940 : vector<8x128xf32> to vector<1x8x128xf32>
    tpu.vector_store %arg23[%c0_346, %c0_347, %c0_348], %943 {strides = array<i32>} : memref<1x8x128xf32, #tpu.memory_space<vmem>>, vector<1x8x128xf32>,
    return
  }
  func.func @transform_0(%arg0: i32, %arg1: memref<3xi32, #tpu.memory_space<smem>>, %arg2: memref<3xi32, #tpu.memory_space<smem>>) -> (i32, i32, i32) {
    %c0_i32 = arith.constant 0 : i32
    %c0_i32_0 = arith.constant 0 : i32
    %c0_i32_1 = arith.constant 0 : i32
    return %arg0, %c0_i32, %c0_i32_0 : i32, i32, i32
  }
  func.func @transform_1(%arg0: i32, %arg1: memref<3xi32, #tpu.memory_space<smem>>, %arg2: memref<3xi32, #tpu.memory_space<smem>>) -> (i32, i32, i32) {
    %0 = arith.index_cast %arg0 : i32 to index
    %1 = memref.load %arg1[%0] : memref<3xi32, #tpu.memory_space<smem>>
    %c0_i32 = arith.constant 0 : i32
    %c0_i32_0 = arith.constant 0 : i32
    %c0_i32_1 = arith.constant 0 : i32
    return %1, %c0_i32, %c0_i32_0 : i32, i32, i32
  }
  func.func @transform_2(%arg0: i32, %arg1: memref<3xi32, #tpu.memory_space<smem>>, %arg2: memref<3xi32, #tpu.memory_space<smem>>) -> (i32, i32, i32) {
    %0 = arith.index_cast %arg0 : i32 to index
    %1 = memref.load %arg2[%0] : memref<3xi32, #tpu.memory_space<smem>>
    %c0_i32 = arith.constant 0 : i32
    %c0_i32_0 = arith.constant 0 : i32
    %c0_i32_1 = arith.constant 0 : i32
    return %1, %c0_i32, %c0_i32_0 : i32, i32, i32
  }
  func.func @transform_3(%arg0: i32, %arg1: memref<3xi32, #tpu.memory_space<smem>>, %arg2: memref<3xi32, #tpu.memory_space<smem>>) -> (i32, i32) {
    %c0_i32 = arith.constant 0 : i32
    %c0_i32_0 = arith.constant 0 : i32
    %c0_i32_1 = arith.constant 0 : i32
    return %c0_i32, %c0_i32_0 : i32, i32
  }
  func.func @transform_4(%arg0: i32, %arg1: memref<3xi32, #tpu.memory_space<smem>>, %arg2: memref<3xi32, #tpu.memory_space<smem>>) -> (i32, i32) {
    %c0_i32 = arith.constant 0 : i32
    %c0_i32_0 = arith.constant 0 : i32
    %c0_i32_1 = arith.constant 0 : i32
    return %c0_i32, %c0_i32_0 : i32, i32
  }
  func.func @transform_5(%arg0: i32, %arg1: memref<3xi32, #tpu.memory_space<smem>>, %arg2: memref<3xi32, #tpu.memory_space<smem>>) -> (i32, i32) {
    %c0_i32 = arith.constant 0 : i32
    %c0_i32_0 = arith.constant 0 : i32
    %c0_i32_1 = arith.constant 0 : i32
    return %c0_i32, %c0_i32_0 : i32, i32
  }
  func.func @transform_6(%arg0: i32, %arg1: memref<3xi32, #tpu.memory_space<smem>>, %arg2: memref<3xi32, #tpu.memory_space<smem>>) -> (i32, i32, i32, i32) {
    %c0_i32 = arith.constant 0 : i32
    %c0_i32_0 = arith.constant 0 : i32
    %c0_i32_1 = arith.constant 0 : i32
    %c0_i32_2 = arith.constant 0 : i32
    return %arg0, %c0_i32, %c0_i32_0, %c0_i32_1 : i32, i32, i32, i32
  }
  func.func @transform_7(%arg0: i32, %arg1: memref<3xi32, #tpu.memory_space<smem>>, %arg2: memref<3xi32, #tpu.memory_space<smem>>) -> (i32, i32, i32, i32) {
    %c0_i32 = arith.constant 0 : i32
    %c0_i32_0 = arith.constant 0 : i32
    %c0_i32_1 = arith.constant 0 : i32
    %c0_i32_2 = arith.constant 0 : i32
    return %arg0, %c0_i32, %c0_i32_0, %c0_i32_1 : i32, i32, i32, i32
  }
  func.func @transform_8(%arg0: i32, %arg1: memref<3xi32, #tpu.memory_space<smem>>, %arg2: memref<3xi32, #tpu.memory_space<smem>>) -> (i32, i32, i32, i32) {
    %c0_i32 = arith.constant 0 : i32
    %c0_i32_0 = arith.constant 0 : i32
    %c0_i32_1 = arith.constant 0 : i32
    %c0_i32_2 = arith.constant 0 : i32
    return %arg0, %c0_i32, %c0_i32_0, %c0_i32_1 : i32, i32, i32, i32
  }
  func.func @transform_9(%arg0: i32, %arg1: memref<3xi32, #tpu.memory_space<smem>>, %arg2: memref<3xi32, #tpu.memory_space<smem>>) -> (i32, i32, i32, i32) {
    %c0_i32 = arith.constant 0 : i32
    %c0_i32_0 = arith.constant 0 : i32
    %c0_i32_1 = arith.constant 0 : i32
    %c0_i32_2 = arith.constant 0 : i32
    return %arg0, %c0_i32, %c0_i32_0, %c0_i32_1 : i32, i32, i32, i32
  }
  func.func @transform_10(%arg0: i32, %arg1: memref<3xi32, #tpu.memory_space<smem>>, %arg2: memref<3xi32, #tpu.memory_space<smem>>) -> (i32, i32, i32, i32) {
    %c0_i32 = arith.constant 0 : i32
    %c0_i32_0 = arith.constant 0 : i32
    %c0_i32_1 = arith.constant 0 : i32
    %c0_i32_2 = arith.constant 0 : i32
    return %arg0, %c0_i32, %c0_i32_0, %c0_i32_1 : i32, i32, i32, i32
  }
  func.func @transform_11(%arg0: i32, %arg1: memref<3xi32, #tpu.memory_space<smem>>, %arg2: memref<3xi32, #tpu.memory_space<smem>>) -> (i32, i32, i32, i32) {
    %c0_i32 = arith.constant 0 : i32
    %c0_i32_0 = arith.constant 0 : i32
    %c0_i32_1 = arith.constant 0 : i32
    %c0_i32_2 = arith.constant 0 : i32
    return %arg0, %c0_i32, %c0_i32_0, %c0_i32_1 : i32, i32, i32, i32
  }
  func.func @transform_12(%arg0: i32, %arg1: memref<3xi32, #tpu.memory_space<smem>>, %arg2: memref<3xi32, #tpu.memory_space<smem>>) -> (i32, i32, i32, i32) {
    %c0_i32 = arith.constant 0 : i32
    %c0_i32_0 = arith.constant 0 : i32
    %c0_i32_1 = arith.constant 0 : i32
    %c0_i32_2 = arith.constant 0 : i32
    return %arg0, %c0_i32, %c0_i32_0, %c0_i32_1 : i32, i32, i32, i32
  }
  func.func @transform_13(%arg0: i32, %arg1: memref<3xi32, #tpu.memory_space<smem>>, %arg2: memref<3xi32, #tpu.memory_space<smem>>) -> (i32, i32, i32, i32) {
    %c0_i32 = arith.constant 0 : i32
    %c0_i32_0 = arith.constant 0 : i32
    %c0_i32_1 = arith.constant 0 : i32
    %c0_i32_2 = arith.constant 0 : i32
    return %arg0, %c0_i32, %c0_i32_0, %c0_i32_1 : i32, i32, i32, i32
  }
  func.func @transform_14(%arg0: i32, %arg1: memref<3xi32, #tpu.memory_space<smem>>, %arg2: memref<3xi32, #tpu.memory_space<smem>>) -> (i32, i32, i32, i32) {
    %c0_i32 = arith.constant 0 : i32
    %c0_i32_0 = arith.constant 0 : i32
    %c0_i32_1 = arith.constant 0 : i32
    %c0_i32_2 = arith.constant 0 : i32
    return %arg0, %c0_i32, %c0_i32_0, %c0_i32_1 : i32, i32, i32, i32
  }
  func.func @transform_15(%arg0: i32, %arg1: memref<3xi32, #tpu.memory_space<smem>>, %arg2: memref<3xi32, #tpu.memory_space<smem>>) -> (i32, i32, i32, i32) {
    %c0_i32 = arith.constant 0 : i32
    %c0_i32_0 = arith.constant 0 : i32
    %c0_i32_1 = arith.constant 0 : i32
    %c0_i32_2 = arith.constant 0 : i32
    return %arg0, %c0_i32, %c0_i32_0, %c0_i32_1 : i32, i32, i32, i32
  }
  func.func @transform_16(%arg0: i32, %arg1: memref<3xi32, #tpu.memory_space<smem>>, %arg2: memref<3xi32, #tpu.memory_space<smem>>) -> (i32, i32, i32, i32) {
    %c0_i32 = arith.constant 0 : i32
    %c0_i32_0 = arith.constant 0 : i32
    %c0_i32_1 = arith.constant 0 : i32
    %c0_i32_2 = arith.constant 0 : i32
    return %arg0, %c0_i32, %c0_i32_0, %c0_i32_1 : i32, i32, i32, i32
  }
  func.func @transform_17(%arg0: i32, %arg1: memref<3xi32, #tpu.memory_space<smem>>, %arg2: memref<3xi32, #tpu.memory_space<smem>>) -> (i32, i32, i32, i32) {
    %c0_i32 = arith.constant 0 : i32
    %c0_i32_0 = arith.constant 0 : i32
    %c0_i32_1 = arith.constant 0 : i32
    %c0_i32_2 = arith.constant 0 : i32
    return %arg0, %c0_i32, %c0_i32_0, %c0_i32_1 : i32, i32, i32, i32
  }
  func.func @transform_18(%arg0: i32, %arg1: memref<3xi32, #tpu.memory_space<smem>>, %arg2: memref<3xi32, #tpu.memory_space<smem>>) -> (i32, i32, i32, i32) {
    %c0_i32 = arith.constant 0 : i32
    %c0_i32_0 = arith.constant 0 : i32
    %c0_i32_1 = arith.constant 0 : i32
    %c0_i32_2 = arith.constant 0 : i32
    return %arg0, %c0_i32, %c0_i32_0, %c0_i32_1 : i32, i32, i32, i32
  }
  func.func @transform_19(%arg0: i32, %arg1: memref<3xi32, #tpu.memory_space<smem>>, %arg2: memref<3xi32, #tpu.memory_space<smem>>) -> (i32, i32, i32) {
    %c0_i32 = arith.constant 0 : i32
    %c0_i32_0 = arith.constant 0 : i32
    %c0_i32_1 = arith.constant 0 : i32
    return %arg0, %c0_i32, %c0_i32_0 : i32, i32, i32
  }
  func.func @transform_20(%arg0: i32, %arg1: memref<3xi32, #tpu.memory_space<smem>>, %arg2: memref<3xi32, #tpu.memory_space<smem>>) -> (i32, i32, i32) {
    %c0_i32 = arith.constant 0 : i32
    %c0_i32_0 = arith.constant 0 : i32
    %c0_i32_1 = arith.constant 0 : i32
    return %arg0, %c0_i32, %c0_i32_0 : i32, i32, i32
  }
}

</mosaic_0001>

<bundles_post_ra>
// kernel: forward.1
= control target key start
LH: loop header
LB: loop body
LE: loop exit
PB: predicated region body
PF: predicated region fallthrough
CT: control target
= control target key end

     0   :  { %s12347_s0 = inlined_call_operand.hbm [shape: s32[3], index: 0, kind: input, shape index: {}]   ;;  %s12348_s2 = inlined_call_operand.vmem [shape: f32[3,16,32], index: 2, kind: input, shape index: {}, may-alias: {2,3,4}]   ;;  %s12349_s3 = inlined_call_operand.vmem [shape: f32[3,16,32], index: 3, kind: input, shape index: {}, may-alias: {2,3,4}]   ;;  %s12350_s4 = inlined_call_operand.vmem [shape: f32[3,16,32], index: 4, kind: input, shape index: {}, may-alias: {2,3,4}]   ;;  %s12351_s5 = inlined_call_operand.vmem [shape: f32[16,32], index: 5, kind: input, shape index: {}]   ;;  %s12352_s6 = inlined_call_operand.vmem [shape: f32[16,64], index: 6, kind: input, shape index: {}]   ;;  %s12353_s7 = inlined_call_operand.hbm [shape: f32[64,64], index: 7, kind: input, shape index: {}]   ;;  %s12354_s8 = inlined_call_operand.hbm [shape: bf16[3,8,32,32], index: 8, kind: input, shape index: {}]   ;;  %s12355_s9 = inlined_call_operand.hbm [shape: bf16[3,4,32,64], index: 9, kind: input, shape index: {}]   ;;  %s12356_s10 = inlined_call_operand.hbm [shape: bf16[3,4,32,128], index: 10, kind: input, shape index: {}]   ;;  %s12357_s11 = inlined_call_operand.vmem [shape: bf16[3,4,128,32], index: 11, kind: input, shape index: {}]   ;;  %s12358_s12 = inlined_call_operand.hbm [shape: f32[3,4,9,32], index: 12, kind: input, shape index: {}]   ;;  %s12359_s13 = inlined_call_operand.hbm [shape: f32[3,4,1,128], index: 13, kind: input, shape index: {}]   ;;  %s12360_s14 = inlined_call_operand.vmem [shape: f32[3,2,2,32], index: 14, kind: input, shape index: {}]   ;;  %s12361_s15 = inlined_call_operand.vmem [shape: bf16[3,2,64,192], index: 15, kind: input, shape index: {}]   ;;  %s12362_s16 = inlined_call_operand.hbm [shape: bf16[3,2,64,64], index: 16, kind: input, shape index: {}]   ;;  %s12363_s17 = inlined_call_operand.vmem [shape: bf16[3,2,64,256], index: 17, kind: input, shape index: {}]   ;;  %s12364_s18 = inlined_call_operand.vmem [shape: bf16[3,2,256,64], index: 18, kind: input, shape index: {}]   ;;  %s12365_s19 = inlined_call_operand.vmem [shape: f32[3,2,9,64], index: 19, kind: input, shape index: {}]   ;;  %s12366_s20 = inlined_call_operand.vmem [shape: f32[3,2,1,256], index: 20, kind: input, shape index: {}]   ;;  %s12367_s21 = inlined_call_operand.vmem [shape: f32[3,2,64], index: 21, kind: input, shape index: {}]   ;;  %s12368_s22 = inlined_call_operand.vmem [shape: f32[3,8,128], index: 22, kind: output, shape index: {}]   ;;  %s12369_s1 = inlined_call_operand.hbm [shape: s32[3], index: 1, kind: input, shape index: {}]  }
   0x1   :  { %12395 = sst [smem:[#allocation24_spill]] %s12347_s0 }
   0x2   :  { %12396 = sst [smem:[#allocation25_spill]] %s12348_s2  ;;  %s12413_s29 = sld [smem:[#allocation24_spill]] }
   0x3   :  { %12397 = sst [smem:[#allocation26_spill]] %s12349_s3 }
   0x4   :  { %12398 = sst [smem:[#allocation27_spill]] %s12350_s4 }
   0x5   :  { %12399 = sst [smem:[#allocation28_spill]] %s12351_s5 }
   0x6   :  { %12400 = sst [smem:[#allocation29_spill]] %s12352_s6 }
   0x7   :  { %12401 = sst [smem:[#allocation30_spill]] %s12353_s7 }
   0x8   :  { %12402 = sst [smem:[#allocation31_spill]] %s12354_s8 }
   0x9   :  { %12403 = sst [smem:[#allocation32_spill]] %s12356_s10 }
   0xa   :  { %12404 = sst [smem:[#allocation33_spill]] %s12357_s11 }
   0xb   :  { %12405 = sst [smem:[#allocation34_spill]] %s12359_s13 }
   0xc   :  { %12406 = sst [smem:[#allocation35_spill]] %s12360_s14  ;;  %s10031_s14 = scalar_lea.hbm %s12413_s29, 16 }
   0xd   :  { %12407 = sst [smem:[#allocation36_spill]] %s12363_s17  ;;  %p10032_p0 = scmp.ne.s32.totalorder %s12413_s29, %s10031_s14 }
   0xe   :  { %12408 = sst [smem:[#allocation37_spill]] %s12364_s18  ;;  %p10035_p1 = scmp.lt.u32.totalorder %s10031_s14, %s12413_s29 }
   0xf   :  { %12409 = sst [smem:[#allocation38_spill]] %s12365_s19 }
  0x10   :  { %12410 = sst [smem:[#allocation39_spill]] %s12366_s20  ;;  %p10037_p2 = pnand %p10035_p1, %p10032_p0 }
  0x11   :  { %12411 = sst [smem:[#allocation40_spill]] %s12367_s21 }
  0x12   :  { %12412 = sst [smem:[#allocation41_spill]] %s12368_s22 }
  0x13   :  { %10040 = shalt.err (!%p10037_p2)  }
  0x14   :  { %s10309_s2 = smov [#allocation3]   ;;  %s10041_s26 = scalar_lea.hbm %s12369_s1, 16 }
  0x15   :  { %28 = dma.hbm_to_smem %s12413_s29, 16, %s10309_s2, [#allocation2] }
  0x16   :  { %p10042_p3 = scmp.ne.s32.totalorder %s12369_s1, %s10041_s26  ;;  %p10045_p4 = scmp.lt.u32.totalorder %s10041_s26, %s12369_s1 }
  0x18   :  { %p10047_p5 = pnand %p10045_p4, %p10042_p3 }
  0x1a   :  { %10050 = shalt.err (!%p10047_p5)  }
  0x1b   :  { %s10310_s14 = smov [#allocation4]  }
  0x1c   :  { %30 = dma.hbm_to_smem %s12369_s1, 16, %s10310_s14, [#allocation2] }
  0x1d   :  { %10275 = dma.done.wait [#allocation2], 32 }
  0x1e   :  { %10276 = vsyncadd [#allocation2], 4294967264 }
  0x1f   :  { %32 = sfence }
  0x20   :  { %33 = vsyncpa [#allocation6], 0 }
  0x21   :  { %34 = vsyncpa [#allocation8], 0 }
  0x22   :  { %36 = vsyncpa [#allocation8 + $0x1], 0 }
  0x23   :  { %37 = vsyncpa [#allocation11], 0 }
  0x24   :  { %39 = vsyncpa [#allocation11 + $0x1], 0 }
  0x25   :  { %40 = vsyncpa [#allocation14], 0 }
  0x26   :  { %42 = vsyncpa [#allocation14 + $0x1], 0  ;;  %s10477_s29 = smov 0   ;;  %s10479_s0 = smov 0  }
  0x27   :  { %s10481_s23 = smov 0   ;;  %s10483_s2 = smov 0  }
  0x28 LB: > { %12414 = sst [smem:[#allocation21_spill]] %s10303_s23  ;;  %s10498_s1 = sadd.s32 1, %s10307_s2   ;;  %s10307_s2 = sphi %s10483_s2, %s12458_s2   ;;  %s10303_s23 = sphi %s10481_s23, %s12460_s23   ;;  %s10299_s0 = sphi %s10479_s0, %s12462_s0   ;;  %s10295_s29 = sphi %s10477_s29, %s12461_s29  }
  0x29   : > { %12415 = sst [smem:[#allocation22_spill]] %s10498_s1  ;;  %s200_s6 = sadd.s32 1, %s10303_s23 }
  0x2a   : > { %s197_s24 = ssub.s32 %s10307_s2, %s10498_s1  ;;  %p207_p6 = scmp.ne.s32.totalorder %s10303_s23, %s10299_s0 }
  0x2b   : > { %p198_p7 = scmp.eq.s32.totalorder %s197_s24, 0  ;;  %p208_p8 = scmp.eq.s32.totalorder %s10307_s2, 0 }
  0x2c   : > { %p9155_p9 = scmp.lt.s32.totalorder %s10307_s2, 3  ;;  %s10511_s25 = sand.u32 1, %s10307_s2  }
  0x2d   : > { %s10508_s7 = scalar_select %p198_p7, %s10303_s23, %s200_s6  }
  0x2e   : > { %p209_p10 = por %p208_p8, %p207_p6  ;;  %s10514_s26 = sand.u32 1, %s10303_s23  }
  0x2f   : > { %12416 = sst [smem:[#allocation23_spill]] %s10508_s7  ;;  %s7432_s3 = sshll.u32 %s10514_s26, 7 }
  0x30   : > { %s7962_s27 = sshll.u32 %s10307_s2, 11  ;;  %s12417_s8 = sld [smem:[#allocation31_spill]] }
  0x31   : > { %s652_s30 = scalar_lea.vmem [#allocation7], %s7432_s3  ;;  %p10523_p11 = pnand %p9155_p9, %p209_p10 }
  0x32   : > { %s659_s5 = sshll.u32 %s652_s30, 4  ;;  %s10527_s5 = int_to_ptr.vmem [resolvable:$true] %s659_s5 }
  0x33   : > { %s12418_s6 = scalar_select %p10523_p11, 1, 0 }
  0x34   : > { %p10534_p13 = pneg %p10523_p11 }
  0x36   : > { %s10521_s14 = scalar_lea.hbm %s12417_s8, %s7962_s27  ;;  %s10056_s28 = scalar_lea.hbm %s12417_s8, 6144 }
  0x37   : > { %s10051_s7 = scalar_lea.hbm %s10521_s14, 2048  ;;  %p10057_p2 = scmp.lt.u32.totalorder %s10521_s14, %s12417_s8 }
  0x38   : > { %p10052_p12 = scmp.ne.s32.totalorder %s10521_s14, %s10051_s7  ;;  %p10058_p3 = scmp.lt.u32.totalorder %s10056_s28, %s10051_s7 }
  0x39   : > { %s12419_s27 = scalar_select %p10534_p13, 1, 0 }
  0x3a   : > { %p10054_p0 = pnand %p10534_p13, %p10052_p12  ;;  %p10059_p4 = por %p10058_p3, %p10057_p2 }
  0x3b   : > { %p10060_p5 = scmp.lt.u32.totalorder %s10051_s7, %s10521_s14 }
  0x3c   : > { %p10055_p1 = pneg %p10054_p0 }
  0x3d   : > { %p10061_p6 = por %p10060_p5, %p10059_p4 }
  0x3f   : > { %p10062_p7 = pnand %p10061_p6, %p10055_p1 }
  0x41   : > { %10065 = shalt.err (!%p10062_p7)
}
  0x42   : > { %s10066_s24 = scalar_lea.vmem %s10527_s5, 2048  ;;  %s10311_s3 = smov [#allocation7]  }
  0x43   : > { %p10067_p8 = scmp.ne.s32.totalorder %s10527_s5, %s10066_s24  ;;  %s10071_s4 = sshll.u32 %s10311_s3, 4  ;;  %s10072_s4 = int_to_ptr.vmem [resolvable:$false] %s10071_s4 }
  0x44   : > { %s10073_s23 = scalar_lea.vmem %s10072_s4, 4096  ;;  %p10074_p12 = scmp.lt.s32.totalorder %s10527_s5, %s10072_s4 }
  0x45   : > { %p10069_p9 = pnand %p10067_p8, %p10534_p13  ;;  %p10075_p0 = scmp.lt.s32.totalorder %s10073_s23, %s10066_s24 }
  0x47   : > { %p10070_p10 = pneg %p10069_p9  ;;  %p10076_p2 = por %p10075_p0, %p10074_p12 }
  0x49   : > { %p10077_p3 = pnand %p10076_p2, %p10070_p10 }
  0x4b   : > { %10080 = shalt.err (!%p10077_p3)
}
  0x4c   : > { %s12377_s7 = smov 64   ;;  %s12379_s28 = smov 4  }
  0x4d   : > { %s12420_s30 = scalar_lea.sflag [#allocation8], %s10511_s25  ;;  %s10563_s24 = sshll.u32 %s10514_s26, 6 }
  0x4e   : > { %9138 = dma.hbm_to_vmem [thread:$0]  (!%p10523_p11), %s10521_s14, 2048, %s10527_s5, %s12420_s30, %s12377_s7, %s12377_s7, %s12379_s28  }
  0x4f   : > { %s10566_s3 = sshll.u32 %s10307_s2, 10  ;;  %s12421_s10 = sld [smem:[#allocation32_spill]] }
  0x50   : > { %s694_s1 = scalar_lea.vmem [#allocation10], %s10563_s24  ;;  %s12382_s14 = scalar_lea.sflag [#allocation11], %s10511_s25 }
  0x51   : > { %s701_s22 = sshll.u32 %s694_s1, 4  ;;  %s10575_s22 = int_to_ptr.vmem [resolvable:$true] %s701_s22 }
  0x55   : > { %s10572_s8 = scalar_lea.hbm %s12421_s10, %s10566_s3  ;;  %s10086_s4 = scalar_lea.hbm %s12421_s10, 3072 }
  0x56   : > { %s10081_s5 = scalar_lea.hbm %s10572_s8, 1024  ;;  %p10087_p6 = scmp.lt.u32.totalorder %s10572_s8, %s12421_s10 }
  0x57   : > { %p10082_p1 = scmp.ne.s32.totalorder %s10572_s8, %s10081_s5  ;;  %p10088_p7 = scmp.lt.u32.totalorder %s10086_s4, %s10081_s5 }
  0x58   : > { %p10090_p9 = scmp.lt.u32.totalorder %s10081_s5, %s10572_s8 }
  0x59   : > { %p10084_p4 = pnand %p10082_p1, %p10534_p13  ;;  %p10089_p8 = por %p10088_p7, %p10087_p6 }
  0x5b   : > { %p10085_p5 = pneg %p10084_p4  ;;  %p10091_p10 = por %p10090_p9, %p10089_p8 }
  0x5d   : > { %p10092_p12 = pnand %p10091_p10, %p10085_p5 }
  0x5f   : > { %10095 = shalt.err (!%p10092_p12)
}
  0x60   : > { %s10096_s1 = scalar_lea.vmem %s10575_s22, 1024  ;;  %s10314_s7 = smov [#allocation10]  }
  0x61   : > { %p10097_p0 = scmp.ne.s32.totalorder %s10575_s22, %s10096_s1  ;;  %s10101_s30 = sshll.u32 %s10314_s7, 4  ;;  %s10102_s30 = int_to_ptr.vmem [resolvable:$false] %s10101_s30 }
  0x62   : > { %s10103_s28 = scalar_lea.vmem %s10102_s30, 2048  ;;  %p10104_p1 = scmp.lt.s32.totalorder %s10575_s22, %s10102_s30 }
  0x63   : > { %p10099_p2 = pnand %p10097_p0, %p10534_p13  ;;  %p10105_p4 = scmp.lt.s32.totalorder %s10103_s28, %s10096_s1 }
  0x65   : > { %p10100_p3 = pneg %p10099_p2  ;;  %p10106_p6 = por %p10105_p4, %p10104_p1 }
  0x67   : > { %p10107_p7 = pnand %p10106_p6, %p10100_p3 }
  0x69   : > { %10110 = shalt.err (!%p10107_p7)
}
  0x6a   : > { %s12422_s5 = smov 4   ;;  %s12423_s4 = smov 64  }
  0x6b   : > { %9144 = dma.hbm_to_vmem [thread:$0]  (!%p10523_p11), %s10572_s8, 1024, %s10575_s22, %s12382_s14, %s12423_s4, %s12423_s4, %s12422_s5  }
  0x6c   : > { %s7444_s23 = sshll.u32 %s10514_s26, 2  ;;  %s7966_s7 = sshll.u32 %s10307_s2, 6 }
  0x6d   : > { %s12424_s13 = sld [smem:[#allocation34_spill]]  ;;  %s744_s10 = scalar_lea.vmem [#allocation13], %s7444_s23 }
  0x6e   : > { %s751_s21 = sshll.u32 %s744_s10, 4  ;;  %s12381_s20 = scalar_lea.sflag [#allocation14], %s10511_s25  ;;  %s10611_s21 = int_to_ptr.vmem [resolvable:$true] %s751_s21 }
  0x73   : > { %s10609_s28 = scalar_lea.hbm %s12424_s13, %s7966_s7  ;;  %s10116_s26 = scalar_lea.hbm %s12424_s13, 192 }
  0x74   : > { %s10111_s19 = scalar_lea.hbm %s10609_s28, 64  ;;  %p10117_p10 = scmp.lt.u32.totalorder %s10609_s28, %s12424_s13 }
  0x75   : > { %p10112_p5 = scmp.ne.s32.totalorder %s10609_s28, %s10111_s19  ;;  %p10118_p12 = scmp.lt.u32.totalorder %s10116_s26, %s10111_s19 }
  0x76   : > { %p10120_p2 = scmp.lt.u32.totalorder %s10111_s19, %s10609_s28 }
  0x77   : > { %p10114_p8 = pnand %p10112_p5, %p10534_p13  ;;  %p10119_p0 = por %p10118_p12, %p10117_p10 }
  0x79   : > { %p10115_p9 = pneg %p10114_p8  ;;  %p10121_p3 = por %p10120_p2, %p10119_p0 }
  0x7b   : > { %p10122_p1 = pnand %p10121_p3, %p10115_p9 }
  0x7d   : > { %10125 = shalt.err (!%p10122_p1)
}
  0x7e   : > { %s10126_s10 = scalar_lea.vmem %s10611_s21, 64  ;;  %s10315_s23 = smov [#allocation13]  }
  0x7f   : > { %p10127_p4 = scmp.ne.s32.totalorder %s10611_s21, %s10126_s10  ;;  %s10131_s30 = sshll.u32 %s10315_s23, 4  ;;  %s10132_s30 = int_to_ptr.vmem [resolvable:$false] %s10131_s30 }
  0x80   : > { %s10133_s8 = scalar_lea.vmem %s10132_s30, 128  ;;  %p10134_p5 = scmp.lt.s32.totalorder %s10611_s21, %s10132_s30 }
  0x81   : > { %p10129_p6 = pnand %p10127_p4, %p10534_p13  ;;  %p10135_p8 = scmp.lt.s32.totalorder %s10133_s8, %s10126_s10 }
  0x83   : > { %p10130_p7 = pneg %p10129_p6  ;;  %p10136_p10 = por %p10135_p8, %p10134_p5 }
  0x85   : > { %p10137_p12 = pnand %p10136_p10, %p10130_p7 }
  0x87   : > { %10140 = shalt.err (!%p10137_p12)
}
  0x88   : > { %s10316_s19 = smov 16   ;;  %s10317_s22 = smov 1  }
  0x89   : > { %9150 = dma.hbm_to_vmem [thread:$0]  (!%p10523_p11), %s10609_s28, 64, %s10611_s21, %s12381_s20, %s10316_s19, %s10316_s19, %s10317_s22  }
  0x8a   : > { %s10638_s26 = sadd.s32 4294967295, %s10307_s2   ;;  %p213_p0 = scmp.ne.s32.totalorder %s10299_s0, %s10295_s29 }
  0x8b   : > { %p12383_p9 = scmp.eq.s32.totalorder %s10638_s26, 0  ;;  %p7429_p2 = scmp.ge.s32.totalorder %s10307_s2, 1 }
  0x8c   : > { %p588_p3 = scmp.lt.s32.totalorder %s10307_s2, 4  ;;  %s10318_s21 = smov [#allocation5]  }
  0x8d   : > { %p10647_p1 = por %p12383_p9, %p213_p0  ;;  %s606_s28 = sshll.u32 %s10318_s21, 4  ;;  %s10655_s28 = int_to_ptr.vmem [resolvable:$true] %s606_s28 }
  0x8e   : > { %p10651_p4 = pnand %p7429_p2, %p588_p3  ;;  %s10663_s2 = scalar_lea.hbm %s12355_s9, %s10566_s3 }
  0x8f   : > { %s12425_s7 = scalar_select %p10647_p1, 1, 0 }
  0x90   : > { %s12426_s1 = scalar_select %p10651_p4, 1, 0 }
  0x91   : > { %p9131_p6 = pneg %p10651_p4  ;;  %s673_s30 = scalar_lea.vmem [#allocation9], %s10563_s24 }
  0x92   : > { %s680_s8 = sshll.u32 %s673_s30, 4  ;;  %s10678_s21 = scalar_lea.hbm %s12358_s12, %s10566_s3  ;;  %s10672_s8 = int_to_ptr.vmem [resolvable:$true] %s680_s8 }
  0x93   : > { %p10667_p7 = pnand %p9131_p6, %p12383_p9  ;;  %s12428_s10 = sld [smem:[#allocation30_spill]] }
  0x95   : > { %p10143_p8 = pneg %p10667_p7 }
  0x99   : > { %s10141_s29 = scalar_lea.hbm %s12428_s10, 1024 }
  0x9a   : > { %p10142_p5 = scmp.ne.s32.totalorder %s12428_s10, %s10141_s29  ;;  %p10148_p0 = scmp.lt.u32.totalorder %s10141_s29, %s12428_s10 }
  0x9c   : > { %p10144_p10 = pnand %p10143_p8, %p10142_p5 }
  0x9e   : > { %p10145_p12 = pneg %p10144_p10 }
  0xa0   : > { %p10150_p2 = pnand %p10148_p0, %p10145_p12 }
  0xa2   : > { %10153 = shalt.err (!%p10150_p2)
}
  0xa3   : > { %s10154_s19 = scalar_lea.vmem %s10655_s28, 1024  ;;  %p10162_p1 = scmp.lt.s32.totalorder %s10655_s28, %s10655_s28 }
  0xa4   : > { %p10155_p3 = scmp.ne.s32.totalorder %s10655_s28, %s10154_s19  ;;  %p10163_p4 = scmp.lt.s32.totalorder %s10154_s19, %s10154_s19 }
  0xa6   : > { %p10157_p6 = pnand %p10155_p3, %p10143_p8  ;;  %p10164_p11 = por %p10163_p4, %p10162_p1 }
  0xa8   : > { %p10158_p9 = pneg %p10157_p6 }
  0xaa   : > { %p10165_p13 = pnand %p10164_p11, %p10158_p9 }
  0xac   : > { %10168 = shalt.err (!%p10165_p13)
}
  0xad   : > { %s12390_s13 = smov 128   ;;  %s10320_s17 = smov 8  }
  0xae   : > { %9134 = dma.hbm_to_vmem [thread:$0]  (!%p10667_p7), %s12428_s10, 1024, %s10655_s28, [#allocation6], %s12390_s13, %s12390_s13, %s10320_s17  }
  0xaf   : > { %s10169_s14 = scalar_lea.hbm %s10663_s2, 1024  ;;  %p12429_p13 = scmp.ne.s32.totalorder %s12419_s27, 0 }
  0xb0   : > { %p10170_p11 = scmp.ne.s32.totalorder %s10663_s2, %s10169_s14  ;;  %s10174_s30 = scalar_lea.hbm %s12355_s9, 3072 }
  0xb1   : > { %p10175_p4 = scmp.lt.u32.totalorder %s10663_s2, %s12355_s9  ;;  %p10176_p5 = scmp.lt.u32.totalorder %s10174_s30, %s10169_s14 }
  0xb2   : > { %p10172_p9 = pnand %p10170_p11, %p12429_p13  ;;  %p10178_p10 = scmp.lt.u32.totalorder %s10169_s14, %s10663_s2 }
  0xb3   : > { %p10177_p8 = por %p10176_p5, %p10175_p4 }
  0xb4   : > { %p10173_p1 = pneg %p10172_p9 }
  0xb5   : > { %p10179_p12 = por %p10178_p10, %p10177_p8 }
  0xb7   : > { %p10180_p0 = pnand %p10179_p12, %p10173_p1 }
  0xb9   : > { %10183 = shalt.err (!%p10180_p0)
}
  0xba   : > { %s10184_s28 = scalar_lea.vmem %s10672_s8, 1024  ;;  %s10321_s23 = smov [#allocation9]  }
  0xbb   : > { %p10185_p7 = scmp.ne.s32.totalorder %s10672_s8, %s10184_s28  ;;  %s10189_s18 = sshll.u32 %s10321_s23, 4  ;;  %s10190_s18 = int_to_ptr.vmem [resolvable:$false] %s10189_s18 }
  0xbc   : > { %s10191_s11 = scalar_lea.vmem %s10190_s18, 2048  ;;  %p10192_p6 = scmp.lt.s32.totalorder %s10672_s8, %s10190_s18 }
  0xbd   : > { %p10187_p2 = pnand %p10185_p7, %p12429_p13  ;;  %p10193_p11 = scmp.lt.s32.totalorder %s10191_s11, %s10184_s28 }
  0xbf   : > { %p10188_p3 = pneg %p10187_p2  ;;  %p10194_p9 = por %p10193_p11, %p10192_p6 }
  0xc1   : > { %p10195_p4 = pnand %p10194_p9, %p10188_p3 }
  0xc3   : > { %10198 = shalt.err (!%p10195_p4)
}
  0xc4   : > { %p12430_p1 = scmp.ne.s32.totalorder %s12418_s6, 0  ;;  %s12431_s20 = scalar_lea.sflag [#allocation8], %s10511_s25 }
  0xc5   : > { %s723_s14 = scalar_lea.vmem [#allocation12], %s10563_s24  ;;  %s10737_s19 = scalar_lea.hbm %s12362_s16, %s10566_s3 }
  0xc6   : > { %9141 = dma.hbm_to_vmem [thread:$0]  (!%p12430_p1), %s10663_s2, 1024, %s10672_s8, %s12431_s20, %s12423_s4, %s12423_s4, %s12422_s5  }
  0xc7   : > { %s730_s22 = sshll.u32 %s723_s14, 4  ;;  %s10199_s28 = scalar_lea.hbm %s10678_s21, 1024  ;;  %s10731_s22 = int_to_ptr.vmem [resolvable:$true] %s730_s22 }
  0xc8   : > { %p10200_p5 = scmp.ne.s32.totalorder %s10678_s21, %s10199_s28  ;;  %s10204_s11 = scalar_lea.hbm %s12358_s12, 3072 }
  0xc9   : > { %p10205_p12 = scmp.lt.u32.totalorder %s10678_s21, %s12358_s12  ;;  %p10206_p0 = scmp.lt.u32.totalorder %s10204_s11, %s10199_s28 }
  0xca   : > { %p10202_p8 = pnand %p10200_p5, %p12429_p13  ;;  %p10208_p2 = scmp.lt.u32.totalorder %s10199_s28, %s10678_s21 }
  0xcb   : > { %p10207_p7 = por %p10206_p0, %p10205_p12 }
  0xcc   : > { %p10203_p10 = pneg %p10202_p8 }
  0xcd   : > { %p10209_p3 = por %p10208_p2, %p10207_p7 }
  0xcf   : > { %p10210_p6 = pnand %p10209_p3, %p10203_p10 }
  0xd1   : > { %10213 = shalt.err (!%p10210_p6)
}
  0xd2   : > { %s10214_s3 = scalar_lea.vmem %s10731_s22, 1024  ;;  %s10322_s8 = smov [#allocation12]  }
  0xd3   : > { %p10215_p11 = scmp.ne.s32.totalorder %s10731_s22, %s10214_s3  ;;  %s10219_s20 = sshll.u32 %s10322_s8, 4  ;;  %s10220_s20 = int_to_ptr.vmem [resolvable:$false] %s10219_s20 }
  0xd4   : > { %s10221_s13 = scalar_lea.vmem %s10220_s20, 2048  ;;  %p10222_p5 = scmp.lt.s32.totalorder %s10731_s22, %s10220_s20 }
  0xd5   : > { %p10217_p9 = pnand %p10215_p11, %p12429_p13  ;;  %p10223_p8 = scmp.lt.s32.totalorder %s10221_s13, %s10214_s3 }
  0xd7   : > { %p10218_p4 = pneg %p10217_p9  ;;  %p10224_p12 = por %p10223_p8, %p10222_p5 }
  0xd9   : > { %p10225_p0 = pnand %p10224_p12, %p10218_p4 }
  0xdb   : > { %10228 = shalt.err (!%p10225_p0)
}
  0xdc   : > { %s12432_s14 = smov 128   ;;  %s12433_s29 = scalar_lea.sflag [#allocation11], %s10511_s25 }
  0xdd   : > { %9147 = dma.hbm_to_vmem [thread:$0]  (!%p12430_p1), %s10678_s21, 1024, %s10731_s22, %s12433_s29, %s12432_s14, %s12432_s14, %s10320_s17  }
  0xde   : > { %s781_s30 = scalar_lea.vmem [#allocation15], %s10563_s24  ;;  %s10229_s23 = scalar_lea.hbm %s10737_s19, 1024 }
  0xdf   : > { %s788_s28 = sshll.u32 %s781_s30, 4  ;;  %p10230_p10 = scmp.ne.s32.totalorder %s10737_s19, %s10229_s23  ;;  %s10766_s28 = int_to_ptr.vmem [resolvable:$true] %s788_s28 }
  0xe0   : > { %s10234_s2 = scalar_lea.hbm %s12362_s16, 3072  ;;  %p10235_p3 = scmp.lt.u32.totalorder %s10737_s19, %s12362_s16 }
  0xe1   : > { %p10232_p7 = pnand %p10230_p10, %p12429_p13  ;;  %p10236_p6 = scmp.lt.u32.totalorder %s10234_s2, %s10229_s23 }
  0xe2   : > { %p10238_p9 = scmp.lt.u32.totalorder %s10229_s23, %s10737_s19 }
  0xe3   : > { %p10233_p2 = pneg %p10232_p7  ;;  %p10237_p11 = por %p10236_p6, %p10235_p3 }
  0xe5   : > { %p10239_p4 = por %p10238_p9, %p10237_p11 }
  0xe7   : > { %p10240_p5 = pnand %p10239_p4, %p10233_p2 }
  0xe9   : > { %10243 = shalt.err (!%p10240_p5)
}
  0xea   : > { %s10244_s24 = scalar_lea.vmem %s10766_s28, 1024  ;;  %s10323_s21 = smov [#allocation15]  }
  0xeb   : > { %p10245_p8 = scmp.ne.s32.totalorder %s10766_s28, %s10244_s24  ;;  %s10249_s17 = sshll.u32 %s10323_s21, 4  ;;  %s10250_s17 = int_to_ptr.vmem [resolvable:$false] %s10249_s17 }
  0xec   : > { %s10251_s22 = scalar_lea.vmem %s10250_s17, 2048  ;;  %p10252_p10 = scmp.lt.s32.totalorder %s10766_s28, %s10250_s17 }
  0xed   : > { %p10247_p12 = pnand %p10245_p8, %p12429_p13  ;;  %p10253_p7 = scmp.lt.s32.totalorder %s10251_s22, %s10244_s24 }
  0xef   : > { %p10248_p0 = pneg %p10247_p12  ;;  %p10254_p3 = por %p10253_p7, %p10252_p10 }
  0xf1   : > { %p10255_p6 = pnand %p10254_p3, %p10248_p0 }
  0xf3   : > { %10258 = shalt.err (!%p10255_p6)
}
  0xf4   : > { %s12434_s20 = scalar_lea.sflag [#allocation14], %s10511_s25  ;;  %p12435_p13 = scmp.ne.s32.totalorder %s12426_s1, 0 }
  0xf5   : > { %9153 = dma.hbm_to_vmem [thread:$0]  (!%p12430_p1), %s10737_s19, 1024, %s10766_s28, %s12434_s20, %s12423_s4, %s12423_s4, %s12422_s5  }
  0xf6   : > { %838 = sbr.rel (%p12435_p13) target bundleno = 15974 (0x3e66), region = 100  ;;  %p12436_p2 = scmp.eq.s32.totalorder (!%p12435_p13), %s10638_s26, 0 }
  0xfd   : > { %10278 = dma.done.wait (%p12436_p2), [#allocation6], 1024   ;;  %p12437_p11 = pmov %p12436_p2 }
  0xfe   : > { %s844_s6 = sand.u32 1, %s10638_s26   ;;  %s846_s27 = sand.u32 1, %s10299_s0  }
  0xff   : > { %10280 = vsyncadd (%p12437_p11), [#allocation6], 4294966272  ;;  %s7452_s13 = sshll.u32 %s846_s27, 7  ;;  %s845_s14 = scalar_lea.sflag [#allocation8], %s844_s6 }
 0x100   : > { %s10802_s25 = scalar_lea.vmem [#allocation7], %s7452_s13  ;;  %p12438_p9 = scmp.ne.s32.totalorder %s12425_s7, 0 }
 0x102   : > { %10282 = dma.done.wait (%p12438_p9), %s845_s14, 3072  }
 0x103   : > { %10284 = vsyncadd (%p12438_p9), %s845_s14, 4294964224  ;;  %s10808_s5 = sshll.u32 %s846_s27, 6  ;;  %s863_s1 = scalar_lea.sflag [#allocation11], %s844_s6 }
 0x104   : > { %s10811_s4 = scalar_lea.vmem [#allocation9], %s10808_s5  ;;  %s10814_s19 = scalar_lea.vmem [#allocation10], %s10808_s5 }
 0x105   : > { %10286 = dma.done.wait (%p12438_p9), %s863_s1, 2048  }
 0x106   : > { %10288 = vsyncadd (%p12438_p9), %s863_s1, 4294965248  ;;  %s7456_s29 = sshll.u32 %s846_s27, 2  ;;  %s10821_s30 = scalar_lea.vmem [#allocation12], %s10808_s5 }
 0x107   : > { %s881_s28 = scalar_lea.sflag [#allocation14], %s844_s6  ;;  %s10823_s23 = scalar_lea.vmem [#allocation13], %s7456_s29 }
 0x108   : > { %10290 = dma.done.wait (%p12438_p9), %s881_s28, 1088  }
 0x109   : > { %10292 = vsyncadd (%p12438_p9), %s881_s28, 4294966208  ;;  %p1029_p1 = scmp.lt.s32.totalorder %s10638_s26, 2  ;;  %s1034_s18 = sld [smem:[#allocation3 + %s10638_s26]]  ;;  %vm1155_vm0 = vcmask 261120   ;;  %v9602_v38 = vld [vmem:[%s10802_s25] sm:$0xff]   ;;  %v10324_v39 = vmov 0.0   ;;  %v1183_v45 = vlaneseq }
 0x10a   : > { %s12439_s24 = sld [smem:[#allocation25_spill]]  ;;  %s12440_s6 = sld [smem:[#allocation28_spill]]  ;;  %8307 = vmatprep.subr.bf16.mxu0 %v10324_v39  ;;  %v9603_v40 = vld [vmem:[%s10802_s25 + $0x8] sm:$0xff]   ;;  %vm10325_vm1 = vmmov 0   ;;  %v10910_v55 = vld [vmem:[%s10821_s30] sm:$0xff]  ;;  %vm1403_vm2 = vcmask 64512  }
 0x10b   : > { %s10832_s11 = scalar_select %p1029_p1, %s10638_s26, 2  ;;  %8308 = vmatpush3.bf16.msra.mxu0 %v9602_v38  ;;  %8311 = vmatprep.mubr.msk.bf16.mxu0 %vm10325_vm1, %v10324_v39  ;;  %v10904_v49 = vshrl.u32 %v1183_v45, 7  ;;  %v7643_v56 = vld [vmem:[%s10821_s30 + $0x20] sm:$0xff]  ;;  %vm10978_vm3 = vmpackc.low %vm1403_vm2, %vm1403_vm2  ;;  %vm1541_vm4 = vcmask 523264   ;;  %vm1817_vm5 = vcmask 130048   ;;  %vm1820_vm6 = vcmask 195584  }
 0x10c   : > { %s12441_s8 = sld [smem:[#allocation26_spill]]  ;;  %s12442_s20 = sld [smem:[#allocation33_spill]]  ;;  %8309 = vmatprep.subr.bf16.mxu0 %v10324_v39  ;;  %vm11929_vm7 = vmpackc.low %vm1817_vm5, %vm1817_vm5  ;;  %vm5671_vm8 = vcmask 392192  }
 0x10d   : > { %s7968_s2 = sshll.u32 %s10832_s11, 4  ;;  %s7973_s17 = sshll.u32 %s10832_s11, 7  ;;  %v10907_v53 = vsub.s32 0, %v10904_v49  ;;  %v10914_v59 = vsub.s32 1, %v10904_v49 }
 0x10e   : > { %s7971_s22 = sshll.u32 %s10832_s11, 8  ;;  %s10851_s29 = scalar_lea.vmem %s12361_s15, %s7973_s17 }
 0x10f   : > { %p1035_p4 = scmp.lt.s32.totalorder %s1034_s18, 2  ;;  %s12443_s14 = sld [smem:[#allocation36_spill]]  ;;  %8310 = vmatpush3.bf16.msra.mxu0 %v9603_v40  ;;  %v1186_v60 = vrot.slane %v10910_v55, %v10907_v53  ;;  %v10919_v62 = vrot.slane %v7643_v56, %v10907_v53 }
 0x110   : > { %s1033_s21 = scalar_lea.vmem %s12439_s24, %s7968_s2  ;;  %v1099_v0 = vld [vmem:[%s12440_s6] sm:$0xff]  ;;  %v1100_v2 = vld [vmem:[%s12440_s6 + $0x8] sm:$0xff]  ;;  %s12444_s3 = sld [smem:[#allocation37_spill]]  ;;  %8315 = vmatprep.subr.bf16.mxu0 %v10324_v39 }
 0x111   : > { %v1101_v1 = vld [vmem:[%s1033_s21] sm:$0xff]  ;;  %v1102_v4 = vld [vmem:[%s1033_s21 + $0x8] sm:$0xff]  ;;  %s12464_s18 = smov (!%p1035_p4, %s1034_s18), 2  ;;  %s10329_s21 = smov 32  }
 0x112   : > { %v1103_v3 = vmul.f32 5.656854, %v1101_v1  ;;  %v1104_v5 = vmul.f32 5.656854, %v1102_v4  ;;  %s7969_s28 = sshll.u32 %s12464_s18, 4  ;;  %s10869_s27 = scalar_lea.vmem %s12442_s20, %s7971_s22  ;;  %v10924_v1 = vld [vmem:[%s10821_s30 + $0x10] sm:$0xff] }
 0x113   : > { %s1039_s24 = scalar_lea.vmem %s12441_s8, %s7969_s28  ;;  %s10330_s7 = smov 96  }
 0x114   : > { %v10853_v6 = vadd.f32 %v1103_v3, %v1099_v0  ;;  %v10855_v7 = vadd.f32 %v1104_v5, %v1100_v2  ;;  %v1107_v10 = vld [vmem:[%s1039_s24] sm:$0xff]  ;;  %v1108_v11 = vld [vmem:[%s1039_s24 + $0x8] sm:$0xff]  ;;  %v10928_v5 = vrot.slane %v7643_v56, %v10914_v59  ;;  %s10328_s24 = smov 104   ;;  %s10331_s20 = smov 8  }
 0x115   : > { %v1109_v12 = vmul.f32 5.656854, %v1107_v10  ;;  %v1110_v13 = vmul.f32 5.656854, %v1108_v11  ;;  %s10878_s1 = scalar_lea.vmem %s12443_s14, %s7973_s17  ;;  %v10933_v11 = vrot.slane %v10924_v1, %v10907_v53  ;;  %s10326_s17 = smov 112  }
 0x116   : > { %v1156_v8 = vsel %vm1155_vm0, %v10853_v6, 0.0  ;;  %v1159_v9 = vsel %vm1155_vm0, %v10855_v7, 0.0  ;;  %s10885_s8 = scalar_lea.vmem %s12444_s3, %s7971_s22  ;;  %s10327_s22 = smov 120  }
 0x117   : > { %1157 = vadd.xlane.f32.xlu0 %v1156_v8  ;;  %v1111_v14 = vadd.f32 %v1109_v12, %v1099_v0  ;;  %v1112_v15 = vadd.f32 %v1110_v13, %v1100_v2  ;;  %v1192_v0 = vrot.slane %v10910_v55, %v10914_v59  ;;  %s12393_s18 = smov 16   ;;  %s12391_s13 = smov 24  }
 0x118   : > { %s1041_s14 = sld [smem:[#allocation4 + %s10638_s26]]  ;;  %s12449_s2 = smov 24  }
 0x119   : > { %v1195_v16 = vsel %vm1155_vm0, %v1111_v14, 0.0  ;;  %v1198_v17 = vsel %vm1155_vm0, %v1112_v15, 0.0  ;;  %s7976_s26 = sshll.u32 %s10832_s11, 5  ;;  %s12457_s3 = sld [smem:[#allocation41_spill]] }
 0x11a   : > { %1196 = vadd.xlane.f32.xlu1 %v1195_v16 }
 0x11b   : > { %1160 = vadd.xlane.f32.xlu0 %v1159_v9 }
 0x11e   : > { %1199 = vadd.xlane.f32.xlu1 %v1198_v17  ;;  %v9604_v17 = vld [vmem:[%s10811_s4] sm:$0xff]   ;;  %p1042_p5 = scmp.lt.s32.totalorder %s1041_s14, 2 }
 0x120   : > { %s12466_s14 = smov (!%p1042_p5, %s1041_s14), 2 }
 0x121   : > { %s7970_s28 = sshll.u32 %s12466_s14, 4 }
 0x1a4   : > { %v1158_v18 = vpop.xlane.xlu0 %1157 }
 0x1a5   : > { %v1163_v19 = vmul.f32 0.03125, %v1158_v18 }
 0x1a7   : > { %v1165_v20 = vsub.f32 %v10853_v6, %v1163_v19  ;;  %v1197_v25 = vpop.xlane.xlu1 %1196 }
 0x1a8   : > { %v1161_v21 = vpop.xlane.xlu0 %1160  ;;  %v1201_v27 = vmul.f32 0.03125, %v1197_v25 }
 0x1a9   : > { %v1164_v22 = vmul.f32 0.03125, %v1161_v21  ;;  %v1167_v23 = vmul.f32 %v1165_v20, %v1165_v20 }
 0x1aa   : > { %v1203_v29 = vsub.f32 %v1111_v14, %v1201_v27  ;;  %v9605_v27 = vld [vmem:[%s10811_s4 + $0x8] sm:$0xff]  }
 0x1ab   : > { %v1166_v24 = vsub.f32 %v10855_v7, %v1164_v22  ;;  %v1169_v26 = vsel %vm1155_vm0, %v1167_v23, 0.0  ;;  %v1200_v30 = vpop.xlane.xlu1 %1199  ;;  %v10948_v23 = vrot.slane %v10924_v1, %v10914_v59 }
 0x1ac   : > { %1170 = vadd.xlane.f32.xlu0 %v1169_v26  ;;  %v1202_v32 = vmul.f32 0.03125, %v1200_v30  ;;  %v1205_v33 = vmul.f32 %v1203_v29, %v1203_v29 }
 0x1ad   : > { %v1168_v28 = vmul.f32 %v1166_v24, %v1166_v24 }
 0x1ae   : > { %v10891_v34 = vsub.f32 %v1112_v15, %v1202_v32  ;;  %v1207_v35 = vsel %vm1155_vm0, %v1205_v33, 0.0 }
 0x1af   : > { %v1172_v31 = vsel %vm1155_vm0, %v1168_v28, 0.0 }
 0x1b0   : > { %1173 = vadd.xlane.f32.xlu1 %v1172_v31  ;;  %1208 = vadd.xlane.f32.xlu0 %v1207_v35  ;;  %v1206_v36 = vmul.f32 %v10891_v34, %v10891_v34 }
 0x1b2   : > { %v1210_v37 = vsel %vm1155_vm0, %v1206_v36, 0.0 }
 0x1b4   : > { %1211 = vadd.xlane.f32.xlu1 %v1210_v37 }
 0x239   : > { %v1171_v41 = vpop.xlane.xlu0 %1170 }
 0x23a   : > { %v1175_v42 = vmul.f32 0.03125, %v1171_v41 }
 0x23c   : > { %v1177_v43 = vadd.f32 1e-05, %v1175_v42 }
 0x23d   : > { %v1174_v44 = vpop.xlane.xlu1 %1173  ;;  %v1209_v48 = vpop.xlane.xlu0 %1208 }
 0x23e   : > { %9754 = vrsqrt.f32 %v1177_v43  ;;  %v1176_v46 = vmul.f32 0.03125, %v1174_v44  ;;  %v1213_v50 = vmul.f32 0.03125, %v1209_v48  ;;  %v10971_v43 = vsub.s32 3, %v10904_v49 }
 0x240   : > { %v1178_v47 = vadd.f32 1e-05, %v1176_v46  ;;  %v1215_v51 = vadd.f32 1e-05, %v1213_v50  ;;  %v1348_v44 = vrot.slane %v10910_v55, %v10971_v43 }
 0x241   : > { %v1212_v52 = vpop.xlane.xlu1 %1211 }
 0x242   : > { %9756 = vrsqrt.f32 %v1178_v47  ;;  %v1214_v54 = vmul.f32 0.03125, %v1212_v52 }
 0x243   : > { %9758 = vrsqrt.f32 %v1215_v51 }
 0x244   : > { %v1216_v57 = vadd.f32 1e-05, %v1214_v54 }
 0x246   : > { %9760 = vrsqrt.f32 %v1216_v57 }
 0x248   : > { %v9755_v58 = vpop.eup %9754 }
 0x249   : > { %v1181_v61 = vmul.f32 %v9755_v58, %v1165_v20 }
 0x24b   : > { %v1187_v3 = vmul.f32 %v1186_v60, %v1181_v61  ;;  %v3114_v4 = vmul.f32 %v10919_v62, %v1181_v61 }
 0x24c   : > { %v9757_v63 = vpop.eup %9756 }
 0x24d   : > { %v1182_v2 = vmul.f32 %v9757_v63, %v1166_v24  ;;  %v9759_v8 = vpop.eup %9758  ;;  %v1193_v13 = vadd.f32 %v1192_v0, %v1187_v3  ;;  %v10936_v15 = vadd.f32 %v10928_v5, %v3114_v4 }
 0x24e   : > { %v1219_v12 = vmul.f32 %v9759_v8, %v1203_v29 }
 0x24f   : > { %v1188_v9 = vmul.f32 %v1186_v60, %v1182_v2  ;;  %v3115_v10 = vmul.f32 %v10919_v62, %v1182_v2 }
 0x250   : > { %v9761_v18 = vpop.eup %9760  ;;  %v2167_v21 = vmul.f32 %v10933_v11, %v1219_v12  ;;  %v1221_v24 = vmul.f32 %v1219_v12, %v1186_v60 }
 0x251   : > { %v1194_v14 = vadd.f32 %v1192_v0, %v1188_v9  ;;  %v10939_v16 = vadd.f32 %v10928_v5, %v3115_v10  ;;  %v1220_v22 = vmul.f32 %v9761_v18, %v10891_v34  ;;  %v10966_v34 = vsub.s32 2, %v10904_v49 }
 0x252   : > { %v10957_v29 = vadd.f32 %v2167_v21, %v10948_v23  ;;  %v1223_v31 = vadd.f32 %v1221_v24, %v1192_v0 }
 0x253   : > { %v1225_v19 = vpack.c.bf16 %v1194_v14, %v1193_v13  ;;  %v3152_v20 = vpack.c.bf16 %v10939_v16, %v10936_v15  ;;  %v1222_v25 = vmul.f32 %v1220_v22, %v1186_v60  ;;  %v2168_v26 = vmul.f32 %v10933_v11, %v1220_v22  ;;  %v9637_v15 = vld [vmem:[%s10869_s27 + $0x78] sm:$0xff]   ;;  %v7597_v16 = vld [vmem:[%s10823_s23 + $0x1] ss:$0 sm:$0xff] }
 0x254   : > { %v1229_v35 = vrot.slane %v10910_v55, %v10966_v34  ;;  %v10995_v60 = vsub.s32 4, %v10904_v49 }
 0x255   : > { %8312 = vmatmul.mubr.msk.bf16.vlgmr.msra.gmra.mrb[0].mxu0 %vm1155_vm0, %v1225_v19  ;;  %v1224_v28 = vadd.f32 %v1222_v25, %v1192_v0  ;;  %v10960_v30 = vadd.f32 %v2168_v26, %v10948_v23 }
 0x256   : > { %8316 = vmatpush3.bf16.msra.mxu0 %v9604_v17  ;;  %8319 = vmatprep.mubr.msk.bf16.mxu0 %vm10325_vm1, %v10324_v39  ;;  %v1354_v61 = vrot.slane %v10910_v55, %v10995_v60 }
 0x257   : > { %8317 = vmatprep.subr.bf16.mxu0 %v10324_v39  ;;  %v2234_v32 = vpack.c.bf16 %v10960_v30, %v10957_v29  ;;  %v1288_v33 = vpack.c.bf16 %v1224_v28, %v1223_v31 }
 0x25a   : > { %8318 = vmatpush3.bf16.msra.mxu0 %v9605_v27 }
 0x25d   : > { %8320 = vmatmul.mubr.msk.bf16.vlgmr.msra.gmra.mrb[4].mxu0 %vm1155_vm0, %v1288_v33  ;;  %v11023_v33 = vld [vmem:[#allocation5 + $0x8] sm:$0xff] }
 0x328   : > { %v1279_v36 = vpop.f32.mrb[0].mxu0 }
 0x329   : > { %v1280_v37 = vadd.f32 %v1279_v36, %v1229_v35  ;;  %v8313_v38 = vpop.f32.mrb[1].mxu0 }
 0x32a   : > { %v1282_v40 = vpop.f32.mrb[2].mxu0 }
 0x32b   : > { %v1286_v41 = vmul.f32 0.35355338, %v1280_v37  ;;  %v8314_v42 = vpop.f32.mrb[3].mxu0  ;;  %v1283_v52 = vadd.f32 %v1282_v40, %v1229_v35  ;;  %v11025_v35 = vld [vmem:[#allocation5] sm:$0xff] }
 0x32d   : > { %8339 = vmatprep.mubr.msk.f32.mxu0 %vm1403_vm2, %v1286_v41  ;;  %v1287_v58 = vmul.f32 0.35355338, %v1283_v52 }
 0x330   : > { %v1338_v45 = vpop.f32.mrb[4].mxu0 }
 0x331   : > { %v8321_v46 = vpop.f32.mrb[5].mxu0  ;;  %v1349_v48 = vadd.f32 %v1348_v44, %v1338_v45 }
 0x332   : > { %v1341_v47 = vpop.f32.mrb[6].mxu0 }
 0x333   : > { %v1350_v50 = vadd.f32 %v1348_v44, %v1341_v47  ;;  %v8322_v51 = vpop.f32.mrb[7].mxu0 }
 0x335   : > { %v9217_v54 = vpack.i.bf16 %v1350_v50, %v1349_v48  ;;  %v8875_v56 = vpack.c.bf16 %v1350_v50, %v1349_v48  ;;  %v11034_v48 = vld [vmem:[#allocation5 + $0x10] sm:$0xff]  ;;  %v11036_v50 = vld [vmem:[#allocation5 + $0x28] sm:$0xff] }
 0x337   : > { %9218 = vrot.lane.b32.xlu1 %v9217_v54, %s10326_s17  ;;  %9213 = vrot.lane.b32.xlu0 %v9217_v54, %s10327_s22 }
 0x338   : > { %8877 = vmatprep.subr.msk.bf16.mxu0 %vm10978_vm3, %v8875_v56 }
 0x339   : > { %8880 = vmatpush3.bf16.xpose.msk.msra.mxu0 %vm10978_vm3, %v8875_v56 }
 0x33b   : > { %9223 = vrot.lane.b32.xlu1 %v9217_v54, %s10328_s24  ;;  %1365 = vrot.lane.b32.xlu0 %v1287_v58, %s10327_s22 }
 0x33f   : > { %1363 = vrot.lane.b32.xlu1 %v1286_v41, %s10327_s22  ;;  %1369 = vrot.lane.b32.xlu0 %v1287_v58, %s10326_s17 }
 0x343   : > { %1367 = vrot.lane.b32.xlu1 %v1286_v41, %s10326_s17  ;;  %1373 = vrot.lane.b32.xlu0 %v1287_v58, %s10328_s24 }
 0x347   : > { %1371 = vrot.lane.b32.xlu1 %v1286_v41, %s10328_s24  ;;  %v11029_v41 = vld [vmem:[#allocation5 + $0x18] sm:$0xff] }
 0x34b   : > { %1356 = vrot.lane.b32.xlu1 %v1354_v61, %s10329_s21  ;;  %v11041_v61 = vld [vmem:[#allocation5 + $0x20] sm:$0xff] }
 0x3a9   : > { %v9219_v63 = vpop.permute.xlu1 %9218  ;;  %v9214_v0 = vpop.permute.xlu0 %9213 }
 0x3aa   : > { %v9221_v2 = vunpack.i.h.bf16 %v9219_v63  ;;  %v9220_v3 = vunpack.i.l.bf16 %v9219_v63  ;;  %v9216_v4 = vunpack.i.h.bf16 %v9214_v0  ;;  %v9215_v8 = vunpack.i.l.bf16 %v9214_v0  ;;  %v11043_v63 = vld [vmem:[#allocation5 + $0x38] sm:$0xff] }
 0x3ac   : > { %v8881_v9 = vpack.c.bf16 %v9216_v4, %v9215_v8  ;;  %v8887_v12 = vpack.c.bf16 %v9221_v2, %v9220_v3 }
 0x3ad   : > { %v9224_v10 = vpop.permute.xlu1 %9223  ;;  %v1366_v27 = vpop.permute.xlu0 %1365 }
 0x3ae   : > { %8883 = vmatprep.subr.msk.bf16.mxu0 %vm10978_vm3, %v8881_v9  ;;  %v9226_v14 = vunpack.i.h.bf16 %v9224_v10  ;;  %v9225_v17 = vunpack.i.l.bf16 %v9224_v10  ;;  %v11049_v10 = vld [vmem:[#allocation5 + $0x30] sm:$0xff] }
 0x3af   : > { %8886 = vmatpush3.bf16.xpose.msk.msra.mxu0 %vm10978_vm3, %v8881_v9 }
 0x3b0   : > { %8889 = vmatprep.subr.msk.bf16.mxu0 %vm10978_vm3, %v8887_v12  ;;  %v8893_v19 = vpack.c.bf16 %v9226_v14, %v9225_v17 }
 0x3b1   : > { %v1364_v13 = vpop.permute.xlu1 %1363  ;;  %v1370_v28 = vpop.permute.xlu0 %1369 }
 0x3b5   : > { %v1368_v18 = vpop.permute.xlu1 %1367  ;;  %v1374_v31 = vpop.permute.xlu0 %1373 }
 0x3b7   : > { %8892 = vmatpush3.bf16.xpose.msk.msra.mxu0 %vm10978_vm3, %v8887_v12 }
 0x3b8   : > { %8895 = vmatprep.subr.msk.bf16.mxu0 %vm10978_vm3, %v8893_v19 }
 0x3b9   : > { %v1372_v21 = vpop.permute.xlu1 %1371 }
 0x3bd   : > { %v1357_v22 = vpop.permute.xlu1 %1356 }
 0x3be   : > { %v1359_v24 = vadd.f32 %v1357_v22, %v1338_v45  ;;  %v1360_v25 = vadd.f32 %v1357_v22, %v1341_v47 }
 0x3bf   : > { %8898 = vmatpush3.bf16.xpose.msk.msra.mxu0 %vm10978_vm3, %v8893_v19 }
 0x3c0   : > { %v9232_v26 = vpack.i.bf16 %v1360_v25, %v1359_v24  ;;  %8395 = vmatprep.subr.bf16.mxu0 %v10324_v39 }
 0x3c6   : > { %8340 = vmatmul.mubr.msk.f32.vlgmr.msra.gmra.mrb[8].mxu0 %vm1403_vm2, %v1287_v58 }
 0x3c7   : > { %8342 = vmatprep.mubr.msk.f32.mxu0 %vm1403_vm2, %v1364_v13 }
 0x3ca   : > { %8343 = vmatmul.mubr.msk.f32.gmra.mrb[10].mxu0 %vm1403_vm2, %v1366_v27 }
 0x3cb   : > { %8345 = vmatprep.mubr.msk.f32.mxu0 %vm1403_vm2, %v1368_v18 }
 0x3ce   : > { %8346 = vmatmul.mubr.msk.f32.gmra.mrb[12].mxu0 %vm1403_vm2, %v1370_v28 }
 0x3cf   : > { %8348 = vmatprep.mubr.msk.f32.mxu0 %vm1403_vm2, %v1372_v21 }
 0x3d2   : > { %8349 = vmatmul.mubr.msk.f32.gmra.mrb[14].mxu0 %vm1403_vm2, %v1374_v31 }
 0x3d3   : > { %8411 = vmatprep.mubr.msk.bf16.mxu0 %vm10325_vm1, %v10324_v39 }
 0x499   : > { %v8341_v36 = vpop.f32.mrb[8].mxu0 }
 0x49a   : > { %v1508_v37 = vadd.f32 %v8341_v36, %v11023_v33  ;;  %v1502_v38 = vpop.f32.mrb[9].mxu0 }
 0x49b   : > { %v1503_v40 = vadd.f32 %v1502_v38, %v11025_v35 }
 0x49c   : > { %v1545_v42 = vsel %vm1541_vm4, %v1508_v37, -inf }
 0x49d   : > { %1546 = vmax.xlane.f32.xlu1 %v1545_v42  ;;  %v8344_v44 = vpop.f32.mrb[10].mxu0  ;;  %v1542_v45 = vsel %vm1541_vm4, %v1503_v40, -inf }
 0x49e   : > { %v1518_v46 = vadd.f32 %v8344_v44, %v11029_v41  ;;  %v1512_v47 = vpop.f32.mrb[11].mxu0  ;;  %1543 = vmax.xlane.f32.xlu0 %v1542_v45 }
 0x49f   : > { %v1513_v52 = vadd.f32 %v1512_v47, %v11034_v48 }
 0x4a0   : > { %v1551_v51 = vsel %vm1541_vm4, %v1518_v46, -inf }
 0x4a1   : > { %v8347_v54 = vpop.f32.mrb[12].mxu0  ;;  %v1548_v4 = vsel %vm1541_vm4, %v1513_v52, -inf }
 0x4a2   : > { %v1528_v56 = vadd.f32 %v8347_v54, %v11036_v50  ;;  %v1522_v58 = vpop.f32.mrb[13].mxu0  ;;  %1552 = vmax.xlane.f32.xlu0 %v1551_v51 }
 0x4a3   : > { %v1523_v2 = vadd.f32 %v1522_v58, %v11041_v61 }
 0x4a4   : > { %v1557_v0 = vsel %vm1541_vm4, %v1528_v56, -inf }
 0x4a5   : > { %1558 = vmax.xlane.f32.xlu1 %v1557_v0  ;;  %v8350_v3 = vpop.f32.mrb[14].mxu0  ;;  %v1554_v14 = vsel %vm1541_vm4, %v1523_v2, -inf }
 0x4a6   : > { %v1538_v8 = vadd.f32 %v8350_v3, %v11043_v63  ;;  %v1532_v9 = vpop.f32.mrb[15].mxu0  ;;  %1549 = vmax.xlane.f32.xlu0 %v1548_v4 }
 0x4a7   : > { %v1533_v13 = vadd.f32 %v1532_v9, %v11049_v10 }
 0x4a8   : > { %v1563_v12 = vsel %vm1541_vm4, %v1538_v8, -inf }
 0x4a9   : > { %1564 = vmax.xlane.f32.xlu1 %v1563_v12  ;;  %v1560_v17 = vsel %vm1541_vm4, %v1533_v13, -inf }
 0x4aa   : > { %1555 = vmax.xlane.f32.xlu0 %v1554_v14 }
 0x4ae   : > { %1561 = vmax.xlane.f32.xlu0 %v1560_v17 }
 0x4ba   : > { %9233 = vrot.lane.b32.xlu1 %v9232_v26, %s10326_s17 }
 0x4be   : > { %9238 = vrot.lane.b32.xlu1 %v9232_v26, %s10328_s24 }
 0x4c2   : > { %9243 = vrot.lane.b32.xlu1 %v9232_v26, %s10330_s7 }
 0x4c4   : > { %9228 = vrot.lane.b32.xlu0 %v9232_v26, %s10327_s22 }
 0x52a   : > { %v1547_v18 = vpop.xlane.xlu1 %1546 }
 0x52b   : > { %v1567_v19 = vsub.f32 %v1508_v37, %v1547_v18  ;;  %v1544_v21 = vpop.xlane.xlu0 %1543 }
 0x52c   : > { %v1566_v22 = vsub.f32 %v1503_v40, %v1544_v21 }
 0x52d   : > { %v1576_v24 = vmul.f32 1.442695, %v1567_v19 }
 0x52e   : > { %v1574_v25 = vmul.f32 1.442695, %v1566_v22 }
 0x52f   : > { %9762 = vpow2.f32 %v1576_v24  ;;  %v1553_v27 = vpop.xlane.xlu0 %1552 }
 0x530   : > { %9764 = vpow2.f32 %v1574_v25  ;;  %v1569_v28 = vsub.f32 %v1518_v46, %v1553_v27 }
 0x532   : > { %v1580_v31 = vmul.f32 1.442695, %v1569_v28  ;;  %v1559_v36 = vpop.xlane.xlu1 %1558 }
 0x533   : > { %v1571_v38 = vsub.f32 %v1528_v56, %v1559_v36  ;;  %v1550_v42 = vpop.xlane.xlu0 %1549 }
 0x534   : > { %9766 = vpow2.f32 %v1580_v31  ;;  %v1568_v44 = vsub.f32 %v1513_v52, %v1550_v42 }
 0x535   : > { %v1584_v45 = vmul.f32 1.442695, %v1571_v38 }
 0x536   : > { %v1578_v47 = vmul.f32 1.442695, %v1568_v44  ;;  %v1565_v51 = vpop.xlane.xlu1 %1564 }
 0x537   : > { %v1573_v26 = vsub.f32 %v1538_v8, %v1565_v51  ;;  %v1556_v54 = vpop.xlane.xlu0 %1555 }
 0x538   : > { %9768 = vpow2.f32 %v1578_v47  ;;  %v1570_v37 = vsub.f32 %v1523_v2, %v1556_v54 }
 0x539   : > { %v11059_v40 = vpop.eup %9762  ;;  %9770 = vpow2.f32 %v1584_v45  ;;  %v1588_v0 = vmul.f32 1.442695, %v1573_v26 }
 0x53a   : > { %v9765_v58 = vpop.eup %9764  ;;  %v1582_v3 = vmul.f32 1.442695, %v1570_v37  ;;  %v9234_v46 = vpop.permute.xlu1 %9233  ;;  %v1593_v56 = vsel %vm1541_vm4, %v11059_v40, 0.0 }
 0x53b   : > { %1594 = vadd.xlane.f32.xlu0 %v1593_v56  ;;  %v1562_v4 = vpop.xlane.xlu0 %1561  ;;  %v1590_v52 = vsel %vm1541_vm4, %v9765_v58, 0.0 }
 0x53c   : > { %9772 = vpow2.f32 %v1582_v3  ;;  %v1572_v9 = vsub.f32 %v1533_v13, %v1562_v4  ;;  %1591 = vadd.xlane.f32.xlu1 %v1590_v52 }
 0x53d   : > { %9774 = vpow2.f32 %v1588_v0 }
 0x53e   : > { %v11064_v8 = vpop.eup %9766  ;;  %v1586_v2 = vmul.f32 1.442695, %v1572_v9  ;;  %v9239_v12 = vpop.permute.xlu1 %9238 }
 0x53f   : > { %v1599_v14 = vsel %vm1541_vm4, %v11064_v8, 0.0  ;;  %v9229_v44 = vpop.permute.xlu0 %9228 }
 0x540   : > { %1600 = vadd.xlane.f32.xlu0 %v1599_v14  ;;  %9776 = vpow2.f32 %v1586_v2 }
 0x542   : > { %v11068_v17 = vpop.eup %9768  ;;  %v9244_v18 = vpop.permute.xlu1 %9243 }
 0x543   : > { %v1596_v19 = vsel %vm1541_vm4, %v11068_v17, 0.0  ;;  %v9246_v21 = vunpack.i.h.bf16 %v9244_v18  ;;  %v9245_v22 = vunpack.i.l.bf16 %v9244_v18  ;;  %v11072_v13 = vpop.eup %9770 }
 0x544   : > { %1597 = vadd.xlane.f32.xlu0 %v1596_v19  ;;  %v1605_v27 = vsel %vm1541_vm4, %v11072_v13, 0.0 }
 0x545   : > { %v8899_v24 = vpack.c.bf16 %v9246_v21, %v9245_v22 }
 0x546   : > { %v11074_v25 = vpop.eup %9772 }
 0x547   : > { %8900 = vmatprep.subr.bf16.mxu1 %v8899_v24  ;;  %v1602_v28 = vsel %vm1541_vm4, %v11074_v25, 0.0  ;;  %v11080_v31 = vpop.eup %9774 }
 0x548   : > { %8902 = vmatpush3.bf16.msra.mxu1 %v8899_v24  ;;  %1606 = vadd.xlane.f32.xlu0 %v1605_v27  ;;  %v1611_v36 = vsel %vm1541_vm4, %v11080_v31, 0.0 }
 0x549   : > { %1603 = vadd.xlane.f32.xlu1 %v1602_v28 }
 0x54a   : > { %v9777_v38 = vpop.eup %9776 }
 0x54b   : > { %v1608_v42 = vsel %vm1541_vm4, %v9777_v38, 0.0 }
 0x54c   : > { %1612 = vadd.xlane.f32.xlu0 %v1611_v36 }
 0x550   : > { %1609 = vadd.xlane.f32.xlu0 %v1608_v42 }
 0x55a   : > { %9253 = vrot.lane.b32.xlu1 %v9234_v46, %s10330_s7 }
 0x55e   : > { %9258 = vrot.lane.b32.xlu1 %v9239_v12, %s10330_s7 }
 0x566   : > { %9248 = vrot.lane.b32.xlu0 %v9229_v44, %s10330_s7 }
 0x5c8   : > { %v1595_v45 = vpop.xlane.xlu0 %1594 }
 0x5c9   : > { %v1592_v47 = vpop.xlane.xlu1 %1591 }
 0x5ca   : > { %9778 = vrcp.f32 %v1592_v47 }
 0x5cb   : > { %9780 = vrcp.f32 %v1595_v45 }
 0x5cd   : > { %v1601_v51 = vpop.xlane.xlu0 %1600 }
 0x5d1   : > { %v1598_v26 = vpop.xlane.xlu0 %1597 }
 0x5d2   : > { %9782 = vrcp.f32 %v1598_v26 }
 0x5d3   : > { %9784 = vrcp.f32 %v1601_v51 }
 0x5d4   : > { %v9779_v54 = vpop.eup %9778 }
 0x5d5   : > { %v1607_v37 = vpop.xlane.xlu0 %1606  ;;  %v1630_v0 = vmul.f32 %v9779_v54, %v9765_v58  ;;  %v9781_v27 = vpop.eup %9780 }
 0x5d6   : > { %v1604_v3 = vpop.xlane.xlu1 %1603  ;;  %v1631_v36 = vmul.f32 %v9781_v27, %v11059_v40 }
 0x5d7   : > { %8367 = vmatprep.mubr.msk.f32.mxu1 %vm1541_vm4, %v1630_v0  ;;  %9786 = vrcp.f32 %v1604_v3 }
 0x5d8   : > { %9788 = vrcp.f32 %v1607_v37 }
 0x5d9   : > { %v1613_v56 = vpop.xlane.xlu0 %1612 }
 0x5da   : > { %v9254_v4 = vpop.permute.xlu1 %9253 }
 0x5db   : > { %v9256_v9 = vunpack.i.h.bf16 %v9254_v4  ;;  %v9255_v2 = vunpack.i.l.bf16 %v9254_v4 }
 0x5dc   : > { %v9783_v28 = vpop.eup %9782 }
 0x5dd   : > { %v1610_v52 = vpop.xlane.xlu0 %1609  ;;  %v8907_v24 = vpack.c.bf16 %v9256_v9, %v9255_v2  ;;  %v9785_v42 = vpop.eup %9784  ;;  %v1632_v44 = vmul.f32 %v9783_v28, %v11068_v17 }
 0x5de   : > { %v9259_v18 = vpop.permute.xlu1 %9258  ;;  %9790 = vrcp.f32 %v1610_v52  ;;  %v1633_v47 = vmul.f32 %v9785_v42, %v11064_v8  ;;  %v9606_v8 = vld [vmem:[%s10802_s25 + $0x10] sm:$0xff]  }
 0x5df   : > { %v9261_v21 = vunpack.i.h.bf16 %v9259_v18  ;;  %v9260_v22 = vunpack.i.l.bf16 %v9259_v18  ;;  %9792 = vrcp.f32 %v1613_v56 }
 0x5e1   : > { %v9249_v46 = vpop.permute.xlu0 %9248  ;;  %v8911_v58 = vpack.c.bf16 %v9261_v21, %v9260_v22  ;;  %v9787_v45 = vpop.eup %9786 }
 0x5e2   : > { %v9251_v12 = vunpack.i.h.bf16 %v9249_v46  ;;  %v9250_v14 = vunpack.i.l.bf16 %v9249_v46  ;;  %v9789_v51 = vpop.eup %9788  ;;  %v1634_v26 = vmul.f32 %v9787_v45, %v11074_v25 }
 0x5e3   : > { %v1635_v40 = vmul.f32 %v9789_v51, %v11072_v13  ;;  %v9607_v13 = vld [vmem:[%s10802_s25 + $0x18] sm:$0xff]  }
 0x5e4   : > { %v8903_v19 = vpack.c.bf16 %v9251_v12, %v9250_v14 }
 0x5e6   : > { %8904 = vmatprep.subr.bf16.mxu1 %v8903_v19 }
 0x5e7   : > { %8906 = vmatpush3.bf16.msra.mxu1 %v8903_v19 }
 0x5e8   : > { %8908 = vmatprep.subr.bf16.mxu1 %v8907_v24  ;;  %v9791_v54 = vpop.eup %9790 }
 0x5e9   : > { %v9793_v17 = vpop.eup %9792  ;;  %v1636_v37 = vmul.f32 %v9791_v54, %v9777_v38  ;;  %v11122_v54 = vsub.s32 5, %v10904_v49 }
 0x5ea   : > { %v1637_v0 = vmul.f32 %v9793_v17, %v11080_v31 }
 0x5eb   : > { %8910 = vmatpush3.bf16.msra.mxu1 %v8907_v24 }
 0x5ec   : > { %8912 = vmatprep.subr.bf16.mxu1 %v8911_v58 }
 0x5ef   : > { %8914 = vmatpush3.bf16.msra.mxu1 %v8911_v58 }
 0x5f0   : > { %8379 = vmatprep.subr.bf16.mxu1 %v10324_v39 }
 0x5f2   : > { %8368 = vmatmul.mubr.msk.f32.vlgmr.msra.gmra.mrb[0].mxu1 %vm1541_vm4, %v1631_v36 }
 0x5f3   : > { %8370 = vmatprep.mubr.msk.f32.mxu1 %vm1541_vm4, %v1632_v44  ;;  %8380 = vmatpush3.bf16.msra.mxu1 %v9606_v8 }
 0x5f4   : > { %8381 = vmatprep.subr.bf16.mxu1 %v10324_v39 }
 0x5f6   : > { %8371 = vmatmul.mubr.msk.f32.gmra.mrb[2].mxu1 %vm1541_vm4, %v1633_v47 }
 0x5f7   : > { %8373 = vmatprep.mubr.msk.f32.mxu1 %vm1541_vm4, %v1634_v26  ;;  %8382 = vmatpush3.bf16.msra.mxu1 %v9607_v13 }
 0x5f8   : > { %8387 = vmatprep.subr.bf16.mxu1 %v10324_v39 }
 0x5fa   : > { %8374 = vmatmul.mubr.msk.f32.gmra.mrb[4].mxu1 %vm1541_vm4, %v1635_v40  ;;  %v1885_v40 = vrot.slane %v10910_v55, %v11122_v54 }
 0x5fb   : > { %8376 = vmatprep.mubr.msk.f32.mxu1 %vm1541_vm4, %v1636_v37 }
 0x5fe   : > { %8377 = vmatmul.mubr.msk.f32.gmra.mrb[6].mxu1 %vm1541_vm4, %v1637_v0 }
 0x5ff   : > { %8383 = vmatprep.mubr.msk.bf16.mxu1 %vm10325_vm1, %v10324_v39 }
 0x6c5   : > { %v8369_v25 = vpop.f32.mrb[0].mxu1 }
 0x6c6   : > { %v1752_v3 = vpop.f32.mrb[1].mxu1 }
 0x6c9   : > { %v8372_v38 = vpop.f32.mrb[2].mxu1 }
 0x6ca   : > { %v1762_v56 = vpop.f32.mrb[3].mxu1 }
 0x6cb   : > { %v9262_v4 = vpack.i.bf16 %v8372_v38, %v1762_v56 }
 0x6cd   : > { %9263 = vrot.lane.b32.xlu1 %v9262_v4, %s10331_s20  ;;  %v8375_v31 = vpop.f32.mrb[4].mxu1 }
 0x6ce   : > { %v1772_v52 = vpop.f32.mrb[5].mxu1 }
 0x6cf   : > { %v9267_v46 = vpack.i.bf16 %v8375_v31, %v1772_v52 }
 0x6d1   : > { %9268 = vrot.lane.b32.xlu1 %v9267_v46, %s12393_s18  ;;  %v8378_v9 = vpop.f32.mrb[6].mxu1 }
 0x6d2   : > { %v1782_v2 = vpop.f32.mrb[7].mxu1 }
 0x6d3   : > { %v9272_v12 = vpack.i.bf16 %v8378_v9, %v1782_v2 }
 0x6d5   : > { %9273 = vrot.lane.b32.xlu1 %v9272_v12, %s12391_s13 }
 0x73f   : > { %v9264_v14 = vpop.permute.xlu1 %9263 }
 0x740   : > { %v9266_v19 = vunpack.i.h.bf16 %v9264_v14  ;;  %v9265_v21 = vunpack.i.l.bf16 %v9264_v14 }
 0x742   : > { %v1816_v27 = vsel %vm1403_vm2, %v8369_v25, %v9266_v19  ;;  %v1815_v28 = vsel %vm1403_vm2, %v1752_v3, %v9265_v21 }
 0x743   : > { %v9269_v18 = vpop.permute.xlu1 %9268 }
 0x744   : > { %v9271_v22 = vunpack.i.h.bf16 %v9269_v18  ;;  %v9270_v24 = vunpack.i.l.bf16 %v9269_v18 }
 0x746   : > { %v1819_v44 = vsel %vm1817_vm5, %v1816_v27, %v9271_v22  ;;  %v1818_v45 = vsel %vm1817_vm5, %v1815_v28, %v9270_v24  ;;  %v9608_v22 = vld [vmem:[%s10814_s19] sm:$0xff]   ;;  %v9609_v24 = vld [vmem:[%s10814_s19 + $0x8] sm:$0xff]   ;;  %v9612_v28 = vld [vmem:[%s10869_s27 + $0x10] sm:$0xff]  }
 0x747   : > { %v9274_v58 = vpop.permute.xlu1 %9273  ;;  %v9611_v27 = vld [vmem:[%s10869_s27 + $0x8] sm:$0xff]  }
 0x748   : > { %v9276_v36 = vunpack.i.h.bf16 %v9274_v58  ;;  %v9275_v42 = vunpack.i.l.bf16 %v9274_v58  ;;  %v9610_v58 = vld [vmem:[%s10869_s27] sm:$0xff]  }
 0x749   : > { %8396 = vmatpush3.bf16.msra.mxu0 %v9610_v58 }
 0x74a   : > { %v1822_v47 = vsel %vm1820_vm6, %v1819_v44, %v9276_v36  ;;  %v1821_v51 = vsel %vm1820_vm6, %v1818_v45, %v9275_v42  ;;  %8397 = vmatprep.subr.bf16.mxu0 %v10324_v39  ;;  %v9613_v36 = vld [vmem:[%s10869_s27 + $0x18] sm:$0xff]   ;;  %v9614_v42 = vld [vmem:[%s10869_s27 + $0x20] sm:$0xff]   ;;  %v9615_v44 = vld [vmem:[%s10869_s27 + $0x28] sm:$0xff]  }
 0x74b   : > { %v1823_v26 = vpack.c.bf16 %v1822_v47, %v1821_v51 }
 0x74d   : > { %8384 = vmatmul.mubr.msk.bf16.vlgmr.msra.gmra.mrb[8].mxu1 %vm1155_vm0, %v1823_v26  ;;  %8398 = vmatpush3.bf16.msra.mxu0 %v9611_v27 }
 0x74e   : > { %8391 = vmatprep.mubr.msk.bf16.mxu1 %vm10325_vm1, %v10324_v39  ;;  %8388 = vmatpush3.bf16.msra.mxu1 %v9608_v22 }
 0x74f   : > { %8389 = vmatprep.subr.bf16.mxu1 %v10324_v39  ;;  %8399 = vmatprep.subr.bf16.mxu0 %v10324_v39 }
 0x751   : > { %8400 = vmatpush3.bf16.msra.mxu0 %v9612_v28 }
 0x752   : > { %8390 = vmatpush3.bf16.msra.mxu1 %v9609_v24  ;;  %8401 = vmatprep.subr.bf16.mxu0 %v10324_v39 }
 0x753   : > { %8415 = vmatprep.subr.bf16.mxu1 %v10324_v39 }
 0x755   : > { %8402 = vmatpush3.bf16.msra.mxu0 %v9613_v36 }
 0x756   : > { %8403 = vmatprep.subr.bf16.mxu0 %v10324_v39 }
 0x759   : > { %8404 = vmatpush3.bf16.msra.mxu0 %v9614_v42  ;;  %v7520_v42 = vld [vmem:[%s10821_s30 + $0x8] ss:$0 sm:$0xff] }
 0x75a   : > { %8405 = vmatprep.subr.bf16.mxu0 %v10324_v39 }
 0x75d   : > { %8406 = vmatpush3.bf16.msra.mxu0 %v9615_v44 }
 0x75e   : > { %8407 = vmatprep.subr.bf16.mxu0 %v10324_v39 }
 0x820   : > { %v1873_v17 = vpop.f32.mrb[8].mxu1 }
 0x821   : > { %v1880_v37 = vadd.f32 %v1873_v17, %v10853_v6  ;;  %v8385_v0 = vpop.f32.mrb[9].mxu1 }
 0x822   : > { %v1876_v8 = vpop.f32.mrb[10].mxu1 }
 0x823   : > { %v11127_v25 = vadd.f32 %v1885_v40, %v1880_v37  ;;  %v1881_v3 = vadd.f32 %v1876_v8, %v10855_v7  ;;  %v8386_v13 = vpop.f32.mrb[11].mxu1  ;;  %v11157_v37 = vsub.s32 6, %v10904_v49 }
 0x824   : > { %v11162_v13 = vsub.s32 7, %v10904_v49  ;;  %v9617_v49 = vld [vmem:[%s10869_s27 + $0x38] sm:$0xff]  }
 0x825   : > { %v11130_v38 = vadd.f32 %v1885_v40, %v1881_v3  ;;  %v1888_v56 = vsel %vm1155_vm0, %v11127_v25, 0.0  ;;  %v1917_v8 = vrot.slane %v10910_v55, %v11157_v37 }
 0x826   : > { %1889 = vadd.xlane.f32.xlu0 %v1888_v56 }
 0x827   : > { %v1891_v4 = vsel %vm1155_vm0, %v11130_v38, 0.0 }
 0x828   : > { %1892 = vadd.xlane.f32.xlu1 %v1891_v4 }
 0x8b3   : > { %v1890_v31 = vpop.xlane.xlu0 %1889 }
 0x8b4   : > { %v1894_v52 = vmul.f32 0.03125, %v1890_v31 }
 0x8b5   : > { %v1893_v46 = vpop.xlane.xlu1 %1892 }
 0x8b6   : > { %v1896_v9 = vsub.f32 %v11127_v25, %v1894_v52  ;;  %v1895_v2 = vmul.f32 0.03125, %v1893_v46  ;;  %v1923_v52 = vrot.slane %v10910_v55, %v11162_v13 }
 0x8b8   : > { %v1897_v12 = vsub.f32 %v11130_v38, %v1895_v2  ;;  %v1898_v14 = vmul.f32 %v1896_v9, %v1896_v9 }
 0x8ba   : > { %v1900_v18 = vsel %vm1155_vm0, %v1898_v14, 0.0  ;;  %v1899_v19 = vmul.f32 %v1897_v12, %v1897_v12 }
 0x8bb   : > { %1901 = vadd.xlane.f32.xlu0 %v1900_v18 }
 0x8bc   : > { %v1903_v21 = vsel %vm1155_vm0, %v1899_v19, 0.0 }
 0x8bf   : > { %1904 = vadd.xlane.f32.xlu0 %v1903_v21 }
 0x948   : > { %v1902_v45 = vpop.xlane.xlu0 %1901 }
 0x949   : > { %v1906_v47 = vmul.f32 0.03125, %v1902_v45 }
 0x94b   : > { %v1908_v51 = vadd.f32 1e-05, %v1906_v47 }
 0x94c   : > { %v1905_v26 = vpop.xlane.xlu0 %1904 }
 0x94d   : > { %9794 = vrsqrt.f32 %v1908_v51  ;;  %v1907_v40 = vmul.f32 0.03125, %v1905_v26 }
 0x94f   : > { %v1909_v17 = vadd.f32 1e-05, %v1907_v40 }
 0x951   : > { %9796 = vrsqrt.f32 %v1909_v17 }
 0x957   : > { %v9795_v0 = vpop.eup %9794 }
 0x958   : > { %v1912_v3 = vmul.f32 %v9795_v0, %v1896_v9  ;;  %v9616_v9 = vld [vmem:[%s10869_s27 + $0x30] sm:$0xff]  }
 0x959   : > { %8408 = vmatpush3.bf16.msra.mxu0 %v9616_v9  ;;  %v9618_v9 = vld [vmem:[%s10802_s25 + $0x20] sm:$0xff]  }
 0x95a   : > { %v1918_v4 = vmul.f32 %v1917_v8, %v1912_v3  ;;  %8409 = vmatprep.subr.bf16.mxu0 %v10324_v39 }
 0x95b   : > { %v9797_v56 = vpop.eup %9796 }
 0x95c   : > { %v1913_v31 = vmul.f32 %v9797_v56, %v1897_v12  ;;  %v1924_v2 = vadd.f32 %v1923_v52, %v1918_v4  ;;  %v7516_v12 = vld [vmem:[%s10823_s23] ss:$0 sm:$0xff] }
 0x95d   : > { %8410 = vmatpush3.bf16.msra.mxu0 %v9617_v49  ;;  %v9619_v49 = vld [vmem:[%s10802_s25 + $0x28] sm:$0xff]  }
 0x95e   : > { %v1919_v46 = vmul.f32 %v1917_v8, %v1913_v31 }
 0x960   : > { %v1925_v14 = vadd.f32 %v1923_v52, %v1919_v46 }
 0x962   : > { %v1926_v18 = vpack.c.bf16 %v1925_v14, %v1924_v2 }
 0x964   : > { %8392 = vmatmul.mubr.msk.bf16.vlgmr.msra.gmra.mrb[12].mxu1 %vm1155_vm0, %v1926_v18 }
 0x965   : > { %8419 = vmatprep.mubr.msk.bf16.mxu1 %vm10325_vm1, %v10324_v39  ;;  %8416 = vmatpush3.bf16.msra.mxu1 %v9618_v9 }
 0x966   : > { %8417 = vmatprep.subr.bf16.mxu1 %v10324_v39 }
 0x969   : > { %8418 = vmatpush3.bf16.msra.mxu1 %v9619_v49 }
 0x96a   : > { %8423 = vmatprep.subr.bf16.mxu1 %v10324_v39 }
 0xa37   : > { %v1982_v19 = vpop.f32.mrb[12].mxu1 }
 0xa38   : > { %v1983_v21 = vadd.f32 %v7516_v12, %v1982_v19  ;;  %v8393_v55 = vpop.f32.mrb[13].mxu1 }
 0xa39   : > { %v1985_v22 = vpop.f32.mrb[14].mxu1 }
 0xa3a   : > { %v1986_v24 = vadd.f32 %v7516_v12, %v1985_v22  ;;  %v8394_v58 = vpop.f32.mrb[15].mxu1  ;;  %v1989_v27 = vmax.f32 %v1983_v21, 0.0 }
 0xa3c   : > { %v1990_v28 = vmax.f32 %v1986_v24, 0.0 }
 0xa3e   : > { %v1991_v36 = vpack.c.bf16 %v1990_v28, %v1989_v27 }
 0xa40   : > { %8412 = vmatmul.mubr.bf16.vlgmr.msra.gmra.mrb[16].mxu0 %v1991_v36 }
 0xb13   : > { %v2078_v44 = vpop.f32.mrb[16].mxu0 }
 0xb14   : > { %v2079_v45 = vadd.f32 %v7520_v42, %v2078_v44  ;;  %v8413_v47 = vpop.f32.mrb[17].mxu0 }
 0xb15   : > { %v2081_v51 = vpop.f32.mrb[18].mxu0 }
 0xb16   : > { %v11175_v26 = vadd.f32 %v2079_v45, %v11127_v25  ;;  %v2082_v40 = vadd.f32 %v7520_v42, %v2081_v51  ;;  %v8414_v17 = vpop.f32.mrb[19].mxu0  ;;  %v9620_v51 = vld [vmem:[%s10811_s4 + $0x10] sm:$0xff]  }
 0xb17   : > { %v9621_v17 = vld [vmem:[%s10811_s4 + $0x18] sm:$0xff]  }
 0xb18   : > { %v11178_v0 = vadd.f32 %v2082_v40, %v11130_v38  ;;  %v2129_v8 = vsel %vm1155_vm0, %v11175_v26, 0.0 }
 0xb19   : > { %2130 = vadd.xlane.f32.xlu0 %v2129_v8 }
 0xb1a   : > { %v2132_v3 = vsel %vm1155_vm0, %v11178_v0, 0.0 }
 0xb1b   : > { %2133 = vadd.xlane.f32.xlu1 %v2132_v3 }
 0xba6   : > { %v2131_v56 = vpop.xlane.xlu0 %2130 }
 0xba7   : > { %v2135_v4 = vmul.f32 0.03125, %v2131_v56 }
 0xba8   : > { %v2134_v31 = vpop.xlane.xlu1 %2133 }
 0xba9   : > { %v2137_v25 = vsub.f32 %v11175_v26, %v2135_v4  ;;  %v2136_v52 = vmul.f32 0.03125, %v2134_v31 }
 0xbab   : > { %v2138_v46 = vsub.f32 %v11178_v0, %v2136_v52  ;;  %v2139_v38 = vmul.f32 %v2137_v25, %v2137_v25 }
 0xbad   : > { %v2141_v2 = vsel %vm1155_vm0, %v2139_v38, 0.0  ;;  %v2140_v14 = vmul.f32 %v2138_v46, %v2138_v46 }
 0xbae   : > { %2142 = vadd.xlane.f32.xlu0 %v2141_v2 }
 0xbaf   : > { %v2144_v18 = vsel %vm1155_vm0, %v2140_v14, 0.0 }
 0xbb0   : > { %2145 = vadd.xlane.f32.xlu1 %v2144_v18 }
 0xc3b   : > { %v2143_v12 = vpop.xlane.xlu0 %2142 }
 0xc3c   : > { %v2147_v19 = vmul.f32 0.03125, %v2143_v12 }
 0xc3d   : > { %v2146_v21 = vpop.xlane.xlu1 %2145 }
 0xc3e   : > { %v2149_v55 = vadd.f32 1e-05, %v2147_v19  ;;  %v2148_v22 = vmul.f32 0.03125, %v2146_v21 }
 0xc40   : > { %9798 = vrsqrt.f32 %v2149_v55  ;;  %v2150_v24 = vadd.f32 1e-05, %v2148_v22 }
 0xc42   : > { %9800 = vrsqrt.f32 %v2150_v24 }
 0xc4a   : > { %v9799_v58 = vpop.eup %9798 }
 0xc4b   : > { %v2153_v27 = vmul.f32 %v9799_v58, %v2137_v25  ;;  %v2294_v25 = vrot.slane %v10924_v1, %v10971_v43 }
 0xc4c   : > { %v9801_v28 = vpop.eup %9800 }
 0xc4d   : > { %v2159_v36 = vmul.f32 %v10933_v11, %v2153_v27  ;;  %v2154_v42 = vmul.f32 %v9801_v28, %v2138_v46 }
 0xc4f   : > { %v2160_v44 = vmul.f32 %v10933_v11, %v2154_v42  ;;  %v2165_v45 = vadd.f32 %v10948_v23, %v2159_v36  ;;  %v2175_v11 = vrot.slane %v10924_v1, %v10966_v34  ;;  %v11225_v1 = vld [vmem:[%s10821_s30 + $0x10] sm:$0xff] }
 0xc50   : > { %v2300_v49 = vrot.slane %v11225_v1, %v10995_v60 }
 0xc51   : > { %v2166_v47 = vadd.f32 %v10948_v23, %v2160_v44 }
 0xc53   : > { %v2171_v40 = vpack.c.bf16 %v2166_v47, %v2165_v45 }
 0xc55   : > { %8420 = vmatmul.mubr.msk.bf16.vlgmr.msra.gmra.mrb[16].mxu1 %vm1155_vm0, %v2171_v40 }
 0xc56   : > { %8424 = vmatpush3.bf16.msra.mxu1 %v9620_v51  ;;  %8427 = vmatprep.mubr.msk.bf16.mxu1 %vm10325_vm1, %v10324_v39 }
 0xc57   : > { %8425 = vmatprep.subr.bf16.mxu1 %v10324_v39 }
 0xc5a   : > { %8426 = vmatpush3.bf16.msra.mxu1 %v9621_v17 }
 0xc5d   : > { %8428 = vmatmul.mubr.msk.bf16.vlgmr.msra.gmra.mrb[20].mxu1 %vm1155_vm0, %v2234_v32 }
 0xd28   : > { %v2225_v23 = vpop.f32.mrb[16].mxu1 }
 0xd29   : > { %v2226_v8 = vadd.f32 %v2225_v23, %v2175_v11  ;;  %v8421_v3 = vpop.f32.mrb[17].mxu1 }
 0xd2a   : > { %v2228_v56 = vpop.f32.mrb[18].mxu1 }
 0xd2b   : > { %v2232_v4 = vmul.f32 0.35355338, %v2226_v8  ;;  %v8422_v31 = vpop.f32.mrb[19].mxu1  ;;  %v2229_v2 = vadd.f32 %v2228_v56, %v2175_v11 }
 0xd2d   : > { %8447 = vmatprep.mubr.msk.f32.mxu1 %vm1403_vm2, %v2232_v4  ;;  %v2233_v9 = vmul.f32 0.35355338, %v2229_v2 }
 0xd30   : > { %v2284_v52 = vpop.f32.mrb[20].mxu1 }
 0xd31   : > { %v8429_v46 = vpop.f32.mrb[21].mxu1  ;;  %v2295_v29 = vadd.f32 %v2294_v25, %v2284_v52 }
 0xd32   : > { %v2287_v38 = vpop.f32.mrb[22].mxu1 }
 0xd33   : > { %v2296_v30 = vadd.f32 %v2294_v25, %v2287_v38  ;;  %v8430_v32 = vpop.f32.mrb[23].mxu1 }
 0xd35   : > { %v9282_v14 = vpack.i.bf16 %v2296_v30, %v2295_v29  ;;  %v8915_v18 = vpack.c.bf16 %v2296_v30, %v2295_v29 }
 0xd37   : > { %9283 = vrot.lane.b32.xlu1 %v9282_v14, %s10326_s17  ;;  %9278 = vrot.lane.b32.xlu0 %v9282_v14, %s10327_s22 }
 0xd38   : > { %8917 = vmatprep.subr.msk.bf16.mxu1 %vm10978_vm3, %v8915_v18 }
 0xd39   : > { %8920 = vmatpush3.bf16.xpose.msk.msra.mxu1 %vm10978_vm3, %v8915_v18 }
 0xd3b   : > { %9288 = vrot.lane.b32.xlu1 %v9282_v14, %s10328_s24  ;;  %2311 = vrot.lane.b32.xlu0 %v2233_v9, %s10327_s22 }
 0xd3f   : > { %2309 = vrot.lane.b32.xlu1 %v2232_v4, %s10327_s22  ;;  %2315 = vrot.lane.b32.xlu0 %v2233_v9, %s10326_s17 }
 0xd43   : > { %2313 = vrot.lane.b32.xlu1 %v2232_v4, %s10326_s17  ;;  %2319 = vrot.lane.b32.xlu0 %v2233_v9, %s10328_s24 }
 0xd47   : > { %2317 = vrot.lane.b32.xlu1 %v2232_v4, %s10328_s24 }
 0xd4b   : > { %2302 = vrot.lane.b32.xlu1 %v2300_v49, %s10329_s21 }
 0xda9   : > { %v9284_v12 = vpop.permute.xlu1 %9283  ;;  %v9279_v19 = vpop.permute.xlu0 %9278 }
 0xdaa   : > { %v9286_v21 = vunpack.i.h.bf16 %v9284_v12  ;;  %v9285_v55 = vunpack.i.l.bf16 %v9284_v12  ;;  %v9281_v22 = vunpack.i.h.bf16 %v9279_v19  ;;  %v9280_v24 = vunpack.i.l.bf16 %v9279_v19 }
 0xdac   : > { %v8921_v58 = vpack.c.bf16 %v9281_v22, %v9280_v24  ;;  %v8927_v28 = vpack.c.bf16 %v9286_v21, %v9285_v55 }
 0xdad   : > { %v9289_v27 = vpop.permute.xlu1 %9288  ;;  %v2312_v8 = vpop.permute.xlu0 %2311 }
 0xdae   : > { %8923 = vmatprep.subr.msk.bf16.mxu1 %vm10978_vm3, %v8921_v58  ;;  %v9291_v42 = vunpack.i.h.bf16 %v9289_v27  ;;  %v9290_v44 = vunpack.i.l.bf16 %v9289_v27 }
 0xdaf   : > { %8926 = vmatpush3.bf16.xpose.msk.msra.mxu1 %vm10978_vm3, %v8921_v58 }
 0xdb0   : > { %8929 = vmatprep.subr.msk.bf16.mxu1 %vm10978_vm3, %v8927_v28  ;;  %v8933_v47 = vpack.c.bf16 %v9291_v42, %v9290_v44 }
 0xdb1   : > { %v2310_v36 = vpop.permute.xlu1 %2309  ;;  %v2316_v3 = vpop.permute.xlu0 %2315 }
 0xdb5   : > { %v2314_v45 = vpop.permute.xlu1 %2313  ;;  %v2320_v56 = vpop.permute.xlu0 %2319 }
 0xdb7   : > { %8932 = vmatpush3.bf16.xpose.msk.msra.mxu1 %vm10978_vm3, %v8927_v28 }
 0xdb8   : > { %8935 = vmatprep.subr.msk.bf16.mxu1 %vm10978_vm3, %v8933_v47 }
 0xdb9   : > { %v2318_v51 = vpop.permute.xlu1 %2317 }
 0xdbd   : > { %v2303_v40 = vpop.permute.xlu1 %2302 }
 0xdbe   : > { %v2305_v17 = vadd.f32 %v2303_v40, %v2284_v52  ;;  %v2306_v11 = vadd.f32 %v2303_v40, %v2287_v38 }
 0xdbf   : > { %8938 = vmatpush3.bf16.xpose.msk.msra.mxu1 %vm10978_vm3, %v8933_v47 }
 0xdc0   : > { %v9297_v23 = vpack.i.bf16 %v2306_v11, %v2305_v17  ;;  %8503 = vmatprep.subr.bf16.mxu1 %v10324_v39 }
 0xdc6   : > { %8448 = vmatmul.mubr.msk.f32.vlgmr.msra.gmra.mrb[24].mxu1 %vm1403_vm2, %v2233_v9 }
 0xdc7   : > { %8450 = vmatprep.mubr.msk.f32.mxu1 %vm1403_vm2, %v2310_v36 }
 0xdca   : > { %8451 = vmatmul.mubr.msk.f32.gmra.mrb[26].mxu1 %vm1403_vm2, %v2312_v8 }
 0xdcb   : > { %8453 = vmatprep.mubr.msk.f32.mxu1 %vm1403_vm2, %v2314_v45 }
 0xdce   : > { %8454 = vmatmul.mubr.msk.f32.gmra.mrb[28].mxu1 %vm1403_vm2, %v2316_v3 }
 0xdcf   : > { %8456 = vmatprep.mubr.msk.f32.mxu1 %vm1403_vm2, %v2318_v51 }
 0xdd2   : > { %8457 = vmatmul.mubr.msk.f32.gmra.mrb[30].mxu1 %vm1403_vm2, %v2320_v56 }
 0xdd3   : > { %8519 = vmatprep.mubr.msk.bf16.mxu1 %vm10325_vm1, %v10324_v39 }
 0xe99   : > { %v8449_v4 = vpop.f32.mrb[24].mxu1 }
 0xe9a   : > { %v2453_v31 = vadd.f32 %v8449_v4, %v11023_v33  ;;  %v2447_v25 = vpop.f32.mrb[25].mxu1 }
 0xe9b   : > { %v2448_v52 = vadd.f32 %v2447_v25, %v11025_v35 }
 0xe9c   : > { %v2489_v46 = vsel %vm1541_vm4, %v2453_v31, -inf }
 0xe9d   : > { %2490 = vmax.xlane.f32.xlu1 %v2489_v46  ;;  %v8452_v38 = vpop.f32.mrb[26].mxu1  ;;  %v2486_v29 = vsel %vm1541_vm4, %v2448_v52, -inf }
 0xe9e   : > { %v2463_v30 = vadd.f32 %v8452_v38, %v11029_v41  ;;  %v2457_v32 = vpop.f32.mrb[27].mxu1  ;;  %2487 = vmax.xlane.f32.xlu0 %v2486_v29 }
 0xe9f   : > { %v2458_v14 = vadd.f32 %v2457_v32, %v11034_v48 }
 0xea0   : > { %v2495_v2 = vsel %vm1541_vm4, %v2463_v30, -inf }
 0xea1   : > { %v8455_v18 = vpop.f32.mrb[28].mxu1  ;;  %v2492_v19 = vsel %vm1541_vm4, %v2458_v14, -inf }
 0xea2   : > { %v2473_v33 = vadd.f32 %v8455_v18, %v11036_v50  ;;  %v2467_v9 = vpop.f32.mrb[29].mxu1  ;;  %2496 = vmax.xlane.f32.xlu0 %v2495_v2 }
 0xea3   : > { %v2468_v49 = vadd.f32 %v2467_v9, %v11041_v61 }
 0xea4   : > { %v2501_v35 = vsel %vm1541_vm4, %v2473_v33, -inf }
 0xea5   : > { %2502 = vmax.xlane.f32.xlu1 %v2501_v35  ;;  %v8458_v12 = vpop.f32.mrb[30].mxu1  ;;  %v2498_v50 = vsel %vm1541_vm4, %v2468_v49, -inf }
 0xea6   : > { %v2483_v41 = vadd.f32 %v8458_v12, %v11043_v63  ;;  %v2477_v21 = vpop.f32.mrb[31].mxu1  ;;  %2493 = vmax.xlane.f32.xlu0 %v2492_v19 }
 0xea7   : > { %v2478_v48 = vadd.f32 %v2477_v21, %v11049_v10 }
 0xea8   : > { %v2507_v55 = vsel %vm1541_vm4, %v2483_v41, -inf }
 0xea9   : > { %2508 = vmax.xlane.f32.xlu1 %v2507_v55  ;;  %v2504_v22 = vsel %vm1541_vm4, %v2478_v48, -inf }
 0xeaa   : > { %2499 = vmax.xlane.f32.xlu0 %v2498_v50 }
 0xeae   : > { %2505 = vmax.xlane.f32.xlu0 %v2504_v22 }
 0xeba   : > { %9298 = vrot.lane.b32.xlu1 %v9297_v23, %s10326_s17 }
 0xebe   : > { %9303 = vrot.lane.b32.xlu1 %v9297_v23, %s10328_s24 }
 0xec2   : > { %9308 = vrot.lane.b32.xlu1 %v9297_v23, %s10330_s7 }
 0xec4   : > { %9293 = vrot.lane.b32.xlu0 %v9297_v23, %s10327_s22 }
 0xf2a   : > { %v2491_v61 = vpop.xlane.xlu1 %2490 }
 0xf2b   : > { %v2511_v63 = vsub.f32 %v2453_v31, %v2491_v61  ;;  %v2488_v24 = vpop.xlane.xlu0 %2487 }
 0xf2c   : > { %v2510_v58 = vsub.f32 %v2448_v52, %v2488_v24 }
 0xf2d   : > { %v2520_v10 = vmul.f32 1.442695, %v2511_v63 }
 0xf2e   : > { %v2518_v27 = vmul.f32 1.442695, %v2510_v58 }
 0xf2f   : > { %9802 = vpow2.f32 %v2520_v10  ;;  %v2497_v28 = vpop.xlane.xlu0 %2496 }
 0xf30   : > { %9804 = vpow2.f32 %v2518_v27  ;;  %v2513_v36 = vsub.f32 %v2463_v30, %v2497_v28 }
 0xf32   : > { %v2524_v42 = vmul.f32 1.442695, %v2513_v36  ;;  %v2503_v44 = vpop.xlane.xlu1 %2502 }
 0xf33   : > { %v2515_v45 = vsub.f32 %v2473_v33, %v2503_v44  ;;  %v2494_v47 = vpop.xlane.xlu0 %2493 }
 0xf34   : > { %9806 = vpow2.f32 %v2524_v42  ;;  %v2512_v51 = vsub.f32 %v2458_v14, %v2494_v47 }
 0xf35   : > { %v2528_v40 = vmul.f32 1.442695, %v2515_v45 }
 0xf36   : > { %v2522_v17 = vmul.f32 1.442695, %v2512_v51  ;;  %v2509_v11 = vpop.xlane.xlu1 %2508 }
 0xf37   : > { %v2517_v23 = vsub.f32 %v2483_v41, %v2509_v11  ;;  %v2500_v8 = vpop.xlane.xlu0 %2499 }
 0xf38   : > { %9808 = vpow2.f32 %v2522_v17  ;;  %v2514_v3 = vsub.f32 %v2468_v49, %v2500_v8 }
 0xf39   : > { %v11272_v56 = vpop.eup %9802  ;;  %9810 = vpow2.f32 %v2528_v40  ;;  %v2532_v31 = vmul.f32 1.442695, %v2517_v23 }
 0xf3a   : > { %v9805_v4 = vpop.eup %9804  ;;  %v2526_v25 = vmul.f32 1.442695, %v2514_v3  ;;  %v9299_v52 = vpop.permute.xlu1 %9298  ;;  %v2537_v46 = vsel %vm1541_vm4, %v11272_v56, 0.0 }
 0xf3b   : > { %2538 = vadd.xlane.f32.xlu0 %v2537_v46  ;;  %v2506_v38 = vpop.xlane.xlu0 %2505  ;;  %v2534_v29 = vsel %vm1541_vm4, %v9805_v4, 0.0 }
 0xf3c   : > { %9812 = vpow2.f32 %v2526_v25  ;;  %v2516_v30 = vsub.f32 %v2478_v48, %v2506_v38  ;;  %2535 = vadd.xlane.f32.xlu1 %v2534_v29 }
 0xf3d   : > { %9814 = vpow2.f32 %v2532_v31 }
 0xf3e   : > { %v11277_v32 = vpop.eup %9806  ;;  %v2530_v2 = vmul.f32 1.442695, %v2516_v30  ;;  %v9304_v14 = vpop.permute.xlu1 %9303 }
 0xf3f   : > { %v2543_v18 = vsel %vm1541_vm4, %v11277_v32, 0.0  ;;  %v9294_v24 = vpop.permute.xlu0 %9293 }
 0xf40   : > { %2544 = vadd.xlane.f32.xlu0 %v2543_v18  ;;  %9816 = vpow2.f32 %v2530_v2 }
 0xf42   : > { %v11281_v33 = vpop.eup %9808  ;;  %v9309_v9 = vpop.permute.xlu1 %9308 }
 0xf43   : > { %v9311_v35 = vunpack.i.h.bf16 %v9309_v9  ;;  %v9310_v49 = vunpack.i.l.bf16 %v9309_v9  ;;  %v2540_v12 = vsel %vm1541_vm4, %v11281_v33, 0.0  ;;  %v11285_v19 = vpop.eup %9810 }
 0xf44   : > { %2541 = vadd.xlane.f32.xlu0 %v2540_v12  ;;  %v2549_v55 = vsel %vm1541_vm4, %v11285_v19, 0.0 }
 0xf45   : > { %v8939_v41 = vpack.c.bf16 %v9311_v35, %v9310_v49 }
 0xf46   : > { %v11287_v21 = vpop.eup %9812 }
 0xf47   : > { %8940 = vmatprep.subr.bf16.mxu0 %v8939_v41  ;;  %v2546_v48 = vsel %vm1541_vm4, %v11287_v21, 0.0  ;;  %v11293_v50 = vpop.eup %9814 }
 0xf48   : > { %8942 = vmatpush3.bf16.msra.mxu0 %v8939_v41  ;;  %2550 = vadd.xlane.f32.xlu0 %v2549_v55  ;;  %v2555_v22 = vsel %vm1541_vm4, %v11293_v50, 0.0 }
 0xf49   : > { %2547 = vadd.xlane.f32.xlu1 %v2546_v48 }
 0xf4a   : > { %v9817_v61 = vpop.eup %9816 }
 0xf4b   : > { %v2552_v63 = vsel %vm1541_vm4, %v9817_v61, 0.0 }
 0xf4c   : > { %2556 = vadd.xlane.f32.xlu0 %v2555_v22 }
 0xf50   : > { %2553 = vadd.xlane.f32.xlu0 %v2552_v63 }
 0xf5a   : > { %9318 = vrot.lane.b32.xlu1 %v9299_v52, %s10330_s7 }
 0xf5e   : > { %9323 = vrot.lane.b32.xlu1 %v9304_v14, %s10330_s7 }
 0xf66   : > { %9313 = vrot.lane.b32.xlu0 %v9294_v24, %s10330_s7 }
 0xfc8   : > { %v2539_v58 = vpop.xlane.xlu0 %2538 }
 0xfc9   : > { %v2536_v10 = vpop.xlane.xlu1 %2535 }
 0xfca   : > { %9818 = vrcp.f32 %v2536_v10 }
 0xfcb   : > { %9820 = vrcp.f32 %v2539_v58 }
 0xfcd   : > { %v2545_v27 = vpop.xlane.xlu0 %2544 }
 0xfd1   : > { %v2542_v28 = vpop.xlane.xlu0 %2541 }
 0xfd2   : > { %9822 = vrcp.f32 %v2542_v28 }
 0xfd3   : > { %9824 = vrcp.f32 %v2545_v27 }
 0xfd4   : > { %v9819_v36 = vpop.eup %9818 }
 0xfd5   : > { %v2551_v42 = vpop.xlane.xlu0 %2550  ;;  %v2574_v44 = vmul.f32 %v9819_v36, %v9805_v4  ;;  %v9821_v29 = vpop.eup %9820 }
 0xfd6   : > { %v2548_v45 = vpop.xlane.xlu1 %2547  ;;  %v2575_v2 = vmul.f32 %v9821_v29, %v11272_v56  ;;  %v2827_v29 = vrot.slane %v11225_v1, %v11122_v54 }
 0xfd7   : > { %8475 = vmatprep.mubr.msk.f32.mxu0 %vm1541_vm4, %v2574_v44  ;;  %9826 = vrcp.f32 %v2548_v45 }
 0xfd8   : > { %9828 = vrcp.f32 %v2551_v42 }
 0xfd9   : > { %v2557_v47 = vpop.xlane.xlu0 %2556 }
 0xfda   : > { %v9319_v51 = vpop.permute.xlu1 %9318 }
 0xfdb   : > { %v9321_v11 = vunpack.i.h.bf16 %v9319_v51  ;;  %v9320_v23 = vunpack.i.l.bf16 %v9319_v51 }
 0xfdc   : > { %v9823_v30 = vpop.eup %9822 }
 0xfdd   : > { %v2554_v40 = vpop.xlane.xlu0 %2553  ;;  %v8947_v38 = vpack.c.bf16 %v9321_v11, %v9320_v23  ;;  %v9825_v14 = vpop.eup %9824  ;;  %v2576_v18 = vmul.f32 %v9823_v30, %v11281_v33 }
 0xfde   : > { %v9324_v31 = vpop.permute.xlu1 %9323  ;;  %9830 = vrcp.f32 %v2554_v40  ;;  %v2577_v35 = vmul.f32 %v9825_v14, %v11277_v32  ;;  %v9622_v32 = vld [vmem:[%s10802_s25 + $0x30] sm:$0xff]  }
 0xfdf   : > { %v9326_v52 = vunpack.i.h.bf16 %v9324_v31  ;;  %v9325_v46 = vunpack.i.l.bf16 %v9324_v31  ;;  %9832 = vrcp.f32 %v2557_v47 }
 0xfe1   : > { %v9314_v17 = vpop.permute.xlu0 %9313  ;;  %v8951_v4 = vpack.c.bf16 %v9326_v52, %v9325_v46  ;;  %v9827_v9 = vpop.eup %9826 }
 0xfe2   : > { %v9316_v8 = vunpack.i.h.bf16 %v9314_v17  ;;  %v9315_v3 = vunpack.i.l.bf16 %v9314_v17  ;;  %v9829_v49 = vpop.eup %9828  ;;  %v2578_v12 = vmul.f32 %v9827_v9, %v11287_v21 }
 0xfe3   : > { %v2579_v56 = vmul.f32 %v9829_v49, %v11285_v19  ;;  %v9623_v19 = vld [vmem:[%s10802_s25 + $0x38] sm:$0xff]  }
 0xfe4   : > { %v8943_v25 = vpack.c.bf16 %v9316_v8, %v9315_v3 }
 0xfe6   : > { %8944 = vmatprep.subr.bf16.mxu0 %v8943_v25 }
 0xfe7   : > { %8946 = vmatpush3.bf16.msra.mxu0 %v8943_v25 }
 0xfe8   : > { %8948 = vmatprep.subr.bf16.mxu0 %v8947_v38  ;;  %v9831_v41 = vpop.eup %9830 }
 0xfe9   : > { %v9833_v33 = vpop.eup %9832  ;;  %v2580_v55 = vmul.f32 %v9831_v41, %v9817_v61 }
 0xfea   : > { %v2581_v48 = vmul.f32 %v9833_v33, %v11293_v50 }
 0xfeb   : > { %8950 = vmatpush3.bf16.msra.mxu0 %v8947_v38 }
 0xfec   : > { %8952 = vmatprep.subr.bf16.mxu0 %v8951_v4 }
 0xfef   : > { %8954 = vmatpush3.bf16.msra.mxu0 %v8951_v4 }
 0xff0   : > { %8487 = vmatprep.subr.bf16.mxu0 %v10324_v39 }
 0xff2   : > { %8476 = vmatmul.mubr.msk.f32.vlgmr.msra.gmra.mrb[20].mxu0 %vm1541_vm4, %v2575_v2 }
 0xff3   : > { %8478 = vmatprep.mubr.msk.f32.mxu0 %vm1541_vm4, %v2576_v18  ;;  %8488 = vmatpush3.bf16.msra.mxu0 %v9622_v32 }
 0xff4   : > { %8489 = vmatprep.subr.bf16.mxu0 %v10324_v39 }
 0xff6   : > { %8479 = vmatmul.mubr.msk.f32.gmra.mrb[22].mxu0 %vm1541_vm4, %v2577_v35 }
 0xff7   : > { %8481 = vmatprep.mubr.msk.f32.mxu0 %vm1541_vm4, %v2578_v12  ;;  %8490 = vmatpush3.bf16.msra.mxu0 %v9623_v19 }
 0xff8   : > { %8495 = vmatprep.subr.bf16.mxu0 %v10324_v39 }
 0xffa   : > { %8482 = vmatmul.mubr.msk.f32.gmra.mrb[24].mxu0 %vm1541_vm4, %v2579_v56  ;;  %v10011_v56 = vld [vmem:[%s12440_s6] sm:$0xff] }
 0xffb   : > { %8484 = vmatprep.mubr.msk.f32.mxu0 %vm1541_vm4, %v2580_v55 }
 0xffe   : > { %8485 = vmatmul.mubr.msk.f32.gmra.mrb[26].mxu0 %vm1541_vm4, %v2581_v48 }
 0xfff   : > { %8491 = vmatprep.mubr.msk.bf16.mxu0 %vm10325_vm1, %v10324_v39 }
0x10c5   : > { %v8477_v21 = vpop.f32.mrb[20].mxu0 }
0x10c6   : > { %v2696_v22 = vpop.f32.mrb[21].mxu0 }
0x10c9   : > { %v8480_v61 = vpop.f32.mrb[22].mxu0 }
0x10ca   : > { %v2706_v63 = vpop.f32.mrb[23].mxu0 }
0x10cb   : > { %v9327_v24 = vpack.i.bf16 %v8480_v61, %v2706_v63 }
0x10cd   : > { %9328 = vrot.lane.b32.xlu1 %v9327_v24, %s10331_s20  ;;  %v8483_v50 = vpop.f32.mrb[24].mxu0 }
0x10ce   : > { %v2716_v58 = vpop.f32.mrb[25].mxu0 }
0x10cf   : > { %v9332_v10 = vpack.i.bf16 %v8483_v50, %v2716_v58 }
0x10d1   : > { %9333 = vrot.lane.b32.xlu1 %v9332_v10, %s12393_s18  ;;  %v8486_v27 = vpop.f32.mrb[26].mxu0 }
0x10d2   : > { %v2726_v28 = vpop.f32.mrb[27].mxu0 }
0x10d3   : > { %v9337_v36 = vpack.i.bf16 %v8486_v27, %v2726_v28 }
0x10d5   : > { %9338 = vrot.lane.b32.xlu1 %v9337_v36, %s12391_s13  ;;  %s12447_s13 = sld [smem:[#allocation27_spill]] }
0x10db   : > { %s1046_s18 = scalar_lea.vmem %s12447_s13, %s7970_s28  ;;  %s12448_s28 = smov 16  }
0x10dc   : > { %v1113_v4 = vld [vmem:[%s1046_s18] sm:$0xff]  ;;  %v1114_v14 = vld [vmem:[%s1046_s18 + $0x8] sm:$0xff]  ;;  %s12452_s13 = sld [smem:[#allocation38_spill]] }
0x10dd   : > { %v1115_v30 = vmul.f32 5.656854, %v1113_v4  ;;  %v1116_v55 = vmul.f32 5.656854, %v1114_v14  ;;  %v9633_v4 = vld [vmem:[%s10869_s27 + $0x58] sm:$0xff]  }
0x10df   : > { %v1117_v33 = vadd.f32 %v10011_v56, %v1115_v30  ;;  %v9635_v30 = vld [vmem:[%s10869_s27 + $0x68] sm:$0xff]  }
0x113f   : > { %v9329_v42 = vpop.permute.xlu1 %9328 }
0x1140   : > { %v9331_v45 = vunpack.i.h.bf16 %v9329_v42  ;;  %v9330_v47 = vunpack.i.l.bf16 %v9329_v42 }
0x1142   : > { %v2760_v11 = vsel %vm1403_vm2, %v8477_v21, %v9331_v45  ;;  %v2759_v23 = vsel %vm1403_vm2, %v2696_v22, %v9330_v47  ;;  %v3122_v21 = vsel %vm1155_vm0, %v1117_v33, 0.0 }
0x1143   : > { %v9334_v44 = vpop.permute.xlu1 %9333 }
0x1144   : > { %v9336_v51 = vunpack.i.h.bf16 %v9334_v44  ;;  %v9335_v40 = vunpack.i.l.bf16 %v9334_v44 }
0x1146   : > { %v2762_v31 = vsel %vm1817_vm5, %v2760_v11, %v9336_v51  ;;  %v2761_v25 = vsel %vm1817_vm5, %v2759_v23, %v9335_v40 }
0x1147   : > { %v9339_v17 = vpop.permute.xlu1 %9338 }
0x1148   : > { %v9341_v8 = vunpack.i.h.bf16 %v9339_v17  ;;  %v9340_v3 = vunpack.i.l.bf16 %v9339_v17 }
0x114a   : > { %v2764_v52 = vsel %vm1820_vm6, %v2762_v31, %v9341_v8  ;;  %v2763_v46 = vsel %vm1820_vm6, %v2761_v25, %v9340_v3  ;;  %v9624_v31 = vld [vmem:[%s10814_s19 + $0x10] sm:$0xff]   ;;  %v9625_v25 = vld [vmem:[%s10814_s19 + $0x18] sm:$0xff]  }
0x114b   : > { %v2765_v38 = vpack.c.bf16 %v2764_v52, %v2763_v46  ;;  %v9630_v52 = vld [vmem:[%s10869_s27 + $0x40] sm:$0xff]   ;;  %v9631_v46 = vld [vmem:[%s10869_s27 + $0x48] sm:$0xff]  }
0x114c   : > { %8504 = vmatpush3.bf16.msra.mxu1 %v9630_v52 }
0x114d   : > { %8492 = vmatmul.mubr.msk.bf16.vlgmr.msra.gmra.mrb[28].mxu0 %vm1155_vm0, %v2765_v38  ;;  %8505 = vmatprep.subr.bf16.mxu1 %v10324_v39  ;;  %v9632_v38 = vld [vmem:[%s10869_s27 + $0x50] sm:$0xff]  }
0x114e   : > { %8499 = vmatprep.mubr.msk.bf16.mxu0 %vm10325_vm1, %v10324_v39  ;;  %8496 = vmatpush3.bf16.msra.mxu0 %v9624_v31  ;;  %v9628_v31 = vld [vmem:[%s10811_s4 + $0x20] sm:$0xff]  }
0x114f   : > { %8497 = vmatprep.subr.bf16.mxu0 %v10324_v39 }
0x1150   : > { %8506 = vmatpush3.bf16.msra.mxu1 %v9631_v46  ;;  %v9629_v46 = vld [vmem:[%s10811_s4 + $0x28] sm:$0xff]  }
0x1151   : > { %8507 = vmatprep.subr.bf16.mxu1 %v10324_v39 }
0x1152   : > { %8498 = vmatpush3.bf16.msra.mxu0 %v9625_v25 }
0x1153   : > { %8523 = vmatprep.subr.bf16.mxu0 %v10324_v39 }
0x1154   : > { %8508 = vmatpush3.bf16.msra.mxu1 %v9632_v38 }
0x1155   : > { %8509 = vmatprep.subr.bf16.mxu1 %v10324_v39 }
0x1158   : > { %8510 = vmatpush3.bf16.msra.mxu1 %v9633_v4 }
0x1159   : > { %8511 = vmatprep.subr.bf16.mxu1 %v10324_v39 }
0x1220   : > { %v2815_v2 = vpop.f32.mrb[28].mxu0 }
0x1221   : > { %v2822_v18 = vadd.f32 %v2815_v2, %v11175_v26  ;;  %v8493_v9 = vpop.f32.mrb[29].mxu0 }
0x1222   : > { %v2818_v35 = vpop.f32.mrb[30].mxu0 }
0x1223   : > { %v11341_v49 = vadd.f32 %v2827_v29, %v2822_v18  ;;  %v2823_v12 = vadd.f32 %v2818_v35, %v11178_v0  ;;  %v8494_v41 = vpop.f32.mrb[31].mxu0  ;;  %v10012_v0 = vld [vmem:[%s12440_s6 + $0x8] sm:$0xff] }
0x1224   : > { %v1118_v22 = vadd.f32 %v10012_v0, %v1116_v55 }
0x1225   : > { %v11347_v48 = vadd.f32 %v2827_v29, %v2823_v12  ;;  %v2830_v32 = vsel %vm1155_vm0, %v11341_v49, 0.0  ;;  %v9634_v29 = vld [vmem:[%s10869_s27 + $0x60] sm:$0xff]  }
0x1226   : > { %2831 = vadd.xlane.f32.xlu0 %v2830_v32  ;;  %v3125_v19 = vsel %vm1155_vm0, %v1118_v22, 0.0  ;;  %8512 = vmatpush3.bf16.msra.mxu1 %v9634_v29 }
0x1227   : > { %v2833_v26 = vsel %vm1155_vm0, %v11347_v48, 0.0  ;;  %8513 = vmatprep.subr.bf16.mxu1 %v10324_v39 }
0x1228   : > { %2834 = vadd.xlane.f32.xlu1 %v2833_v26 }
0x122a   : > { %3123 = vadd.xlane.f32.xlu0 %v3122_v21  ;;  %8514 = vmatpush3.bf16.msra.mxu1 %v9635_v30  ;;  %v2859_v21 = vrot.slane %v11225_v1, %v11157_v37 }
0x122b   : > { %8515 = vmatprep.subr.bf16.mxu1 %v10324_v39 }
0x122e   : > { %3126 = vadd.xlane.f32.xlu0 %v3125_v19 }
0x12b3   : > { %v2832_v61 = vpop.xlane.xlu0 %2831 }
0x12b4   : > { %v2836_v63 = vmul.f32 0.03125, %v2832_v61  ;;  %v11400_v61 = vld [vmem:[%s10821_s30 + $0x30] sm:$0xff] }
0x12b5   : > { %v2835_v24 = vpop.xlane.xlu1 %2834 }
0x12b6   : > { %v11359_v50 = vsub.f32 %v11341_v49, %v2836_v63  ;;  %v2837_v58 = vmul.f32 0.03125, %v2835_v24 }
0x12b7   : > { %v3124_v10 = vpop.xlane.xlu0 %3123 }
0x12b8   : > { %v11362_v27 = vsub.f32 %v11347_v48, %v2837_v58  ;;  %v3128_v28 = vmul.f32 0.03125, %v3124_v10  ;;  %v2840_v36 = vmul.f32 %v11359_v50, %v11359_v50  ;;  %v2865_v58 = vrot.slane %v11225_v1, %v11162_v13 }
0x12b9   : > { %v11415_v1 = vrot.slane %v11400_v61, %v10914_v59 }
0x12ba   : > { %v11366_v42 = vsub.f32 %v1117_v33, %v3128_v28  ;;  %v2842_v44 = vsel %vm1155_vm0, %v2840_v36, 0.0  ;;  %v2841_v45 = vmul.f32 %v11362_v27, %v11362_v27  ;;  %v11407_v36 = vrot.slane %v11400_v61, %v10907_v53 }
0x12bb   : > { %2843 = vadd.xlane.f32.xlu0 %v2842_v44  ;;  %v3127_v47 = vpop.xlane.xlu0 %3126 }
0x12bc   : > { %v3129_v51 = vmul.f32 0.03125, %v3127_v47  ;;  %v2845_v40 = vsel %vm1155_vm0, %v2841_v45, 0.0  ;;  %v3132_v17 = vmul.f32 %v11366_v42, %v11366_v42 }
0x12bd   : > { %2846 = vadd.xlane.f32.xlu1 %v2845_v40 }
0x12be   : > { %v11374_v11 = vsub.f32 %v1118_v22, %v3129_v51  ;;  %v3134_v23 = vsel %vm1155_vm0, %v3132_v17, 0.0  ;;  %v9626_v51 = vld [vmem:[%s10802_s25 + $0x40] sm:$0xff]  }
0x12bf   : > { %3135 = vadd.xlane.f32.xlu0 %v3134_v23 }
0x12c0   : > { %v3133_v8 = vmul.f32 %v11374_v11, %v11374_v11 }
0x12c2   : > { %v3137_v3 = vsel %vm1155_vm0, %v3133_v8, 0.0 }
0x12c3   : > { %3138 = vadd.xlane.f32.xlu1 %v3137_v3 }
0x1348   : > { %v2844_v2 = vpop.xlane.xlu0 %2843 }
0x1349   : > { %v2848_v14 = vmul.f32 0.03125, %v2844_v2 }
0x134a   : > { %v2847_v18 = vpop.xlane.xlu1 %2846 }
0x134b   : > { %v2850_v9 = vadd.f32 1e-05, %v2848_v14  ;;  %v2849_v35 = vmul.f32 0.03125, %v2847_v18 }
0x134c   : > { %v3136_v12 = vpop.xlane.xlu0 %3135 }
0x134d   : > { %9834 = vrsqrt.f32 %v2850_v9  ;;  %v2851_v41 = vadd.f32 1e-05, %v2849_v35  ;;  %v3140_v56 = vmul.f32 0.03125, %v3136_v12  ;;  %v11451_v12 = vld [vmem:[%s10821_s30 + $0x20] sm:$0xff] }
0x134f   : > { %9836 = vrsqrt.f32 %v2851_v41  ;;  %v3142_v33 = vadd.f32 1e-05, %v3140_v56  ;;  %v3156_v41 = vrot.slane %v11451_v12, %v10966_v34 }
0x1350   : > { %v3139_v55 = vpop.xlane.xlu1 %3138 }
0x1351   : > { %9838 = vrsqrt.f32 %v3142_v33  ;;  %v3141_v32 = vmul.f32 0.03125, %v3139_v55 }
0x1353   : > { %v3143_v26 = vadd.f32 1e-05, %v3141_v32 }
0x1355   : > { %9840 = vrsqrt.f32 %v3143_v26 }
0x1357   : > { %v9835_v0 = vpop.eup %9834 }
0x1358   : > { %v2854_v22 = vmul.f32 %v9835_v0, %v11359_v50 }
0x1359   : > { %v9837_v19 = vpop.eup %9836 }
0x135a   : > { %v2860_v63 = vmul.f32 %v2859_v21, %v2854_v22  ;;  %v2855_v24 = vmul.f32 %v9837_v19, %v11362_v27  ;;  %v3275_v22 = vrot.slane %v11451_v12, %v10971_v43 }
0x135b   : > { %v9839_v10 = vpop.eup %9838 }
0x135c   : > { %v2861_v28 = vmul.f32 %v2859_v21, %v2855_v24  ;;  %v3146_v44 = vmul.f32 %v9839_v10, %v11366_v42  ;;  %v2866_v45 = vadd.f32 %v2865_v58, %v2860_v63  ;;  %v9627_v42 = vld [vmem:[%s10802_s25 + $0x48] sm:$0xff]  }
0x135e   : > { %v2867_v50 = vadd.f32 %v2865_v58, %v2861_v28  ;;  %v4090_v40 = vmul.f32 %v11407_v36, %v3146_v44  ;;  %v3148_v52 = vmul.f32 %v3146_v44, %v10919_v62 }
0x135f   : > { %v9841_v47 = vpop.eup %9840 }
0x1360   : > { %v3147_v27 = vmul.f32 %v9841_v47, %v11374_v11  ;;  %v2868_v17 = vpack.c.bf16 %v2867_v50, %v2866_v45  ;;  %v11424_v8 = vadd.f32 %v4090_v40, %v11415_v1  ;;  %v3150_v4 = vadd.f32 %v3148_v52, %v10928_v5 }
0x1362   : > { %v4091_v23 = vmul.f32 %v11407_v36, %v3147_v27  ;;  %8500 = vmatmul.mubr.msk.bf16.vlgmr.msra.gmra.mrb[32].mxu0 %vm1155_vm0, %v2868_v17  ;;  %v3149_v25 = vmul.f32 %v3147_v27, %v10919_v62  ;;  %v9636_v62 = vld [vmem:[%s10869_s27 + $0x70] sm:$0xff]  }
0x1363   : > { %8524 = vmatpush3.bf16.msra.mxu0 %v9626_v51  ;;  %8527 = vmatprep.mubr.msk.bf16.mxu0 %vm10325_vm1, %v10324_v39  ;;  %v3281_v51 = vrot.slane %v11451_v12, %v10995_v60 }
0x1364   : > { %8525 = vmatprep.subr.bf16.mxu0 %v10324_v39  ;;  %v11427_v11 = vadd.f32 %v4091_v23, %v11415_v1  ;;  %v3151_v38 = vadd.f32 %v3149_v25, %v10928_v5  ;;  %8516 = vmatpush3.bf16.msra.mxu1 %v9636_v62 }
0x1365   : > { %8517 = vmatprep.subr.bf16.mxu1 %v10324_v39 }
0x1366   : > { %v4157_v3 = vpack.c.bf16 %v11427_v11, %v11424_v8  ;;  %v3215_v29 = vpack.c.bf16 %v3151_v38, %v3150_v4 }
0x1367   : > { %8526 = vmatpush3.bf16.msra.mxu0 %v9627_v42 }
0x1368   : > { %8531 = vmatprep.subr.bf16.mxu0 %v10324_v39  ;;  %8518 = vmatpush3.bf16.msra.mxu1 %v9637_v15 }
0x136a   : > { %8528 = vmatmul.mubr.msk.bf16.vlgmr.msra.gmra.mrb[36].mxu0 %vm1155_vm0, %v3152_v20 }
0x136b   : > { %8532 = vmatpush3.bf16.msra.mxu0 %v9628_v31  ;;  %8535 = vmatprep.mubr.msk.bf16.mxu0 %vm10325_vm1, %v10324_v39 }
0x136c   : > { %8533 = vmatprep.subr.bf16.mxu0 %v10324_v39 }
0x136f   : > { %8534 = vmatpush3.bf16.msra.mxu0 %v9629_v46 }
0x1372   : > { %8536 = vmatmul.mubr.msk.bf16.vlgmr.msra.gmra.mrb[40].mxu0 %vm1155_vm0, %v3215_v29 }
0x1435   : > { %v2924_v20 = vpop.f32.mrb[32].mxu0 }
0x1436   : > { %v2925_v30 = vadd.f32 %v7597_v16, %v2924_v20  ;;  %v8501_v2 = vpop.f32.mrb[33].mxu0 }
0x1437   : > { %v2927_v14 = vpop.f32.mrb[34].mxu0 }
0x1438   : > { %v2928_v18 = vadd.f32 %v7597_v16, %v2927_v14  ;;  %v8502_v9 = vpop.f32.mrb[35].mxu0  ;;  %v2931_v35 = vmax.f32 %v2925_v30, 0.0 }
0x143a   : > { %v2932_v5 = vmax.f32 %v2928_v18, 0.0 }
0x143c   : > { %v2933_v56 = vpack.c.bf16 %v2932_v5, %v2931_v35 }
0x143d   : > { %v3206_v33 = vpop.f32.mrb[36].mxu0 }
0x143e   : > { %v3207_v55 = vadd.f32 %v3206_v33, %v3156_v41  ;;  %8520 = vmatmul.mubr.bf16.vlgmr.msra.gmra.mrb[32].mxu1 %v2933_v56  ;;  %v8529_v32 = vpop.f32.mrb[37].mxu0 }
0x143f   : > { %v3209_v26 = vpop.f32.mrb[38].mxu0  ;;  %v11500_v32 = vld [vmem:[#allocation5 + $0x8] sm:$0xff] }
0x1440   : > { %v3213_v21 = vmul.f32 0.35355338, %v3207_v55  ;;  %v8530_v0 = vpop.f32.mrb[39].mxu0  ;;  %v3210_v44 = vadd.f32 %v3209_v26, %v3156_v41 }
0x1441   : > { %v11503_v0 = vld [vmem:[#allocation5] sm:$0xff] }
0x1442   : > { %8555 = vmatprep.mubr.msk.f32.mxu0 %vm1403_vm2, %v3213_v21  ;;  %v3214_v47 = vmul.f32 0.35355338, %v3210_v44 }
0x1445   : > { %v3265_v19 = vpop.f32.mrb[40].mxu0 }
0x1446   : > { %v8537_v63 = vpop.f32.mrb[41].mxu0  ;;  %v3276_v58 = vadd.f32 %v3275_v22, %v3265_v19 }
0x1447   : > { %v3268_v24 = vpop.f32.mrb[42].mxu0 }
0x1448   : > { %v3277_v10 = vadd.f32 %v3275_v22, %v3268_v24  ;;  %v8538_v28 = vpop.f32.mrb[43].mxu0 }
0x144a   : > { %v9347_v45 = vpack.i.bf16 %v3277_v10, %v3276_v58  ;;  %v8955_v50 = vpack.c.bf16 %v3277_v10, %v3276_v58  ;;  %v11508_v58 = vld [vmem:[#allocation5 + $0x18] sm:$0xff] }
0x144c   : > { %9348 = vrot.lane.b32.xlu1 %v9347_v45, %s10326_s17  ;;  %9343 = vrot.lane.b32.xlu0 %v9347_v45, %s10327_s22 }
0x144d   : > { %8957 = vmatprep.subr.msk.bf16.mxu0 %vm10978_vm3, %v8955_v50 }
0x144e   : > { %8960 = vmatpush3.bf16.xpose.msk.msra.mxu0 %vm10978_vm3, %v8955_v50 }
0x1450   : > { %9353 = vrot.lane.b32.xlu1 %v9347_v45, %s10328_s24  ;;  %3292 = vrot.lane.b32.xlu0 %v3214_v47, %s10327_s22  ;;  %v11512_v45 = vld [vmem:[#allocation5 + $0x10] sm:$0xff] }
0x1454   : > { %3290 = vrot.lane.b32.xlu1 %v3213_v21, %s10327_s22  ;;  %3296 = vrot.lane.b32.xlu0 %v3214_v47, %s10326_s17 }
0x1458   : > { %3294 = vrot.lane.b32.xlu1 %v3213_v21, %s10326_s17  ;;  %3300 = vrot.lane.b32.xlu0 %v3214_v47, %s10328_s24 }
0x145c   : > { %3298 = vrot.lane.b32.xlu1 %v3213_v21, %s10328_s24 }
0x1460   : > { %3283 = vrot.lane.b32.xlu1 %v3281_v51, %s10329_s21  ;;  %v11515_v51 = vld [vmem:[#allocation5 + $0x28] sm:$0xff] }
0x14be   : > { %v9349_v40 = vpop.permute.xlu1 %9348  ;;  %v9344_v27 = vpop.permute.xlu0 %9343 }
0x14bf   : > { %v9351_v17 = vunpack.i.h.bf16 %v9349_v40  ;;  %v9350_v23 = vunpack.i.l.bf16 %v9349_v40  ;;  %v9346_v42 = vunpack.i.h.bf16 %v9344_v27  ;;  %v9345_v31 = vunpack.i.l.bf16 %v9344_v27 }
0x14c1   : > { %v8961_v25 = vpack.c.bf16 %v9346_v42, %v9345_v31  ;;  %v8967_v46 = vpack.c.bf16 %v9351_v17, %v9350_v23  ;;  %v11519_v23 = vld [vmem:[#allocation5 + $0x20] sm:$0xff] }
0x14c2   : > { %v9354_v52 = vpop.permute.xlu1 %9353  ;;  %v3293_v18 = vpop.permute.xlu0 %3292 }
0x14c3   : > { %8963 = vmatprep.subr.msk.bf16.mxu0 %vm10978_vm3, %v8961_v25  ;;  %v9356_v4 = vunpack.i.h.bf16 %v9354_v52  ;;  %v9355_v29 = vunpack.i.l.bf16 %v9354_v52  ;;  %v11523_v52 = vld [vmem:[#allocation5 + $0x38] sm:$0xff] }
0x14c4   : > { %8966 = vmatpush3.bf16.xpose.msk.msra.mxu0 %vm10978_vm3, %v8961_v25 }
0x14c5   : > { %8969 = vmatprep.subr.msk.bf16.mxu0 %vm10978_vm3, %v8967_v46  ;;  %v8973_v15 = vpack.c.bf16 %v9356_v4, %v9355_v29  ;;  %v11527_v29 = vld [vmem:[#allocation5 + $0x30] sm:$0xff] }
0x14c6   : > { %v3291_v38 = vpop.permute.xlu1 %3290  ;;  %v3297_v9 = vpop.permute.xlu0 %3296 }
0x14ca   : > { %v3295_v62 = vpop.permute.xlu1 %3294  ;;  %v3301_v35 = vpop.permute.xlu0 %3300 }
0x14cc   : > { %8972 = vmatpush3.bf16.xpose.msk.msra.mxu0 %vm10978_vm3, %v8967_v46 }
0x14cd   : > { %8975 = vmatprep.subr.msk.bf16.mxu0 %vm10978_vm3, %v8973_v15 }
0x14ce   : > { %v3299_v16 = vpop.permute.xlu1 %3298 }
0x14d2   : > { %v3284_v20 = vpop.permute.xlu1 %3283 }
0x14d3   : > { %v3286_v30 = vadd.f32 %v3284_v20, %v3265_v19  ;;  %v3287_v2 = vadd.f32 %v3284_v20, %v3268_v24 }
0x14d4   : > { %8978 = vmatpush3.bf16.xpose.msk.msra.mxu0 %vm10978_vm3, %v8973_v15 }
0x14d5   : > { %v9362_v14 = vpack.i.bf16 %v3287_v2, %v3286_v30  ;;  %8611 = vmatprep.subr.bf16.mxu0 %v10324_v39 }
0x14db   : > { %8556 = vmatmul.mubr.msk.f32.vlgmr.msra.gmra.mrb[44].mxu0 %vm1403_vm2, %v3214_v47 }
0x14dc   : > { %8558 = vmatprep.mubr.msk.f32.mxu0 %vm1403_vm2, %v3291_v38 }
0x14df   : > { %8559 = vmatmul.mubr.msk.f32.gmra.mrb[46].mxu0 %vm1403_vm2, %v3293_v18 }
0x14e0   : > { %8561 = vmatprep.mubr.msk.f32.mxu0 %vm1403_vm2, %v3295_v62 }
0x14e3   : > { %8562 = vmatmul.mubr.msk.f32.gmra.mrb[48].mxu0 %vm1403_vm2, %v3297_v9 }
0x14e4   : > { %8564 = vmatprep.mubr.msk.f32.mxu0 %vm1403_vm2, %v3299_v16 }
0x14e7   : > { %8565 = vmatmul.mubr.msk.f32.gmra.mrb[50].mxu0 %vm1403_vm2, %v3301_v35 }
0x14e8   : > { %8627 = vmatprep.mubr.msk.bf16.mxu0 %vm10325_vm1, %v10324_v39 }
0x1511   : > { %v11496_v5 = vpop.f32.mrb[32].mxu1 }
0x1512   : > { %v8521_v41 = vpop.f32.mrb[33].mxu1 }
0x1513   : > { %v11498_v56 = vpop.f32.mrb[34].mxu1 }
0x1514   : > { %v8522_v33 = vpop.f32.mrb[35].mxu1 }
0x15ae   : > { %v8557_v55 = vpop.f32.mrb[44].mxu0 }
0x15af   : > { %v3434_v26 = vadd.f32 %v11500_v32, %v8557_v55  ;;  %v3428_v21 = vpop.f32.mrb[45].mxu0 }
0x15b0   : > { %v3429_v22 = vadd.f32 %v11503_v0, %v3428_v21 }
0x15b1   : > { %v3470_v19 = vsel %vm1541_vm4, %v3434_v26, -inf }
0x15b2   : > { %3471 = vmax.xlane.f32.xlu1 %v3470_v19  ;;  %v8560_v63 = vpop.f32.mrb[46].mxu0  ;;  %v3467_v24 = vsel %vm1541_vm4, %v3429_v22, -inf }
0x15b3   : > { %v3444_v10 = vadd.f32 %v11508_v58, %v8560_v63  ;;  %v3438_v28 = vpop.f32.mrb[47].mxu0  ;;  %3468 = vmax.xlane.f32.xlu0 %v3467_v24 }
0x15b4   : > { %v3439_v50 = vadd.f32 %v11512_v45, %v3438_v28 }
0x15b5   : > { %v3476_v44 = vsel %vm1541_vm4, %v3444_v10, -inf }
0x15b6   : > { %v8563_v47 = vpop.f32.mrb[48].mxu0  ;;  %v3473_v25 = vsel %vm1541_vm4, %v3439_v50, -inf }
0x15b7   : > { %v3454_v40 = vadd.f32 %v11515_v51, %v8563_v47  ;;  %v3448_v27 = vpop.f32.mrb[49].mxu0  ;;  %3477 = vmax.xlane.f32.xlu0 %v3476_v44 }
0x15b8   : > { %v3449_v42 = vadd.f32 %v11519_v23, %v3448_v27 }
0x15b9   : > { %v3482_v17 = vsel %vm1541_vm4, %v3454_v40, -inf }
0x15ba   : > { %3483 = vmax.xlane.f32.xlu1 %v3482_v17  ;;  %v8566_v31 = vpop.f32.mrb[50].mxu0  ;;  %v3479_v15 = vsel %vm1541_vm4, %v3449_v42, -inf }
0x15bb   : > { %v3464_v46 = vadd.f32 %v11523_v52, %v8566_v31  ;;  %v3458_v38 = vpop.f32.mrb[51].mxu0  ;;  %3474 = vmax.xlane.f32.xlu0 %v3473_v25 }
0x15bc   : > { %v3459_v62 = vadd.f32 %v11527_v29, %v3458_v38 }
0x15bd   : > { %v3488_v4 = vsel %vm1541_vm4, %v3464_v46, -inf }
0x15be   : > { %3489 = vmax.xlane.f32.xlu1 %v3488_v4  ;;  %v3485_v16 = vsel %vm1541_vm4, %v3459_v62, -inf }
0x15bf   : > { %3480 = vmax.xlane.f32.xlu0 %v3479_v15 }
0x15c3   : > { %3486 = vmax.xlane.f32.xlu0 %v3485_v16 }
0x15cf   : > { %9363 = vrot.lane.b32.xlu1 %v9362_v14, %s10326_s17 }
0x15d3   : > { %9368 = vrot.lane.b32.xlu1 %v9362_v14, %s10328_s24 }
0x15d7   : > { %9373 = vrot.lane.b32.xlu1 %v9362_v14, %s10330_s7 }
0x15d9   : > { %9358 = vrot.lane.b32.xlu0 %v9362_v14, %s10327_s22 }
0x163f   : > { %v3472_v20 = vpop.xlane.xlu1 %3471 }
0x1640   : > { %v3492_v30 = vsub.f32 %v3434_v26, %v3472_v20  ;;  %v3469_v2 = vpop.xlane.xlu0 %3468 }
0x1641   : > { %v3491_v18 = vsub.f32 %v3429_v22, %v3469_v2 }
0x1642   : > { %v3501_v9 = vmul.f32 1.442695, %v3492_v30 }
0x1643   : > { %v3499_v35 = vmul.f32 1.442695, %v3491_v18 }
0x1644   : > { %9842 = vpow2.f32 %v3501_v9  ;;  %v3478_v41 = vpop.xlane.xlu0 %3477 }
0x1645   : > { %9844 = vpow2.f32 %v3499_v35  ;;  %v3494_v33 = vsub.f32 %v3444_v10, %v3478_v41 }
0x1647   : > { %v3505_v55 = vmul.f32 1.442695, %v3494_v33  ;;  %v3484_v21 = vpop.xlane.xlu1 %3483 }
0x1648   : > { %v3496_v19 = vsub.f32 %v3454_v40, %v3484_v21  ;;  %v3475_v63 = vpop.xlane.xlu0 %3474 }
0x1649   : > { %9846 = vpow2.f32 %v3505_v55  ;;  %v3493_v24 = vsub.f32 %v3439_v50, %v3475_v63 }
0x164a   : > { %v3509_v28 = vmul.f32 1.442695, %v3496_v19 }
0x164b   : > { %v3503_v44 = vmul.f32 1.442695, %v3493_v24  ;;  %v3490_v47 = vpop.xlane.xlu1 %3489 }
0x164c   : > { %v3498_v14 = vsub.f32 %v3464_v46, %v3490_v47  ;;  %v3481_v27 = vpop.xlane.xlu0 %3480 }
0x164d   : > { %9848 = vpow2.f32 %v3503_v44  ;;  %v3495_v26 = vsub.f32 %v3449_v42, %v3481_v27 }
0x164e   : > { %v11536_v22 = vpop.eup %9842  ;;  %9850 = vpow2.f32 %v3509_v28  ;;  %v3513_v31 = vmul.f32 1.442695, %v3498_v14 }
0x164f   : > { %v9845_v17 = vpop.eup %9844  ;;  %v3507_v25 = vmul.f32 1.442695, %v3495_v26  ;;  %v9364_v10 = vpop.permute.xlu1 %9363  ;;  %v3518_v40 = vsel %vm1541_vm4, %v11536_v22, 0.0 }
0x1650   : > { %3519 = vadd.xlane.f32.xlu0 %v3518_v40  ;;  %v3487_v38 = vpop.xlane.xlu0 %3486  ;;  %v3515_v50 = vsel %vm1541_vm4, %v9845_v17, 0.0 }
0x1651   : > { %9852 = vpow2.f32 %v3507_v25  ;;  %v3497_v4 = vsub.f32 %v3459_v62, %v3487_v38  ;;  %3516 = vadd.xlane.f32.xlu1 %v3515_v50 }
0x1652   : > { %9854 = vpow2.f32 %v3513_v31 }
0x1653   : > { %v11541_v46 = vpop.eup %9846  ;;  %v3511_v42 = vmul.f32 1.442695, %v3497_v4  ;;  %v9369_v15 = vpop.permute.xlu1 %9368 }
0x1654   : > { %v3524_v16 = vsel %vm1541_vm4, %v11541_v46, 0.0  ;;  %v9359_v28 = vpop.permute.xlu0 %9358 }
0x1655   : > { %3525 = vadd.xlane.f32.xlu0 %v3524_v16  ;;  %9856 = vpow2.f32 %v3511_v42 }
0x1657   : > { %v11545_v20 = vpop.eup %9848  ;;  %v9374_v30 = vpop.permute.xlu1 %9373 }
0x1658   : > { %v9376_v2 = vunpack.i.h.bf16 %v9374_v30  ;;  %v9375_v18 = vunpack.i.l.bf16 %v9374_v30  ;;  %v3521_v9 = vsel %vm1541_vm4, %v11545_v20, 0.0  ;;  %v11549_v62 = vpop.eup %9850 }
0x1659   : > { %3522 = vadd.xlane.f32.xlu0 %v3521_v9  ;;  %v3530_v33 = vsel %vm1541_vm4, %v11549_v62, 0.0 }
0x165a   : > { %v8979_v35 = vpack.c.bf16 %v9376_v2, %v9375_v18 }
0x165b   : > { %v11551_v41 = vpop.eup %9852 }
0x165c   : > { %8980 = vmatprep.subr.bf16.mxu1 %v8979_v35  ;;  %v3527_v55 = vsel %vm1541_vm4, %v11551_v41, 0.0  ;;  %v11557_v21 = vpop.eup %9854 }
0x165d   : > { %8982 = vmatpush3.bf16.msra.mxu1 %v8979_v35  ;;  %3531 = vadd.xlane.f32.xlu0 %v3530_v33  ;;  %v3536_v19 = vsel %vm1541_vm4, %v11557_v21, 0.0 }
0x165e   : > { %3528 = vadd.xlane.f32.xlu1 %v3527_v55 }
0x165f   : > { %v9857_v63 = vpop.eup %9856 }
0x1660   : > { %v3533_v24 = vsel %vm1541_vm4, %v9857_v63, 0.0 }
0x1661   : > { %3537 = vadd.xlane.f32.xlu0 %v3536_v19 }
0x1665   : > { %3534 = vadd.xlane.f32.xlu0 %v3533_v24 }
0x166f   : > { %9383 = vrot.lane.b32.xlu1 %v9364_v10, %s10330_s7 }
0x1673   : > { %9388 = vrot.lane.b32.xlu1 %v9369_v15, %s10330_s7 }
0x167b   : > { %9378 = vrot.lane.b32.xlu0 %v9359_v28, %s10330_s7 }
0x16dd   : > { %v3520_v44 = vpop.xlane.xlu0 %3519 }
0x16de   : > { %v3517_v47 = vpop.xlane.xlu1 %3516 }
0x16df   : > { %9858 = vrcp.f32 %v3517_v47 }
0x16e0   : > { %9860 = vrcp.f32 %v3520_v44 }
0x16e2   : > { %v3526_v14 = vpop.xlane.xlu0 %3525 }
0x16e6   : > { %v3523_v27 = vpop.xlane.xlu0 %3522 }
0x16e7   : > { %9862 = vrcp.f32 %v3523_v27 }
0x16e8   : > { %9864 = vrcp.f32 %v3526_v14 }
0x16e9   : > { %v9859_v26 = vpop.eup %9858 }
0x16ea   : > { %v3532_v31 = vpop.xlane.xlu0 %3531  ;;  %v3555_v25 = vmul.f32 %v9859_v26, %v9845_v17  ;;  %v9861_v55 = vpop.eup %9860 }
0x16eb   : > { %v3529_v40 = vpop.xlane.xlu1 %3528  ;;  %v3556_v24 = vmul.f32 %v9861_v55, %v11536_v22 }
0x16ec   : > { %8583 = vmatprep.mubr.msk.f32.mxu1 %vm1541_vm4, %v3555_v25  ;;  %9866 = vrcp.f32 %v3529_v40 }
0x16ed   : > { %9868 = vrcp.f32 %v3532_v31 }
0x16ee   : > { %v3538_v38 = vpop.xlane.xlu0 %3537 }
0x16ef   : > { %v9384_v50 = vpop.permute.xlu1 %9383 }
0x16f0   : > { %v9386_v42 = vunpack.i.h.bf16 %v9384_v50  ;;  %v9385_v16 = vunpack.i.l.bf16 %v9384_v50 }
0x16f1   : > { %v9863_v19 = vpop.eup %9862 }
0x16f2   : > { %v3535_v4 = vpop.xlane.xlu0 %3534  ;;  %v8987_v33 = vpack.c.bf16 %v9386_v42, %v9385_v16  ;;  %v9865_v28 = vpop.eup %9864  ;;  %v3557_v44 = vmul.f32 %v9863_v19, %v11545_v20 }
0x16f3   : > { %v9389_v2 = vpop.permute.xlu1 %9388  ;;  %9870 = vrcp.f32 %v3535_v4  ;;  %v3558_v14 = vmul.f32 %v9865_v28, %v11541_v46  ;;  %v9638_v46 = vld [vmem:[%s10802_s25 + $0x50] sm:$0xff]  }
0x16f4   : > { %v9391_v9 = vunpack.i.h.bf16 %v9389_v2  ;;  %v9390_v35 = vunpack.i.l.bf16 %v9389_v2  ;;  %9872 = vrcp.f32 %v3538_v38 }
0x16f6   : > { %v9379_v10 = vpop.permute.xlu0 %9378  ;;  %v8991_v17 = vpack.c.bf16 %v9391_v9, %v9390_v35  ;;  %v9867_v47 = vpop.eup %9866 }
0x16f7   : > { %v9381_v15 = vunpack.i.h.bf16 %v9379_v10  ;;  %v9380_v30 = vunpack.i.l.bf16 %v9379_v10  ;;  %v9869_v27 = vpop.eup %9868  ;;  %v3559_v26 = vmul.f32 %v9867_v47, %v11551_v41 }
0x16f8   : > { %v3560_v22 = vmul.f32 %v9869_v27, %v11549_v62  ;;  %v9639_v62 = vld [vmem:[%s10802_s25 + $0x58] sm:$0xff]  }
0x16f9   : > { %v8983_v18 = vpack.c.bf16 %v9381_v15, %v9380_v30 }
0x16fb   : > { %8984 = vmatprep.subr.bf16.mxu1 %v8983_v18 }
0x16fc   : > { %8986 = vmatpush3.bf16.msra.mxu1 %v8983_v18 }
0x16fd   : > { %8988 = vmatprep.subr.bf16.mxu1 %v8987_v33  ;;  %v9871_v31 = vpop.eup %9870 }
0x16fe   : > { %v9873_v20 = vpop.eup %9872  ;;  %v3561_v25 = vmul.f32 %v9871_v31, %v9857_v63 }
0x16ff   : > { %v3562_v40 = vmul.f32 %v9873_v20, %v11557_v21 }
0x1700   : > { %8990 = vmatpush3.bf16.msra.mxu1 %v8987_v33 }
0x1701   : > { %8992 = vmatprep.subr.bf16.mxu1 %v8991_v17 }
0x1704   : > { %8994 = vmatpush3.bf16.msra.mxu1 %v8991_v17 }
0x1705   : > { %8595 = vmatprep.subr.bf16.mxu1 %v10324_v39 }
0x1707   : > { %8584 = vmatmul.mubr.msk.f32.vlgmr.msra.gmra.mrb[36].mxu1 %vm1541_vm4, %v3556_v24 }
0x1708   : > { %8586 = vmatprep.mubr.msk.f32.mxu1 %vm1541_vm4, %v3557_v44  ;;  %8596 = vmatpush3.bf16.msra.mxu1 %v9638_v46 }
0x1709   : > { %8597 = vmatprep.subr.bf16.mxu1 %v10324_v39 }
0x170b   : > { %8587 = vmatmul.mubr.msk.f32.gmra.mrb[38].mxu1 %vm1541_vm4, %v3558_v14 }
0x170c   : > { %8589 = vmatprep.mubr.msk.f32.mxu1 %vm1541_vm4, %v3559_v26  ;;  %8598 = vmatpush3.bf16.msra.mxu1 %v9639_v62 }
0x170d   : > { %8603 = vmatprep.subr.bf16.mxu1 %v10324_v39 }
0x170f   : > { %8590 = vmatmul.mubr.msk.f32.gmra.mrb[40].mxu1 %vm1541_vm4, %v3560_v22  ;;  %v3808_v22 = vrot.slane %v11451_v12, %v11122_v54 }
0x1710   : > { %8592 = vmatprep.mubr.msk.f32.mxu1 %vm1541_vm4, %v3561_v25 }
0x1713   : > { %8593 = vmatmul.mubr.msk.f32.gmra.mrb[42].mxu1 %vm1541_vm4, %v3562_v40 }
0x1714   : > { %8599 = vmatprep.mubr.msk.bf16.mxu1 %vm10325_vm1, %v10324_v39 }
0x17da   : > { %v8585_v41 = vpop.f32.mrb[36].mxu1 }
0x17db   : > { %v3677_v38 = vpop.f32.mrb[37].mxu1 }
0x17de   : > { %v8588_v63 = vpop.f32.mrb[38].mxu1 }
0x17df   : > { %v3687_v50 = vpop.f32.mrb[39].mxu1 }
0x17e0   : > { %v9392_v4 = vpack.i.bf16 %v8588_v63, %v3687_v50 }
0x17e2   : > { %9393 = vrot.lane.b32.xlu1 %v9392_v4, %s10331_s20  ;;  %v8591_v21 = vpop.f32.mrb[40].mxu1 }
0x17e3   : > { %v3697_v10 = vpop.f32.mrb[41].mxu1 }
0x17e4   : > { %v9397_v42 = vpack.i.bf16 %v8591_v21, %v3697_v10 }
0x17e6   : > { %9398 = vrot.lane.b32.xlu1 %v9397_v42, %s12448_s28  ;;  %v8594_v16 = vpop.f32.mrb[42].mxu1 }
0x17e7   : > { %v3707_v15 = vpop.f32.mrb[43].mxu1 }
0x17e8   : > { %v9402_v30 = vpack.i.bf16 %v8594_v16, %v3707_v15 }
0x17ea   : > { %9403 = vrot.lane.b32.xlu1 %v9402_v30, %s12449_s2 }
0x1854   : > { %v9394_v2 = vpop.permute.xlu1 %9393 }
0x1855   : > { %v9396_v9 = vunpack.i.h.bf16 %v9394_v2  ;;  %v9395_v35 = vunpack.i.l.bf16 %v9394_v2 }
0x1857   : > { %v3741_v19 = vsel %vm1403_vm2, %v8585_v41, %v9396_v9  ;;  %v3740_v24 = vsel %vm1403_vm2, %v3677_v38, %v9395_v35  ;;  %v9640_v9 = vld [vmem:[%s10814_s19 + $0x20] sm:$0xff]   ;;  %v9641_v35 = vld [vmem:[%s10814_s19 + $0x28] sm:$0xff]  }
0x1858   : > { %v9399_v18 = vpop.permute.xlu1 %9398 }
0x1859   : > { %v9401_v33 = vunpack.i.h.bf16 %v9399_v18  ;;  %v9400_v17 = vunpack.i.l.bf16 %v9399_v18 }
0x185b   : > { %v3743_v47 = vsel %vm1817_vm5, %v3741_v19, %v9401_v33  ;;  %v3742_v14 = vsel %vm1817_vm5, %v3740_v24, %v9400_v17  ;;  %v9642_v33 = vld [vmem:[%s10869_s27 + $0x80] sm:$0xff]   ;;  %v9643_v17 = vld [vmem:[%s10869_s27 + $0x88] sm:$0xff]   ;;  %v9645_v19 = vld [vmem:[%s10869_s27 + $0x98] sm:$0xff]  }
0x185c   : > { %v9404_v55 = vpop.permute.xlu1 %9403  ;;  %8612 = vmatpush3.bf16.msra.mxu0 %v9642_v33  ;;  %v9646_v24 = vld [vmem:[%s10869_s27 + $0xa0] sm:$0xff]  }
0x185d   : > { %v9406_v28 = vunpack.i.h.bf16 %v9404_v55  ;;  %v9405_v44 = vunpack.i.l.bf16 %v9404_v55  ;;  %8613 = vmatprep.subr.bf16.mxu0 %v10324_v39  ;;  %v9644_v55 = vld [vmem:[%s10869_s27 + $0x90] sm:$0xff]  }
0x185f   : > { %v3745_v27 = vsel %vm1820_vm6, %v3743_v47, %v9406_v28  ;;  %v3744_v26 = vsel %vm1820_vm6, %v3742_v14, %v9405_v44  ;;  %v9647_v28 = vld [vmem:[%s10869_s27 + $0xa8] sm:$0xff]  }
0x1860   : > { %v3746_v31 = vpack.c.bf16 %v3745_v27, %v3744_v26  ;;  %8614 = vmatpush3.bf16.msra.mxu0 %v9643_v17  ;;  %v7682_v17 = vld [vmem:[%s10821_s30 + $0x28] ss:$0 sm:$0xff] }
0x1861   : > { %8615 = vmatprep.subr.bf16.mxu0 %v10324_v39 }
0x1862   : > { %8600 = vmatmul.mubr.msk.bf16.vlgmr.msra.gmra.mrb[44].mxu1 %vm1155_vm0, %v3746_v31 }
0x1863   : > { %8607 = vmatprep.mubr.msk.bf16.mxu1 %vm10325_vm1, %v10324_v39  ;;  %8604 = vmatpush3.bf16.msra.mxu1 %v9640_v9 }
0x1864   : > { %8605 = vmatprep.subr.bf16.mxu1 %v10324_v39  ;;  %8616 = vmatpush3.bf16.msra.mxu0 %v9644_v55 }
0x1865   : > { %8617 = vmatprep.subr.bf16.mxu0 %v10324_v39 }
0x1867   : > { %8606 = vmatpush3.bf16.msra.mxu1 %v9641_v35 }
0x1868   : > { %8631 = vmatprep.subr.bf16.mxu1 %v10324_v39  ;;  %8618 = vmatpush3.bf16.msra.mxu0 %v9645_v19 }
0x1869   : > { %8619 = vmatprep.subr.bf16.mxu0 %v10324_v39 }
0x186c   : > { %8620 = vmatpush3.bf16.msra.mxu0 %v9646_v24 }
0x186d   : > { %8621 = vmatprep.subr.bf16.mxu0 %v10324_v39 }
0x1870   : > { %8622 = vmatpush3.bf16.msra.mxu0 %v9647_v28 }
0x1871   : > { %8623 = vmatprep.subr.bf16.mxu0 %v10324_v39 }
0x1935   : > { %v3796_v20 = vpop.f32.mrb[44].mxu1 }
0x1936   : > { %v3803_v25 = vadd.f32 %v3796_v20, %v10853_v6  ;;  %v8601_v40 = vpop.f32.mrb[45].mxu1  ;;  %v3840_v20 = vrot.slane %v11451_v12, %v11157_v37 }
0x1937   : > { %v3799_v46 = vpop.f32.mrb[46].mxu1 }
0x1938   : > { %v11601_v41 = vadd.f32 %v3808_v22, %v3803_v25  ;;  %v3804_v38 = vadd.f32 %v3799_v46, %v10855_v7  ;;  %v8602_v62 = vpop.f32.mrb[47].mxu1 }
0x1939   : > { %v3846_v62 = vrot.slane %v11451_v12, %v11162_v13 }
0x193a   : > { %v11604_v63 = vadd.f32 %v3808_v22, %v3804_v38  ;;  %v3811_v50 = vsel %vm1155_vm0, %v11601_v41, 0.0 }
0x193b   : > { %3812 = vadd.xlane.f32.xlu0 %v3811_v50 }
0x193c   : > { %v3814_v4 = vsel %vm1155_vm0, %v11604_v63, 0.0 }
0x193d   : > { %3815 = vadd.xlane.f32.xlu1 %v3814_v4 }
0x19c8   : > { %v3813_v6 = vpop.xlane.xlu0 %3812 }
0x19c9   : > { %v3817_v21 = vmul.f32 0.03125, %v3813_v6 }
0x19ca   : > { %v3816_v10 = vpop.xlane.xlu1 %3815 }
0x19cb   : > { %v3819_v42 = vsub.f32 %v11601_v41, %v3817_v21  ;;  %v3818_v7 = vmul.f32 0.03125, %v3816_v10  ;;  %v9648_v10 = vld [vmem:[%s10869_s27 + $0xb0] sm:$0xff]  }
0x19cc   : > { %8624 = vmatpush3.bf16.msra.mxu0 %v9648_v10 }
0x19cd   : > { %v3820_v16 = vsub.f32 %v11604_v63, %v3818_v7  ;;  %v3821_v15 = vmul.f32 %v3819_v42, %v3819_v42  ;;  %8625 = vmatprep.subr.bf16.mxu0 %v10324_v39  ;;  %v7678_v7 = vld [vmem:[%s10823_s23 + $0x2] ss:$0 sm:$0xff] }
0x19cf   : > { %v3823_v30 = vsel %vm1155_vm0, %v3821_v15, 0.0  ;;  %v3822_v2 = vmul.f32 %v3820_v16, %v3820_v16 }
0x19d0   : > { %3824 = vadd.xlane.f32.xlu0 %v3823_v30 }
0x19d1   : > { %v3826_v18 = vsel %vm1155_vm0, %v3822_v2, 0.0 }
0x19d4   : > { %3827 = vadd.xlane.f32.xlu0 %v3826_v18 }
0x1a5d   : > { %v3825_v44 = vpop.xlane.xlu0 %3824 }
0x1a5e   : > { %v3829_v47 = vmul.f32 0.03125, %v3825_v44 }
0x1a60   : > { %v3831_v14 = vadd.f32 1e-05, %v3829_v47 }
0x1a61   : > { %v3828_v27 = vpop.xlane.xlu0 %3827 }
0x1a62   : > { %9874 = vrsqrt.f32 %v3831_v14  ;;  %v3830_v26 = vmul.f32 0.03125, %v3828_v27 }
0x1a64   : > { %v3832_v31 = vadd.f32 1e-05, %v3830_v26 }
0x1a66   : > { %9876 = vrsqrt.f32 %v3832_v31 }
0x1a6c   : > { %v9875_v22 = vpop.eup %9874 }
0x1a6d   : > { %v3835_v25 = vmul.f32 %v9875_v22, %v3819_v42  ;;  %v9649_v42 = vld [vmem:[%s10869_s27 + $0xb8] sm:$0xff]  }
0x1a6e   : > { %8626 = vmatpush3.bf16.msra.mxu0 %v9649_v42 }
0x1a6f   : > { %v3841_v46 = vmul.f32 %v3840_v20, %v3835_v25 }
0x1a70   : > { %v9877_v40 = vpop.eup %9876 }
0x1a71   : > { %v3836_v38 = vmul.f32 %v9877_v40, %v3820_v16  ;;  %v3847_v4 = vadd.f32 %v3846_v62, %v3841_v46 }
0x1a73   : > { %v3842_v50 = vmul.f32 %v3840_v20, %v3836_v38 }
0x1a75   : > { %v3848_v6 = vadd.f32 %v3846_v62, %v3842_v50 }
0x1a77   : > { %v3849_v21 = vpack.c.bf16 %v3848_v6, %v3847_v4  ;;  %v9650_v4 = vld [vmem:[%s10802_s25 + $0x60] sm:$0xff]   ;;  %v9651_v6 = vld [vmem:[%s10802_s25 + $0x68] sm:$0xff]  }
0x1a79   : > { %8608 = vmatmul.mubr.msk.bf16.vlgmr.msra.gmra.mrb[48].mxu1 %vm1155_vm0, %v3849_v21 }
0x1a7a   : > { %8635 = vmatprep.mubr.msk.bf16.mxu1 %vm10325_vm1, %v10324_v39  ;;  %8632 = vmatpush3.bf16.msra.mxu1 %v9650_v4 }
0x1a7b   : > { %8633 = vmatprep.subr.bf16.mxu1 %v10324_v39 }
0x1a7e   : > { %8634 = vmatpush3.bf16.msra.mxu1 %v9651_v6 }
0x1a7f   : > { %8639 = vmatprep.subr.bf16.mxu1 %v10324_v39 }
0x1b4c   : > { %v3905_v16 = vpop.f32.mrb[48].mxu1 }
0x1b4d   : > { %v3906_v15 = vadd.f32 %v7678_v7, %v3905_v16  ;;  %v8609_v12 = vpop.f32.mrb[49].mxu1 }
0x1b4e   : > { %v3908_v30 = vpop.f32.mrb[50].mxu1 }
0x1b4f   : > { %v3909_v2 = vadd.f32 %v7678_v7, %v3908_v30  ;;  %v8610_v18 = vpop.f32.mrb[51].mxu1  ;;  %v3912_v9 = vmax.f32 %v3906_v15, 0.0 }
0x1b51   : > { %v3913_v35 = vmax.f32 %v3909_v2, 0.0 }
0x1b53   : > { %v3914_v33 = vpack.c.bf16 %v3913_v35, %v3912_v9 }
0x1b55   : > { %8628 = vmatmul.mubr.bf16.vlgmr.msra.gmra.mrb[52].mxu0 %v3914_v33 }
0x1c28   : > { %v4001_v55 = vpop.f32.mrb[52].mxu0 }
0x1c29   : > { %v4002_v19 = vadd.f32 %v7682_v17, %v4001_v55  ;;  %v8629_v24 = vpop.f32.mrb[53].mxu0  ;;  %v9652_v55 = vld [vmem:[%s10811_s4 + $0x30] sm:$0xff]  }
0x1c2a   : > { %v4004_v28 = vpop.f32.mrb[54].mxu0  ;;  %v9653_v24 = vld [vmem:[%s10811_s4 + $0x38] sm:$0xff]   ;;  %s10335_s4 = smov 64  }
0x1c2b   : > { %v11643_v44 = vadd.f32 %v4002_v19, %v11601_v41  ;;  %v4005_v47 = vadd.f32 %v7682_v17, %v4004_v28  ;;  %v8630_v14 = vpop.f32.mrb[55].mxu0 }
0x1c2d   : > { %v11646_v27 = vadd.f32 %v4005_v47, %v11604_v63  ;;  %v4052_v26 = vsel %vm1155_vm0, %v11643_v44, 0.0 }
0x1c2e   : > { %4053 = vadd.xlane.f32.xlu0 %v4052_v26 }
0x1c2f   : > { %v4055_v31 = vsel %vm1155_vm0, %v11646_v27, 0.0 }
0x1c30   : > { %4056 = vadd.xlane.f32.xlu1 %v4055_v31 }
0x1cbb   : > { %v4054_v22 = vpop.xlane.xlu0 %4053 }
0x1cbc   : > { %v4058_v20 = vmul.f32 0.03125, %v4054_v22  ;;  %v4217_v22 = vrot.slane %v11400_v61, %v10971_v43 }
0x1cbd   : > { %v4057_v25 = vpop.xlane.xlu1 %4056 }
0x1cbe   : > { %v4060_v41 = vsub.f32 %v11643_v44, %v4058_v20  ;;  %v4059_v40 = vmul.f32 0.03125, %v4057_v25 }
0x1cc0   : > { %v4061_v46 = vsub.f32 %v11646_v27, %v4059_v40  ;;  %v4062_v63 = vmul.f32 %v4060_v41, %v4060_v41 }
0x1cc2   : > { %v4064_v38 = vsel %vm1155_vm0, %v4062_v63, 0.0  ;;  %v4063_v62 = vmul.f32 %v4061_v46, %v4061_v46 }
0x1cc3   : > { %4065 = vadd.xlane.f32.xlu0 %v4064_v38 }
0x1cc4   : > { %v4067_v50 = vsel %vm1155_vm0, %v4063_v62, 0.0 }
0x1cc5   : > { %4068 = vadd.xlane.f32.xlu1 %v4067_v50 }
0x1d50   : > { %v4066_v21 = vpop.xlane.xlu0 %4065 }
0x1d51   : > { %v4070_v10 = vmul.f32 0.03125, %v4066_v21 }
0x1d52   : > { %v4069_v42 = vpop.xlane.xlu1 %4068 }
0x1d53   : > { %v4072_v7 = vadd.f32 1e-05, %v4070_v10  ;;  %v4071_v16 = vmul.f32 0.03125, %v4069_v42 }
0x1d55   : > { %9878 = vrsqrt.f32 %v4072_v7  ;;  %v4073_v15 = vadd.f32 1e-05, %v4071_v16 }
0x1d57   : > { %9880 = vrsqrt.f32 %v4073_v15 }
0x1d5f   : > { %v9879_v12 = vpop.eup %9878 }
0x1d60   : > { %v4076_v30 = vmul.f32 %v9879_v12, %v4060_v41 }
0x1d61   : > { %v9881_v2 = vpop.eup %9880 }
0x1d62   : > { %v4082_v18 = vmul.f32 %v11407_v36, %v4076_v30  ;;  %v4077_v9 = vmul.f32 %v9881_v2, %v4061_v46 }
0x1d64   : > { %v4083_v35 = vmul.f32 %v11407_v36, %v4077_v9  ;;  %v4088_v33 = vadd.f32 %v11415_v1, %v4082_v18  ;;  %v4098_v36 = vrot.slane %v11400_v61, %v10966_v34  ;;  %v11693_v61 = vld [vmem:[%s10821_s30 + $0x30] sm:$0xff] }
0x1d65   : > { %v4223_v62 = vrot.slane %v11693_v61, %v10995_v60 }
0x1d66   : > { %v4089_v17 = vadd.f32 %v11415_v1, %v4083_v35 }
0x1d68   : > { %v4094_v19 = vpack.c.bf16 %v4089_v17, %v4088_v33 }
0x1d6a   : > { %8636 = vmatmul.mubr.msk.bf16.vlgmr.msra.gmra.mrb[52].mxu1 %vm1155_vm0, %v4094_v19 }
0x1d6b   : > { %8640 = vmatpush3.bf16.msra.mxu1 %v9652_v55  ;;  %8643 = vmatprep.mubr.msk.bf16.mxu1 %vm10325_vm1, %v10324_v39 }
0x1d6c   : > { %8641 = vmatprep.subr.bf16.mxu1 %v10324_v39 }
0x1d6f   : > { %8642 = vmatpush3.bf16.msra.mxu1 %v9653_v24 }
0x1d72   : > { %8644 = vmatmul.mubr.msk.bf16.vlgmr.msra.gmra.mrb[56].mxu1 %vm1155_vm0, %v4157_v3 }
0x1e3d   : > { %v4148_v1 = vpop.f32.mrb[52].mxu1 }
0x1e3e   : > { %v4149_v28 = vadd.f32 %v4148_v1, %v4098_v36  ;;  %v8637_v47 = vpop.f32.mrb[53].mxu1 }
0x1e3f   : > { %v4151_v14 = vpop.f32.mrb[54].mxu1 }
0x1e40   : > { %v4155_v26 = vmul.f32 0.35355338, %v4149_v28  ;;  %v8638_v31 = vpop.f32.mrb[55].mxu1  ;;  %v4152_v40 = vadd.f32 %v4151_v14, %v4098_v36 }
0x1e42   : > { %8663 = vmatprep.mubr.msk.f32.mxu1 %vm1403_vm2, %v4155_v26  ;;  %v4156_v38 = vmul.f32 0.35355338, %v4152_v40 }
0x1e45   : > { %v4207_v20 = vpop.f32.mrb[56].mxu1 }
0x1e46   : > { %v8645_v25 = vpop.f32.mrb[57].mxu1  ;;  %v4218_v8 = vadd.f32 %v4217_v22, %v4207_v20 }
0x1e47   : > { %v4210_v41 = vpop.f32.mrb[58].mxu1 }
0x1e48   : > { %v4219_v11 = vadd.f32 %v4217_v22, %v4210_v41  ;;  %v8646_v3 = vpop.f32.mrb[59].mxu1 }
0x1e4a   : > { %v9412_v46 = vpack.i.bf16 %v4219_v11, %v4218_v8  ;;  %v8995_v63 = vpack.c.bf16 %v4219_v11, %v4218_v8 }
0x1e4c   : > { %9413 = vrot.lane.b32.xlu1 %v9412_v46, %s10326_s17  ;;  %9408 = vrot.lane.b32.xlu0 %v9412_v46, %s10327_s22 }
0x1e4d   : > { %8997 = vmatprep.subr.msk.bf16.mxu1 %vm10978_vm3, %v8995_v63 }
0x1e4e   : > { %9000 = vmatpush3.bf16.xpose.msk.msra.mxu1 %vm10978_vm3, %v8995_v63 }
0x1e50   : > { %9418 = vrot.lane.b32.xlu1 %v9412_v46, %s10328_s24  ;;  %4234 = vrot.lane.b32.xlu0 %v4156_v38, %s10327_s22 }
0x1e54   : > { %4232 = vrot.lane.b32.xlu1 %v4155_v26, %s10327_s22  ;;  %4238 = vrot.lane.b32.xlu0 %v4156_v38, %s10326_s17 }
0x1e58   : > { %4236 = vrot.lane.b32.xlu1 %v4155_v26, %s10326_s17  ;;  %4242 = vrot.lane.b32.xlu0 %v4156_v38, %s10328_s24 }
0x1e5c   : > { %4240 = vrot.lane.b32.xlu1 %v4155_v26, %s10328_s24 }
0x1e60   : > { %4225 = vrot.lane.b32.xlu1 %v4223_v62, %s10329_s21 }
0x1ebe   : > { %v9414_v50 = vpop.permute.xlu1 %9413  ;;  %v9409_v4 = vpop.permute.xlu0 %9408 }
0x1ebf   : > { %v9416_v6 = vunpack.i.h.bf16 %v9414_v50  ;;  %v9415_v21 = vunpack.i.l.bf16 %v9414_v50  ;;  %v9411_v10 = vunpack.i.h.bf16 %v9409_v4  ;;  %v9410_v42 = vunpack.i.l.bf16 %v9409_v4 }
0x1ec1   : > { %v9001_v7 = vpack.c.bf16 %v9411_v10, %v9410_v42  ;;  %v9007_v15 = vpack.c.bf16 %v9416_v6, %v9415_v21 }
0x1ec2   : > { %v9419_v16 = vpop.permute.xlu1 %9418  ;;  %v4235_v24 = vpop.permute.xlu0 %4234 }
0x1ec3   : > { %9003 = vmatprep.subr.msk.bf16.mxu1 %vm10978_vm3, %v9001_v7  ;;  %v9421_v30 = vunpack.i.h.bf16 %v9419_v16  ;;  %v9420_v2 = vunpack.i.l.bf16 %v9419_v16 }
0x1ec4   : > { %9006 = vmatpush3.bf16.xpose.msk.msra.mxu1 %vm10978_vm3, %v9001_v7 }
0x1ec5   : > { %9009 = vmatprep.subr.msk.bf16.mxu1 %vm10978_vm3, %v9007_v15  ;;  %v9013_v9 = vpack.c.bf16 %v9421_v30, %v9420_v2 }
0x1ec6   : > { %v4233_v12 = vpop.permute.xlu1 %4232  ;;  %v4239_v36 = vpop.permute.xlu0 %4238 }
0x1eca   : > { %v4237_v18 = vpop.permute.xlu1 %4236  ;;  %v4243_v1 = vpop.permute.xlu0 %4242 }
0x1ecc   : > { %9012 = vmatpush3.bf16.xpose.msk.msra.mxu1 %vm10978_vm3, %v9007_v15 }
0x1ecd   : > { %9015 = vmatprep.subr.msk.bf16.mxu1 %vm10978_vm3, %v9013_v9 }
0x1ece   : > { %v4241_v35 = vpop.permute.xlu1 %4240 }
0x1ed2   : > { %v4226_v33 = vpop.permute.xlu1 %4225 }
0x1ed3   : > { %v4228_v17 = vadd.f32 %v4226_v33, %v4207_v20  ;;  %v4229_v55 = vadd.f32 %v4226_v33, %v4210_v41 }
0x1ed4   : > { %9018 = vmatpush3.bf16.xpose.msk.msra.mxu1 %vm10978_vm3, %v9013_v9 }
0x1ed5   : > { %v9427_v19 = vpack.i.bf16 %v4229_v55, %v4228_v17  ;;  %8719 = vmatprep.subr.bf16.mxu1 %v10324_v39 }
0x1edb   : > { %8664 = vmatmul.mubr.msk.f32.vlgmr.msra.gmra.mrb[60].mxu1 %vm1403_vm2, %v4156_v38 }
0x1edc   : > { %8666 = vmatprep.mubr.msk.f32.mxu1 %vm1403_vm2, %v4233_v12 }
0x1edf   : > { %8667 = vmatmul.mubr.msk.f32.gmra.mrb[62].mxu1 %vm1403_vm2, %v4235_v24 }
0x1ee0   : > { %8669 = vmatprep.mubr.msk.f32.mxu1 %vm1403_vm2, %v4237_v18 }
0x1ee3   : > { %8670 = vmatmul.mubr.msk.f32.gmra.mrb[64].mxu1 %vm1403_vm2, %v4239_v36 }
0x1ee4   : > { %8672 = vmatprep.mubr.msk.f32.mxu1 %vm1403_vm2, %v4241_v35 }
0x1ee7   : > { %8673 = vmatmul.mubr.msk.f32.gmra.mrb[66].mxu1 %vm1403_vm2, %v4243_v1 }
0x1ee8   : > { %8735 = vmatprep.mubr.msk.bf16.mxu1 %vm10325_vm1, %v10324_v39 }
0x1fae   : > { %v8665_v57 = vpop.f32.mrb[60].mxu1 }
0x1faf   : > { %v4376_v28 = vadd.f32 %v11500_v32, %v8665_v57  ;;  %v4370_v47 = vpop.f32.mrb[61].mxu1 }
0x1fb0   : > { %v4371_v14 = vadd.f32 %v11503_v0, %v4370_v47 }
0x1fb1   : > { %v4412_v26 = vsel %vm1541_vm4, %v4376_v28, -inf }
0x1fb2   : > { %4413 = vmax.xlane.f32.xlu1 %v4412_v26  ;;  %v8668_v31 = vpop.f32.mrb[62].mxu1  ;;  %v4409_v22 = vsel %vm1541_vm4, %v4371_v14, -inf }
0x1fb3   : > { %v4386_v20 = vadd.f32 %v11508_v58, %v8668_v31  ;;  %v4380_v25 = vpop.f32.mrb[63].mxu1  ;;  %4410 = vmax.xlane.f32.xlu0 %v4409_v22 }
0x1fb4   : > { %v4381_v8 = vadd.f32 %v11512_v45, %v4380_v25 }
0x1fb5   : > { %v4418_v41 = vsel %vm1541_vm4, %v4386_v20, -inf }
0x1fb6   : > { %v8671_v11 = vpop.f32.mrb[64].mxu1  ;;  %v4415_v63 = vsel %vm1541_vm4, %v4381_v8, -inf }
0x1fb7   : > { %v4396_v32 = vadd.f32 %v11515_v51, %v8671_v11  ;;  %v4390_v3 = vpop.f32.mrb[65].mxu1  ;;  %4419 = vmax.xlane.f32.xlu0 %v4418_v41 }
0x1fb8   : > { %v4391_v40 = vadd.f32 %v11519_v23, %v4390_v3 }
0x1fb9   : > { %v4424_v0 = vsel %vm1541_vm4, %v4396_v32, -inf }
0x1fba   : > { %4425 = vmax.xlane.f32.xlu1 %v4424_v0  ;;  %v8674_v46 = vpop.f32.mrb[66].mxu1  ;;  %v4421_v51 = vsel %vm1541_vm4, %v4391_v40, -inf }
0x1fbb   : > { %v4406_v58 = vadd.f32 %v11523_v52, %v8674_v46  ;;  %v4400_v38 = vpop.f32.mrb[67].mxu1  ;;  %4416 = vmax.xlane.f32.xlu0 %v4415_v63 }
0x1fbc   : > { %v4401_v45 = vadd.f32 %v11527_v29, %v4400_v38 }
0x1fbd   : > { %v4430_v62 = vsel %vm1541_vm4, %v4406_v58, -inf }
0x1fbe   : > { %4431 = vmax.xlane.f32.xlu1 %v4430_v62  ;;  %v4427_v50 = vsel %vm1541_vm4, %v4401_v45, -inf }
0x1fbf   : > { %4422 = vmax.xlane.f32.xlu0 %v4421_v51 }
0x1fc3   : > { %4428 = vmax.xlane.f32.xlu0 %v4427_v50 }
0x1fcf   : > { %9428 = vrot.lane.b32.xlu1 %v9427_v19, %s10326_s17 }
0x1fd3   : > { %9433 = vrot.lane.b32.xlu1 %v9427_v19, %s10328_s24  ;;  %s12451_s24 = sld [smem:[#allocation29_spill]] }
0x1fd7   : > { %9438 = vrot.lane.b32.xlu1 %v9427_v19, %s10330_s7 }
0x1fd9   : > { %9423 = vrot.lane.b32.xlu0 %v9427_v19, %s10327_s22  ;;  %s12455_s22 = sld [smem:[#allocation39_spill]] }
0x203f   : > { %v4414_v23 = vpop.xlane.xlu1 %4413 }
0x2040   : > { %v4434_v52 = vsub.f32 %v4376_v28, %v4414_v23  ;;  %v4411_v4 = vpop.xlane.xlu0 %4410 }
0x2041   : > { %v4433_v6 = vsub.f32 %v4371_v14, %v4411_v4 }
0x2042   : > { %v4443_v29 = vmul.f32 1.442695, %v4434_v52 }
0x2043   : > { %v4441_v21 = vmul.f32 1.442695, %v4433_v6 }
0x2044   : > { %9882 = vpow2.f32 %v4443_v29  ;;  %v4420_v10 = vpop.xlane.xlu0 %4419 }
0x2045   : > { %9884 = vpow2.f32 %v4441_v21  ;;  %v4436_v42 = vsub.f32 %v4386_v20, %v4420_v10 }
0x2047   : > { %v4447_v7 = vmul.f32 1.442695, %v4436_v42  ;;  %v4426_v16 = vpop.xlane.xlu1 %4425 }
0x2048   : > { %v4438_v15 = vsub.f32 %v4396_v32, %v4426_v16  ;;  %v4417_v12 = vpop.xlane.xlu0 %4416 }
0x2049   : > { %9886 = vpow2.f32 %v4447_v7  ;;  %v4435_v30 = vsub.f32 %v4381_v8, %v4417_v12 }
0x204a   : > { %v4451_v2 = vmul.f32 1.442695, %v4438_v15 }
0x204b   : > { %v4445_v18 = vmul.f32 1.442695, %v4435_v30  ;;  %v4432_v9 = vpop.xlane.xlu1 %4431 }
0x204c   : > { %v4440_v35 = vsub.f32 %v4406_v58, %v4432_v9  ;;  %v4423_v33 = vpop.xlane.xlu0 %4422 }
0x204d   : > { %9888 = vpow2.f32 %v4445_v18  ;;  %v4437_v17 = vsub.f32 %v4391_v40, %v4423_v33 }
0x204e   : > { %v11740_v55 = vpop.eup %9882  ;;  %9890 = vpow2.f32 %v4451_v2  ;;  %v4455_v24 = vmul.f32 1.442695, %v4440_v35 }
0x204f   : > { %v9885_v19 = vpop.eup %9884  ;;  %v4449_v36 = vmul.f32 1.442695, %v4437_v17  ;;  %v9429_v1 = vpop.permute.xlu1 %9428  ;;  %v4460_v57 = vsel %vm1541_vm4, %v11740_v55, 0.0 }
0x2050   : > { %4461 = vadd.xlane.f32.xlu0 %v4460_v57  ;;  %v4429_v28 = vpop.xlane.xlu0 %4428  ;;  %v4457_v47 = vsel %vm1541_vm4, %v9885_v19, 0.0 }
0x2051   : > { %9892 = vpow2.f32 %v4449_v36  ;;  %v4439_v14 = vsub.f32 %v4401_v45, %v4429_v28  ;;  %4458 = vadd.xlane.f32.xlu1 %v4457_v47 }
0x2052   : > { %9894 = vpow2.f32 %v4455_v24 }
0x2053   : > { %v11745_v26 = vpop.eup %9886  ;;  %v4453_v31 = vmul.f32 1.442695, %v4439_v14  ;;  %v9434_v22 = vpop.permute.xlu1 %9433 }
0x2054   : > { %v4466_v20 = vsel %vm1541_vm4, %v11745_v26, 0.0  ;;  %v9424_v51 = vpop.permute.xlu0 %9423 }
0x2055   : > { %4467 = vadd.xlane.f32.xlu0 %v4466_v20  ;;  %9896 = vpow2.f32 %v4453_v31 }
0x2057   : > { %v11749_v25 = vpop.eup %9888  ;;  %v9439_v41 = vpop.permute.xlu1 %9438 }
0x2058   : > { %v9441_v8 = vunpack.i.h.bf16 %v9439_v41  ;;  %v9440_v11 = vunpack.i.l.bf16 %v9439_v41  ;;  %v4463_v32 = vsel %vm1541_vm4, %v11749_v25, 0.0  ;;  %v11753_v3 = vpop.eup %9890 }
0x2059   : > { %4464 = vadd.xlane.f32.xlu0 %v4463_v32  ;;  %v4472_v46 = vsel %vm1541_vm4, %v11753_v3, 0.0 }
0x205a   : > { %v9019_v0 = vpack.c.bf16 %v9441_v8, %v9440_v11 }
0x205b   : > { %v11755_v40 = vpop.eup %9892 }
0x205c   : > { %9020 = vmatprep.subr.bf16.mxu0 %v9019_v0  ;;  %v4469_v63 = vsel %vm1541_vm4, %v11755_v40, 0.0  ;;  %v11761_v58 = vpop.eup %9894 }
0x205d   : > { %9022 = vmatpush3.bf16.msra.mxu0 %v9019_v0  ;;  %4473 = vadd.xlane.f32.xlu0 %v4472_v46  ;;  %v4478_v38 = vsel %vm1541_vm4, %v11761_v58, 0.0 }
0x205e   : > { %4470 = vadd.xlane.f32.xlu1 %v4469_v63 }
0x205f   : > { %v9897_v62 = vpop.eup %9896 }
0x2060   : > { %v4475_v45 = vsel %vm1541_vm4, %v9897_v62, 0.0 }
0x2061   : > { %4479 = vadd.xlane.f32.xlu0 %v4478_v38 }
0x2065   : > { %4476 = vadd.xlane.f32.xlu0 %v4475_v45 }
0x206f   : > { %9448 = vrot.lane.b32.xlu1 %v9429_v1, %s10330_s7 }
0x2073   : > { %9453 = vrot.lane.b32.xlu1 %v9434_v22, %s10330_s7 }
0x207b   : > { %9443 = vrot.lane.b32.xlu0 %v9424_v51, %s10330_s7 }
0x20dd   : > { %v4462_v50 = vpop.xlane.xlu0 %4461 }
0x20de   : > { %v4459_v23 = vpop.xlane.xlu1 %4458 }
0x20df   : > { %9898 = vrcp.f32 %v4459_v23 }
0x20e0   : > { %9900 = vrcp.f32 %v4462_v50 }
0x20e2   : > { %v4468_v52 = vpop.xlane.xlu0 %4467 }
0x20e6   : > { %v4465_v4 = vpop.xlane.xlu0 %4464 }
0x20e7   : > { %9902 = vrcp.f32 %v4465_v4 }
0x20e8   : > { %9904 = vrcp.f32 %v4468_v52 }
0x20e9   : > { %v9899_v6 = vpop.eup %9898 }
0x20ea   : > { %v4474_v29 = vpop.xlane.xlu0 %4473  ;;  %v4497_v21 = vmul.f32 %v9899_v6, %v9885_v19  ;;  %v9901_v36 = vpop.eup %9900 }
0x20eb   : > { %v4471_v10 = vpop.xlane.xlu1 %4470  ;;  %v4498_v57 = vmul.f32 %v9901_v36, %v11740_v55 }
0x20ec   : > { %8691 = vmatprep.mubr.msk.f32.mxu0 %vm1541_vm4, %v4497_v21  ;;  %9906 = vrcp.f32 %v4471_v10 }
0x20ed   : > { %9908 = vrcp.f32 %v4474_v29 }
0x20ee   : > { %v4480_v42 = vpop.xlane.xlu0 %4479 }
0x20ef   : > { %v9449_v7 = vpop.permute.xlu1 %9448 }
0x20f0   : > { %v9451_v12 = vunpack.i.h.bf16 %v9449_v7  ;;  %v9450_v30 = vunpack.i.l.bf16 %v9449_v7 }
0x20f1   : > { %v9903_v1 = vpop.eup %9902 }
0x20f2   : > { %v4477_v16 = vpop.xlane.xlu0 %4476  ;;  %v9027_v24 = vpack.c.bf16 %v9451_v12, %v9450_v30  ;;  %v9905_v28 = vpop.eup %9904  ;;  %v4499_v47 = vmul.f32 %v9903_v1, %v11749_v25 }
0x20f3   : > { %v9454_v9 = vpop.permute.xlu1 %9453  ;;  %9910 = vrcp.f32 %v4477_v16  ;;  %v4500_v31 = vmul.f32 %v9905_v28, %v11745_v26  ;;  %v9654_v26 = vld [vmem:[%s10802_s25 + $0x70] sm:$0xff]  }
0x20f4   : > { %v9456_v33 = vunpack.i.h.bf16 %v9454_v9  ;;  %v9455_v17 = vunpack.i.l.bf16 %v9454_v9  ;;  %9912 = vrcp.f32 %v4480_v42 }
0x20f6   : > { %v9444_v15 = vpop.permute.xlu0 %9443  ;;  %v9031_v19 = vpack.c.bf16 %v9456_v33, %v9455_v17  ;;  %v9907_v14 = vpop.eup %9906 }
0x20f7   : > { %v9446_v2 = vunpack.i.h.bf16 %v9444_v15  ;;  %v9445_v18 = vunpack.i.l.bf16 %v9444_v15  ;;  %v9909_v22 = vpop.eup %9908  ;;  %v4501_v20 = vmul.f32 %v9907_v14, %v11755_v40 }
0x20f8   : > { %v4502_v55 = vmul.f32 %v9909_v22, %v11753_v3  ;;  %v9655_v3 = vld [vmem:[%s10802_s25 + $0x78] sm:$0xff]   ;;  %s7972_s25 = sshll.u32 %s10832_s11, 2 }
0x20f9   : > { %v9023_v35 = vpack.c.bf16 %v9446_v2, %v9445_v18 }
0x20fb   : > { %9024 = vmatprep.subr.bf16.mxu0 %v9023_v35 }
0x20fc   : > { %9026 = vmatpush3.bf16.msra.mxu0 %v9023_v35  ;;  %v4750_v35 = vrot.slane %v11693_v61, %v11122_v54 }
0x20fd   : > { %9028 = vmatprep.subr.bf16.mxu0 %v9027_v24  ;;  %v9911_v41 = vpop.eup %9910 }
0x20fe   : > { %v9913_v25 = vpop.eup %9912  ;;  %v4503_v8 = vmul.f32 %v9911_v41, %v9897_v62 }
0x20ff   : > { %v4504_v11 = vmul.f32 %v9913_v25, %v11761_v58 }
0x2100   : > { %9030 = vmatpush3.bf16.msra.mxu0 %v9027_v24 }
0x2101   : > { %9032 = vmatprep.subr.bf16.mxu0 %v9031_v19 }
0x2104   : > { %9034 = vmatpush3.bf16.msra.mxu0 %v9031_v19 }
0x2105   : > { %8703 = vmatprep.subr.bf16.mxu0 %v10324_v39 }
0x2107   : > { %8692 = vmatmul.mubr.msk.f32.vlgmr.msra.gmra.mrb[56].mxu0 %vm1541_vm4, %v4498_v57 }
0x2108   : > { %8694 = vmatprep.mubr.msk.f32.mxu0 %vm1541_vm4, %v4499_v47  ;;  %8704 = vmatpush3.bf16.msra.mxu0 %v9654_v26  ;;  %v9656_v26 = vld [vmem:[%s10814_s19 + $0x30] sm:$0xff]  }
0x2109   : > { %8705 = vmatprep.subr.bf16.mxu0 %v10324_v39 }
0x210b   : > { %8695 = vmatmul.mubr.msk.f32.gmra.mrb[58].mxu0 %vm1541_vm4, %v4500_v31 }
0x210c   : > { %8697 = vmatprep.mubr.msk.f32.mxu0 %vm1541_vm4, %v4501_v20  ;;  %8706 = vmatpush3.bf16.msra.mxu0 %v9655_v3  ;;  %v9659_v3 = vld [vmem:[%s10869_s27 + $0xc8] sm:$0xff]  }
0x210d   : > { %8711 = vmatprep.subr.bf16.mxu0 %v10324_v39 }
0x210f   : > { %8698 = vmatmul.mubr.msk.f32.gmra.mrb[60].mxu0 %vm1541_vm4, %v4502_v55 }
0x2110   : > { %8700 = vmatprep.mubr.msk.f32.mxu0 %vm1541_vm4, %v4503_v8 }
0x2113   : > { %8701 = vmatmul.mubr.msk.f32.gmra.mrb[62].mxu0 %vm1541_vm4, %v4504_v11 }
0x2114   : > { %8707 = vmatprep.mubr.msk.bf16.mxu0 %vm10325_vm1, %v10324_v39 }
0x21da   : > { %v8693_v32 = vpop.f32.mrb[56].mxu0 }
0x21db   : > { %v4619_v0 = vpop.f32.mrb[57].mxu0 }
0x21de   : > { %v8696_v40 = vpop.f32.mrb[58].mxu0 }
0x21df   : > { %v4629_v46 = vpop.f32.mrb[59].mxu0 }
0x21e0   : > { %v9457_v63 = vpack.i.bf16 %v8696_v40, %v4629_v46  ;;  %v9660_v40 = vld [vmem:[%s10869_s27 + $0xd0] sm:$0xff]   ;;  %v9661_v46 = vld [vmem:[%s10869_s27 + $0xd8] sm:$0xff]  }
0x21e2   : > { %9458 = vrot.lane.b32.xlu1 %v9457_v63, %s10331_s20  ;;  %v8699_v58 = vpop.f32.mrb[60].mxu0  ;;  %v9662_v63 = vld [vmem:[%s10869_s27 + $0xe0] sm:$0xff]   ;;  %s12110_s20 = scalar_lea.vmem %s12455_s22, %s7972_s25 }
0x21e3   : > { %v4639_v38 = vpop.f32.mrb[61].mxu0 }
0x21e4   : > { %v9462_v62 = vpack.i.bf16 %v8699_v58, %v4639_v38  ;;  %v9663_v58 = vld [vmem:[%s10869_s27 + $0xe8] sm:$0xff]  }
0x21e6   : > { %9463 = vrot.lane.b32.xlu1 %v9462_v62, %s12448_s28  ;;  %v8702_v45 = vpop.f32.mrb[62].mxu0 }
0x21e7   : > { %v4649_v51 = vpop.f32.mrb[63].mxu0 }
0x21e8   : > { %v9467_v50 = vpack.i.bf16 %v8702_v45, %v4649_v51 }
0x21ea   : > { %9468 = vrot.lane.b32.xlu1 %v9467_v50, %s12449_s2  ;;  %s11903_s2 = scalar_lea.vmem %s12452_s13, %s7976_s26 }
0x2254   : > { %v9459_v23 = vpop.permute.xlu1 %9458 }
0x2255   : > { %v9461_v4 = vunpack.i.h.bf16 %v9459_v23  ;;  %v9460_v6 = vunpack.i.l.bf16 %v9459_v23 }
0x2257   : > { %v4683_v42 = vsel %vm1403_vm2, %v8693_v32, %v9461_v4  ;;  %v4682_v7 = vsel %vm1403_vm2, %v4619_v0, %v9460_v6  ;;  %v9657_v32 = vld [vmem:[%s10814_s19 + $0x38] sm:$0xff]   ;;  %v9658_v0 = vld [vmem:[%s10869_s27 + $0xc0] sm:$0xff]   ;;  %v4782_v4 = vrot.slane %v11693_v61, %v11157_v37  ;;  %s10336_s19 = smov 80  }
0x2258   : > { %v9464_v52 = vpop.permute.xlu1 %9463  ;;  %8720 = vmatpush3.bf16.msra.mxu1 %v9658_v0 }
0x2259   : > { %v9466_v29 = vunpack.i.h.bf16 %v9464_v52  ;;  %v9465_v21 = vunpack.i.l.bf16 %v9464_v52  ;;  %8721 = vmatprep.subr.bf16.mxu1 %v10324_v39 }
0x225b   : > { %v4685_v12 = vsel %vm1817_vm5, %v4683_v42, %v9466_v29  ;;  %v4684_v30 = vsel %vm1817_vm5, %v4682_v7, %v9465_v21  ;;  %v4788_v42 = vrot.slane %v11693_v61, %v11162_v13 }
0x225c   : > { %v9469_v10 = vpop.permute.xlu1 %9468  ;;  %8722 = vmatpush3.bf16.msra.mxu1 %v9659_v3 }
0x225d   : > { %v9471_v16 = vunpack.i.h.bf16 %v9469_v10  ;;  %v9470_v15 = vunpack.i.l.bf16 %v9469_v10  ;;  %8723 = vmatprep.subr.bf16.mxu1 %v10324_v39 }
0x225f   : > { %v4687_v2 = vsel %vm1820_vm6, %v4685_v12, %v9471_v16  ;;  %v4686_v18 = vsel %vm1820_vm6, %v4684_v30, %v9470_v15  ;;  %v9664_v30 = vld [vmem:[%s10869_s27 + $0xf0] sm:$0xff]  }
0x2260   : > { %v4688_v9 = vpack.c.bf16 %v4687_v2, %v4686_v18  ;;  %8724 = vmatpush3.bf16.msra.mxu1 %v9660_v40  ;;  %v9665_v2 = vld [vmem:[%s10869_s27 + $0xf8] sm:$0xff]   ;;  %v7759_v18 = vld [vmem:[%s10823_s23 + $0x3] ss:$0 sm:$0xff] }
0x2261   : > { %8725 = vmatprep.subr.bf16.mxu1 %v10324_v39 }
0x2262   : > { %8708 = vmatmul.mubr.msk.bf16.vlgmr.msra.gmra.mrb[64].mxu0 %vm1155_vm0, %v4688_v9 }
0x2263   : > { %8715 = vmatprep.mubr.msk.bf16.mxu0 %vm10325_vm1, %v10324_v39  ;;  %8712 = vmatpush3.bf16.msra.mxu0 %v9656_v26 }
0x2264   : > { %8713 = vmatprep.subr.bf16.mxu0 %v10324_v39  ;;  %8726 = vmatpush3.bf16.msra.mxu1 %v9661_v46 }
0x2265   : > { %8727 = vmatprep.subr.bf16.mxu1 %v10324_v39 }
0x2267   : > { %8714 = vmatpush3.bf16.msra.mxu0 %v9657_v32 }
0x2268   : > { %8728 = vmatpush3.bf16.msra.mxu1 %v9662_v63 }
0x2269   : > { %8729 = vmatprep.subr.bf16.mxu1 %v10324_v39 }
0x226c   : > { %8730 = vmatpush3.bf16.msra.mxu1 %v9663_v58 }
0x226d   : > { %8731 = vmatprep.subr.bf16.mxu1 %v10324_v39 }
0x2270   : > { %8732 = vmatpush3.bf16.msra.mxu1 %v9664_v30 }
0x2271   : > { %8733 = vmatprep.subr.bf16.mxu1 %v10324_v39 }
0x2274   : > { %8734 = vmatpush3.bf16.msra.mxu1 %v9665_v2 }
0x2335   : > { %v4738_v33 = vpop.f32.mrb[64].mxu0 }
0x2336   : > { %v4745_v17 = vadd.f32 %v4738_v33, %v11643_v44  ;;  %v8709_v24 = vpop.f32.mrb[65].mxu0 }
0x2337   : > { %v4741_v19 = vpop.f32.mrb[66].mxu0 }
0x2338   : > { %v11805_v36 = vadd.f32 %v4750_v35, %v4745_v17  ;;  %v4746_v1 = vadd.f32 %v4741_v19, %v11646_v27  ;;  %v8710_v57 = vpop.f32.mrb[67].mxu0 }
0x233a   : > { %v11808_v28 = vadd.f32 %v4750_v35, %v4746_v1  ;;  %v4753_v47 = vsel %vm1155_vm0, %v11805_v36, 0.0 }
0x233b   : > { %4754 = vadd.xlane.f32.xlu0 %v4753_v47  ;;  %v7601_v47 = vld [vmem:[%s10821_s30 + $0x18] ss:$0 sm:$0xff] }
0x233c   : > { %v4756_v14 = vsel %vm1155_vm0, %v11808_v28, 0.0 }
0x233d   : > { %4757 = vadd.xlane.f32.xlu1 %v4756_v14  ;;  %v7763_v14 = vld [vmem:[%s10821_s30 + $0x38] ss:$0 sm:$0xff]  ;;  %s12450_s30 = sld [smem:[#allocation35_spill]] }
0x2343   : > { %s1057_s23 = scalar_lea.vmem %s12450_s30, %s7972_s25  ;;  %s12040_s30 = scalar_lea.vmem [#allocation15], %s10808_s5 }
0x2344   : > { %v7772_v2 = vld [vmem:[%s1057_s23 + $0x2] sm:$0x3]  ;;  %s10337_s5 = smov 48  }
0x23c8   : > { %v4755_v44 = vpop.xlane.xlu0 %4754 }
0x23c9   : > { %v4759_v31 = vmul.f32 0.03125, %v4755_v44 }
0x23ca   : > { %v4758_v22 = vpop.xlane.xlu1 %4757 }
0x23cb   : > { %v4761_v20 = vsub.f32 %v11805_v36, %v4759_v31  ;;  %v4760_v27 = vmul.f32 0.03125, %v4758_v22  ;;  %v3021_v31 = vadd.f32 %v7601_v47, %v11496_v5 }
0x23cd   : > { %v4762_v41 = vsub.f32 %v11808_v28, %v4760_v27  ;;  %v4763_v55 = vmul.f32 %v4761_v20, %v4761_v20 }
0x23cf   : > { %v4765_v25 = vsel %vm1155_vm0, %v4763_v55, 0.0  ;;  %v4764_v8 = vmul.f32 %v4762_v41, %v4762_v41 }
0x23d0   : > { %4766 = vadd.xlane.f32.xlu0 %v4765_v25 }
0x23d1   : > { %v4768_v11 = vsel %vm1155_vm0, %v4764_v8, 0.0 }
0x23d4   : > { %4769 = vadd.xlane.f32.xlu0 %v4768_v11  ;;  %v3027_v11 = vadd.f32 %v3021_v31, %v11341_v49 }
0x23d6   : > { %v3030_v3 = vsel %vm1155_vm0, %v3027_v11, 0.0 }
0x245d   : > { %v4767_v38 = vpop.xlane.xlu0 %4766 }
0x245e   : > { %v4771_v62 = vmul.f32 0.03125, %v4767_v38 }
0x2460   : > { %v4773_v45 = vadd.f32 1e-05, %v4771_v62 }
0x2461   : > { %v4770_v51 = vpop.xlane.xlu0 %4769 }
0x2462   : > { %9914 = vrsqrt.f32 %v4773_v45  ;;  %v4772_v50 = vmul.f32 0.03125, %v4770_v51 }
0x2464   : > { %v4774_v23 = vadd.f32 1e-05, %v4772_v50 }
0x2466   : > { %9916 = vrsqrt.f32 %v4774_v23 }
0x246c   : > { %v9915_v52 = vpop.eup %9914 }
0x246d   : > { %v4777_v6 = vmul.f32 %v9915_v52, %v4761_v20 }
0x246f   : > { %v4783_v21 = vmul.f32 %v4782_v4, %v4777_v6 }
0x2470   : > { %v9917_v29 = vpop.eup %9916 }
0x2471   : > { %v4778_v10 = vmul.f32 %v9917_v29, %v4762_v41  ;;  %v4789_v16 = vadd.f32 %v4788_v42, %v4783_v21  ;;  %v3024_v41 = vadd.f32 %v7601_v47, %v11498_v56 }
0x2473   : > { %v4784_v7 = vmul.f32 %v4782_v4, %v4778_v10  ;;  %v3028_v0 = vadd.f32 %v3024_v41, %v11347_v48  ;;  %v3029_v41 = vld [vmem:[%s1057_s23] sm:$0x3] }
0x2475   : > { %v4790_v15 = vadd.f32 %v4788_v42, %v4784_v7  ;;  %v3033_v56 = vsel %vm1155_vm0, %v3028_v0, 0.0 }
0x2477   : > { %v4791_v12 = vpack.c.bf16 %v4790_v15, %v4789_v16 }
0x2479   : > { %8716 = vmatmul.mubr.msk.bf16.vlgmr.msra.gmra.mrb[68].mxu0 %vm1155_vm0, %v4791_v12 }
0x254c   : > { %v4847_v9 = vpop.f32.mrb[68].mxu0 }
0x254d   : > { %v4848_v35 = vadd.f32 %v7759_v18, %v4847_v9  ;;  %v8717_v33 = vpop.f32.mrb[69].mxu0 }
0x254e   : > { %v4850_v17 = vpop.f32.mrb[70].mxu0  ;;  %v4989_v33 = vrot.slane %v7772_v2, %v10914_v59 }
0x254f   : > { %v4851_v61 = vadd.f32 %v7759_v18, %v4850_v17  ;;  %v8718_v24 = vpop.f32.mrb[71].mxu0  ;;  %v4854_v19 = vmax.f32 %v4848_v35, 0.0  ;;  %v4983_v18 = vrot.slane %v7772_v2, %v10907_v53  ;;  %v9672_v2 = vld [vmem:[%s10851_s29 + $0x20] ss:$8 sps:$4 sm:$0xff]  }
0x2551   : > { %v4855_v1 = vmax.f32 %v4851_v61, 0.0 }
0x2553   : > { %v4856_v57 = vpack.c.bf16 %v4855_v1, %v4854_v19 }
0x2555   : > { %8736 = vmatmul.mubr.bf16.vlgmr.msra.gmra.mrb[68].mxu1 %v4856_v57 }
0x2628   : > { %v4943_v44 = vpop.f32.mrb[68].mxu1 }
0x2629   : > { %v4944_v22 = vadd.f32 %v7763_v14, %v4943_v44  ;;  %v8737_v20 = vpop.f32.mrb[69].mxu1 }
0x262a   : > { %v4946_v27 = vpop.f32.mrb[70].mxu1 }
0x262b   : > { %v4950_v55 = vadd.f32 %v4944_v22, %v11805_v36  ;;  %v4947_v25 = vadd.f32 %v7763_v14, %v4946_v27  ;;  %v8738_v8 = vpop.f32.mrb[71].mxu1 }
0x262c   : > { %v3059_v8 = vrot.slane %v3029_v41, %v10907_v53 }
0x262d   : > { %v4951_v26 = vadd.f32 %v4947_v25, %v11808_v28  ;;  %v4954_v32 = vsel %vm1155_vm0, %v4950_v55, 0.0 }
0x262e   : > { %4955 = vadd.xlane.f32.xlu0 %v4954_v32  ;;  %v3065_v32 = vrot.slane %v3029_v41, %v10914_v59 }
0x262f   : > { %v4957_v5 = vsel %vm1155_vm0, %v4951_v26, 0.0 }
0x2630   : > { %4958 = vadd.xlane.f32.xlu1 %v4957_v5 }
0x2632   : > { %3031 = vadd.xlane.f32.xlu0 %v3030_v3 }
0x2634   : > { %3034 = vadd.xlane.f32.xlu1 %v3033_v56  ;;  %v5004_v56 = vld [vmem:[%s12451_s24] sm:$0xff] }
0x26bb   : > { %v4956_v36 = vpop.xlane.xlu0 %4955 }
0x26bc   : > { %v4960_v40 = vmul.f32 0.03125, %v4956_v36 }
0x26bd   : > { %v4959_v46 = vpop.xlane.xlu1 %4958 }
0x26be   : > { %v4962_v49 = vsub.f32 %v4950_v55, %v4960_v40  ;;  %v4961_v63 = vmul.f32 0.03125, %v4959_v46 }
0x26bf   : > { %v3032_v28 = vpop.xlane.xlu0 %3031 }
0x26c0   : > { %v4963_v58 = vsub.f32 %v4951_v26, %v4961_v63  ;;  %v3036_v38 = vmul.f32 0.03125, %v3032_v28  ;;  %v4964_v62 = vmul.f32 %v4962_v49, %v4962_v49  ;;  %v5005_v63 = vld [vmem:[%s12451_s24 + $0x8] sm:$0xff] }
0x26c1   : > { %v3035_v45 = vpop.xlane.xlu1 %3034 }
0x26c2   : > { %v3038_v48 = vsub.f32 %v3027_v11, %v3036_v38  ;;  %v3037_v51 = vmul.f32 0.03125, %v3035_v45  ;;  %v4966_v50 = vsel %vm1155_vm0, %v4964_v62, 0.0  ;;  %v4965_v23 = vmul.f32 %v4963_v58, %v4963_v58 }
0x26c3   : > { %4967 = vadd.xlane.f32.xlu0 %v4966_v50 }
0x26c4   : > { %v3039_v52 = vsub.f32 %v3028_v0, %v3037_v51  ;;  %v4969_v4 = vsel %vm1155_vm0, %v4965_v23, 0.0  ;;  %v3040_v6 = vmul.f32 %v3038_v48, %v3038_v48 }
0x26c5   : > { %4970 = vadd.xlane.f32.xlu1 %v4969_v4 }
0x26c6   : > { %v3042_v29 = vsel %vm1155_vm0, %v3040_v6, 0.0  ;;  %v3041_v21 = vmul.f32 %v3039_v52, %v3039_v52 }
0x26c7   : > { %3043 = vadd.xlane.f32.xlu0 %v3042_v29 }
0x26c8   : > { %v3045_v10 = vsel %vm1155_vm0, %v3041_v21, 0.0 }
0x26c9   : > { %3046 = vadd.xlane.f32.xlu1 %v3045_v10 }
0x2750   : > { %v4968_v42 = vpop.xlane.xlu0 %4967 }
0x2751   : > { %v4972_v7 = vmul.f32 0.03125, %v4968_v42 }
0x2752   : > { %v4971_v16 = vpop.xlane.xlu1 %4970 }
0x2753   : > { %v4974_v15 = vadd.f32 1e-05, %v4972_v7  ;;  %v4973_v12 = vmul.f32 0.03125, %v4971_v16  ;;  %v9668_v7 = vld [vmem:[%s10851_s29 + $0x4] ss:$8 sps:$4 sm:$0xff]  }
0x2754   : > { %v3044_v47 = vpop.xlane.xlu0 %3043  ;;  %v9666_v16 = vld [vmem:[%s10851_s29] ss:$8 sps:$4 sm:$0xff]   ;;  %5150 = vmatprep.subr.bf16.mxu0 %v9668_v7 }
0x2755   : > { %9918 = vrsqrt.f32 %v4974_v15  ;;  %v4975_v30 = vadd.f32 1e-05, %v4973_v12  ;;  %v3048_v44 = vmul.f32 0.03125, %v3044_v47  ;;  %5151 = vmatpush1.bf16.msra.mxu0 %v9666_v16  ;;  %v9671_v15 = vld [vmem:[%s10851_s29 + $0x14] ss:$8 sps:$4 sm:$0xff]  }
0x2756   : > { %v3047_v14 = vpop.xlane.xlu1 %3046  ;;  %v9669_v12 = vld [vmem:[%s10851_s29 + $0x10] ss:$8 sps:$4 sm:$0xff]   ;;  %5152 = vmatprep.subr.bf16.mxu0 %v9671_v15 }
0x2757   : > { %9920 = vrsqrt.f32 %v4975_v30  ;;  %v3049_v31 = vmul.f32 0.03125, %v3047_v14  ;;  %v3050_v22 = vadd.f32 1e-05, %v3048_v44  ;;  %v9674_v30 = vld [vmem:[%s10851_s29 + $0x24] ss:$8 sps:$4 sm:$0xff]  }
0x2759   : > { %v3051_v20 = vadd.f32 1e-05, %v3049_v31  ;;  %9922 = vrsqrt.f32 %v3050_v22  ;;  %5153 = vmatpush1.bf16.msra.mxu0 %v9669_v12 }
0x275a   : > { %5154 = vmatprep.subr.bf16.mxu0 %v9674_v30 }
0x275b   : > { %9924 = vrsqrt.f32 %v3051_v20 }
0x275d   : > { %5155 = vmatpush1.bf16.msra.mxu0 %v9672_v2 }
0x275f   : > { %v9919_v9 = vpop.eup %9918 }
0x2760   : > { %v4978_v35 = vmul.f32 %v9919_v9, %v4962_v49  ;;  %v9677_v9 = vld [vmem:[%s10851_s29 + $0x34] ss:$8 sps:$4 sm:$0xff]  }
0x2761   : > { %v9921_v17 = vpop.eup %9920  ;;  %5156 = vmatprep.subr.bf16.mxu0 %v9677_v9 }
0x2762   : > { %v4984_v61 = vmul.f32 %v4983_v18, %v4978_v35  ;;  %v4979_v24 = vmul.f32 %v9921_v17, %v4963_v58  ;;  %v10334_v35 = vmov 0  }
0x2763   : > { %v9923_v27 = vpop.eup %9922  ;;  %5182 = vmatprep.mubr.bf16.mxu0 %v10334_v35 }
0x2764   : > { %v4990_v19 = vadd.f32 %v4989_v33, %v4984_v61  ;;  %v4985_v1 = vmul.f32 %v4983_v18, %v4979_v24  ;;  %v3054_v25 = vmul.f32 %v9923_v27, %v3038_v48  ;;  %v9675_v18 = vld [vmem:[%s10851_s29 + $0x30] ss:$8 sps:$4 sm:$0xff]  }
0x2765   : > { %v9925_v55 = vpop.eup %9924  ;;  %5157 = vmatpush1.bf16.msra.mxu0 %v9675_v18 }
0x2766   : > { %4994 = vrot.lane.b32.xlu0 %v4990_v19, %s10329_s21  ;;  %v4991_v57 = vadd.f32 %v4989_v33, %v4985_v1  ;;  %v3055_v11 = vmul.f32 %v9925_v55, %v3039_v52  ;;  %v3060_v26 = vmul.f32 %v3059_v8, %v3054_v25  ;;  %v11906_v33 = vld [vmem:[%s11903_s2] sm:$0xff] }
0x2767   : > { %v5204_v17 = vrot.slane %v11906_v33, %v10971_v43  ;;  %v5097_v14 = vrot.slane %v11906_v33, %v10907_v53  ;;  %v5103_v41 = vrot.slane %v11906_v33, %v10914_v59 }
0x2768   : > { %4996 = vrot.lane.b32.xlu1 %v4991_v57, %s10329_s21  ;;  %v3061_v0 = vmul.f32 %v3059_v8, %v3055_v11  ;;  %v3066_v5 = vadd.f32 %v3065_v32, %v3060_v26  ;;  %v5196_v26 = vrot.slane %v11906_v33, %v10966_v34 }
0x276a   : > { %v3067_v40 = vadd.f32 %v3065_v32, %v3061_v0 }
0x27d8   : > { %v4995_v3 = vpop.permute.xlu0 %4994 }
0x27d9   : > { %v5000_v36 = vsel %vm1155_vm0, %v3066_v5, %v4995_v3  ;;  %v5214_v5 = vrot.slane %v11906_v33, %v10995_v60 }
0x27da   : > { %v5002_v46 = vmul.f32 8.0, %v5000_v36  ;;  %v4997_v49 = vpop.permute.xlu1 %4996 }
0x27db   : > { %v5001_v28 = vsel %vm1155_vm0, %v3067_v40, %v4997_v49 }
0x27dc   : > { %v11878_v58 = vadd.f32 %v5004_v56, %v5002_v46  ;;  %v5003_v38 = vmul.f32 8.0, %v5001_v28 }
0x27de   : > { %v11880_v62 = vadd.f32 %v5005_v63, %v5003_v38  ;;  %v5067_v45 = vsel %vm1541_vm4, %v11878_v58, 0.0 }
0x27df   : > { %5068 = vadd.xlane.f32.xlu1 %v5067_v45 }
0x27e0   : > { %v5070_v48 = vsel %vm1541_vm4, %v11880_v62, 0.0 }
0x27e1   : > { %5071 = vadd.xlane.f32.xlu0 %v5070_v48 }
0x286c   : > { %v5069_v51 = vpop.xlane.xlu1 %5068 }
0x286d   : > { %v5074_v50 = vmul.f32 0.015625, %v5069_v51 }
0x286e   : > { %v5072_v23 = vpop.xlane.xlu0 %5071 }
0x286f   : > { %v5076_v52 = vsub.f32 %v11878_v58, %v5074_v50  ;;  %v5075_v4 = vmul.f32 0.015625, %v5072_v23 }
0x2871   : > { %v5077_v6 = vsub.f32 %v11880_v62, %v5075_v4  ;;  %v5078_v29 = vmul.f32 %v5076_v52, %v5076_v52 }
0x2873   : > { %v5080_v21 = vsel %vm1541_vm4, %v5078_v29, 0.0  ;;  %v5079_v10 = vmul.f32 %v5077_v6, %v5077_v6 }
0x2874   : > { %5081 = vadd.xlane.f32.xlu0 %v5080_v21 }
0x2875   : > { %v5083_v42 = vsel %vm1541_vm4, %v5079_v10, 0.0 }
0x2876   : > { %5084 = vadd.xlane.f32.xlu1 %v5083_v42 }
0x288a   : > { %5206 = vrot.lane.b32.xlu0 %v5204_v17, %s10335_s4 }
0x2901   : > { %v5082_v61 = vpop.xlane.xlu0 %5081 }
0x2902   : > { %v5086_v24 = vmul.f32 0.015625, %v5082_v61 }
0x2903   : > { %v5085_v19 = vpop.xlane.xlu1 %5084 }
0x2904   : > { %v5088_v1 = vadd.f32 1e-05, %v5086_v24  ;;  %v5087_v57 = vmul.f32 0.015625, %v5085_v19 }
0x2905   : > { %v5207_v32 = vpop.permute.xlu0 %5206 }
0x2906   : > { %9926 = vrsqrt.f32 %v5088_v1  ;;  %v5089_v47 = vadd.f32 1e-05, %v5087_v57 }
0x2908   : > { %9928 = vrsqrt.f32 %v5089_v47 }
0x2910   : > { %v9927_v44 = vpop.eup %9926 }
0x2911   : > { %v5092_v31 = vmul.f32 %v9927_v44, %v5076_v52 }
0x2912   : > { %v9929_v22 = vpop.eup %9928 }
0x2913   : > { %v5098_v20 = vmul.f32 %v5097_v14, %v5092_v31  ;;  %v5093_v27 = vmul.f32 %v9929_v22, %v5077_v6 }
0x2915   : > { %v5099_v55 = vmul.f32 %v5097_v14, %v5093_v27  ;;  %v5104_v25 = vadd.f32 %v5103_v41, %v5098_v20  ;;  %v11966_v27 = vld [vmem:[#allocation5 + $0x8] sm:$0xff] }
0x2917   : > { %v5105_v8 = vadd.f32 %v5103_v41, %v5099_v55 }
0x2919   : > { %v5106_v11 = vpack.c.bf16 %v5105_v8, %v5104_v25  ;;  %v11969_v25 = vld [vmem:[#allocation5] sm:$0xff] }
0x291b   : > { %7781 = vmatmul.mubr.msk.bf16.vlgmr.msra.gmra.mrb[72].mxu0 %vm1541_vm4, %v5106_v11 }
0x29ee   : > { %v5184_v0 = vpop.f32.mrb[72].mxu0 }
0x29ef   : > { %v5197_v3 = vadd.f32 %v5196_v26, %v5184_v0  ;;  %v5186_v56 = vpop.f32.mrb[73].mxu0  ;;  %v5209_v46 = vadd.f32 %v5207_v32, %v5184_v0  ;;  %v11974_v0 = vld [vmem:[#allocation5 + $0x18] sm:$0xff] }
0x29f0   : > { %v5188_v36 = vpop.f32.mrb[74].mxu0  ;;  %v5215_v38 = vadd.f32 %v5214_v5, %v5186_v56 }
0x29f1   : > { %v5199_v40 = vmul.f32 0.25, %v5197_v3  ;;  %v5198_v49 = vadd.f32 %v5196_v26, %v5188_v36  ;;  %v5210_v63 = vadd.f32 %v5207_v32, %v5188_v36  ;;  %v5190_v28 = vpop.f32.mrb[75].mxu0  ;;  %v11978_v36 = vld [vmem:[#allocation5 + $0x10] sm:$0xff] }
0x29f2   : > { %v5216_v45 = vadd.f32 %v5214_v5, %v5190_v28 }
0x29f3   : > { %8755 = vmatprep.mubr.msk.f32.mxu0 %vm1817_vm5, %v5199_v40  ;;  %v9487_v48 = vpack.i.bf16 %v5210_v63, %v5209_v46  ;;  %v5200_v7 = vmul.f32 0.25, %v5198_v49  ;;  %v11981_v49 = vld [vmem:[#allocation5 + $0x28] sm:$0xff] }
0x29f4   : > { %v9059_v51 = vpack.c.bf16 %v5216_v45, %v5215_v38  ;;  %v11921_v50 = vpack.i.bf16 %v5216_v45, %v5215_v38  ;;  %v11985_v45 = vld [vmem:[#allocation5 + $0x20] sm:$0xff] }
0x29f5   : > { %9488 = vrot.lane.b32.xlu0 %v9487_v48, %s10335_s4  ;;  %9473 = vrot.lane.b32.xlu1 %v9487_v48, %s10326_s17 }
0x29f6   : > { %9060 = vmatprep.subr.bf16.mxu1 %v9059_v51 }
0x29f7   : > { %9062 = vmatpush3.bf16.msra.mxu1 %v9059_v51 }
0x29f9   : > { %9478 = vrot.lane.b32.xlu1 %v9487_v48, %s10330_s7 }
0x29fd   : > { %9483 = vrot.lane.b32.xlu1 %v9487_v48, %s10336_s19 }
0x2a67   : > { %v9489_v23 = vpop.permute.xlu0 %9488  ;;  %v9474_v52 = vpop.permute.xlu1 %9473 }
0x2a68   : > { %v9491_v4 = vunpack.i.h.bf16 %v9489_v23  ;;  %v9490_v6 = vunpack.i.l.bf16 %v9489_v23  ;;  %9493 = vrot.lane.b32.xlu1 %v9474_v52, %s10335_s4  ;;  %v11989_v52 = vld [vmem:[#allocation5 + $0x38] sm:$0xff] }
0x2a6a   : > { %v9035_v21 = vpack.c.bf16 %v9491_v4, %v9490_v6 }
0x2a6b   : > { %v9479_v10 = vpop.permute.xlu1 %9478 }
0x2a6c   : > { %9037 = vmatprep.subr.msk.bf16.mxu0 %vm11929_vm7, %v9035_v21  ;;  %9498 = vrot.lane.b32.xlu0 %v9479_v10, %s10335_s4  ;;  %v11993_v10 = vld [vmem:[#allocation5 + $0x30] sm:$0xff] }
0x2a6d   : > { %9040 = vmatpush3.bf16.xpose.msk.msra.mxu0 %vm11929_vm7, %v9035_v21 }
0x2a6f   : > { %v9484_v42 = vpop.permute.xlu1 %9483 }
0x2a70   : > { %5219 = vrot.lane.b32.xlu0 %v5199_v40, %s10326_s17  ;;  %9503 = vrot.lane.b32.xlu1 %v9484_v42, %s10335_s4 }
0x2a74   : > { %5223 = vrot.lane.b32.xlu0 %v5199_v40, %s10330_s7  ;;  %5221 = vrot.lane.b32.xlu1 %v5200_v7, %s10326_s17 }
0x2a78   : > { %5227 = vrot.lane.b32.xlu0 %v5199_v40, %s10336_s19  ;;  %5225 = vrot.lane.b32.xlu1 %v5200_v7, %s10330_s7 }
0x2a7c   : > { %5229 = vrot.lane.b32.xlu1 %v5200_v7, %s10336_s19 }
0x2ada   : > { %v9494_v16 = vpop.permute.xlu1 %9493 }
0x2adb   : > { %v9496_v15 = vunpack.i.h.bf16 %v9494_v16  ;;  %v9495_v12 = vunpack.i.l.bf16 %v9494_v16 }
0x2add   : > { %v9041_v30 = vpack.c.bf16 %v9496_v15, %v9495_v12 }
0x2ade   : > { %v9499_v2 = vpop.permute.xlu0 %9498 }
0x2adf   : > { %v9501_v18 = vunpack.i.h.bf16 %v9499_v2  ;;  %v9500_v9 = vunpack.i.l.bf16 %v9499_v2  ;;  %9043 = vmatprep.subr.msk.bf16.mxu0 %vm11929_vm7, %v9041_v30 }
0x2ae0   : > { %9046 = vmatpush3.bf16.xpose.msk.msra.mxu0 %vm11929_vm7, %v9041_v30 }
0x2ae1   : > { %v9047_v17 = vpack.c.bf16 %v9501_v18, %v9500_v9 }
0x2ae2   : > { %v9504_v61 = vpop.permute.xlu1 %9503  ;;  %v5220_v57 = vpop.permute.xlu0 %5219 }
0x2ae3   : > { %v9506_v24 = vunpack.i.h.bf16 %v9504_v61  ;;  %v9505_v19 = vunpack.i.l.bf16 %v9504_v61  ;;  %9049 = vmatprep.subr.msk.bf16.mxu0 %vm11929_vm7, %v9047_v17 }
0x2ae5   : > { %v9053_v1 = vpack.c.bf16 %v9506_v24, %v9505_v19 }
0x2ae6   : > { %v5222_v47 = vpop.permute.xlu1 %5221  ;;  %v5224_v14 = vpop.permute.xlu0 %5223 }
0x2ae8   : > { %9052 = vmatpush3.bf16.xpose.msk.msra.mxu0 %vm11929_vm7, %v9047_v17 }
0x2ae9   : > { %9055 = vmatprep.subr.msk.bf16.mxu0 %vm11929_vm7, %v9053_v1 }
0x2aea   : > { %v5226_v44 = vpop.permute.xlu1 %5225  ;;  %v5228_v31 = vpop.permute.xlu0 %5227 }
0x2aee   : > { %v5230_v22 = vpop.permute.xlu1 %5229 }
0x2af0   : > { %9058 = vmatpush3.bf16.xpose.msk.msra.mxu0 %vm11929_vm7, %v9053_v1 }
0x2af7   : > { %8756 = vmatmul.mubr.msk.f32.vlgmr.msra.gmra.mrb[76].mxu0 %vm1817_vm5, %v5200_v7 }
0x2af8   : > { %8758 = vmatprep.mubr.msk.f32.mxu0 %vm1817_vm5, %v5220_v57 }
0x2afb   : > { %8759 = vmatmul.mubr.msk.f32.gmra.mrb[78].mxu0 %vm1817_vm5, %v5222_v47 }
0x2afc   : > { %8761 = vmatprep.mubr.msk.f32.mxu0 %vm1817_vm5, %v5224_v14 }
0x2aff   : > { %8762 = vmatmul.mubr.msk.f32.gmra.mrb[80].mxu0 %vm1817_vm5, %v5226_v44 }
0x2b00   : > { %8764 = vmatprep.mubr.msk.f32.mxu0 %vm1817_vm5, %v5228_v31 }
0x2b03   : > { %8765 = vmatmul.mubr.msk.f32.gmra.mrb[82].mxu0 %vm1817_vm5, %v5230_v22 }
0x2b04   : > { %5876 = vmatprep.mubr.bf16.mxu0 %v10334_v35 }
0x2bca   : > { %v8757_v20 = vpop.f32.mrb[76].mxu0 }
0x2bcb   : > { %v5385_v41 = vadd.f32 %v11966_v27, %v8757_v20  ;;  %v5379_v55 = vpop.f32.mrb[77].mxu0 }
0x2bcc   : > { %v5380_v8 = vadd.f32 %v11969_v25, %v5379_v55 }
0x2bcd   : > { %v5421_v11 = vsel %vm1541_vm4, %v5385_v41, -inf }
0x2bce   : > { %5422 = vmax.xlane.f32.xlu1 %v5421_v11  ;;  %v8760_v26 = vpop.f32.mrb[78].mxu0  ;;  %v5418_v32 = vsel %vm1541_vm4, %v5380_v8, -inf }
0x2bcf   : > { %v5395_v5 = vadd.f32 %v11974_v0, %v8760_v26  ;;  %v5389_v3 = vpop.f32.mrb[79].mxu0  ;;  %5419 = vmax.xlane.f32.xlu0 %v5418_v32 }
0x2bd0   : > { %v5390_v40 = vadd.f32 %v11978_v36, %v5389_v3 }
0x2bd1   : > { %v5427_v56 = vsel %vm1541_vm4, %v5395_v5, -inf }
0x2bd2   : > { %v8763_v46 = vpop.f32.mrb[80].mxu0  ;;  %v5424_v23 = vsel %vm1541_vm4, %v5390_v40, -inf }
0x2bd3   : > { %v5405_v63 = vadd.f32 %v11981_v49, %v8763_v46  ;;  %v5399_v28 = vpop.f32.mrb[81].mxu0  ;;  %5428 = vmax.xlane.f32.xlu0 %v5427_v56 }
0x2bd4   : > { %v5400_v48 = vadd.f32 %v11985_v45, %v5399_v28 }
0x2bd5   : > { %v5433_v38 = vsel %vm1541_vm4, %v5405_v63, -inf }
0x2bd6   : > { %5434 = vmax.xlane.f32.xlu1 %v5433_v38  ;;  %v8766_v51 = vpop.f32.mrb[82].mxu0  ;;  %v5430_v7 = vsel %vm1541_vm4, %v5400_v48, -inf }
0x2bd7   : > { %v5415_v4 = vadd.f32 %v11989_v52, %v8766_v51  ;;  %v5409_v6 = vpop.f32.mrb[83].mxu0  ;;  %5425 = vmax.xlane.f32.xlu0 %v5424_v23 }
0x2bd8   : > { %v5410_v42 = vadd.f32 %v11993_v10, %v5409_v6 }
0x2bd9   : > { %v5439_v21 = vsel %vm1541_vm4, %v5415_v4, -inf }
0x2bda   : > { %5440 = vmax.xlane.f32.xlu1 %v5439_v21  ;;  %v5436_v16 = vsel %vm1541_vm4, %v5410_v42, -inf }
0x2bdb   : > { %5431 = vmax.xlane.f32.xlu0 %v5430_v7 }
0x2bdf   : > { %5437 = vmax.xlane.f32.xlu0 %v5436_v16 }
0x2c5b   : > { %v5423_v15 = vpop.xlane.xlu1 %5422 }
0x2c5c   : > { %v5443_v12 = vsub.f32 %v5385_v41, %v5423_v15  ;;  %v5420_v30 = vpop.xlane.xlu0 %5419 }
0x2c5d   : > { %v5442_v2 = vsub.f32 %v5380_v8, %v5420_v30 }
0x2c5e   : > { %v5452_v18 = vmul.f32 1.442695, %v5443_v12 }
0x2c5f   : > { %v5450_v9 = vmul.f32 1.442695, %v5442_v2 }
0x2c60   : > { %9930 = vpow2.f32 %v5452_v18  ;;  %v5429_v17 = vpop.xlane.xlu0 %5428 }
0x2c61   : > { %9932 = vpow2.f32 %v5450_v9  ;;  %v5445_v61 = vsub.f32 %v5395_v5, %v5429_v17 }
0x2c63   : > { %v5456_v24 = vmul.f32 1.442695, %v5445_v61  ;;  %v5435_v19 = vpop.xlane.xlu1 %5434 }
0x2c64   : > { %v5447_v1 = vsub.f32 %v5405_v63, %v5435_v19  ;;  %v5426_v57 = vpop.xlane.xlu0 %5425 }
0x2c65   : > { %9934 = vpow2.f32 %v5456_v24  ;;  %v5444_v47 = vsub.f32 %v5390_v40, %v5426_v57 }
0x2c66   : > { %v5460_v14 = vmul.f32 1.442695, %v5447_v1 }
0x2c67   : > { %v5454_v44 = vmul.f32 1.442695, %v5444_v47  ;;  %v5441_v31 = vpop.xlane.xlu1 %5440 }
0x2c68   : > { %9936 = vpow2.f32 %v5460_v14  ;;  %v5449_v22 = vsub.f32 %v5415_v4, %v5441_v31  ;;  %v5432_v20 = vpop.xlane.xlu0 %5431 }
0x2c69   : > { %9938 = vpow2.f32 %v5454_v44  ;;  %v5446_v41 = vsub.f32 %v5400_v48, %v5432_v20 }
0x2c6a   : > { %v11998_v55 = vpop.eup %9930  ;;  %v5464_v8 = vmul.f32 1.442695, %v5449_v22 }
0x2c6b   : > { %v9933_v11 = vpop.eup %9932  ;;  %v5458_v26 = vmul.f32 1.442695, %v5446_v41  ;;  %v5469_v32 = vsel %vm1541_vm4, %v11998_v55, 0.0 }
0x2c6c   : > { %9940 = vpow2.f32 %v5464_v8  ;;  %5470 = vadd.xlane.f32.xlu1 %v5469_v32  ;;  %v5438_v5 = vpop.xlane.xlu0 %5437  ;;  %v5466_v3 = vsel %vm1541_vm4, %v9933_v11, 0.0 }
0x2c6d   : > { %9942 = vpow2.f32 %v5458_v26  ;;  %v5448_v56 = vsub.f32 %v5410_v42, %v5438_v5  ;;  %5467 = vadd.xlane.f32.xlu0 %v5466_v3 }
0x2c6f   : > { %v12003_v40 = vpop.eup %9934  ;;  %v5462_v46 = vmul.f32 1.442695, %v5448_v56 }
0x2c70   : > { %v5475_v63 = vsel %vm1541_vm4, %v12003_v40, 0.0 }
0x2c71   : > { %9944 = vpow2.f32 %v5462_v46  ;;  %5476 = vadd.xlane.f32.xlu1 %v5475_v63 }
0x2c72   : > { %v12007_v28 = vpop.eup %9936 }
0x2c73   : > { %v9939_v38 = vpop.eup %9938  ;;  %v5481_v48 = vsel %vm1541_vm4, %v12007_v28, 0.0 }
0x2c74   : > { %v5472_v51 = vsel %vm1541_vm4, %v9939_v38, 0.0 }
0x2c75   : > { %5482 = vadd.xlane.f32.xlu1 %v5481_v48  ;;  %5473 = vadd.xlane.f32.xlu0 %v5472_v51 }
0x2c76   : > { %v12012_v23 = vpop.eup %9940 }
0x2c77   : > { %v9943_v4 = vpop.eup %9942  ;;  %v5487_v6 = vsel %vm1541_vm4, %v12012_v23, 0.0 }
0x2c78   : > { %v5478_v21 = vsel %vm1541_vm4, %v9943_v4, 0.0 }
0x2c79   : > { %5488 = vadd.xlane.f32.xlu1 %v5487_v6  ;;  %5479 = vadd.xlane.f32.xlu0 %v5478_v21 }
0x2c7b   : > { %v9945_v42 = vpop.eup %9944 }
0x2c7c   : > { %v5484_v7 = vsel %vm1541_vm4, %v9945_v42, 0.0 }
0x2c7d   : > { %5485 = vadd.xlane.f32.xlu0 %v5484_v7 }
0x2c8a   : > { %9513 = vrot.lane.b32.xlu1 %v11921_v50, %s10330_s7 }
0x2c8e   : > { %9518 = vrot.lane.b32.xlu1 %v11921_v50, %s10336_s19 }
0x2c93   : > { %9508 = vrot.lane.b32.xlu0 %v11921_v50, %s10326_s17 }
0x2cf9   : > { %v5471_v16 = vpop.xlane.xlu1 %5470 }
0x2cfa   : > { %v5468_v15 = vpop.xlane.xlu0 %5467 }
0x2cfb   : > { %9946 = vrcp.f32 %v5468_v15  ;;  %v9681_v15 = vld [vmem:[%s12040_s30 + $0x18] sm:$0xff]  }
0x2cfc   : > { %9948 = vrcp.f32 %v5471_v16 }
0x2cfe   : > { %v5477_v12 = vpop.xlane.xlu1 %5476 }
0x2d02   : > { %v5483_v30 = vpop.xlane.xlu1 %5482  ;;  %v5474_v2 = vpop.xlane.xlu0 %5473 }
0x2d03   : > { %9950 = vrcp.f32 %v5474_v2 }
0x2d04   : > { %9952 = vrcp.f32 %v5477_v12 }
0x2d05   : > { %v9947_v18 = vpop.eup %9946 }
0x2d06   : > { %v5489_v9 = vpop.xlane.xlu1 %5488  ;;  %v5480_v17 = vpop.xlane.xlu0 %5479  ;;  %v5506_v61 = vmul.f32 %v9947_v18, %v9933_v11 }
0x2d07   : > { %9954 = vrcp.f32 %v5480_v17  ;;  %v9949_v11 = vpop.eup %9948 }
0x2d08   : > { %8783 = vmatprep.mubr.msk.f32.mxu1 %vm1541_vm4, %v5506_v61  ;;  %9956 = vrcp.f32 %v5483_v30  ;;  %v5507_v32 = vmul.f32 %v9949_v11, %v11998_v55 }
0x2d0a   : > { %v5486_v24 = vpop.xlane.xlu0 %5485  ;;  %v9514_v19 = vpop.permute.xlu1 %9513 }
0x2d0b   : > { %v9516_v57 = vunpack.i.h.bf16 %v9514_v19  ;;  %v9515_v47 = vunpack.i.l.bf16 %v9514_v19  ;;  %9958 = vrcp.f32 %v5486_v24 }
0x2d0c   : > { %9960 = vrcp.f32 %v5489_v9 }
0x2d0d   : > { %v9067_v22 = vpack.c.bf16 %v9516_v57, %v9515_v47  ;;  %v9951_v26 = vpop.eup %9950 }
0x2d0e   : > { %v9509_v1 = vpop.permute.xlu0 %9508  ;;  %v9519_v50 = vpop.permute.xlu1 %9518  ;;  %v5508_v3 = vmul.f32 %v9951_v26, %v9939_v38 }
0x2d0f   : > { %v9511_v14 = vunpack.i.h.bf16 %v9509_v1  ;;  %v9510_v44 = vunpack.i.l.bf16 %v9509_v1  ;;  %v9521_v20 = vunpack.i.h.bf16 %v9519_v50  ;;  %v9520_v41 = vunpack.i.l.bf16 %v9519_v50  ;;  %v9953_v5 = vpop.eup %9952 }
0x2d10   : > { %v5509_v46 = vmul.f32 %v9953_v5, %v12003_v40  ;;  %v9678_v40 = vld [vmem:[%s12040_s30] sm:$0xff]   ;;  %v5748_v5 = vrot.slane %v11906_v33, %v11122_v54 }
0x2d11   : > { %v9063_v31 = vpack.c.bf16 %v9511_v14, %v9510_v44  ;;  %v9071_v8 = vpack.c.bf16 %v9521_v20, %v9520_v41  ;;  %v9955_v56 = vpop.eup %9954 }
0x2d12   : > { %v9957_v63 = vpop.eup %9956  ;;  %v5510_v48 = vmul.f32 %v9955_v56, %v9943_v4 }
0x2d13   : > { %9064 = vmatprep.subr.bf16.mxu1 %v9063_v31  ;;  %v5511_v55 = vmul.f32 %v9957_v63, %v12007_v28  ;;  %v9679_v28 = vld [vmem:[%s12040_s30 + $0x8] sm:$0xff]  }
0x2d14   : > { %9066 = vmatpush3.bf16.msra.mxu1 %v9063_v31 }
0x2d15   : > { %9068 = vmatprep.subr.bf16.mxu1 %v9067_v22  ;;  %v9959_v51 = vpop.eup %9958 }
0x2d16   : > { %v9961_v6 = vpop.eup %9960  ;;  %v5512_v21 = vmul.f32 %v9959_v51, %v9945_v42  ;;  %v9680_v42 = vld [vmem:[%s12040_s30 + $0x10] sm:$0xff]  }
0x2d17   : > { %v5513_v38 = vmul.f32 %v9961_v6, %v12012_v23 }
0x2d18   : > { %9070 = vmatpush3.bf16.msra.mxu1 %v9067_v22 }
0x2d19   : > { %9072 = vmatprep.subr.bf16.mxu1 %v9071_v8 }
0x2d1c   : > { %9074 = vmatpush3.bf16.msra.mxu1 %v9071_v8 }
0x2d1d   : > { %8795 = vmatprep.subr.bf16.mxu1 %v10324_v39 }
0x2d1f   : > { %8784 = vmatmul.mubr.msk.f32.vlgmr.msra.gmra.mrb[72].mxu1 %vm1541_vm4, %v5507_v32 }
0x2d20   : > { %8786 = vmatprep.mubr.msk.f32.mxu1 %vm1541_vm4, %v5508_v3  ;;  %8796 = vmatpush3.bf16.msra.mxu1 %v9678_v40 }
0x2d21   : > { %8797 = vmatprep.subr.bf16.mxu1 %v10324_v39 }
0x2d23   : > { %8787 = vmatmul.mubr.msk.f32.gmra.mrb[74].mxu1 %vm1541_vm4, %v5509_v46 }
0x2d24   : > { %8789 = vmatprep.mubr.msk.f32.mxu1 %vm1541_vm4, %v5510_v48  ;;  %8798 = vmatpush3.bf16.msra.mxu1 %v9679_v28 }
0x2d25   : > { %8799 = vmatprep.subr.bf16.mxu1 %v10324_v39 }
0x2d27   : > { %8790 = vmatmul.mubr.msk.f32.gmra.mrb[76].mxu1 %vm1541_vm4, %v5511_v55 }
0x2d28   : > { %8792 = vmatprep.mubr.msk.f32.mxu1 %vm1541_vm4, %v5512_v21  ;;  %8800 = vmatpush3.bf16.msra.mxu1 %v9680_v42 }
0x2d29   : > { %8801 = vmatprep.subr.bf16.mxu1 %v10324_v39 }
0x2d2b   : > { %8793 = vmatmul.mubr.msk.f32.gmra.mrb[78].mxu1 %vm1541_vm4, %v5513_v38 }
0x2d2c   : > { %8803 = vmatprep.mubr.msk.bf16.mxu1 %vm10325_vm1, %v10324_v39  ;;  %8802 = vmatpush3.bf16.msra.mxu1 %v9681_v15 }
0x2df2   : > { %v8785_v4 = vpop.f32.mrb[72].mxu1 }
0x2df3   : > { %v5604_v23 = vpop.f32.mrb[73].mxu1 }
0x2df6   : > { %v8788_v7 = vpop.f32.mrb[74].mxu1 }
0x2df7   : > { %v5614_v16 = vpop.f32.mrb[75].mxu1 }
0x2df8   : > { %v9522_v12 = vpack.i.bf16 %v8788_v7, %v5614_v16 }
0x2dfa   : > { %9523 = vrot.lane.b32.xlu1 %v9522_v12, %s12448_s28  ;;  %v8791_v30 = vpop.f32.mrb[76].mxu1  ;;  %v9684_v12 = vld [vmem:[%s10878_s1 + $0x4] ss:$8 sps:$4 sm:$0xff]  }
0x2dfb   : > { %v5624_v2 = vpop.f32.mrb[77].mxu1  ;;  %5844 = vmatprep.subr.bf16.mxu0 %v9684_v12 }
0x2dfc   : > { %v9527_v18 = vpack.i.bf16 %v8791_v30, %v5624_v2  ;;  %v9682_v30 = vld [vmem:[%s10878_s1] ss:$8 sps:$4 sm:$0xff]   ;;  %v9687_v2 = vld [vmem:[%s10878_s1 + $0x14] ss:$8 sps:$4 sm:$0xff]  }
0x2dfd   : > { %5845 = vmatpush1.bf16.msra.mxu0 %v9682_v30 }
0x2dfe   : > { %9528 = vrot.lane.b32.xlu0 %v9527_v18, %s10329_s21  ;;  %v8794_v9 = vpop.f32.mrb[78].mxu1  ;;  %v9685_v18 = vld [vmem:[%s10878_s1 + $0x10] ss:$8 sps:$4 sm:$0xff]   ;;  %5846 = vmatprep.subr.bf16.mxu0 %v9687_v2 }
0x2dff   : > { %v5634_v17 = vpop.f32.mrb[79].mxu1 }
0x2e00   : > { %v9532_v61 = vpack.i.bf16 %v8794_v9, %v5634_v17  ;;  %v9690_v9 = vld [vmem:[%s10878_s1 + $0x24] ss:$8 sps:$4 sm:$0xff]   ;;  %v9688_v17 = vld [vmem:[%s10878_s1 + $0x20] ss:$8 sps:$4 sm:$0xff]  }
0x2e01   : > { %5847 = vmatpush1.bf16.msra.mxu0 %v9685_v18 }
0x2e02   : > { %9533 = vrot.lane.b32.xlu1 %v9532_v61, %s10337_s5  ;;  %5848 = vmatprep.subr.bf16.mxu0 %v9690_v9  ;;  %v9691_v61 = vld [vmem:[%s10878_s1 + $0x30] ss:$8 sps:$4 sm:$0xff]  }
0x2e05   : > { %5849 = vmatpush1.bf16.msra.mxu0 %v9688_v17 }
0x2e6c   : > { %v9524_v24 = vpop.permute.xlu1 %9523 }
0x2e6d   : > { %v9526_v1 = vunpack.i.h.bf16 %v9524_v24  ;;  %v9525_v57 = vunpack.i.l.bf16 %v9524_v24  ;;  %v9693_v24 = vld [vmem:[%s10878_s1 + $0x34] ss:$8 sps:$4 sm:$0xff]  }
0x2e6e   : > { %5850 = vmatprep.subr.bf16.mxu0 %v9693_v24 }
0x2e6f   : > { %v5668_v50 = vsel %vm1817_vm5, %v8785_v4, %v9526_v1  ;;  %v5667_v31 = vsel %vm1817_vm5, %v5604_v23, %v9525_v57  ;;  %5851 = vmatpush1.bf16.msra.mxu0 %v9691_v61  ;;  %v9695_v1 = vld [vmem:[%s10885_s8] sm:$0xff]   ;;  %v9696_v57 = vld [vmem:[%s10885_s8 + $0x48] sm:$0xff]  }
0x2e70   : > { %v9529_v19 = vpop.permute.xlu0 %9528 }
0x2e71   : > { %v9531_v47 = vunpack.i.h.bf16 %v9529_v19  ;;  %v9530_v14 = vunpack.i.l.bf16 %v9529_v19  ;;  %v9694_v19 = vld [vmem:[%s10885_s8 + $0x40] sm:$0xff]  }
0x2e72   : > { %8226 = vmatprep.subr.bf16.mxu1 %v9694_v19 }
0x2e73   : > { %v5670_v41 = vsel %vm1155_vm0, %v5668_v50, %v9531_v47  ;;  %v5669_v8 = vsel %vm1155_vm0, %v5667_v31, %v9530_v14  ;;  %v9697_v47 = vld [vmem:[%s10885_s8 + $0x8] sm:$0xff]   ;;  %v9698_v14 = vld [vmem:[%s10885_s8 + $0x50] sm:$0xff]   ;;  %v9700_v50 = vld [vmem:[%s10885_s8 + $0x58] sm:$0xff]  }
0x2e74   : > { %v9534_v44 = vpop.permute.xlu1 %9533  ;;  %v9701_v31 = vld [vmem:[%s10885_s8 + $0x18] sm:$0xff]  }
0x2e75   : > { %v9536_v22 = vunpack.i.h.bf16 %v9534_v44  ;;  %v9535_v20 = vunpack.i.l.bf16 %v9534_v44  ;;  %v9699_v44 = vld [vmem:[%s10885_s8 + $0x10] sm:$0xff]  }
0x2e77   : > { %v5673_v11 = vsel %vm5671_vm8, %v5670_v41, %v9536_v22  ;;  %v5672_v26 = vsel %vm5671_vm8, %v5669_v8, %v9535_v20  ;;  %v9702_v22 = vld [vmem:[%s10885_s8 + $0x60] sm:$0xff]   ;;  %v9704_v41 = vld [vmem:[%s10885_s8 + $0x68] sm:$0xff]  }
0x2e78   : > { %v5674_v32 = vpack.c.bf16 %v5673_v11, %v5672_v26  ;;  %v9703_v20 = vld [vmem:[%s10885_s8 + $0x20] sm:$0xff]  }
0x2e7a   : > { %8804 = vmatmul.mubr.msk.bf16.vlgmr.msra.gmra.mrb[80].mxu1 %vm1541_vm4, %v5674_v32 }
0x2e7b   : > { %8227 = vmatpush3.bf16.msra.mxu1 %v9695_v1 }
0x2e7c   : > { %8228 = vmatprep.subr.bf16.mxu1 %v9696_v57 }
0x2e7f   : > { %8229 = vmatpush3.bf16.msra.mxu1 %v9697_v47 }
0x2e80   : > { %8230 = vmatprep.subr.bf16.mxu1 %v9698_v14 }
0x2e83   : > { %8231 = vmatpush3.bf16.msra.mxu1 %v9699_v44 }
0x2e84   : > { %8232 = vmatprep.subr.bf16.mxu1 %v9700_v50 }
0x2e87   : > { %8233 = vmatpush3.bf16.msra.mxu1 %v9701_v31 }
0x2e88   : > { %8234 = vmatprep.subr.bf16.mxu1 %v9702_v22  ;;  %v7820_v22 = vld [vmem:[%s11903_s2 + $0x8] ss:$0 sm:$0xff] }
0x2e8b   : > { %8235 = vmatpush3.bf16.msra.mxu1 %v9703_v20 }
0x2e8c   : > { %8236 = vmatprep.subr.bf16.mxu1 %v9704_v41 }
0x2f4d   : > { %v5736_v3 = vpop.f32.mrb[80].mxu1 }
0x2f4e   : > { %v5743_v56 = vadd.f32 %v5736_v3, %v11878_v58  ;;  %v8805_v46 = vpop.f32.mrb[81].mxu1 }
0x2f4f   : > { %v5739_v63 = vpop.f32.mrb[82].mxu1  ;;  %v5780_v46 = vrot.slane %v11906_v33, %v11157_v37 }
0x2f50   : > { %v12062_v48 = vadd.f32 %v5748_v5, %v5743_v56  ;;  %v5744_v51 = vadd.f32 %v5739_v63, %v11880_v62  ;;  %v8806_v55 = vpop.f32.mrb[83].mxu1 }
0x2f51   : > { %v5786_v55 = vrot.slane %v11906_v33, %v11162_v13  ;;  %v9709_v33 = vld [vmem:[%s10885_s8 + $0x38] sm:$0xff]  }
0x2f52   : > { %v12065_v6 = vadd.f32 %v5748_v5, %v5744_v51  ;;  %v5751_v21 = vsel %vm1541_vm4, %v12062_v48, 0.0 }
0x2f53   : > { %5752 = vadd.xlane.f32.xlu0 %v5751_v21 }
0x2f54   : > { %v5754_v38 = vsel %vm1541_vm4, %v12065_v6, 0.0 }
0x2f55   : > { %5755 = vadd.xlane.f32.xlu1 %v5754_v38 }
0x2fe0   : > { %v5753_v58 = vpop.xlane.xlu0 %5752 }
0x2fe1   : > { %v5757_v40 = vmul.f32 0.015625, %v5753_v58 }
0x2fe2   : > { %v5756_v28 = vpop.xlane.xlu1 %5755 }
0x2fe3   : > { %v5759_v62 = vsub.f32 %v12062_v48, %v5757_v40  ;;  %v5758_v4 = vmul.f32 0.015625, %v5756_v28 }
0x2fe5   : > { %v5760_v23 = vsub.f32 %v12065_v6, %v5758_v4  ;;  %v5761_v42 = vmul.f32 %v5759_v62, %v5759_v62 }
0x2fe7   : > { %v5763_v7 = vsel %vm1541_vm4, %v5761_v42, 0.0  ;;  %v5762_v16 = vmul.f32 %v5760_v23, %v5760_v23  ;;  %v9705_v42 = vld [vmem:[%s10885_s8 + $0x28] sm:$0xff]  }
0x2fe8   : > { %5764 = vadd.xlane.f32.xlu0 %v5763_v7  ;;  %8237 = vmatpush3.bf16.msra.mxu1 %v9705_v42  ;;  %v9707_v7 = vld [vmem:[%s10885_s8 + $0x30] sm:$0xff]   ;;  %v9712_v42 = vld [vmem:[%s10851_s29 + $0x44] ss:$8 sps:$4 sm:$0xff]  }
0x2fe9   : > { %v5766_v15 = vsel %vm1541_vm4, %v5762_v16, 0.0  ;;  %v9708_v16 = vld [vmem:[%s10885_s8 + $0x78] sm:$0xff]   ;;  %6183 = vmatprep.subr.bf16.mxu0 %v9712_v42 }
0x2fec   : > { %5767 = vadd.xlane.f32.xlu0 %v5766_v15 }
0x3075   : > { %v5765_v8 = vpop.xlane.xlu0 %5764 }
0x3076   : > { %v5769_v11 = vmul.f32 0.015625, %v5765_v8 }
0x3078   : > { %v5771_v26 = vadd.f32 1e-05, %v5769_v11 }
0x3079   : > { %v5768_v32 = vpop.xlane.xlu0 %5767 }
0x307a   : > { %9962 = vrsqrt.f32 %v5771_v26  ;;  %v5770_v5 = vmul.f32 0.015625, %v5768_v32 }
0x307c   : > { %v5772_v3 = vadd.f32 1e-05, %v5770_v5 }
0x307e   : > { %9964 = vrsqrt.f32 %v5772_v3 }
0x3084   : > { %v9963_v56 = vpop.eup %9962 }
0x3085   : > { %v5775_v63 = vmul.f32 %v9963_v56, %v5759_v62  ;;  %v9706_v62 = vld [vmem:[%s10885_s8 + $0x70] sm:$0xff]  }
0x3086   : > { %8238 = vmatprep.subr.bf16.mxu1 %v9706_v62  ;;  %v9710_v62 = vld [vmem:[%s10851_s29 + $0x40] ss:$8 sps:$4 sm:$0xff]  }
0x3087   : > { %v5781_v21 = vmul.f32 %v5780_v46, %v5775_v63  ;;  %8239 = vmatpush3.bf16.msra.mxu1 %v9707_v7  ;;  %v9715_v7 = vld [vmem:[%s10851_s29 + $0x54] ss:$8 sps:$4 sm:$0xff]  }
0x3088   : > { %v9965_v51 = vpop.eup %9964  ;;  %8240 = vmatprep.subr.bf16.mxu1 %v9708_v16  ;;  %v9713_v16 = vld [vmem:[%s10851_s29 + $0x50] ss:$8 sps:$4 sm:$0xff]  }
0x3089   : > { %v5776_v38 = vmul.f32 %v9965_v51, %v5760_v23  ;;  %v5787_v40 = vadd.f32 %v5786_v55, %v5781_v21  ;;  %v5032_v23 = vld [vmem:[%s12110_s20] sm:$0x3] }
0x308a   : > { %v5794_v15 = vrot.slane %v5032_v23, %v10907_v53  ;;  %v5798_v12 = vrot.slane %v5032_v23, %v10914_v59  ;;  %v9716_v23 = vld [vmem:[%s10851_s29 + $0x60] ss:$8 sps:$4 sm:$0xff]  }
0x308b   : > { %v5782_v58 = vmul.f32 %v5780_v46, %v5776_v38  ;;  %8241 = vmatpush3.bf16.msra.mxu1 %v9709_v33  ;;  %v9718_v33 = vld [vmem:[%s10851_s29 + $0x64] ss:$8 sps:$4 sm:$0xff]  }
0x308d   : > { %v5788_v28 = vadd.f32 %v5786_v55, %v5782_v58 }
0x308f   : > { %v5789_v4 = vpack.c.bf16 %v5788_v28, %v5787_v40 }
0x3091   : > { %7819 = vmatmul.mubr.msk.bf16.vlgmr.msra.gmra.mrb[84].mxu0 %vm1541_vm4, %v5789_v4 }
0x3092   : > { %6215 = vmatprep.mubr.bf16.mxu0 %v10334_v35  ;;  %6184 = vmatpush1.bf16.msra.mxu0 %v9710_v62 }
0x3093   : > { %6185 = vmatprep.subr.bf16.mxu0 %v9715_v7 }
0x3096   : > { %6186 = vmatpush1.bf16.msra.mxu0 %v9713_v16 }
0x3097   : > { %6187 = vmatprep.subr.bf16.mxu0 %v9718_v33 }
0x309a   : > { %6188 = vmatpush1.bf16.msra.mxu0 %v9716_v23 }
0x3164   : > { %v5878_v30 = vpop.f32.mrb[84].mxu0 }
0x3165   : > { %v5879_v2 = vadd.f32 %v5878_v30, %v5794_v15  ;;  %v5880_v18 = vpop.f32.mrb[85].mxu0  ;;  %v12139_v30 = vld [vmem:[%s11903_s2 + $0x10] sm:$0xff] }
0x3166   : > { %v5881_v9 = vadd.f32 %v5880_v18, %v5798_v12  ;;  %v5882_v17 = vpop.f32.mrb[86].mxu0 }
0x3167   : > { %v5883_v61 = vadd.f32 %v5882_v17, %v5794_v15  ;;  %v5884_v24 = vpop.f32.mrb[87].mxu0  ;;  %v5887_v1 = vmax.f32 %v5879_v2, 0.0  ;;  %v9721_v15 = vld [vmem:[%s10851_s29 + $0x74] ss:$8 sps:$4 sm:$0xff]   ;;  %v6237_v2 = vrot.slane %v12139_v30, %v10971_v43  ;;  %v6136_v43 = vrot.slane %v12139_v30, %v10914_v59 }
0x3168   : > { %v5885_v19 = vadd.f32 %v5884_v24, %v5798_v12  ;;  %v5888_v47 = vmax.f32 %v5881_v9, 0.0  ;;  %v9719_v12 = vld [vmem:[%s10851_s29 + $0x70] ss:$8 sps:$4 sm:$0xff]   ;;  %6189 = vmatprep.subr.bf16.mxu0 %v9721_v15  ;;  %s7477_s29 = sshll.u32 %s10832_s11, 1 }
0x3169   : > { %v5889_v57 = vmax.f32 %v5883_v61, 0.0  ;;  %6190 = vmatpush1.bf16.msra.mxu0 %v9719_v12 }
0x316a   : > { %v5890_v14 = vmax.f32 %v5885_v19, 0.0 }
0x316b   : > { %v5891_v44 = vpack.c.bf16 %v5889_v57, %v5887_v1  ;;  %v6130_v1 = vrot.slane %v12139_v30, %v10907_v53 }
0x316c   : > { %v5892_v50 = vpack.c.bf16 %v5890_v14, %v5888_v47 }
0x316e   : > { %6025 = vmatprep.mubr.bf16.mxu1 %v5892_v50 }
0x316f   : > { %6026 = vmatmul.mubr.bf16.vlgmr.msra.gmra.mrb[84].mxu1 %v5891_v44 }
0x3242   : > { %v8242_v31 = vpop.f32.mrb[84].mxu1 }
0x3243   : > { %v8243_v20 = vpop.f32.mrb[85].mxu1 }
0x3244   : > { %v8244_v41 = vadd.f32 %v8243_v20, %v8242_v31  ;;  %v8245_v8 = vpop.f32.mrb[86].mxu1 }
0x3245   : > { %v8246_v11 = vpop.f32.mrb[87].mxu1 }
0x3246   : > { %v6028_v26 = vadd.f32 %v8244_v41, %v7820_v22  ;;  %v8247_v32 = vadd.f32 %v8246_v11, %v8245_v8  ;;  %v6229_v8 = vrot.slane %v12139_v30, %v10966_v34 }
0x3248   : > { %v12117_v5 = vadd.f32 %v6028_v26, %v12062_v48  ;;  %v6031_v3 = vadd.f32 %v8247_v32, %v7820_v22  ;;  %v6247_v32 = vrot.slane %v12139_v30, %v10995_v60 }
0x324a   : > { %v12120_v56 = vadd.f32 %v6031_v3, %v12065_v6  ;;  %v6101_v46 = vsel %vm1541_vm4, %v12117_v5, 0.0 }
0x324b   : > { %6102 = vadd.xlane.f32.xlu0 %v6101_v46 }
0x324c   : > { %v6104_v63 = vsel %vm1541_vm4, %v12120_v56, 0.0 }
0x324d   : > { %6105 = vadd.xlane.f32.xlu1 %v6104_v63 }
0x32d8   : > { %v6103_v51 = vpop.xlane.xlu0 %6102 }
0x32d9   : > { %v6107_v55 = vmul.f32 0.015625, %v6103_v51 }
0x32da   : > { %v6106_v48 = vpop.xlane.xlu1 %6105 }
0x32db   : > { %v6109_v21 = vsub.f32 %v12117_v5, %v6107_v55  ;;  %v6108_v38 = vmul.f32 0.015625, %v6106_v48 }
0x32dd   : > { %v6110_v6 = vsub.f32 %v12120_v56, %v6108_v38  ;;  %v6111_v58 = vmul.f32 %v6109_v21, %v6109_v21 }
0x32df   : > { %v6113_v40 = vsel %vm1541_vm4, %v6111_v58, 0.0  ;;  %v6112_v28 = vmul.f32 %v6110_v6, %v6110_v6 }
0x32e0   : > { %6114 = vadd.xlane.f32.xlu0 %v6113_v40 }
0x32e1   : > { %v6116_v4 = vsel %vm1541_vm4, %v6112_v28, 0.0 }
0x32e2   : > { %6117 = vadd.xlane.f32.xlu1 %v6116_v4 }
0x32f6   : > { %6239 = vrot.lane.b32.xlu0 %v6237_v2, %s10335_s4 }
0x336d   : > { %v6115_v18 = vpop.xlane.xlu0 %6114 }
0x336e   : > { %v6119_v9 = vmul.f32 0.015625, %v6115_v18 }
0x336f   : > { %v6118_v17 = vpop.xlane.xlu1 %6117 }
0x3370   : > { %v6121_v61 = vadd.f32 1e-05, %v6119_v9  ;;  %v6120_v24 = vmul.f32 0.015625, %v6118_v17 }
0x3371   : > { %v6240_v26 = vpop.permute.xlu0 %6239 }
0x3372   : > { %9966 = vrsqrt.f32 %v6121_v61  ;;  %v6122_v19 = vadd.f32 1e-05, %v6120_v24 }
0x3374   : > { %9968 = vrsqrt.f32 %v6122_v19 }
0x337c   : > { %v9967_v57 = vpop.eup %9966 }
0x337d   : > { %v6125_v47 = vmul.f32 %v9967_v57, %v6109_v21 }
0x337e   : > { %v9969_v14 = vpop.eup %9968 }
0x337f   : > { %v6131_v44 = vmul.f32 %v6130_v1, %v6125_v47  ;;  %v6126_v50 = vmul.f32 %v9969_v14, %v6110_v6 }
0x3381   : > { %v6132_v31 = vmul.f32 %v6130_v1, %v6126_v50  ;;  %v6137_v22 = vadd.f32 %v6136_v43, %v6131_v44 }
0x3383   : > { %v6138_v20 = vadd.f32 %v6136_v43, %v6132_v31 }
0x3385   : > { %v6139_v41 = vpack.c.bf16 %v6138_v20, %v6137_v22 }
0x3387   : > { %7904 = vmatmul.mubr.msk.bf16.vlgmr.msra.gmra.mrb[88].mxu0 %vm1541_vm4, %v6139_v41 }
0x345a   : > { %v6217_v11 = vpop.f32.mrb[88].mxu0 }
0x345b   : > { %v6230_v3 = vadd.f32 %v6229_v8, %v6217_v11  ;;  %v6219_v46 = vpop.f32.mrb[89].mxu0  ;;  %v6242_v55 = vadd.f32 %v6240_v26, %v6217_v11 }
0x345c   : > { %v6221_v63 = vpop.f32.mrb[90].mxu0  ;;  %v6248_v6 = vadd.f32 %v6247_v32, %v6219_v46 }
0x345d   : > { %v6232_v51 = vmul.f32 0.25, %v6230_v3  ;;  %v6231_v48 = vadd.f32 %v6229_v8, %v6221_v63  ;;  %v6243_v21 = vadd.f32 %v6240_v26, %v6221_v63  ;;  %v6223_v38 = vpop.f32.mrb[91].mxu0 }
0x345e   : > { %v6249_v58 = vadd.f32 %v6247_v32, %v6223_v38 }
0x345f   : > { %8823 = vmatprep.mubr.msk.f32.mxu0 %vm1817_vm5, %v6232_v51  ;;  %v9552_v40 = vpack.i.bf16 %v6243_v21, %v6242_v55  ;;  %v6233_v23 = vmul.f32 0.25, %v6231_v48 }
0x3460   : > { %v9099_v28 = vpack.c.bf16 %v6249_v58, %v6248_v6  ;;  %v12154_v34 = vpack.i.bf16 %v6249_v58, %v6248_v6 }
0x3461   : > { %9553 = vrot.lane.b32.xlu0 %v9552_v40, %s10335_s4  ;;  %9538 = vrot.lane.b32.xlu1 %v9552_v40, %s10326_s17 }
0x3462   : > { %9100 = vmatprep.subr.bf16.mxu1 %v9099_v28 }
0x3463   : > { %9102 = vmatpush3.bf16.msra.mxu1 %v9099_v28 }
0x3465   : > { %9543 = vrot.lane.b32.xlu1 %v9552_v40, %s10330_s7 }
0x3469   : > { %9548 = vrot.lane.b32.xlu1 %v9552_v40, %s10336_s19 }
0x34d3   : > { %v9554_v60 = vpop.permute.xlu0 %9553  ;;  %v9539_v4 = vpop.permute.xlu1 %9538 }
0x34d4   : > { %v9556_v42 = vunpack.i.h.bf16 %v9554_v60  ;;  %v9555_v62 = vunpack.i.l.bf16 %v9554_v60  ;;  %9558 = vrot.lane.b32.xlu1 %v9539_v4, %s10335_s4 }
0x34d6   : > { %v9075_v7 = vpack.c.bf16 %v9556_v42, %v9555_v62 }
0x34d7   : > { %v9544_v16 = vpop.permute.xlu1 %9543 }
0x34d8   : > { %9077 = vmatprep.subr.msk.bf16.mxu0 %vm11929_vm7, %v9075_v7  ;;  %9563 = vrot.lane.b32.xlu0 %v9544_v16, %s10335_s4 }
0x34d9   : > { %9080 = vmatpush3.bf16.xpose.msk.msra.mxu0 %vm11929_vm7, %v9075_v7 }
0x34db   : > { %v9549_v33 = vpop.permute.xlu1 %9548 }
0x34dc   : > { %6252 = vrot.lane.b32.xlu0 %v6232_v51, %s10326_s17  ;;  %9568 = vrot.lane.b32.xlu1 %v9549_v33, %s10335_s4 }
0x34e0   : > { %6256 = vrot.lane.b32.xlu0 %v6232_v51, %s10330_s7  ;;  %6254 = vrot.lane.b32.xlu1 %v6233_v23, %s10326_s17 }
0x34e4   : > { %6260 = vrot.lane.b32.xlu0 %v6232_v51, %s10336_s19  ;;  %6258 = vrot.lane.b32.xlu1 %v6233_v23, %s10330_s7 }
0x34e8   : > { %6262 = vrot.lane.b32.xlu1 %v6233_v23, %s10336_s19 }
0x3546   : > { %v9559_v15 = vpop.permute.xlu1 %9558 }
0x3547   : > { %v9561_v12 = vunpack.i.h.bf16 %v9559_v15  ;;  %v9560_v2 = vunpack.i.l.bf16 %v9559_v15 }
0x3549   : > { %v9081_v18 = vpack.c.bf16 %v9561_v12, %v9560_v2 }
0x354a   : > { %v9564_v9 = vpop.permute.xlu0 %9563 }
0x354b   : > { %v9566_v17 = vunpack.i.h.bf16 %v9564_v9  ;;  %v9565_v61 = vunpack.i.l.bf16 %v9564_v9  ;;  %9083 = vmatprep.subr.msk.bf16.mxu0 %vm11929_vm7, %v9081_v18 }
0x354c   : > { %9086 = vmatpush3.bf16.xpose.msk.msra.mxu0 %vm11929_vm7, %v9081_v18 }
0x354d   : > { %v9087_v24 = vpack.c.bf16 %v9566_v17, %v9565_v61 }
0x354e   : > { %v9569_v19 = vpop.permute.xlu1 %9568  ;;  %v6253_v14 = vpop.permute.xlu0 %6252 }
0x354f   : > { %v9571_v1 = vunpack.i.h.bf16 %v9569_v19  ;;  %v9570_v57 = vunpack.i.l.bf16 %v9569_v19  ;;  %9089 = vmatprep.subr.msk.bf16.mxu0 %vm11929_vm7, %v9087_v24 }
0x3551   : > { %v9093_v47 = vpack.c.bf16 %v9571_v1, %v9570_v57 }
0x3552   : > { %v6255_v44 = vpop.permute.xlu1 %6254  ;;  %v6257_v50 = vpop.permute.xlu0 %6256 }
0x3554   : > { %9092 = vmatpush3.bf16.xpose.msk.msra.mxu0 %vm11929_vm7, %v9087_v24 }
0x3555   : > { %9095 = vmatprep.subr.msk.bf16.mxu0 %vm11929_vm7, %v9093_v47 }
0x3556   : > { %v6259_v43 = vpop.permute.xlu1 %6258  ;;  %v6261_v31 = vpop.permute.xlu0 %6260 }
0x355a   : > { %v6263_v22 = vpop.permute.xlu1 %6262 }
0x355c   : > { %9098 = vmatpush3.bf16.xpose.msk.msra.mxu0 %vm11929_vm7, %v9093_v47 }
0x3563   : > { %8824 = vmatmul.mubr.msk.f32.vlgmr.msra.gmra.mrb[92].mxu0 %vm1817_vm5, %v6233_v23 }
0x3564   : > { %8826 = vmatprep.mubr.msk.f32.mxu0 %vm1817_vm5, %v6253_v14 }
0x3567   : > { %8827 = vmatmul.mubr.msk.f32.gmra.mrb[94].mxu0 %vm1817_vm5, %v6255_v44 }
0x3568   : > { %8829 = vmatprep.mubr.msk.f32.mxu0 %vm1817_vm5, %v6257_v50 }
0x356b   : > { %8830 = vmatmul.mubr.msk.f32.gmra.mrb[96].mxu0 %vm1817_vm5, %v6259_v43 }
0x356c   : > { %8832 = vmatprep.mubr.msk.f32.mxu0 %vm1817_vm5, %v6261_v31 }
0x356f   : > { %8833 = vmatmul.mubr.msk.f32.gmra.mrb[98].mxu0 %vm1817_vm5, %v6263_v22 }
0x3570   : > { %6908 = vmatprep.mubr.bf16.mxu0 %v10334_v35 }
0x3636   : > { %v8825_v29 = vpop.f32.mrb[92].mxu0 }
0x3637   : > { %v6418_v20 = vadd.f32 %v11966_v27, %v8825_v29  ;;  %v6412_v41 = vpop.f32.mrb[93].mxu0 }
0x3638   : > { %v6413_v8 = vadd.f32 %v11969_v25, %v6412_v41 }
0x3639   : > { %v6454_v11 = vsel %vm1541_vm4, %v6418_v20, -inf }
0x363a   : > { %6455 = vmax.xlane.f32.xlu1 %v6454_v11  ;;  %v8828_v26 = vpop.f32.mrb[94].mxu0  ;;  %v6451_v32 = vsel %vm1541_vm4, %v6413_v8, -inf }
0x363b   : > { %v6428_v3 = vadd.f32 %v11974_v0, %v8828_v26  ;;  %v6422_v46 = vpop.f32.mrb[95].mxu0  ;;  %6452 = vmax.xlane.f32.xlu0 %v6451_v32 }
0x363c   : > { %v6423_v35 = vadd.f32 %v11978_v36, %v6422_v46 }
0x363d   : > { %v6460_v63 = vsel %vm1541_vm4, %v6428_v3, -inf }
0x363e   : > { %v8831_v51 = vpop.f32.mrb[96].mxu0  ;;  %v6457_v38 = vsel %vm1541_vm4, %v6423_v35, -inf }
0x363f   : > { %v6438_v27 = vadd.f32 %v11981_v49, %v8831_v51  ;;  %v6432_v55 = vpop.f32.mrb[97].mxu0  ;;  %6461 = vmax.xlane.f32.xlu0 %v6460_v63 }
0x3640   : > { %v6433_v48 = vadd.f32 %v11985_v45, %v6432_v55 }
0x3641   : > { %v6466_v25 = vsel %vm1541_vm4, %v6438_v27, -inf }
0x3642   : > { %6467 = vmax.xlane.f32.xlu1 %v6466_v25  ;;  %v8834_v21 = vpop.f32.mrb[98].mxu0  ;;  %v6463_v49 = vsel %vm1541_vm4, %v6433_v48, -inf }
0x3643   : > { %v6448_v0 = vadd.f32 %v11989_v52, %v8834_v21  ;;  %v6442_v6 = vpop.f32.mrb[99].mxu0  ;;  %6458 = vmax.xlane.f32.xlu0 %v6457_v38 }
0x3644   : > { %v6443_v36 = vadd.f32 %v11993_v10, %v6442_v6 }
0x3645   : > { %v6472_v58 = vsel %vm1541_vm4, %v6448_v0, -inf }
0x3646   : > { %6473 = vmax.xlane.f32.xlu1 %v6472_v58  ;;  %v6469_v40 = vsel %vm1541_vm4, %v6443_v36, -inf }
0x3647   : > { %6464 = vmax.xlane.f32.xlu0 %v6463_v49 }
0x364b   : > { %6470 = vmax.xlane.f32.xlu0 %v6469_v40 }
0x36c7   : > { %v6456_v45 = vpop.xlane.xlu1 %6455 }
0x36c8   : > { %v6476_v28 = vsub.f32 %v6418_v20, %v6456_v45  ;;  %v6453_v60 = vpop.xlane.xlu0 %6452 }
0x36c9   : > { %v6475_v4 = vsub.f32 %v6413_v8, %v6453_v60 }
0x36ca   : > { %v6485_v42 = vmul.f32 1.442695, %v6476_v28 }
0x36cb   : > { %v6483_v62 = vmul.f32 1.442695, %v6475_v4 }
0x36cc   : > { %9970 = vpow2.f32 %v6485_v42  ;;  %v6462_v52 = vpop.xlane.xlu0 %6461 }
0x36cd   : > { %9972 = vpow2.f32 %v6483_v62  ;;  %v6478_v7 = vsub.f32 %v6428_v3, %v6462_v52 }
0x36cf   : > { %v6489_v16 = vmul.f32 1.442695, %v6478_v7  ;;  %v6468_v33 = vpop.xlane.xlu1 %6467 }
0x36d0   : > { %v6480_v10 = vsub.f32 %v6438_v27, %v6468_v33  ;;  %v6459_v23 = vpop.xlane.xlu0 %6458 }
0x36d1   : > { %9974 = vpow2.f32 %v6489_v16  ;;  %v6477_v15 = vsub.f32 %v6423_v35, %v6459_v23 }
0x36d2   : > { %v6493_v12 = vmul.f32 1.442695, %v6480_v10 }
0x36d3   : > { %v6487_v2 = vmul.f32 1.442695, %v6477_v15  ;;  %v6474_v18 = vpop.xlane.xlu1 %6473 }
0x36d4   : > { %9976 = vpow2.f32 %v6493_v12  ;;  %v6482_v9 = vsub.f32 %v6448_v0, %v6474_v18  ;;  %v6465_v17 = vpop.xlane.xlu0 %6464 }
0x36d5   : > { %9978 = vpow2.f32 %v6487_v2  ;;  %v6479_v61 = vsub.f32 %v6433_v48, %v6465_v17 }
0x36d6   : > { %v12209_v24 = vpop.eup %9970  ;;  %v6497_v19 = vmul.f32 1.442695, %v6482_v9 }
0x36d7   : > { %v9973_v1 = vpop.eup %9972  ;;  %v6491_v57 = vmul.f32 1.442695, %v6479_v61  ;;  %v6502_v47 = vsel %vm1541_vm4, %v12209_v24, 0.0 }
0x36d8   : > { %9980 = vpow2.f32 %v6497_v19  ;;  %6503 = vadd.xlane.f32.xlu1 %v6502_v47  ;;  %v6471_v14 = vpop.xlane.xlu0 %6470  ;;  %v6499_v44 = vsel %vm1541_vm4, %v9973_v1, 0.0 }
0x36d9   : > { %9982 = vpow2.f32 %v6491_v57  ;;  %v6481_v50 = vsub.f32 %v6443_v36, %v6471_v14  ;;  %6500 = vadd.xlane.f32.xlu0 %v6499_v44  ;;  %v9723_v57 = vld [vmem:[%s12040_s30 + $0x28] sm:$0xff]   ;;  %v9724_v44 = vld [vmem:[%s12040_s30 + $0x30] sm:$0xff]  }
0x36db   : > { %v12214_v43 = vpop.eup %9974  ;;  %v6495_v31 = vmul.f32 1.442695, %v6481_v50 }
0x36dc   : > { %v6508_v22 = vsel %vm1541_vm4, %v12214_v43, 0.0 }
0x36dd   : > { %9984 = vpow2.f32 %v6495_v31  ;;  %6509 = vadd.xlane.f32.xlu1 %v6508_v22  ;;  %v9725_v31 = vld [vmem:[%s12040_s30 + $0x38] sm:$0xff]  }
0x36de   : > { %v12218_v29 = vpop.eup %9976 }
0x36df   : > { %v9979_v20 = vpop.eup %9978  ;;  %v6514_v41 = vsel %vm1541_vm4, %v12218_v29, 0.0 }
0x36e0   : > { %v6505_v8 = vsel %vm1541_vm4, %v9979_v20, 0.0 }
0x36e1   : > { %6515 = vadd.xlane.f32.xlu1 %v6514_v41  ;;  %6506 = vadd.xlane.f32.xlu0 %v6505_v8 }
0x36e2   : > { %v12223_v11 = vpop.eup %9980 }
0x36e3   : > { %v9983_v26 = vpop.eup %9982  ;;  %v6520_v32 = vsel %vm1541_vm4, %v12223_v11, 0.0 }
0x36e4   : > { %v6511_v3 = vsel %vm1541_vm4, %v9983_v26, 0.0 }
0x36e5   : > { %6521 = vadd.xlane.f32.xlu1 %v6520_v32  ;;  %6512 = vadd.xlane.f32.xlu0 %v6511_v3 }
0x36e7   : > { %v9985_v46 = vpop.eup %9984 }
0x36e8   : > { %v6517_v63 = vsel %vm1541_vm4, %v9985_v46, 0.0 }
0x36e9   : > { %6518 = vadd.xlane.f32.xlu0 %v6517_v63 }
0x36f6   : > { %9578 = vrot.lane.b32.xlu1 %v12154_v34, %s10330_s7  ;;  %s7478_s7 = sshll.u32 %s10832_s11, 3 }
0x36f7   : > { %s1089_s26 = scalar_lea.vmem %s12457_s3, %s7478_s7 }
0x36fa   : > { %9583 = vrot.lane.b32.xlu1 %v12154_v34, %s10336_s19 }
0x36ff   : > { %9573 = vrot.lane.b32.xlu0 %v12154_v34, %s10326_s17  ;;  %s12456_s17 = sld [smem:[#allocation40_spill]] }
0x3765   : > { %v6504_v35 = vpop.xlane.xlu1 %6503 }
0x3766   : > { %v6501_v51 = vpop.xlane.xlu0 %6500 }
0x3767   : > { %9986 = vrcp.f32 %v6501_v51 }
0x3768   : > { %9988 = vrcp.f32 %v6504_v35 }
0x376a   : > { %v6510_v27 = vpop.xlane.xlu1 %6509 }
0x376e   : > { %v6516_v55 = vpop.xlane.xlu1 %6515  ;;  %v6507_v25 = vpop.xlane.xlu0 %6506 }
0x376f   : > { %9990 = vrcp.f32 %v6507_v25 }
0x3770   : > { %9992 = vrcp.f32 %v6510_v27 }
0x3771   : > { %v9987_v48 = vpop.eup %9986 }
0x3772   : > { %v6522_v21 = vpop.xlane.xlu1 %6521  ;;  %v6513_v38 = vpop.xlane.xlu0 %6512  ;;  %v6539_v0 = vmul.f32 %v9987_v48, %v9973_v1  ;;  %v9722_v1 = vld [vmem:[%s12040_s30 + $0x20] sm:$0xff]  }
0x3773   : > { %9994 = vrcp.f32 %v6513_v38  ;;  %v9989_v7 = vpop.eup %9988 }
0x3774   : > { %8851 = vmatprep.mubr.msk.f32.mxu1 %vm1541_vm4, %v6539_v0  ;;  %9996 = vrcp.f32 %v6516_v55  ;;  %v6540_v33 = vmul.f32 %v9989_v7, %v12209_v24 }
0x3776   : > { %v9579_v6 = vpop.permute.xlu1 %9578  ;;  %v6519_v58 = vpop.xlane.xlu0 %6518 }
0x3777   : > { %v9581_v49 = vunpack.i.h.bf16 %v9579_v6  ;;  %v9580_v40 = vunpack.i.l.bf16 %v9579_v6  ;;  %9998 = vrcp.f32 %v6519_v58 }
0x3778   : > { %10000 = vrcp.f32 %v6522_v21 }
0x3779   : > { %v9107_v4 = vpack.c.bf16 %v9581_v49, %v9580_v40  ;;  %v9991_v16 = vpop.eup %9990 }
0x377a   : > { %v9574_v36 = vpop.permute.xlu0 %9573  ;;  %v9584_v34 = vpop.permute.xlu1 %9583  ;;  %v6541_v23 = vmul.f32 %v9991_v16, %v9979_v20 }
0x377b   : > { %v9576_v45 = vunpack.i.h.bf16 %v9574_v36  ;;  %v9575_v28 = vunpack.i.l.bf16 %v9574_v36  ;;  %v9586_v42 = vunpack.i.h.bf16 %v9584_v34  ;;  %v9585_v62 = vunpack.i.l.bf16 %v9584_v34  ;;  %v9993_v10 = vpop.eup %9992 }
0x377c   : > { %v6542_v12 = vmul.f32 %v9993_v10, %v12214_v43  ;;  %v6780_v36 = vrot.slane %v12139_v30, %v11122_v54 }
0x377d   : > { %v9103_v60 = vpack.c.bf16 %v9576_v45, %v9575_v28  ;;  %v9111_v52 = vpack.c.bf16 %v9586_v42, %v9585_v62  ;;  %v9995_v15 = vpop.eup %9994 }
0x377e   : > { %v9997_v2 = vpop.eup %9996  ;;  %v6543_v18 = vmul.f32 %v9995_v15, %v9983_v26 }
0x377f   : > { %9104 = vmatprep.subr.bf16.mxu1 %v9103_v60  ;;  %v6544_v17 = vmul.f32 %v9997_v2, %v12218_v29  ;;  %v9728_v2 = vld [vmem:[%s10878_s1 + $0x44] ss:$8 sps:$4 sm:$0xff]  }
0x3780   : > { %9106 = vmatpush3.bf16.msra.mxu1 %v9103_v60  ;;  %6876 = vmatprep.subr.bf16.mxu0 %v9728_v2 }
0x3781   : > { %9108 = vmatprep.subr.bf16.mxu1 %v9107_v4  ;;  %v9999_v9 = vpop.eup %9998 }
0x3782   : > { %v10001_v61 = vpop.eup %10000  ;;  %v6545_v24 = vmul.f32 %v9999_v9, %v9985_v46  ;;  %v9731_v9 = vld [vmem:[%s10878_s1 + $0x54] ss:$8 sps:$4 sm:$0xff]  }
0x3783   : > { %v6546_v19 = vmul.f32 %v10001_v61, %v12223_v11  ;;  %v9734_v61 = vld [vmem:[%s10878_s1 + $0x64] ss:$8 sps:$4 sm:$0xff]  }
0x3784   : > { %9110 = vmatpush3.bf16.msra.mxu1 %v9107_v4 }
0x3785   : > { %9112 = vmatprep.subr.bf16.mxu1 %v9111_v52 }
0x3788   : > { %9114 = vmatpush3.bf16.msra.mxu1 %v9111_v52 }
0x3789   : > { %8863 = vmatprep.subr.bf16.mxu1 %v10324_v39 }
0x378b   : > { %8852 = vmatmul.mubr.msk.f32.vlgmr.msra.gmra.mrb[88].mxu1 %vm1541_vm4, %v6540_v33 }
0x378c   : > { %8854 = vmatprep.mubr.msk.f32.mxu1 %vm1541_vm4, %v6541_v23  ;;  %8864 = vmatpush3.bf16.msra.mxu1 %v9722_v1  ;;  %v9737_v1 = vld [vmem:[%s10878_s1 + $0x74] ss:$8 sps:$4 sm:$0xff]  }
0x378d   : > { %8865 = vmatprep.subr.bf16.mxu1 %v10324_v39 }
0x378f   : > { %8855 = vmatmul.mubr.msk.f32.gmra.mrb[90].mxu1 %vm1541_vm4, %v6542_v12 }
0x3790   : > { %8857 = vmatprep.mubr.msk.f32.mxu1 %vm1541_vm4, %v6543_v18  ;;  %8866 = vmatpush3.bf16.msra.mxu1 %v9723_v57  ;;  %v9726_v18 = vld [vmem:[%s10878_s1 + $0x40] ss:$8 sps:$4 sm:$0xff]  }
0x3791   : > { %8867 = vmatprep.subr.bf16.mxu1 %v10324_v39  ;;  %6877 = vmatpush1.bf16.msra.mxu0 %v9726_v18  ;;  %v9738_v57 = vld [vmem:[%s10885_s8 + $0xc0] sm:$0xff]  }
0x3792   : > { %6878 = vmatprep.subr.bf16.mxu0 %v9731_v9 }
0x3793   : > { %8858 = vmatmul.mubr.msk.f32.gmra.mrb[92].mxu1 %vm1541_vm4, %v6544_v17  ;;  %v9729_v17 = vld [vmem:[%s10878_s1 + $0x50] ss:$8 sps:$4 sm:$0xff]  }
0x3794   : > { %8860 = vmatprep.mubr.msk.f32.mxu1 %vm1541_vm4, %v6545_v24  ;;  %8868 = vmatpush3.bf16.msra.mxu1 %v9724_v44  ;;  %v9732_v24 = vld [vmem:[%s10878_s1 + $0x60] ss:$8 sps:$4 sm:$0xff]  }
0x3795   : > { %8869 = vmatprep.subr.bf16.mxu1 %v10324_v39  ;;  %6879 = vmatpush1.bf16.msra.mxu0 %v9729_v17  ;;  %v9741_v44 = vld [vmem:[%s10885_s8 + $0x88] sm:$0xff]  }
0x3796   : > { %6880 = vmatprep.subr.bf16.mxu0 %v9734_v61 }
0x3797   : > { %8861 = vmatmul.mubr.msk.f32.gmra.mrb[94].mxu1 %vm1541_vm4, %v6546_v19  ;;  %v9735_v19 = vld [vmem:[%s10878_s1 + $0x70] ss:$8 sps:$4 sm:$0xff]  }
0x3798   : > { %8871 = vmatprep.mubr.msk.bf16.mxu1 %vm10325_vm1, %v10324_v39  ;;  %8870 = vmatpush3.bf16.msra.mxu1 %v9725_v31  ;;  %v9744_v31 = vld [vmem:[%s10885_s8 + $0xd8] sm:$0xff]  }
0x3799   : > { %6881 = vmatpush1.bf16.msra.mxu0 %v9732_v24  ;;  %8285 = vmatprep.subr.bf16.mxu1 %v9738_v57 }
0x379a   : > { %6882 = vmatprep.subr.bf16.mxu0 %v9737_v1 }
0x379d   : > { %6883 = vmatpush1.bf16.msra.mxu0 %v9735_v19 }
0x385e   : > { %v8853_v47 = vpop.f32.mrb[88].mxu1 }
0x385f   : > { %v6637_v14 = vpop.f32.mrb[89].mxu1 }
0x3862   : > { %v8856_v50 = vpop.f32.mrb[90].mxu1 }
0x3863   : > { %v6647_v43 = vpop.f32.mrb[91].mxu1 }
0x3864   : > { %v9587_v22 = vpack.i.bf16 %v8856_v50, %v6647_v43  ;;  %v9742_v50 = vld [vmem:[%s10885_s8 + $0xd0] sm:$0xff]  }
0x3865   : > { %v9743_v43 = vld [vmem:[%s10885_s8 + $0x90] sm:$0xff]  }
0x3866   : > { %9588 = vrot.lane.b32.xlu1 %v9587_v22, %s12448_s28  ;;  %v8859_v29 = vpop.f32.mrb[92].mxu1  ;;  %v9745_v22 = vld [vmem:[%s10885_s8 + $0x98] sm:$0xff]  }
0x3867   : > { %v6657_v20 = vpop.f32.mrb[93].mxu1 }
0x3868   : > { %v9592_v41 = vpack.i.bf16 %v8859_v29, %v6657_v20  ;;  %v9746_v29 = vld [vmem:[%s10885_s8 + $0xe0] sm:$0xff]  }
0x3869   : > { %v9747_v20 = vld [vmem:[%s10885_s8 + $0xa0] sm:$0xff]  }
0x386a   : > { %9593 = vrot.lane.b32.xlu0 %v9592_v41, %s10329_s21  ;;  %v8862_v8 = vpop.f32.mrb[94].mxu1  ;;  %v9748_v41 = vld [vmem:[%s10885_s8 + $0xe8] sm:$0xff]   ;;  %s1085_s21 = scalar_lea.vmem %s12456_s17, %s7477_s29 }
0x386b   : > { %v6667_v11 = vpop.f32.mrb[95].mxu1 }
0x386c   : > { %v9597_v26 = vpack.i.bf16 %v8862_v8, %v6667_v11 }
0x386e   : > { %9598 = vrot.lane.b32.xlu1 %v9597_v26, %s10337_s5 }
0x38d8   : > { %v9589_v32 = vpop.permute.xlu1 %9588 }
0x38d9   : > { %v9591_v46 = vunpack.i.h.bf16 %v9589_v32  ;;  %v9590_v39 = vunpack.i.l.bf16 %v9589_v32 }
0x38db   : > { %v6701_v27 = vsel %vm1817_vm5, %v8853_v47, %v9591_v46  ;;  %v6700_v55 = vsel %vm1817_vm5, %v6637_v14, %v9590_v39  ;;  %v9739_v47 = vld [vmem:[%s10885_s8 + $0x80] sm:$0xff]   ;;  %v9740_v14 = vld [vmem:[%s10885_s8 + $0xc8] sm:$0xff]  }
0x38dc   : > { %v9594_v3 = vpop.permute.xlu0 %9593 }
0x38dd   : > { %v9596_v63 = vunpack.i.h.bf16 %v9594_v3  ;;  %v9595_v35 = vunpack.i.l.bf16 %v9594_v3 }
0x38df   : > { %v6703_v21 = vsel %vm1155_vm0, %v6701_v27, %v9596_v63  ;;  %v6702_v38 = vsel %vm1155_vm0, %v6700_v55, %v9595_v35  ;;  %v6812_v63 = vrot.slane %v12139_v30, %v11157_v37  ;;  %v6818_v27 = vrot.slane %v12139_v30, %v11162_v13  ;;  %v9751_v37 = vld [vmem:[%s10885_s8 + $0xb0] sm:$0xff]   ;;  %v7861_v13 = vld [vmem:[%s12110_s20 + $0x2] sm:$0x3] }
0x38e0   : > { %v9599_v51 = vpop.permute.xlu1 %9598  ;;  %v6826_v30 = vrot.slane %v7861_v13, %v10907_v53 }
0x38e1   : > { %v9601_v25 = vunpack.i.h.bf16 %v9599_v51  ;;  %v9600_v48 = vunpack.i.l.bf16 %v9599_v51 }
0x38e3   : > { %v6705_v0 = vsel %vm5671_vm8, %v6703_v21, %v9601_v25  ;;  %v6704_v6 = vsel %vm5671_vm8, %v6702_v38, %v9600_v48 }
0x38e4   : > { %v6706_v58 = vpack.c.bf16 %v6705_v0, %v6704_v6  ;;  %v9749_v6 = vld [vmem:[%s10885_s8 + $0xa8] sm:$0xff]  }
0x38e6   : > { %8872 = vmatmul.mubr.msk.bf16.vlgmr.msra.gmra.mrb[96].mxu1 %vm1541_vm4, %v6706_v58  ;;  %v9750_v58 = vld [vmem:[%s10885_s8 + $0xf0] sm:$0xff]  }
0x38e7   : > { %8286 = vmatpush3.bf16.msra.mxu1 %v9739_v47 }
0x38e8   : > { %8287 = vmatprep.subr.bf16.mxu1 %v9740_v14 }
0x38eb   : > { %8288 = vmatpush3.bf16.msra.mxu1 %v9741_v44 }
0x38ec   : > { %8289 = vmatprep.subr.bf16.mxu1 %v9742_v50 }
0x38ef   : > { %8290 = vmatpush3.bf16.msra.mxu1 %v9743_v43 }
0x38f0   : > { %8291 = vmatprep.subr.bf16.mxu1 %v9744_v31 }
0x38f3   : > { %8292 = vmatpush3.bf16.msra.mxu1 %v9745_v22 }
0x38f4   : > { %8293 = vmatprep.subr.bf16.mxu1 %v9746_v29 }
0x38f7   : > { %8294 = vmatpush3.bf16.msra.mxu1 %v9747_v20 }
0x38f8   : > { %8295 = vmatprep.subr.bf16.mxu1 %v9748_v41 }
0x38fb   : > { %8296 = vmatpush3.bf16.msra.mxu1 %v9749_v6 }
0x38fc   : > { %8297 = vmatprep.subr.bf16.mxu1 %v9750_v58 }
0x38ff   : > { %8298 = vmatpush3.bf16.msra.mxu1 %v9751_v37 }
0x39b9   : > { %v6768_v49 = vpop.f32.mrb[96].mxu1 }
0x39ba   : > { %v6775_v40 = vadd.f32 %v6768_v49, %v12117_v5  ;;  %v8873_v45 = vpop.f32.mrb[97].mxu1  ;;  %v9753_v49 = vld [vmem:[%s10885_s8 + $0xb8] sm:$0xff]  }
0x39bb   : > { %v6771_v28 = vpop.f32.mrb[98].mxu1 }
0x39bc   : > { %v12270_v34 = vadd.f32 %v6780_v36, %v6775_v40  ;;  %v6776_v60 = vadd.f32 %v6771_v28, %v12120_v56  ;;  %v8874_v4 = vpop.f32.mrb[99].mxu1  ;;  %v6830_v40 = vrot.slane %v7861_v13, %v10914_v59 }
0x39be   : > { %v12273_v42 = vadd.f32 %v6780_v36, %v6776_v60  ;;  %v6783_v62 = vsel %vm1541_vm4, %v12270_v34, 0.0  ;;  %v9752_v36 = vld [vmem:[%s10885_s8 + $0xf8] sm:$0xff]  }
0x39bf   : > { %6784 = vadd.xlane.f32.xlu0 %v6783_v62  ;;  %8299 = vmatprep.subr.bf16.mxu1 %v9752_v36 }
0x39c0   : > { %v6786_v54 = vsel %vm1541_vm4, %v12273_v42, 0.0  ;;  %8300 = vmatpush3.bf16.msra.mxu1 %v9753_v49 }
0x39c1   : > { %6787 = vadd.xlane.f32.xlu1 %v6786_v54 }
0x3a4c   : > { %v6785_v5 = vpop.xlane.xlu0 %6784 }
0x3a4d   : > { %v6789_v52 = vmul.f32 0.015625, %v6785_v5 }
0x3a4e   : > { %v6788_v7 = vpop.xlane.xlu1 %6787 }
0x3a4f   : > { %v6791_v56 = vsub.f32 %v12270_v34, %v6789_v52  ;;  %v6790_v16 = vmul.f32 0.015625, %v6788_v7 }
0x3a51   : > { %v6792_v33 = vsub.f32 %v12273_v42, %v6790_v16  ;;  %v6793_v10 = vmul.f32 %v6791_v56, %v6791_v56 }
0x3a53   : > { %v6795_v23 = vsel %vm1541_vm4, %v6793_v10, 0.0  ;;  %v6794_v15 = vmul.f32 %v6792_v33, %v6792_v33 }
0x3a54   : > { %6796 = vadd.xlane.f32.xlu0 %v6795_v23 }
0x3a55   : > { %v6798_v12 = vsel %vm1541_vm4, %v6794_v15, 0.0 }
0x3a58   : > { %6799 = vadd.xlane.f32.xlu0 %v6798_v12  ;;  %v7943_v12 = vld [vmem:[%s11903_s2 + $0x18] ss:$0 sm:$0xff] }
0x3ae1   : > { %v6797_v8 = vpop.xlane.xlu0 %6796 }
0x3ae2   : > { %v6801_v11 = vmul.f32 0.015625, %v6797_v8 }
0x3ae4   : > { %v6803_v26 = vadd.f32 1e-05, %v6801_v11 }
0x3ae5   : > { %v6800_v32 = vpop.xlane.xlu0 %6799 }
0x3ae6   : > { %10002 = vrsqrt.f32 %v6803_v26  ;;  %v6802_v3 = vmul.f32 0.015625, %v6800_v32 }
0x3ae8   : > { %v6804_v46 = vadd.f32 1e-05, %v6802_v3 }
0x3aea   : > { %10004 = vrsqrt.f32 %v6804_v46 }
0x3af0   : > { %v10003_v39 = vpop.eup %10002 }
0x3af1   : > { %v6807_v35 = vmul.f32 %v10003_v39, %v6791_v56  ;;  %v7068_v39 = vld [vmem:[%s1085_s21] sm:$0x3] }
0x3af3   : > { %v6813_v55 = vmul.f32 %v6812_v63, %v6807_v35 }
0x3af4   : > { %v10005_v51 = vpop.eup %10004 }
0x3af5   : > { %v6808_v25 = vmul.f32 %v10005_v51, %v6792_v33  ;;  %v6819_v21 = vadd.f32 %v6818_v27, %v6813_v55  ;;  %v7104_v51 = vrot.slane %v7068_v39, %v10914_v59 }
0x3af7   : > { %v6814_v48 = vmul.f32 %v6812_v63, %v6808_v25  ;;  %v7098_v63 = vrot.slane %v7068_v39, %v10907_v53 }
0x3af9   : > { %v6820_v38 = vadd.f32 %v6818_v27, %v6814_v48 }
0x3afb   : > { %v6821_v0 = vpack.c.bf16 %v6820_v38, %v6819_v21 }
0x3afd   : > { %7942 = vmatmul.mubr.msk.bf16.vlgmr.msra.gmra.mrb[100].mxu0 %vm1541_vm4, %v6821_v0 }
0x3bd0   : > { %v6910_v45 = vpop.f32.mrb[100].mxu0 }
0x3bd1   : > { %v6911_v28 = vadd.f32 %v6910_v45, %v6826_v30  ;;  %v6912_v60 = vpop.f32.mrb[101].mxu0 }
0x3bd2   : > { %v6913_v4 = vadd.f32 %v6912_v60, %v6830_v40  ;;  %v6914_v62 = vpop.f32.mrb[102].mxu0 }
0x3bd3   : > { %v6915_v54 = vadd.f32 %v6914_v62, %v6826_v30  ;;  %v6916_v5 = vpop.f32.mrb[103].mxu0  ;;  %v6919_v7 = vmax.f32 %v6911_v28, 0.0 }
0x3bd4   : > { %v6917_v52 = vadd.f32 %v6916_v5, %v6830_v40  ;;  %v6920_v16 = vmax.f32 %v6913_v4, 0.0 }
0x3bd5   : > { %v6921_v56 = vmax.f32 %v6915_v54, 0.0 }
0x3bd6   : > { %v6922_v33 = vmax.f32 %v6917_v52, 0.0 }
0x3bd7   : > { %v6923_v10 = vpack.c.bf16 %v6921_v56, %v6919_v7 }
0x3bd8   : > { %v6924_v23 = vpack.c.bf16 %v6922_v33, %v6920_v16 }
0x3bda   : > { %7057 = vmatprep.mubr.bf16.mxu1 %v6924_v23 }
0x3bdb   : > { %7058 = vmatmul.mubr.bf16.vlgmr.msra.gmra.mrb[100].mxu1 %v6923_v10 }
0x3cae   : > { %v8301_v15 = vpop.f32.mrb[100].mxu1 }
0x3caf   : > { %v8302_v2 = vpop.f32.mrb[101].mxu1 }
0x3cb0   : > { %v8303_v18 = vadd.f32 %v8302_v2, %v8301_v15  ;;  %v8304_v9 = vpop.f32.mrb[102].mxu1 }
0x3cb1   : > { %v8305_v17 = vpop.f32.mrb[103].mxu1 }
0x3cb2   : > { %v7060_v61 = vadd.f32 %v8303_v18, %v7943_v12  ;;  %v8306_v24 = vadd.f32 %v8305_v17, %v8304_v9 }
0x3cb4   : > { %v7063_v19 = vadd.f32 %v8306_v24, %v7943_v12  ;;  %v7066_v1 = vadd.f32 %v7060_v61, %v12270_v34 }
0x3cb6   : > { %v7069_v57 = vsel %vm1541_vm4, %v7066_v1, 0.0  ;;  %v7067_v47 = vadd.f32 %v7063_v19, %v12273_v42 }
0x3cb7   : > { %7070 = vadd.xlane.f32.xlu1 %v7069_v57 }
0x3cb8   : > { %v7072_v14 = vsel %vm1541_vm4, %v7067_v47, 0.0 }
0x3cb9   : > { %7073 = vadd.xlane.f32.xlu0 %v7072_v14 }
0x3d44   : > { %v7071_v44 = vpop.xlane.xlu1 %7070 }
0x3d45   : > { %v7075_v50 = vmul.f32 0.015625, %v7071_v44 }
0x3d46   : > { %v7074_v43 = vpop.xlane.xlu0 %7073 }
0x3d47   : > { %v7077_v31 = vsub.f32 %v7066_v1, %v7075_v50  ;;  %v7076_v22 = vmul.f32 0.015625, %v7074_v43 }
0x3d49   : > { %v7078_v29 = vsub.f32 %v7067_v47, %v7076_v22  ;;  %v7079_v20 = vmul.f32 %v7077_v31, %v7077_v31 }
0x3d4b   : > { %v7081_v41 = vsel %vm1541_vm4, %v7079_v20, 0.0  ;;  %v7080_v8 = vmul.f32 %v7078_v29, %v7078_v29 }
0x3d4c   : > { %7082 = vadd.xlane.f32.xlu1 %v7081_v41 }
0x3d4d   : > { %v7084_v34 = vsel %vm1541_vm4, %v7080_v8, 0.0 }
0x3d4e   : > { %7085 = vadd.xlane.f32.xlu0 %v7084_v34 }
0x3dd9   : > { %v7083_v42 = vpop.xlane.xlu1 %7082 }
0x3dda   : > { %v7087_v11 = vmul.f32 0.015625, %v7083_v42 }
0x3ddb   : > { %v7086_v26 = vpop.xlane.xlu0 %7085 }
0x3ddc   : > { %v7089_v32 = vadd.f32 1e-05, %v7087_v11  ;;  %v7088_v3 = vmul.f32 0.015625, %v7086_v26 }
0x3dde   : > { %10006 = vrsqrt.f32 %v7089_v32  ;;  %v7090_v46 = vadd.f32 1e-05, %v7088_v3 }
0x3de0   : > { %10008 = vrsqrt.f32 %v7090_v46 }
0x3de8   : > { %v10007_v35 = vpop.eup %10006 }
0x3de9   : > { %v7093_v27 = vmul.f32 %v10007_v35, %v7077_v31 }
0x3dea   : > { %v10009_v55 = vpop.eup %10008 }
0x3deb   : > { %v7094_v25 = vmul.f32 %v10009_v55, %v7078_v29  ;;  %v7099_v48 = vmul.f32 %v7098_v63, %v7093_v27 }
0x3ded   : > { %v7100_v21 = vmul.f32 %v7098_v63, %v7094_v25  ;;  %v7105_v38 = vadd.f32 %v7104_v51, %v7099_v48 }
0x3def   : > { %v7106_v0 = vadd.f32 %v7104_v51, %v7100_v21 }
0x3df1   : > { %7108 = vrot.lane.b32.xlu0 %v7106_v0, %s10335_s4 }
0x3e63   : > { %v7109_v6 = vpop.permute.xlu0 %7108 }
0x3e64   : > { %v7111_v53 = vsel %vm1541_vm4, %v7105_v38, %v7109_v6 }
0x3e65   : > { %7112 = vst [vmem:[%s1089_s26] sm:$0xff] %v7111_v53 }
0x3e66 PF: > { %s12458_s2 = sld [smem:[#allocation22_spill]]  ;;  %s12459_s14 = sld [smem:[#allocation21_spill]] }
0x3e67   : > { %s12460_s23 = sld [smem:[#allocation23_spill]]  ;;  %s12461_s29 = smov %s10299_s0 }
0x3e6c   : > { %p45_p8 = scmp.ge.s32.totalorder %s12458_s2, 5   ;;  %s12462_s0 = smov %s12459_s14 }
0x3e6e   :  { %47 = sbr.rel (!%p45_p8) target bundleno = 40 (0x28), region = 266 }
0x3e75   :  { %7132 = vsyncpa [#allocation6], 1 }
0x3e76   :  { %7134 = vsyncpa [#allocation6 + $0x1], 1 }
0x3e77   :  { %7135 = vsyncpa [#allocation8], 1 }
0x3e78   :  { %7137 = vsyncpa [#allocation8 + $0x1], 1 }
0x3e79   :  { %7138 = vsyncpa [#allocation11], 1 }
0x3e7a   :  { %7140 = vsyncpa [#allocation11 + $0x1], 1 }
0x3e7b   :  { %7141 = vsyncpa [#allocation14], 1 }
0x3e7c   :  { %7143 = vsyncpa [#allocation14 + $0x1], 1 }

</bundles_post_ra>
